<compile_context>
chip_gen: v7x
topology: tpu7x:2x2x1
jax: 0.10.0
libtpu: 0.0.40
codegen_flags: <defaults>
</compile_context>

<pallas_src>
import functools

import jax
import jax.numpy as jnp
from jax.experimental import pallas as pl
from jax.experimental.pallas import tpu as pltpu


# ---------------------------------------------------------------------------
# Pallas kernel 1: fused matmul + bias + optional ReLU (conv layers via im2col).
# Tiled over M; weight/bias blocks are grid-invariant so they stay VMEM-resident.
# ---------------------------------------------------------------------------
def _matmul_bias_act_kernel(x_ref, w_ref, b_ref, o_ref, *, relu: bool):
    acc = jnp.dot(x_ref[...], w_ref[...], preferred_element_type=jnp.float32)
    acc = acc + b_ref[...]                       # (1, N) f32 broadcast over rows
    if relu:
        acc = jnp.maximum(acc, 0.0)
    o_ref[...] = acc.astype(o_ref.dtype)


def _choose_tm(m: int, target: int = 1024) -> int:
    """Pick an M tile: full M if small, else a multiple-of-8 divisor <= target."""
    if m <= target:
        return m
    for t in range(target - (target % 8), 7, -8):
        if m % t == 0:
            return t
    return target  # fall back to boundary masking by Pallas


def matmul_bias_act(x, w, b, *, relu: bool, out_dtype):
    """y = act(x @ w + b).  x:(M,K) bf16, w:(K,N) bf16, b:(1,N) f32."""
    m, k = x.shape
    k2, n = w.shape
    assert k == k2
    tm = _choose_tm(m)
    grid = (pl.cdiv(m, tm),)
    return pl.pallas_call(
        functools.partial(_matmul_bias_act_kernel, relu=relu),
        out_shape=jax.ShapeDtypeStruct((m, n), out_dtype),
        grid=grid,
        in_specs=[
            pl.BlockSpec((tm, k), lambda i: (i, 0)),
            pl.BlockSpec((k, n), lambda i: (0, 0)),
            pl.BlockSpec((1, n), lambda i: (0, 0)),
        ],
        out_specs=pl.BlockSpec((tm, n), lambda i: (i, 0)),
        compiler_params=pltpu.CompilerParams(
            dimension_semantics=("parallel",),   # M tiles independent -> megacore
        ),
    )(x, w, b)


# ---------------------------------------------------------------------------
# Pallas kernel 2: fused FC head  (fc1 -> ReLU -> fc2 -> ReLU -> v).
# Streams fc1_w over a K grid axis into an f32 accumulator; fc2 / v weights are
# grid-invariant VMEM residents; epilogue runs on the last grid step only.
# ---------------------------------------------------------------------------
def _fc_head_kernel(x_ref, w1_ref, b1_ref, w2_ref, b2_ref, wv_ref, bv_ref,
                    o_ref, acc_ref):
    k = pl.program_id(0)

    @pl.when(k == 0)
    def _():
        acc_ref[...] = jnp.zeros_like(acc_ref)

    acc_ref[...] += jnp.dot(x_ref[...], w1_ref[...],
                            preferred_element_type=jnp.float32)

    @pl.when(k == pl.num_programs(0) - 1)
    def _():
        h1 = jnp.maximum(acc_ref[...] + b1_ref[...], 0.0)               # (M, 256) f32
        h2 = jnp.dot(h1.astype(w2_ref.dtype), w2_ref[...],
                     preferred_element_type=jnp.float32) + b2_ref[...]
        h2 = jnp.maximum(h2, 0.0)                                       # (M, 256) f32
        v = jnp.dot(h2.astype(wv_ref.dtype), wv_ref[...],
                    preferred_element_type=jnp.float32) + bv_ref[...]   # (M, 1)
        o_ref[...] = v.astype(o_ref.dtype)


def _choose_tk(k: int, n: int, elem_bytes: int = 2,
               per_buffer_budget: int = 3 << 20) -> int:
    """Largest K tile (full K, or a multiple-of-128 divisor of K) whose streamed
    weight block (tk, n) fits one double-buffer slot of the VMEM budget.  Fewer,
    larger K steps -> less per-step overhead on the DMA-bound fc1_w stream."""
    if k * n * elem_bytes <= per_buffer_budget:
        return k
    cap = (per_buffer_budget // (n * elem_bytes)) // 128 * 128
    for t in range(cap, 127, -128):
        if k % t == 0:
            return t
    return k  # fallback: single K block


def fc_head(x, params):
    """Fused fc1/fc2/v head.  x: (M, 9216) bf16 -> (M, 1) f32."""
    m, k = x.shape
    n1 = params["fc1_b"].shape[-1]
    n2 = params["fc2_b"].shape[-1]
    tk = _choose_tk(k, n1)
    kt = k // tk
    return pl.pallas_call(
        _fc_head_kernel,
        out_shape=jax.ShapeDtypeStruct((m, 1), jnp.float32),
        grid=(kt,),
        in_specs=[
            pl.BlockSpec((m, tk), lambda kk: (0, kk)),    # activations: K-sliced
            pl.BlockSpec((tk, n1), lambda kk: (kk, 0)),   # fc1_w: streamed over K
            pl.BlockSpec((1, n1), lambda kk: (0, 0)),     # fc1_b
            pl.BlockSpec((n1, n2), lambda kk: (0, 0)),    # fc2_w (VMEM resident)
            pl.BlockSpec((1, n2), lambda kk: (0, 0)),     # fc2_b
            pl.BlockSpec((n2, 1), lambda kk: (0, 0)),     # v_w
            pl.BlockSpec((1, 1), lambda kk: (0, 0)),      # v_b
        ],
        out_specs=pl.BlockSpec((m, 1), lambda kk: (0, 0)),
        scratch_shapes=[pltpu.VMEM((m, n1), jnp.float32)],
        compiler_params=pltpu.CompilerParams(
            dimension_semantics=("arbitrary",),  # K is a reduction axis
        ),
    )(x, params["fc1_w"], params["fc1_b"], params["fc2_w"], params["fc2_b"],
      params["v_w"], params["v_b"])


# ---------------------------------------------------------------------------
# Glue: NHWC im2col so each conv becomes one Pallas matmul.
# Column order is (kh, kw, c) -- C=64/32 innermost packs lanes cleanly.
# ---------------------------------------------------------------------------
def _im2col_nhwc(x, kh, kw, stride):
    n, h, w, c = x.shape
    oh = (h - kh) // stride + 1
    ow = (w - kw) // stride + 1
    cols = []
    for i in range(kh):
        for j in range(kw):
            cols.append(x[:, i:i + (oh - 1) * stride + 1:stride,
                             j:j + (ow - 1) * stride + 1:stride, :])  # (N,OH,OW,C)
    cols = jnp.stack(cols, axis=3)                 # (N, OH, OW, KH*KW, C)
    return cols.reshape(n * oh * ow, kh * kw * c), oh, ow


def conv2d_relu(x_nhwc, w2d, bias, kh, kw, stride):
    """nn.Conv2d(stride, padding=0) + ReLU, NHWC in/out.

    w2d: pre-flattened weight (KH*KW*C, OC) bf16 (column order (kh,kw,c));
    bias: (1, OC) f32.
    """
    n = x_nhwc.shape[0]
    oc = w2d.shape[1]
    patches, oh, ow = _im2col_nhwc(x_nhwc, kh, kw, stride)       # (M, KH*KW*C) bf16
    out = matmul_bias_act(patches, w2d, bias,
                          relu=True, out_dtype=jnp.bfloat16)     # (M, OC)
    return out.reshape(n, oh, ow, oc)                            # NHWC


# ---------------------------------------------------------------------------
# Parameter construction (deterministic, PyTorch-default-style uniform init).
# Conv weights are generated in torch (OC, C, KH, KW) layout, then flattened
# once to the (KH*KW*C, OC) matmul layout used by the kernels -- the same
# transform a torch-checkpoint loader would apply.
# ---------------------------------------------------------------------------
def _uniform(key, shape, fan_in):
    bound = 1.0 / jnp.sqrt(jnp.float32(fan_in))
    return jax.random.uniform(key, shape, jnp.float32, -bound, bound)


def _conv_w2d(w_oc_c_kh_kw):
    oc, c, kh, kw = w_oc_c_kh_kw.shape
    return (jnp.transpose(w_oc_c_kh_kw, (2, 3, 1, 0))
            .reshape(kh * kw * c, oc)
            .astype(jnp.bfloat16))


def make_value_network_params(key, fc1_dims=256, fc2_dims=256):
    ks = jax.random.split(key, 12)
    p = {}
    p["c1_w2d"] = _conv_w2d(_uniform(ks[0], (32, 4, 8, 8), 4 * 8 * 8))
    p["c1_b"] = _uniform(ks[1], (1, 32), 4 * 8 * 8)
    p["c2_w2d"] = _conv_w2d(_uniform(ks[2], (64, 32, 4, 4), 32 * 4 * 4))
    p["c2_b"] = _uniform(ks[3], (1, 64), 32 * 4 * 4)
    p["c3_w2d"] = _conv_w2d(_uniform(ks[4], (64, 64, 3, 3), 64 * 3 * 3))
    p["c3_b"] = _uniform(ks[5], (1, 64), 64 * 3 * 3)

    # fc1: 64*12*12 -> fc1_dims, stored (K, N) for x @ W.
    # Generate rows in torch flatten order (c, oh, ow), then permute once to the
    # NHWC flatten order (oh, ow, c) used by this implementation -- so loading a
    # real torch checkpoint would use exactly this transform.
    fc1_in = 64 * 12 * 12
    fc1_w_torch_rows = _uniform(ks[6], (fc1_in, fc1_dims), fc1_in)
    fc1_w_nhwc_rows = (fc1_w_torch_rows
                       .reshape(64, 12, 12, fc1_dims)
                       .transpose(1, 2, 0, 3)
                       .reshape(fc1_in, fc1_dims))
    p["fc1_w"] = fc1_w_nhwc_rows.astype(jnp.bfloat16)
    p["fc1_b"] = _uniform(ks[7], (1, fc1_dims), fc1_in)
    p["fc2_w"] = _uniform(ks[8], (fc1_dims, fc2_dims), fc1_dims).astype(jnp.bfloat16)
    p["fc2_b"] = _uniform(ks[9], (1, fc2_dims), fc1_dims)
    p["v_w"] = _uniform(ks[10], (fc2_dims, 1), fc2_dims)      # tiny -> keep f32
    p["v_b"] = _uniform(ks[11], (1, 1), fc2_dims)
    return p


# ---------------------------------------------------------------------------
# Forward pass of ValueNetwork (matches the PyTorch module's computation).
# TODO(synk): checkpoint save/load, Adam optimizer and device plumbing from
# BaseNetwork are training/host-side concerns with no Pallas equivalent.
# ---------------------------------------------------------------------------
def value_network_forward(params, state):
    # state: (N, 4, H, W) NCHW f32 (torch interface).  H=W=124 so the conv trunk
    # yields the 64*12*12 features the hard-coded fc1 expects.
    x = jnp.transpose(state, (0, 2, 3, 1)).astype(jnp.bfloat16)      # NCHW -> NHWC once
    x = conv2d_relu(x, params["c1_w2d"], params["c1_b"], 8, 8, 4)    # (N,30,30,32)
    x = conv2d_relu(x, params["c2_w2d"], params["c2_b"], 4, 4, 2)    # (N,14,14,64)
    x = conv2d_relu(x, params["c3_w2d"], params["c3_b"], 3, 3, 1)    # (N,12,12,64)
    feats = x.reshape(x.shape[0], -1)            # NHWC flatten; fc1_w rows pre-permuted
    return fc_head(feats, params)                # (N, 1) f32


if __name__ == "__main__":
    key = jax.random.PRNGKey(0)
    pkey, xkey = jax.random.split(key)
    params = make_value_network_params(pkey)

    # Smallest input consistent with the module: 4 channels, 124x124 spatial
    # (required so conv3 produces the 64*12*12 features fc1 expects).
    batch = 2
    state = jax.random.normal(xkey, (batch, 4, 124, 124), dtype=jnp.float32)

    v = jax.jit(value_network_forward)(params, state)
    v = jax.block_until_ready(v)
    assert v.shape == (batch, 1), v.shape
    assert v.dtype == jnp.float32
    print("KERNEL_OK")
</pallas_src>

<mosaic_0001>
module attributes {stable_mosaic.version = 11 : i64} {
  func.func @_matmul_bias_act_kernel(%arg0: i32, %arg1: memref<600x256xbf16, #tpu.memory_space<vmem>>, %arg2: memref<256x32xbf16, #tpu.memory_space<vmem>>, %arg3: memref<1x32xf32, #tpu.memory_space<vmem>>, %arg4: memref<600x32xbf16, #tpu.memory_space<vmem>>) attributes {dimension_semantics = [#tpu.dimension_semantics<parallel>], iteration_bounds = array<i64: 3>, scalar_prefetch = 0 : i64, scratch_operands = 0 : i64, tpu.core_type = #tpu.core_type<tc>, window_params = [{transform_indices = @transform_0, window_bounds = array<i64: 600, 256>}, {pipeline_mode = #tpu.pipeline_mode<synchronous>, transform_indices = @transform_1, window_bounds = array<i64: 256, 32>}, {pipeline_mode = #tpu.pipeline_mode<synchronous>, transform_indices = @transform_2, window_bounds = array<i64: 1, 32>}, {transform_indices = @transform_3, window_bounds = array<i64: 600, 32>}]} {
    %c0 = arith.constant 0 : index
    %c0_0 = arith.constant 0 : index
    %0 = vector.load %arg1[%c0, %c0_0] : memref<600x256xbf16, #tpu.memory_space<vmem>>, vector<600x256xbf16>
    %c0_1 = arith.constant 0 : index
    %c0_2 = arith.constant 0 : index
    %1 = vector.load %arg2[%c0_1, %c0_2] : memref<256x32xbf16, #tpu.memory_space<vmem>>, vector<256x32xbf16>
    %cst = arith.constant dense<0.000000e+00> : vector<600x32xf32>
    %2 = tpu.matmul %0, %1, %cst {dimension_numbers = #tpu.dot_dimension_numbers<[1], [0], [0], [1], [0, 0, 1, 1], [], []>} : vector<600x256xbf16>, vector<256x32xbf16>, vector<600x32xf32> -> vector<600x32xf32>
    %c0_3 = arith.constant 0 : index
    %c0_4 = arith.constant 0 : index
    %3 = vector.load %arg3[%c0_3, %c0_4] : memref<1x32xf32, #tpu.memory_space<vmem>>, vector<1x32xf32>
    %4 = vector.broadcast %3 : vector<1x32xf32> to vector<600x32xf32>
    %5 = arith.addf %2, %4 : vector<600x32xf32>
    %cst_5 = arith.constant 0.000000e+00 : f32
    %6 = vector.broadcast %cst_5 : f32 to vector<600x32xf32>
    %7 = arith.maximumf %5, %6 : vector<600x32xf32>
    %8 = arith.truncf %7 : vector<600x32xf32> to vector<600x32xbf16>
    %c0_6 = arith.constant 0 : index
    %c0_7 = arith.constant 0 : index
    %9 = vector.load %arg4[%c0_6, %c0_7] : memref<600x32xbf16, #tpu.memory_space<vmem>>, vector<600x32xbf16>
    tpu.vector_store %arg4[%c0_6, %c0_7], %8 {strides = array<i32>} : memref<600x32xbf16, #tpu.memory_space<vmem>>, vector<600x32xbf16>,
    return
  }
  func.func @transform_0(%arg0: i32) -> (i32, i32) {
    %c0_i32 = arith.constant 0 : i32
    %c0_i32_0 = arith.constant 0 : i32
    return %arg0, %c0_i32 : i32, i32
  }
  func.func @transform_1(%arg0: i32) -> (i32, i32) {
    %c0_i32 = arith.constant 0 : i32
    %c0_i32_0 = arith.constant 0 : i32
    %c0_i32_1 = arith.constant 0 : i32
    return %c0_i32, %c0_i32_0 : i32, i32
  }
  func.func @transform_2(%arg0: i32) -> (i32, i32) {
    %c0_i32 = arith.constant 0 : i32
    %c0_i32_0 = arith.constant 0 : i32
    %c0_i32_1 = arith.constant 0 : i32
    return %c0_i32, %c0_i32_0 : i32, i32
  }
  func.func @transform_3(%arg0: i32) -> (i32, i32) {
    %c0_i32 = arith.constant 0 : i32
    %c0_i32_0 = arith.constant 0 : i32
    return %arg0, %c0_i32 : i32, i32
  }
}

module attributes {stable_mosaic.version = 11 : i64} {
  func.func @_matmul_bias_act_kernel(%arg0: i32, %arg1: memref<392x512xbf16, #tpu.memory_space<vmem>>, %arg2: memref<512x64xbf16, #tpu.memory_space<vmem>>, %arg3: memref<1x64xf32, #tpu.memory_space<vmem>>, %arg4: memref<392x64xbf16, #tpu.memory_space<vmem>>) attributes {dimension_semantics = [#tpu.dimension_semantics<parallel>], iteration_bounds = array<i64: 1>, scalar_prefetch = 0 : i64, scratch_operands = 0 : i64, tpu.core_type = #tpu.core_type<tc>, window_params = [{transform_indices = @transform_0, window_bounds = array<i64: 392, 512>}, {pipeline_mode = #tpu.pipeline_mode<synchronous>, transform_indices = @transform_1, window_bounds = array<i64: 512, 64>}, {pipeline_mode = #tpu.pipeline_mode<synchronous>, transform_indices = @transform_2, window_bounds = array<i64: 1, 64>}, {transform_indices = @transform_3, window_bounds = array<i64: 392, 64>}]} {
    %c0 = arith.constant 0 : index
    %c0_0 = arith.constant 0 : index
    %0 = vector.load %arg1[%c0, %c0_0] : memref<392x512xbf16, #tpu.memory_space<vmem>>, vector<392x512xbf16>
    %c0_1 = arith.constant 0 : index
    %c0_2 = arith.constant 0 : index
    %1 = vector.load %arg2[%c0_1, %c0_2] : memref<512x64xbf16, #tpu.memory_space<vmem>>, vector<512x64xbf16>
    %cst = arith.constant dense<0.000000e+00> : vector<392x64xf32>
    %2 = tpu.matmul %0, %1, %cst {dimension_numbers = #tpu.dot_dimension_numbers<[1], [0], [0], [1], [0, 0, 1, 1], [], []>} : vector<392x512xbf16>, vector<512x64xbf16>, vector<392x64xf32> -> vector<392x64xf32>
    %c0_3 = arith.constant 0 : index
    %c0_4 = arith.constant 0 : index
    %3 = vector.load %arg3[%c0_3, %c0_4] : memref<1x64xf32, #tpu.memory_space<vmem>>, vector<1x64xf32>
    %4 = vector.broadcast %3 : vector<1x64xf32> to vector<392x64xf32>
    %5 = arith.addf %2, %4 : vector<392x64xf32>
    %cst_5 = arith.constant 0.000000e+00 : f32
    %6 = vector.broadcast %cst_5 : f32 to vector<392x64xf32>
    %7 = arith.maximumf %5, %6 : vector<392x64xf32>
    %8 = arith.truncf %7 : vector<392x64xf32> to vector<392x64xbf16>
    %c0_6 = arith.constant 0 : index
    %c0_7 = arith.constant 0 : index
    %9 = vector.load %arg4[%c0_6, %c0_7] : memref<392x64xbf16, #tpu.memory_space<vmem>>, vector<392x64xbf16>
    tpu.vector_store %arg4[%c0_6, %c0_7], %8 {strides = array<i32>} : memref<392x64xbf16, #tpu.memory_space<vmem>>, vector<392x64xbf16>,
    return
  }
  func.func @transform_0(%arg0: i32) -> (i32, i32) {
    %c0_i32 = arith.constant 0 : i32
    %c0_i32_0 = arith.constant 0 : i32
    return %arg0, %c0_i32 : i32, i32
  }
  func.func @transform_1(%arg0: i32) -> (i32, i32) {
    %c0_i32 = arith.constant 0 : i32
    %c0_i32_0 = arith.constant 0 : i32
    %c0_i32_1 = arith.constant 0 : i32
    return %c0_i32, %c0_i32_0 : i32, i32
  }
  func.func @transform_2(%arg0: i32) -> (i32, i32) {
    %c0_i32 = arith.constant 0 : i32
    %c0_i32_0 = arith.constant 0 : i32
    %c0_i32_1 = arith.constant 0 : i32
    return %c0_i32, %c0_i32_0 : i32, i32
  }
  func.func @transform_3(%arg0: i32) -> (i32, i32) {
    %c0_i32 = arith.constant 0 : i32
    %c0_i32_0 = arith.constant 0 : i32
    return %arg0, %c0_i32 : i32, i32
  }
}

module attributes {stable_mosaic.version = 11 : i64} {
  func.func @_matmul_bias_act_kernel(%arg0: i32, %arg1: memref<288x576xbf16, #tpu.memory_space<vmem>>, %arg2: memref<576x64xbf16, #tpu.memory_space<vmem>>, %arg3: memref<1x64xf32, #tpu.memory_space<vmem>>, %arg4: memref<288x64xbf16, #tpu.memory_space<vmem>>) attributes {dimension_semantics = [#tpu.dimension_semantics<parallel>], iteration_bounds = array<i64: 1>, scalar_prefetch = 0 : i64, scratch_operands = 0 : i64, tpu.core_type = #tpu.core_type<tc>, window_params = [{transform_indices = @transform_0, window_bounds = array<i64: 288, 576>}, {pipeline_mode = #tpu.pipeline_mode<synchronous>, transform_indices = @transform_1, window_bounds = array<i64: 576, 64>}, {pipeline_mode = #tpu.pipeline_mode<synchronous>, transform_indices = @transform_2, window_bounds = array<i64: 1, 64>}, {transform_indices = @transform_3, window_bounds = array<i64: 288, 64>}]} {
    %c0 = arith.constant 0 : index
    %c0_0 = arith.constant 0 : index
    %0 = vector.load %arg1[%c0, %c0_0] : memref<288x576xbf16, #tpu.memory_space<vmem>>, vector<288x576xbf16>
    %c0_1 = arith.constant 0 : index
    %c0_2 = arith.constant 0 : index
    %1 = vector.load %arg2[%c0_1, %c0_2] : memref<576x64xbf16, #tpu.memory_space<vmem>>, vector<576x64xbf16>
    %cst = arith.constant dense<0.000000e+00> : vector<288x64xf32>
    %2 = tpu.matmul %0, %1, %cst {dimension_numbers = #tpu.dot_dimension_numbers<[1], [0], [0], [1], [0, 0, 1, 1], [], []>} : vector<288x576xbf16>, vector<576x64xbf16>, vector<288x64xf32> -> vector<288x64xf32>
    %c0_3 = arith.constant 0 : index
    %c0_4 = arith.constant 0 : index
    %3 = vector.load %arg3[%c0_3, %c0_4] : memref<1x64xf32, #tpu.memory_space<vmem>>, vector<1x64xf32>
    %4 = vector.broadcast %3 : vector<1x64xf32> to vector<288x64xf32>
    %5 = arith.addf %2, %4 : vector<288x64xf32>
    %cst_5 = arith.constant 0.000000e+00 : f32
    %6 = vector.broadcast %cst_5 : f32 to vector<288x64xf32>
    %7 = arith.maximumf %5, %6 : vector<288x64xf32>
    %8 = arith.truncf %7 : vector<288x64xf32> to vector<288x64xbf16>
    %c0_6 = arith.constant 0 : index
    %c0_7 = arith.constant 0 : index
    %9 = vector.load %arg4[%c0_6, %c0_7] : memref<288x64xbf16, #tpu.memory_space<vmem>>, vector<288x64xbf16>
    tpu.vector_store %arg4[%c0_6, %c0_7], %8 {strides = array<i32>} : memref<288x64xbf16, #tpu.memory_space<vmem>>, vector<288x64xbf16>,
    return
  }
  func.func @transform_0(%arg0: i32) -> (i32, i32) {
    %c0_i32 = arith.constant 0 : i32
    %c0_i32_0 = arith.constant 0 : i32
    return %arg0, %c0_i32 : i32, i32
  }
  func.func @transform_1(%arg0: i32) -> (i32, i32) {
    %c0_i32 = arith.constant 0 : i32
    %c0_i32_0 = arith.constant 0 : i32
    %c0_i32_1 = arith.constant 0 : i32
    return %c0_i32, %c0_i32_0 : i32, i32
  }
  func.func @transform_2(%arg0: i32) -> (i32, i32) {
    %c0_i32 = arith.constant 0 : i32
    %c0_i32_0 = arith.constant 0 : i32
    %c0_i32_1 = arith.constant 0 : i32
    return %c0_i32, %c0_i32_0 : i32, i32
  }
  func.func @transform_3(%arg0: i32) -> (i32, i32) {
    %c0_i32 = arith.constant 0 : i32
    %c0_i32_0 = arith.constant 0 : i32
    return %arg0, %c0_i32 : i32, i32
  }
}

module attributes {stable_mosaic.version = 11 : i64} {
  func.func @_fc_head_kernel(%arg0: i32, %arg1: memref<2x4608xbf16, #tpu.memory_space<vmem>>, %arg2: memref<4608x256xbf16, #tpu.memory_space<vmem>>, %arg3: memref<1x256xf32, #tpu.memory_space<vmem>>, %arg4: memref<256x256xbf16, #tpu.memory_space<vmem>>, %arg5: memref<1x256xf32, #tpu.memory_space<vmem>>, %arg6: memref<256x1xf32, #tpu.memory_space<vmem>>, %arg7: memref<1x1xf32, #tpu.memory_space<vmem>>, %arg8: memref<2x1xf32, #tpu.memory_space<vmem>>, %arg9: memref<2x256xf32, #tpu.memory_space<vmem>>) attributes {dimension_semantics = [#tpu.dimension_semantics<arbitrary>], iteration_bounds = array<i64: 2>, scalar_prefetch = 0 : i64, scratch_operands = 1 : i64, tpu.core_type = #tpu.core_type<tc>, window_params = [{transform_indices = @transform_0, window_bounds = array<i64: 2, 4608>}, {transform_indices = @transform_1, window_bounds = array<i64: 4608, 256>}, {pipeline_mode = #tpu.pipeline_mode<synchronous>, transform_indices = @transform_2, window_bounds = array<i64: 1, 256>}, {pipeline_mode = #tpu.pipeline_mode<synchronous>, transform_indices = @transform_3, window_bounds = array<i64: 256, 256>}, {pipeline_mode = #tpu.pipeline_mode<synchronous>, transform_indices = @transform_4, window_bounds = array<i64: 1, 256>}, {pipeline_mode = #tpu.pipeline_mode<synchronous>, transform_indices = @transform_5, window_bounds = array<i64: 256, 1>}, {pipeline_mode = #tpu.pipeline_mode<synchronous>, transform_indices = @transform_6, window_bounds = array<i64: 1, 1>}, {pipeline_mode = #tpu.pipeline_mode<synchronous>, transform_indices = @transform_7, window_bounds = array<i64: 2, 1>}]} {
    %c0_i32 = arith.constant 0 : i32
    %0 = arith.cmpi eq, %arg0, %c0_i32 : i32
    %1 = arith.extui %0 : i1 to i32
    %c0_i32_0 = arith.constant 0 : i32
    %2 = arith.cmpi ne, %1, %c0_i32_0 : i32
    scf.if %2 {
      %cst_9 = arith.constant 0.000000e+00 : f32
      %12 = vector.broadcast %cst_9 : f32 to vector<2x256xf32>
      %c0_10 = arith.constant 0 : index
      %c0_11 = arith.constant 0 : index
      %13 = vector.load %arg9[%c0_10, %c0_11] : memref<2x256xf32, #tpu.memory_space<vmem>>, vector<2x256xf32>
      tpu.vector_store %arg9[%c0_10, %c0_11], %12 {strides = array<i32>} : memref<2x256xf32, #tpu.memory_space<vmem>>, vector<2x256xf32>,
    } else {
    }
    %c0 = arith.constant 0 : index
    %c0_1 = arith.constant 0 : index
    %3 = vector.load %arg9[%c0, %c0_1] : memref<2x256xf32, #tpu.memory_space<vmem>>, vector<2x256xf32>
    %c0_2 = arith.constant 0 : index
    %c0_3 = arith.constant 0 : index
    %4 = vector.load %arg1[%c0_2, %c0_3] : memref<2x4608xbf16, #tpu.memory_space<vmem>>, vector<2x4608xbf16>
    %c0_4 = arith.constant 0 : index
    %c0_5 = arith.constant 0 : index
    %5 = vector.load %arg2[%c0_4, %c0_5] : memref<4608x256xbf16, #tpu.memory_space<vmem>>, vector<4608x256xbf16>
    %cst = arith.constant dense<0.000000e+00> : vector<2x256xf32>
    %6 = tpu.matmul %4, %5, %cst {dimension_numbers = #tpu.dot_dimension_numbers<[1], [0], [0], [1], [0, 0, 1, 1], [], []>} : vector<2x4608xbf16>, vector<4608x256xbf16>, vector<2x256xf32> -> vector<2x256xf32>
    %7 = arith.addf %3, %6 : vector<2x256xf32>
    %c0_6 = arith.constant 0 : index
    %c0_7 = arith.constant 0 : index
    %8 = vector.load %arg9[%c0_6, %c0_7] : memref<2x256xf32, #tpu.memory_space<vmem>>, vector<2x256xf32>
    tpu.vector_store %arg9[%c0_6, %c0_7], %7 {strides = array<i32>} : memref<2x256xf32, #tpu.memory_space<vmem>>, vector<2x256xf32>,
    %c1_i32 = arith.constant 1 : i32
    %9 = arith.cmpi eq, %arg0, %c1_i32 : i32
    %10 = arith.extui %9 : i1 to i32
    %c0_i32_8 = arith.constant 0 : i32
    %11 = arith.cmpi ne, %10, %c0_i32_8 : i32
    scf.if %11 {
      %c0_9 = arith.constant 0 : index
      %c0_10 = arith.constant 0 : index
      %12 = vector.load %arg9[%c0_9, %c0_10] : memref<2x256xf32, #tpu.memory_space<vmem>>, vector<2x256xf32>
      %c0_11 = arith.constant 0 : index
      %c0_12 = arith.constant 0 : index
      %13 = vector.load %arg3[%c0_11, %c0_12] : memref<1x256xf32, #tpu.memory_space<vmem>>, vector<1x256xf32>
      %14 = vector.broadcast %13 : vector<1x256xf32> to vector<2x256xf32>
      %15 = arith.addf %12, %14 : vector<2x256xf32>
      %cst_13 = arith.constant 0.000000e+00 : f32
      %16 = vector.broadcast %cst_13 : f32 to vector<2x256xf32>
      %17 = arith.maximumf %15, %16 : vector<2x256xf32>
      %18 = arith.truncf %17 : vector<2x256xf32> to vector<2x256xbf16>
      %c0_14 = arith.constant 0 : index
      %c0_15 = arith.constant 0 : index
      %19 = vector.load %arg4[%c0_14, %c0_15] : memref<256x256xbf16, #tpu.memory_space<vmem>>, vector<256x256xbf16>
      %cst_16 = arith.constant dense<0.000000e+00> : vector<2x256xf32>
      %20 = tpu.matmul %18, %19, %cst_16 {dimension_numbers = #tpu.dot_dimension_numbers<[1], [0], [0], [1], [0, 0, 1, 1], [], []>} : vector<2x256xbf16>, vector<256x256xbf16>, vector<2x256xf32> -> vector<2x256xf32>
      %c0_17 = arith.constant 0 : index
      %c0_18 = arith.constant 0 : index
      %21 = vector.load %arg5[%c0_17, %c0_18] : memref<1x256xf32, #tpu.memory_space<vmem>>, vector<1x256xf32>
      %22 = vector.broadcast %21 : vector<1x256xf32> to vector<2x256xf32>
      %23 = arith.addf %20, %22 : vector<2x256xf32>
      %cst_19 = arith.constant 0.000000e+00 : f32
      %24 = vector.broadcast %cst_19 : f32 to vector<2x256xf32>
      %25 = arith.maximumf %23, %24 : vector<2x256xf32>
      %c0_20 = arith.constant 0 : index
      %c0_21 = arith.constant 0 : index
      %26 = vector.load %arg6[%c0_20, %c0_21] : memref<256x1xf32, #tpu.memory_space<vmem>>, vector<256x1xf32>
      %cst_22 = arith.constant dense<0.000000e+00> : vector<2x1xf32>
      %27 = tpu.matmul %25, %26, %cst_22 {dimension_numbers = #tpu.dot_dimension_numbers<[1], [0], [0], [1], [0, 0, 1, 1], [], []>} : vector<2x256xf32>, vector<256x1xf32>, vector<2x1xf32> -> vector<2x1xf32>
      %c0_23 = arith.constant 0 : index
      %c0_24 = arith.constant 0 : index
      %28 = vector.load %arg7[%c0_23, %c0_24] : memref<1x1xf32, #tpu.memory_space<vmem>>, vector<1x1xf32>
      %29 = vector.broadcast %28 : vector<1x1xf32> to vector<2x1xf32>
      %30 = arith.addf %27, %29 : vector<2x1xf32>
      %c0_25 = arith.constant 0 : index
      %c0_26 = arith.constant 0 : index
      %31 = vector.load %arg8[%c0_25, %c0_26] : memref<2x1xf32, #tpu.memory_space<vmem>>, vector<2x1xf32>
      tpu.vector_store %arg8[%c0_25, %c0_26], %30 {strides = array<i32>} : memref<2x1xf32, #tpu.memory_space<vmem>>, vector<2x1xf32>,
    } else {
    }
    return
  }
  func.func @transform_0(%arg0: i32) -> (i32, i32) {
    %c0_i32 = arith.constant 0 : i32
    %c0_i32_0 = arith.constant 0 : i32
    return %c0_i32, %arg0 : i32, i32
  }
  func.func @transform_1(%arg0: i32) -> (i32, i32) {
    %c0_i32 = arith.constant 0 : i32
    %c0_i32_0 = arith.constant 0 : i32
    return %arg0, %c0_i32 : i32, i32
  }
  func.func @transform_2(%arg0: i32) -> (i32, i32) {
    %c0_i32 = arith.constant 0 : i32
    %c0_i32_0 = arith.constant 0 : i32
    %c0_i32_1 = arith.constant 0 : i32
    return %c0_i32, %c0_i32_0 : i32, i32
  }
  func.func @transform_3(%arg0: i32) -> (i32, i32) {
    %c0_i32 = arith.constant 0 : i32
    %c0_i32_0 = arith.constant 0 : i32
    %c0_i32_1 = arith.constant 0 : i32
    return %c0_i32, %c0_i32_0 : i32, i32
  }
  func.func @transform_4(%arg0: i32) -> (i32, i32) {
    %c0_i32 = arith.constant 0 : i32
    %c0_i32_0 = arith.constant 0 : i32
    %c0_i32_1 = arith.constant 0 : i32
    return %c0_i32, %c0_i32_0 : i32, i32
  }
  func.func @transform_5(%arg0: i32) -> (i32, i32) {
    %c0_i32 = arith.constant 0 : i32
    %c0_i32_0 = arith.constant 0 : i32
    %c0_i32_1 = arith.constant 0 : i32
    return %c0_i32, %c0_i32_0 : i32, i32
  }
  func.func @transform_6(%arg0: i32) -> (i32, i32) {
    %c0_i32 = arith.constant 0 : i32
    %c0_i32_0 = arith.constant 0 : i32
    %c0_i32_1 = arith.constant 0 : i32
    return %c0_i32, %c0_i32_0 : i32, i32
  }
  func.func @transform_7(%arg0: i32) -> (i32, i32) {
    %c0_i32 = arith.constant 0 : i32
    %c0_i32_0 = arith.constant 0 : i32
    %c0_i32_1 = arith.constant 0 : i32
    return %c0_i32, %c0_i32_0 : i32, i32
  }
}

</mosaic_0001>

<bundles_post_ra>
// kernel: value_network_forward.4
= control target key start
LH: loop header
LB: loop body
LE: loop exit
PB: predicated region body
PF: predicated region fallthrough
CT: control target
= control target key end

     0   :  { %s2062_s12 = smov 0   ;;  %s2472_s0 = inlined_call_operand.vmem [shape: bf16[1800,256], index: 0, kind: input, shape index: {}]   ;;  %s2473_s1 = inlined_call_operand.vmem [shape: bf16[256,32], index: 1, kind: input, shape index: {}]   ;;  %s2474_s2 = inlined_call_operand.vmem [shape: f32[1,32], index: 2, kind: input, shape index: {}]   ;;  %s2475_s3 = inlined_call_operand.vmem [shape: bf16[1800,32], index: 3, kind: output, shape index: {}]  }
   0x1 LB: > { %s1609_s13 = sadd.s32 4294967295, %s2039_s12   ;;  %p1613_p0 = scmp.ge.s32.totalorder %s2039_s12, 1  ;;  %s2039_s12 = sphi %s2062_s12, %s13_s12  }
   0x2   : > { %p139_p1 = scmp.lt.s32.totalorder %s2039_s12, 4 }
   0x4   : > { %p140_p2 = pnand %p1613_p0, %p139_p1 }
   0x5   : > { %v1904_v0 = vld [vmem:[%s2473_s1] sm:$0xff] (!%p140_p2)   ;;  %v2041_v1 = vmov (!%p140_p2), 0   ;;  %s164_s16 = smul.u32 (!%p140_p2), 75, %s1609_s13  ;;  %v1905_v2 = vld [vmem:[%s2473_s1 + $0x8] sm:$0xff] (!%p140_p2)   ;;  %v1906_v3 = vld [vmem:[%s2473_s1 + $0x10] sm:$0xff] (!%p140_p2)   ;;  %vm1477_vm0 = vcmask (!%p140_p2), 257024  }
   0x6   : > { %143 = sbr.rel (%p140_p2) target bundleno = 435 (0x1b3), region = 32  ;;  %765 = vmatprep.subr.bf16.mxu0 (!%p140_p2), %v2041_v1  ;;  %1863 = vmatprep.subr.bf16.mxu1 (!%p140_p2), %v2041_v1  ;;  %v1907_v4 = vld [vmem:[%s2473_s1 + $0x18] sm:$0xff] (!%p140_p2)   ;;  %v1908_v5 = vld [vmem:[%s2473_s1 + $0x20] sm:$0xff] (!%p140_p2)   ;;  %v1909_v7 = vld [vmem:[%s2473_s1 + $0x28] sm:$0xff] (!%p140_p2)  }
   0x7   : > { %766 = vmatpush1.bf16.msra.mxu0 (!%p140_p2), %v1904_v0  ;;  %1879 = vmatpush1.bf16.msra.mxu1 (!%p140_p2), %v1904_v0  ;;  %p165_p3 = scmp.lt.s32.totalorder (!%p140_p2), %s164_s16, 224  ;;  %v1910_v9 = vld [vmem:[%s2473_s1 + $0x30] sm:$0xff] (!%p140_p2)   ;;  %v1911_v10 = vld [vmem:[%s2473_s1 + $0x38] sm:$0xff] (!%p140_p2)   ;;  %v1912_v11 = vld [vmem:[%s2473_s1 + $0x40] sm:$0xff] (!%p140_p2)  }
   0x8   : > { %767 = vmatprep.subr.bf16.mxu0 (!%p140_p2), %v2041_v1  ;;  %1864 = vmatprep.subr.bf16.mxu1 (!%p140_p2), %v2041_v1  ;;  %v1913_v12 = vld [vmem:[%s2473_s1 + $0x48] sm:$0xff] (!%p140_p2)   ;;  %v1914_v13 = vld [vmem:[%s2473_s1 + $0x50] sm:$0xff] (!%p140_p2)   ;;  %v1915_v14 = vld [vmem:[%s2473_s1 + $0x58] sm:$0xff] (!%p140_p2)  }
   0x9   : > { %v1916_v15 = vld [vmem:[%s2473_s1 + $0x60] sm:$0xff] (!%p140_p2)   ;;  %v1917_v16 = vld [vmem:[%s2473_s1 + $0x68] sm:$0xff] (!%p140_p2)   ;;  %v1918_v17 = vld [vmem:[%s2473_s1 + $0x70] sm:$0xff] (!%p140_p2)  }
   0xa   : > { %v1919_v18 = vld [vmem:[%s2473_s1 + $0x78] sm:$0xff] (!%p140_p2)  }
   0xb   : > { %768 = vmatpush1.bf16.msra.mxu0 (!%p140_p2), %v1905_v2  ;;  %1880 = vmatpush1.bf16.msra.mxu1 (!%p140_p2), %v1905_v2 }
   0xc   : > { %769 = vmatprep.subr.bf16.mxu0 (!%p140_p2), %v2041_v1  ;;  %1865 = vmatprep.subr.bf16.mxu1 (!%p140_p2), %v2041_v1 }
   0xd   : > { %s2477_s16 = smov (!%p165_p3, %s164_s16), 224 }
   0xe   : > { %s1787_s23 = sshll.u32 %s2477_s16, 3  ;;  %s1616_s29 = sshll.u32 %s2477_s16, 2 }
   0xf   : > { %770 = vmatpush1.bf16.msra.mxu0 %v1906_v3  ;;  %1881 = vmatpush1.bf16.msra.mxu1 %v1906_v3  ;;  %s2099_s28 = scalar_lea.vmem %s2472_s0, %s1787_s23  ;;  %s2246_s16 = scalar_lea.vmem %s2475_s3, %s1616_s29 }
  0x10   : > { %771 = vmatprep.subr.bf16.mxu0 %v2041_v1  ;;  %1866 = vmatprep.subr.bf16.mxu1 %v2041_v1  ;;  %v1922_v6 = vld [vmem:[%s2099_s28 + $0x4] ss:$8 sps:$4 sm:$0xff]   ;;  %v1925_v8 = vld [vmem:[%s2099_s28 + $0x134] ss:$8 sps:$4 sm:$0xff]   ;;  %v1920_v19 = vld [vmem:[%s2099_s28] ss:$8 sps:$4 sm:$0xff]  }
  0x11   : > { %797 = vmatprep.mubr.bf16.mxu0 %v1922_v6  ;;  %949 = vmatprep.mubr.bf16.mxu1 %v1925_v8  ;;  %v1923_v20 = vld [vmem:[%s2099_s28 + $0x130] ss:$8 sps:$4 sm:$0xff]   ;;  %v1926_v21 = vld [vmem:[%s2099_s28 + $0x14] ss:$8 sps:$4 sm:$0xff]   ;;  %v1928_v22 = vld [vmem:[%s2099_s28 + $0x144] ss:$8 sps:$4 sm:$0xff]  }
  0x12   : > { %v1930_v23 = vld [vmem:[%s2099_s28 + $0x10] ss:$8 sps:$4 sm:$0xff]   ;;  %v1931_v24 = vld [vmem:[%s2099_s28 + $0x140] ss:$8 sps:$4 sm:$0xff]   ;;  %v1932_v25 = vld [vmem:[%s2099_s28 + $0x24] ss:$8 sps:$4 sm:$0xff]  }
  0x13   : > { %772 = vmatpush1.bf16.msra.mxu0 %v1907_v4  ;;  %1882 = vmatpush1.bf16.msra.mxu1 %v1907_v4  ;;  %v1934_v26 = vld [vmem:[%s2099_s28 + $0x154] ss:$8 sps:$4 sm:$0xff]   ;;  %v1936_v27 = vld [vmem:[%s2099_s28 + $0x20] ss:$8 sps:$4 sm:$0xff]   ;;  %v1937_v28 = vld [vmem:[%s2099_s28 + $0x150] ss:$8 sps:$4 sm:$0xff]  }
  0x14   : > { %773 = vmatprep.subr.bf16.mxu0 %v2041_v1  ;;  %1867 = vmatprep.subr.bf16.mxu1 %v2041_v1  ;;  %v1938_v29 = vld [vmem:[%s2099_s28 + $0x34] ss:$8 sps:$4 sm:$0xff]   ;;  %v1940_v30 = vld [vmem:[%s2099_s28 + $0x164] ss:$8 sps:$4 sm:$0xff]   ;;  %v1942_v31 = vld [vmem:[%s2099_s28 + $0x30] ss:$8 sps:$4 sm:$0xff]  }
  0x15   : > { %v1943_v32 = vld [vmem:[%s2099_s28 + $0x160] ss:$8 sps:$4 sm:$0xff]   ;;  %v1944_v33 = vld [vmem:[%s2099_s28 + $0x44] ss:$8 sps:$4 sm:$0xff]   ;;  %v1946_v34 = vld [vmem:[%s2099_s28 + $0x174] ss:$8 sps:$4 sm:$0xff]  }
  0x16   : > { %v1948_v35 = vld [vmem:[%s2099_s28 + $0x40] ss:$8 sps:$4 sm:$0xff]   ;;  %v1949_v36 = vld [vmem:[%s2099_s28 + $0x170] ss:$8 sps:$4 sm:$0xff]   ;;  %v1950_v37 = vld [vmem:[%s2099_s28 + $0x54] ss:$8 sps:$4 sm:$0xff]  }
  0x17   : > { %774 = vmatpush1.bf16.msra.mxu0 %v1908_v5  ;;  %1883 = vmatpush1.bf16.msra.mxu1 %v1908_v5  ;;  %v1952_v38 = vld [vmem:[%s2099_s28 + $0x184] ss:$8 sps:$4 sm:$0xff]   ;;  %v1954_v39 = vld [vmem:[%s2099_s28 + $0x50] ss:$8 sps:$4 sm:$0xff]   ;;  %v1955_v40 = vld [vmem:[%s2099_s28 + $0x180] ss:$8 sps:$4 sm:$0xff]  }
  0x18   : > { %775 = vmatprep.subr.bf16.mxu0 %v2041_v1  ;;  %1868 = vmatprep.subr.bf16.mxu1 %v2041_v1  ;;  %v1956_v41 = vld [vmem:[%s2099_s28 + $0x64] ss:$8 sps:$4 sm:$0xff]   ;;  %v1958_v42 = vld [vmem:[%s2099_s28 + $0x194] ss:$8 sps:$4 sm:$0xff]   ;;  %v1960_v43 = vld [vmem:[%s2099_s28 + $0x60] ss:$8 sps:$4 sm:$0xff]  }
  0x19   : > { %v1961_v44 = vld [vmem:[%s2099_s28 + $0x190] ss:$8 sps:$4 sm:$0xff]   ;;  %v1962_v45 = vld [vmem:[%s2099_s28 + $0x74] ss:$8 sps:$4 sm:$0xff]   ;;  %v1964_v46 = vld [vmem:[%s2099_s28 + $0x1a4] ss:$8 sps:$4 sm:$0xff]  }
  0x1a   : > { %v1966_v47 = vld [vmem:[%s2099_s28 + $0x70] ss:$8 sps:$4 sm:$0xff]   ;;  %v1967_v48 = vld [vmem:[%s2099_s28 + $0x1a0] ss:$8 sps:$4 sm:$0xff]   ;;  %v1968_v49 = vld [vmem:[%s2099_s28 + $0x84] ss:$8 sps:$4 sm:$0xff]  }
  0x1b   : > { %776 = vmatpush1.bf16.msra.mxu0 %v1909_v7  ;;  %1884 = vmatpush1.bf16.msra.mxu1 %v1909_v7  ;;  %v1970_v50 = vld [vmem:[%s2099_s28 + $0x1b4] ss:$8 sps:$4 sm:$0xff]   ;;  %v1972_v51 = vld [vmem:[%s2099_s28 + $0x80] ss:$8 sps:$4 sm:$0xff]   ;;  %v1973_v52 = vld [vmem:[%s2099_s28 + $0x1b0] ss:$8 sps:$4 sm:$0xff]  }
  0x1c   : > { %777 = vmatprep.subr.bf16.mxu0 %v2041_v1  ;;  %1869 = vmatprep.subr.bf16.mxu1 %v2041_v1  ;;  %v1974_v53 = vld [vmem:[%s2099_s28 + $0x94] ss:$8 sps:$4 sm:$0xff]   ;;  %v1976_v54 = vld [vmem:[%s2099_s28 + $0x1c4] ss:$8 sps:$4 sm:$0xff]   ;;  %v1978_v55 = vld [vmem:[%s2099_s28 + $0x90] ss:$8 sps:$4 sm:$0xff]  }
  0x1d   : > { %v1979_v56 = vld [vmem:[%s2099_s28 + $0x1c0] ss:$8 sps:$4 sm:$0xff]   ;;  %v1980_v57 = vld [vmem:[%s2099_s28 + $0xa4] ss:$8 sps:$4 sm:$0xff]   ;;  %v1982_v58 = vld [vmem:[%s2099_s28 + $0x1d4] ss:$8 sps:$4 sm:$0xff]  }
  0x1e   : > { %v1984_v59 = vld [vmem:[%s2099_s28 + $0xa0] ss:$8 sps:$4 sm:$0xff]   ;;  %v1985_v60 = vld [vmem:[%s2099_s28 + $0x1d0] ss:$8 sps:$4 sm:$0xff]   ;;  %v1986_v61 = vld [vmem:[%s2099_s28 + $0xb4] ss:$8 sps:$4 sm:$0xff]  }
  0x1f   : > { %778 = vmatpush1.bf16.msra.mxu0 %v1910_v9  ;;  %1885 = vmatpush1.bf16.msra.mxu1 %v1910_v9  ;;  %v1988_v62 = vld [vmem:[%s2099_s28 + $0x1e4] ss:$8 sps:$4 sm:$0xff]   ;;  %v1990_v63 = vld [vmem:[%s2099_s28 + $0xb0] ss:$8 sps:$4 sm:$0xff]   ;;  %v1991_v0 = vld [vmem:[%s2099_s28 + $0x1e0] ss:$8 sps:$4 sm:$0xff]  }
  0x20   : > { %779 = vmatprep.subr.bf16.mxu0 %v2041_v1  ;;  %1870 = vmatprep.subr.bf16.mxu1 %v2041_v1  ;;  %v1994_v2 = vld [vmem:[%s2099_s28 + $0x1f4] ss:$8 sps:$4 sm:$0xff]   ;;  %v1996_v3 = vld [vmem:[%s2099_s28 + $0xc0] ss:$8 sps:$4 sm:$0xff]   ;;  %v1997_v4 = vld [vmem:[%s2099_s28 + $0x1f0] ss:$8 sps:$4 sm:$0xff]  }
  0x21   : > { %v1998_v5 = vld [vmem:[%s2099_s28 + $0xd4] ss:$8 sps:$4 sm:$0xff]   ;;  %v2000_v6 = vld [vmem:[%s2099_s28 + $0x204] ss:$8 sps:$4 sm:$0xff]   ;;  %v2002_v7 = vld [vmem:[%s2099_s28 + $0xd0] ss:$8 sps:$4 sm:$0xff]  }
  0x22   : > { %v2003_v8 = vld [vmem:[%s2099_s28 + $0x200] ss:$8 sps:$4 sm:$0xff]   ;;  %v2004_v9 = vld [vmem:[%s2099_s28 + $0xe4] ss:$8 sps:$4 sm:$0xff]  }
  0x23   : > { %780 = vmatpush1.bf16.msra.mxu0 %v1911_v10  ;;  %1886 = vmatpush1.bf16.msra.mxu1 %v1911_v10  ;;  %v2006_v10 = vld [vmem:[%s2099_s28 + $0x214] ss:$8 sps:$4 sm:$0xff]  }
  0x24   : > { %781 = vmatprep.subr.bf16.mxu0 %v2041_v1  ;;  %1871 = vmatprep.subr.bf16.mxu1 %v2041_v1 }
  0x27   : > { %782 = vmatpush1.bf16.msra.mxu0 %v1912_v11  ;;  %1887 = vmatpush1.bf16.msra.mxu1 %v1912_v11  ;;  %v2008_v11 = vld [vmem:[%s2099_s28 + $0xe0] ss:$8 sps:$4 sm:$0xff]  }
  0x28   : > { %783 = vmatprep.subr.bf16.mxu0 %v2041_v1  ;;  %1872 = vmatprep.subr.bf16.mxu1 %v2041_v1 }
  0x2b   : > { %784 = vmatpush1.bf16.msra.mxu0 %v1913_v12  ;;  %1888 = vmatpush1.bf16.msra.mxu1 %v1913_v12  ;;  %v2009_v12 = vld [vmem:[%s2099_s28 + $0x210] ss:$8 sps:$4 sm:$0xff]  }
  0x2c   : > { %785 = vmatprep.subr.bf16.mxu0 %v2041_v1  ;;  %1873 = vmatprep.subr.bf16.mxu1 %v2041_v1 }
  0x2f   : > { %786 = vmatpush1.bf16.msra.mxu0 %v1914_v13  ;;  %1889 = vmatpush1.bf16.msra.mxu1 %v1914_v13  ;;  %v2010_v13 = vld [vmem:[%s2099_s28 + $0xf4] ss:$8 sps:$4 sm:$0xff]  }
  0x30   : > { %787 = vmatprep.subr.bf16.mxu0 %v2041_v1  ;;  %1874 = vmatprep.subr.bf16.mxu1 %v2041_v1 }
  0x33   : > { %788 = vmatpush1.bf16.msra.mxu0 %v1915_v14  ;;  %1890 = vmatpush1.bf16.msra.mxu1 %v1915_v14  ;;  %v2012_v14 = vld [vmem:[%s2099_s28 + $0x224] ss:$8 sps:$4 sm:$0xff]  }
  0x34   : > { %789 = vmatprep.subr.bf16.mxu0 %v2041_v1  ;;  %1875 = vmatprep.subr.bf16.mxu1 %v2041_v1 }
  0x37   : > { %790 = vmatpush1.bf16.msra.mxu0 %v1916_v15  ;;  %1891 = vmatpush1.bf16.msra.mxu1 %v1916_v15  ;;  %v2014_v15 = vld [vmem:[%s2099_s28 + $0xf0] ss:$8 sps:$4 sm:$0xff]  }
  0x38   : > { %791 = vmatprep.subr.bf16.mxu0 %v2041_v1  ;;  %1876 = vmatprep.subr.bf16.mxu1 %v2041_v1 }
  0x3b   : > { %792 = vmatpush1.bf16.msra.mxu0 %v1917_v16  ;;  %1892 = vmatpush1.bf16.msra.mxu1 %v1917_v16  ;;  %v2015_v16 = vld [vmem:[%s2099_s28 + $0x220] ss:$8 sps:$4 sm:$0xff]  }
  0x3c   : > { %793 = vmatprep.subr.bf16.mxu0 %v2041_v1  ;;  %1877 = vmatprep.subr.bf16.mxu1 %v2041_v1 }
  0x3f   : > { %794 = vmatpush1.bf16.msra.mxu0 %v1918_v17  ;;  %1893 = vmatpush1.bf16.msra.mxu1 %v1918_v17  ;;  %v2016_v17 = vld [vmem:[%s2099_s28 + $0x104] ss:$8 sps:$4 sm:$0xff]  }
  0x40   : > { %795 = vmatprep.subr.bf16.mxu0 %v2041_v1  ;;  %1878 = vmatprep.subr.bf16.mxu1 %v2041_v1  ;;  %v1992_v1 = vld [vmem:[%s2099_s28 + $0xc4] ss:$8 sps:$4 sm:$0xff]  }
  0x43   : > { %796 = vmatpush1.bf16.msra.mxu0 %v1919_v18  ;;  %1894 = vmatpush1.bf16.msra.mxu1 %v1919_v18  ;;  %v2018_v18 = vld [vmem:[%s2099_s28 + $0x234] ss:$8 sps:$4 sm:$0xff]  }
  0x46   : > { %798 = vmatmul.mubr.bf16.vlgmr.msra.gmra.mrb[0].mxu0 %v1920_v19  ;;  %950 = vmatmul.mubr.bf16.vlgmr.msra.gmra.mrb[0].mxu1 %v1923_v20  ;;  %v2020_v19 = vld [vmem:[%s2099_s28 + $0x100] ss:$8 sps:$4 sm:$0xff]   ;;  %v2021_v20 = vld [vmem:[%s2099_s28 + $0x230] ss:$8 sps:$4 sm:$0xff]  }
  0x47   : > { %805 = vmatprep.mubr.bf16.mxu0 %v1926_v21  ;;  %957 = vmatprep.mubr.bf16.mxu1 %v1928_v22  ;;  %v2022_v21 = vld [vmem:[%s2099_s28 + $0x114] ss:$8 sps:$4 sm:$0xff]   ;;  %v2024_v22 = vld [vmem:[%s2099_s28 + $0x244] ss:$8 sps:$4 sm:$0xff]  }
  0x4e   : > { %806 = vmatmul.mubr.bf16.gmra.mrb[4].mxu0 %v1930_v23  ;;  %958 = vmatmul.mubr.bf16.gmra.mrb[4].mxu1 %v1931_v24  ;;  %v252_v23 = vld [vmem:[%s2099_s28 + $0x250] sm:$0xff] }
  0x4f   : > { %813 = vmatprep.mubr.bf16.mxu0 %v1932_v25  ;;  %965 = vmatprep.mubr.bf16.mxu1 %v1934_v26  ;;  %v2026_v24 = vld [vmem:[%s2099_s28 + $0x110] ss:$8 sps:$4 sm:$0xff]   ;;  %v2027_v25 = vld [vmem:[%s2099_s28 + $0x240] ss:$8 sps:$4 sm:$0xff]   ;;  %v2028_v26 = vld [vmem:[%s2099_s28 + $0x124] ss:$8 sps:$4 sm:$0xff]  }
  0x56   : > { %814 = vmatmul.mubr.bf16.gmra.mrb[8].mxu0 %v1936_v27  ;;  %966 = vmatmul.mubr.bf16.gmra.mrb[8].mxu1 %v1937_v28  ;;  %v1693_v27 = vcombine.high %v252_v23, %v252_v23  ;;  %v2031_v28 = vld [vmem:[%s2099_s28 + $0x120] ss:$8 sps:$4 sm:$0xff]  }
  0x57   : > { %821 = vmatprep.mubr.bf16.mxu0 %v1938_v29  ;;  %973 = vmatprep.mubr.bf16.mxu1 %v1940_v30  ;;  %v1692_v29 = vcombine.low %v252_v23, %v252_v23  ;;  %v2236_v30 = vld [vmem:[%s2474_s2] ss:$0 sm:$0xff] }
  0x5e   : > { %822 = vmatmul.mubr.bf16.gmra.mrb[12].mxu0 %v1942_v31  ;;  %974 = vmatmul.mubr.bf16.gmra.mrb[12].mxu1 %v1943_v32 }
  0x5f   : > { %829 = vmatprep.mubr.bf16.mxu0 %v1944_v33  ;;  %981 = vmatprep.mubr.bf16.mxu1 %v1946_v34 }
  0x66   : > { %830 = vmatmul.mubr.bf16.gmra.mrb[16].mxu0 %v1948_v35  ;;  %982 = vmatmul.mubr.bf16.gmra.mrb[16].mxu1 %v1949_v36 }
  0x67   : > { %837 = vmatprep.mubr.bf16.mxu0 %v1950_v37  ;;  %989 = vmatprep.mubr.bf16.mxu1 %v1952_v38 }
  0x6e   : > { %838 = vmatmul.mubr.bf16.gmra.mrb[20].mxu0 %v1954_v39  ;;  %990 = vmatmul.mubr.bf16.gmra.mrb[20].mxu1 %v1955_v40 }
  0x6f   : > { %845 = vmatprep.mubr.bf16.mxu0 %v1956_v41  ;;  %997 = vmatprep.mubr.bf16.mxu1 %v1958_v42 }
  0x76   : > { %846 = vmatmul.mubr.bf16.gmra.mrb[24].mxu0 %v1960_v43  ;;  %998 = vmatmul.mubr.bf16.gmra.mrb[24].mxu1 %v1961_v44 }
  0x77   : > { %853 = vmatprep.mubr.bf16.mxu0 %v1962_v45  ;;  %1005 = vmatprep.mubr.bf16.mxu1 %v1964_v46 }
  0x7e   : > { %854 = vmatmul.mubr.bf16.gmra.mrb[28].mxu0 %v1966_v47  ;;  %1006 = vmatmul.mubr.bf16.gmra.mrb[28].mxu1 %v1967_v48 }
  0x7f   : > { %861 = vmatprep.mubr.bf16.mxu0 %v1968_v49  ;;  %1013 = vmatprep.mubr.bf16.mxu1 %v1970_v50 }
  0x86   : > { %862 = vmatmul.mubr.bf16.gmra.mrb[32].mxu0 %v1972_v51  ;;  %1014 = vmatmul.mubr.bf16.gmra.mrb[32].mxu1 %v1973_v52 }
  0x87   : > { %869 = vmatprep.mubr.bf16.mxu0 %v1974_v53  ;;  %1021 = vmatprep.mubr.bf16.mxu1 %v1976_v54 }
  0x8e   : > { %870 = vmatmul.mubr.bf16.gmra.mrb[36].mxu0 %v1978_v55  ;;  %1022 = vmatmul.mubr.bf16.gmra.mrb[36].mxu1 %v1979_v56 }
  0x8f   : > { %877 = vmatprep.mubr.bf16.mxu0 %v1980_v57  ;;  %1029 = vmatprep.mubr.bf16.mxu1 %v1982_v58 }
  0x96   : > { %878 = vmatmul.mubr.bf16.gmra.mrb[40].mxu0 %v1984_v59  ;;  %1030 = vmatmul.mubr.bf16.gmra.mrb[40].mxu1 %v1985_v60 }
  0x97   : > { %885 = vmatprep.mubr.bf16.mxu0 %v1986_v61  ;;  %1037 = vmatprep.mubr.bf16.mxu1 %v1988_v62 }
  0x9e   : > { %886 = vmatmul.mubr.bf16.gmra.mrb[44].mxu0 %v1990_v63  ;;  %1038 = vmatmul.mubr.bf16.gmra.mrb[44].mxu1 %v1991_v0 }
  0x9f   : > { %893 = vmatprep.mubr.bf16.mxu0 %v1992_v1  ;;  %1045 = vmatprep.mubr.bf16.mxu1 %v1994_v2 }
  0xa6   : > { %894 = vmatmul.mubr.bf16.gmra.mrb[48].mxu0 %v1996_v3  ;;  %1046 = vmatmul.mubr.bf16.gmra.mrb[48].mxu1 %v1997_v4 }
  0xa7   : > { %901 = vmatprep.mubr.bf16.mxu0 %v1998_v5  ;;  %1053 = vmatprep.mubr.bf16.mxu1 %v2000_v6 }
  0xae   : > { %902 = vmatmul.mubr.bf16.gmra.mrb[52].mxu0 %v2002_v7  ;;  %1054 = vmatmul.mubr.bf16.gmra.mrb[52].mxu1 %v2003_v8 }
  0xaf   : > { %909 = vmatprep.mubr.bf16.mxu0 %v2004_v9  ;;  %1061 = vmatprep.mubr.bf16.mxu1 %v2006_v10 }
  0xb6   : > { %910 = vmatmul.mubr.bf16.gmra.mrb[56].mxu0 %v2008_v11  ;;  %1062 = vmatmul.mubr.bf16.gmra.mrb[56].mxu1 %v2009_v12 }
  0xb7   : > { %917 = vmatprep.mubr.bf16.mxu0 %v2010_v13  ;;  %1069 = vmatprep.mubr.bf16.mxu1 %v2012_v14 }
  0xbe   : > { %918 = vmatmul.mubr.bf16.gmra.mrb[60].mxu0 %v2014_v15  ;;  %1070 = vmatmul.mubr.bf16.gmra.mrb[60].mxu1 %v2015_v16 }
  0xbf   : > { %925 = vmatprep.mubr.bf16.mxu0 %v2016_v17  ;;  %1077 = vmatprep.mubr.bf16.mxu1 %v2018_v18 }
  0xc6   : > { %926 = vmatmul.mubr.bf16.gmra.mrb[64].mxu0 %v2020_v19  ;;  %1078 = vmatmul.mubr.bf16.gmra.mrb[64].mxu1 %v2021_v20 }
  0xc7   : > { %933 = vmatprep.mubr.bf16.mxu0 %v2022_v21  ;;  %1085 = vmatprep.mubr.bf16.mxu1 %v2024_v22 }
  0xce   : > { %934 = vmatmul.mubr.bf16.gmra.mrb[68].mxu0 %v2026_v24  ;;  %1086 = vmatmul.mubr.bf16.gmra.mrb[68].mxu1 %v2027_v25 }
  0xcf   : > { %941 = vmatprep.mubr.bf16.mxu0 %v2028_v26  ;;  %1093 = vmatprep.mubr.bf16.mxu1 %v1693_v27 }
  0xd6   : > { %942 = vmatmul.mubr.bf16.gmra.mrb[72].mxu0 %v2031_v28  ;;  %1094 = vmatmul.mubr.bf16.gmra.mrb[72].mxu1 %v1692_v29 }
 0x119   : > { %v799_v31 = vpop.f32.mrb[0].mxu0  ;;  %v951_v32 = vpop.f32.mrb[0].mxu1 }
 0x11a   : > { %v800_v33 = vadd.f32 %v2236_v30, %v799_v31  ;;  %v952_v34 = vadd.f32 %v2236_v30, %v951_v32  ;;  %v801_v35 = vpop.f32.mrb[1].mxu0  ;;  %v953_v36 = vpop.f32.mrb[1].mxu1 }
 0x11b   : > { %v802_v37 = vpop.f32.mrb[2].mxu0  ;;  %v954_v38 = vpop.f32.mrb[2].mxu1 }
 0x11c   : > { %v1101_v39 = vmax.f32 %v800_v33, 0.0  ;;  %v1139_v40 = vmax.f32 %v952_v34, 0.0  ;;  %v803_v41 = vadd.f32 %v2236_v30, %v802_v37  ;;  %v955_v42 = vadd.f32 %v2236_v30, %v954_v38  ;;  %v804_v43 = vpop.f32.mrb[3].mxu0  ;;  %v956_v44 = vpop.f32.mrb[3].mxu1 }
 0x11e   : > { %v1788_v45 = vpack.c.bf16 %v1101_v39, %v1101_v39  ;;  %v1826_v46 = vpack.c.bf16 %v1139_v40, %v1139_v40  ;;  %v1102_v47 = vmax.f32 %v803_v41, 0.0  ;;  %v1140_v48 = vmax.f32 %v955_v42, 0.0 }
 0x120   : > { %1478 = vst.msk [vmem:[%s2246_s16] sm:$0xf] %vm1477_vm0, %v1788_v45  ;;  %1516 = vst.msk [vmem:[%s2246_s16 + $0x98] sm:$0xf] %vm1477_vm0, %v1826_v46  ;;  %v1789_v49 = vpack.c.bf16 %v1102_v47, %v1102_v47  ;;  %v1827_v50 = vpack.c.bf16 %v1140_v48, %v1140_v48 }
 0x121   : > { %v807_v51 = vpop.f32.mrb[4].mxu0  ;;  %v959_v52 = vpop.f32.mrb[4].mxu1 }
 0x122   : > { %1479 = vst.msk [vmem:[%s2246_s16 + $0x4] sm:$0xf] %vm1477_vm0, %v1789_v49  ;;  %1517 = vst.msk [vmem:[%s2246_s16 + $0x9c] sm:$0xf] %vm1477_vm0, %v1827_v50  ;;  %v808_v53 = vadd.f32 %v2236_v30, %v807_v51  ;;  %v960_v54 = vadd.f32 %v2236_v30, %v959_v52  ;;  %v809_v55 = vpop.f32.mrb[5].mxu0  ;;  %v961_v56 = vpop.f32.mrb[5].mxu1 }
 0x123   : > { %v810_v57 = vpop.f32.mrb[6].mxu0  ;;  %v962_v58 = vpop.f32.mrb[6].mxu1 }
 0x124   : > { %v1103_v59 = vmax.f32 %v808_v53, 0.0  ;;  %v1141_v60 = vmax.f32 %v960_v54, 0.0  ;;  %v811_v61 = vadd.f32 %v2236_v30, %v810_v57  ;;  %v963_v62 = vadd.f32 %v2236_v30, %v962_v58  ;;  %v812_v63 = vpop.f32.mrb[7].mxu0  ;;  %v964_v0 = vpop.f32.mrb[7].mxu1 }
 0x126   : > { %v1790_v1 = vpack.c.bf16 %v1103_v59, %v1103_v59  ;;  %v1828_v2 = vpack.c.bf16 %v1141_v60, %v1141_v60  ;;  %v1104_v3 = vmax.f32 %v811_v61, 0.0  ;;  %v1142_v4 = vmax.f32 %v963_v62, 0.0 }
 0x128   : > { %1480 = vst.msk [vmem:[%s2246_s16 + $0x8] sm:$0xf] %vm1477_vm0, %v1790_v1  ;;  %1518 = vst.msk [vmem:[%s2246_s16 + $0xa0] sm:$0xf] %vm1477_vm0, %v1828_v2  ;;  %v1791_v5 = vpack.c.bf16 %v1104_v3, %v1104_v3  ;;  %v1829_v6 = vpack.c.bf16 %v1142_v4, %v1142_v4 }
 0x129   : > { %v815_v7 = vpop.f32.mrb[8].mxu0  ;;  %v967_v8 = vpop.f32.mrb[8].mxu1 }
 0x12a   : > { %1481 = vst.msk [vmem:[%s2246_s16 + $0xc] sm:$0xf] %vm1477_vm0, %v1791_v5  ;;  %1519 = vst.msk [vmem:[%s2246_s16 + $0xa4] sm:$0xf] %vm1477_vm0, %v1829_v6  ;;  %v816_v9 = vadd.f32 %v2236_v30, %v815_v7  ;;  %v968_v10 = vadd.f32 %v2236_v30, %v967_v8  ;;  %v817_v11 = vpop.f32.mrb[9].mxu0  ;;  %v969_v12 = vpop.f32.mrb[9].mxu1 }
 0x12b   : > { %v818_v13 = vpop.f32.mrb[10].mxu0  ;;  %v970_v14 = vpop.f32.mrb[10].mxu1 }
 0x12c   : > { %v1105_v15 = vmax.f32 %v816_v9, 0.0  ;;  %v1143_v16 = vmax.f32 %v968_v10, 0.0  ;;  %v819_v17 = vadd.f32 %v2236_v30, %v818_v13  ;;  %v971_v18 = vadd.f32 %v2236_v30, %v970_v14  ;;  %v820_v19 = vpop.f32.mrb[11].mxu0  ;;  %v972_v20 = vpop.f32.mrb[11].mxu1 }
 0x12e   : > { %v1792_v21 = vpack.c.bf16 %v1105_v15, %v1105_v15  ;;  %v1830_v22 = vpack.c.bf16 %v1143_v16, %v1143_v16  ;;  %v1106_v23 = vmax.f32 %v819_v17, 0.0  ;;  %v1144_v24 = vmax.f32 %v971_v18, 0.0 }
 0x130   : > { %1482 = vst.msk [vmem:[%s2246_s16 + $0x10] sm:$0xf] %vm1477_vm0, %v1792_v21  ;;  %1520 = vst.msk [vmem:[%s2246_s16 + $0xa8] sm:$0xf] %vm1477_vm0, %v1830_v22  ;;  %v1793_v25 = vpack.c.bf16 %v1106_v23, %v1106_v23  ;;  %v1831_v26 = vpack.c.bf16 %v1144_v24, %v1144_v24 }
 0x131   : > { %v823_v27 = vpop.f32.mrb[12].mxu0  ;;  %v975_v28 = vpop.f32.mrb[12].mxu1 }
 0x132   : > { %1483 = vst.msk [vmem:[%s2246_s16 + $0x14] sm:$0xf] %vm1477_vm0, %v1793_v25  ;;  %1521 = vst.msk [vmem:[%s2246_s16 + $0xac] sm:$0xf] %vm1477_vm0, %v1831_v26  ;;  %v824_v29 = vadd.f32 %v2236_v30, %v823_v27  ;;  %v976_v31 = vadd.f32 %v2236_v30, %v975_v28  ;;  %v825_v32 = vpop.f32.mrb[13].mxu0  ;;  %v977_v33 = vpop.f32.mrb[13].mxu1 }
 0x133   : > { %v826_v34 = vpop.f32.mrb[14].mxu0  ;;  %v978_v35 = vpop.f32.mrb[14].mxu1 }
 0x134   : > { %v1107_v36 = vmax.f32 %v824_v29, 0.0  ;;  %v1145_v37 = vmax.f32 %v976_v31, 0.0  ;;  %v827_v38 = vadd.f32 %v2236_v30, %v826_v34  ;;  %v979_v39 = vadd.f32 %v2236_v30, %v978_v35  ;;  %v828_v40 = vpop.f32.mrb[15].mxu0  ;;  %v980_v41 = vpop.f32.mrb[15].mxu1 }
 0x136   : > { %v1794_v42 = vpack.c.bf16 %v1107_v36, %v1107_v36  ;;  %v1832_v43 = vpack.c.bf16 %v1145_v37, %v1145_v37  ;;  %v1108_v44 = vmax.f32 %v827_v38, 0.0  ;;  %v1146_v45 = vmax.f32 %v979_v39, 0.0 }
 0x138   : > { %1484 = vst.msk [vmem:[%s2246_s16 + $0x18] sm:$0xf] %vm1477_vm0, %v1794_v42  ;;  %1522 = vst.msk [vmem:[%s2246_s16 + $0xb0] sm:$0xf] %vm1477_vm0, %v1832_v43  ;;  %v1795_v46 = vpack.c.bf16 %v1108_v44, %v1108_v44  ;;  %v1833_v47 = vpack.c.bf16 %v1146_v45, %v1146_v45 }
 0x139   : > { %v831_v48 = vpop.f32.mrb[16].mxu0  ;;  %v983_v49 = vpop.f32.mrb[16].mxu1 }
 0x13a   : > { %1485 = vst.msk [vmem:[%s2246_s16 + $0x1c] sm:$0xf] %vm1477_vm0, %v1795_v46  ;;  %1523 = vst.msk [vmem:[%s2246_s16 + $0xb4] sm:$0xf] %vm1477_vm0, %v1833_v47  ;;  %v832_v50 = vadd.f32 %v2236_v30, %v831_v48  ;;  %v984_v51 = vadd.f32 %v2236_v30, %v983_v49  ;;  %v833_v52 = vpop.f32.mrb[17].mxu0  ;;  %v985_v53 = vpop.f32.mrb[17].mxu1 }
 0x13b   : > { %v834_v54 = vpop.f32.mrb[18].mxu0  ;;  %v986_v55 = vpop.f32.mrb[18].mxu1 }
 0x13c   : > { %v1109_v56 = vmax.f32 %v832_v50, 0.0  ;;  %v1147_v57 = vmax.f32 %v984_v51, 0.0  ;;  %v835_v58 = vadd.f32 %v2236_v30, %v834_v54  ;;  %v987_v59 = vadd.f32 %v2236_v30, %v986_v55  ;;  %v836_v60 = vpop.f32.mrb[19].mxu0  ;;  %v988_v61 = vpop.f32.mrb[19].mxu1 }
 0x13e   : > { %v1796_v62 = vpack.c.bf16 %v1109_v56, %v1109_v56  ;;  %v1834_v63 = vpack.c.bf16 %v1147_v57, %v1147_v57  ;;  %v1110_v0 = vmax.f32 %v835_v58, 0.0  ;;  %v1148_v1 = vmax.f32 %v987_v59, 0.0 }
 0x140   : > { %1486 = vst.msk [vmem:[%s2246_s16 + $0x20] sm:$0xf] %vm1477_vm0, %v1796_v62  ;;  %1524 = vst.msk [vmem:[%s2246_s16 + $0xb8] sm:$0xf] %vm1477_vm0, %v1834_v63  ;;  %v1797_v2 = vpack.c.bf16 %v1110_v0, %v1110_v0  ;;  %v1835_v3 = vpack.c.bf16 %v1148_v1, %v1148_v1 }
 0x141   : > { %v839_v4 = vpop.f32.mrb[20].mxu0  ;;  %v991_v5 = vpop.f32.mrb[20].mxu1 }
 0x142   : > { %1487 = vst.msk [vmem:[%s2246_s16 + $0x24] sm:$0xf] %vm1477_vm0, %v1797_v2  ;;  %1525 = vst.msk [vmem:[%s2246_s16 + $0xbc] sm:$0xf] %vm1477_vm0, %v1835_v3  ;;  %v840_v6 = vadd.f32 %v2236_v30, %v839_v4  ;;  %v992_v7 = vadd.f32 %v2236_v30, %v991_v5  ;;  %v841_v8 = vpop.f32.mrb[21].mxu0  ;;  %v993_v9 = vpop.f32.mrb[21].mxu1 }
 0x143   : > { %v842_v10 = vpop.f32.mrb[22].mxu0  ;;  %v994_v11 = vpop.f32.mrb[22].mxu1 }
 0x144   : > { %v1111_v12 = vmax.f32 %v840_v6, 0.0  ;;  %v1149_v13 = vmax.f32 %v992_v7, 0.0  ;;  %v843_v14 = vadd.f32 %v2236_v30, %v842_v10  ;;  %v995_v15 = vadd.f32 %v2236_v30, %v994_v11  ;;  %v844_v16 = vpop.f32.mrb[23].mxu0  ;;  %v996_v17 = vpop.f32.mrb[23].mxu1 }
 0x146   : > { %v1798_v18 = vpack.c.bf16 %v1111_v12, %v1111_v12  ;;  %v1836_v19 = vpack.c.bf16 %v1149_v13, %v1149_v13  ;;  %v1112_v20 = vmax.f32 %v843_v14, 0.0  ;;  %v1150_v21 = vmax.f32 %v995_v15, 0.0 }
 0x148   : > { %1488 = vst.msk [vmem:[%s2246_s16 + $0x28] sm:$0xf] %vm1477_vm0, %v1798_v18  ;;  %1526 = vst.msk [vmem:[%s2246_s16 + $0xc0] sm:$0xf] %vm1477_vm0, %v1836_v19  ;;  %v1799_v22 = vpack.c.bf16 %v1112_v20, %v1112_v20  ;;  %v1837_v23 = vpack.c.bf16 %v1150_v21, %v1150_v21 }
 0x149   : > { %v847_v24 = vpop.f32.mrb[24].mxu0  ;;  %v999_v25 = vpop.f32.mrb[24].mxu1 }
 0x14a   : > { %1489 = vst.msk [vmem:[%s2246_s16 + $0x2c] sm:$0xf] %vm1477_vm0, %v1799_v22  ;;  %1527 = vst.msk [vmem:[%s2246_s16 + $0xc4] sm:$0xf] %vm1477_vm0, %v1837_v23  ;;  %v848_v26 = vadd.f32 %v2236_v30, %v847_v24  ;;  %v1000_v27 = vadd.f32 %v2236_v30, %v999_v25  ;;  %v849_v28 = vpop.f32.mrb[25].mxu0  ;;  %v1001_v29 = vpop.f32.mrb[25].mxu1 }
 0x14b   : > { %v850_v31 = vpop.f32.mrb[26].mxu0  ;;  %v1002_v32 = vpop.f32.mrb[26].mxu1 }
 0x14c   : > { %v1113_v33 = vmax.f32 %v848_v26, 0.0  ;;  %v1151_v34 = vmax.f32 %v1000_v27, 0.0  ;;  %v851_v35 = vadd.f32 %v2236_v30, %v850_v31  ;;  %v1003_v36 = vadd.f32 %v2236_v30, %v1002_v32  ;;  %v852_v37 = vpop.f32.mrb[27].mxu0  ;;  %v1004_v38 = vpop.f32.mrb[27].mxu1 }
 0x14e   : > { %v1800_v39 = vpack.c.bf16 %v1113_v33, %v1113_v33  ;;  %v1838_v40 = vpack.c.bf16 %v1151_v34, %v1151_v34  ;;  %v1114_v41 = vmax.f32 %v851_v35, 0.0  ;;  %v1152_v42 = vmax.f32 %v1003_v36, 0.0 }
 0x150   : > { %1490 = vst.msk [vmem:[%s2246_s16 + $0x30] sm:$0xf] %vm1477_vm0, %v1800_v39  ;;  %1528 = vst.msk [vmem:[%s2246_s16 + $0xc8] sm:$0xf] %vm1477_vm0, %v1838_v40  ;;  %v1801_v43 = vpack.c.bf16 %v1114_v41, %v1114_v41  ;;  %v1839_v44 = vpack.c.bf16 %v1152_v42, %v1152_v42 }
 0x151   : > { %v855_v45 = vpop.f32.mrb[28].mxu0  ;;  %v1007_v46 = vpop.f32.mrb[28].mxu1 }
 0x152   : > { %1491 = vst.msk [vmem:[%s2246_s16 + $0x34] sm:$0xf] %vm1477_vm0, %v1801_v43  ;;  %1529 = vst.msk [vmem:[%s2246_s16 + $0xcc] sm:$0xf] %vm1477_vm0, %v1839_v44  ;;  %v856_v47 = vadd.f32 %v2236_v30, %v855_v45  ;;  %v1008_v48 = vadd.f32 %v2236_v30, %v1007_v46  ;;  %v857_v49 = vpop.f32.mrb[29].mxu0  ;;  %v1009_v50 = vpop.f32.mrb[29].mxu1 }
 0x153   : > { %v858_v51 = vpop.f32.mrb[30].mxu0  ;;  %v1010_v52 = vpop.f32.mrb[30].mxu1 }
 0x154   : > { %v1115_v53 = vmax.f32 %v856_v47, 0.0  ;;  %v1153_v54 = vmax.f32 %v1008_v48, 0.0  ;;  %v859_v55 = vadd.f32 %v2236_v30, %v858_v51  ;;  %v1011_v56 = vadd.f32 %v2236_v30, %v1010_v52  ;;  %v860_v57 = vpop.f32.mrb[31].mxu0  ;;  %v1012_v58 = vpop.f32.mrb[31].mxu1 }
 0x156   : > { %v1802_v59 = vpack.c.bf16 %v1115_v53, %v1115_v53  ;;  %v1840_v60 = vpack.c.bf16 %v1153_v54, %v1153_v54  ;;  %v1116_v61 = vmax.f32 %v859_v55, 0.0  ;;  %v1154_v62 = vmax.f32 %v1011_v56, 0.0 }
 0x158   : > { %1492 = vst.msk [vmem:[%s2246_s16 + $0x38] sm:$0xf] %vm1477_vm0, %v1802_v59  ;;  %1530 = vst.msk [vmem:[%s2246_s16 + $0xd0] sm:$0xf] %vm1477_vm0, %v1840_v60  ;;  %v1803_v63 = vpack.c.bf16 %v1116_v61, %v1116_v61  ;;  %v1841_v0 = vpack.c.bf16 %v1154_v62, %v1154_v62 }
 0x159   : > { %v863_v1 = vpop.f32.mrb[32].mxu0  ;;  %v1015_v2 = vpop.f32.mrb[32].mxu1 }
 0x15a   : > { %1493 = vst.msk [vmem:[%s2246_s16 + $0x3c] sm:$0xf] %vm1477_vm0, %v1803_v63  ;;  %1531 = vst.msk [vmem:[%s2246_s16 + $0xd4] sm:$0xf] %vm1477_vm0, %v1841_v0  ;;  %v864_v3 = vadd.f32 %v2236_v30, %v863_v1  ;;  %v1016_v4 = vadd.f32 %v2236_v30, %v1015_v2  ;;  %v865_v5 = vpop.f32.mrb[33].mxu0  ;;  %v1017_v6 = vpop.f32.mrb[33].mxu1 }
 0x15b   : > { %v866_v7 = vpop.f32.mrb[34].mxu0  ;;  %v1018_v8 = vpop.f32.mrb[34].mxu1 }
 0x15c   : > { %v1117_v9 = vmax.f32 %v864_v3, 0.0  ;;  %v1155_v10 = vmax.f32 %v1016_v4, 0.0  ;;  %v867_v11 = vadd.f32 %v2236_v30, %v866_v7  ;;  %v1019_v12 = vadd.f32 %v2236_v30, %v1018_v8  ;;  %v868_v13 = vpop.f32.mrb[35].mxu0  ;;  %v1020_v14 = vpop.f32.mrb[35].mxu1 }
 0x15e   : > { %v1804_v15 = vpack.c.bf16 %v1117_v9, %v1117_v9  ;;  %v1842_v16 = vpack.c.bf16 %v1155_v10, %v1155_v10  ;;  %v1118_v17 = vmax.f32 %v867_v11, 0.0  ;;  %v1156_v18 = vmax.f32 %v1019_v12, 0.0 }
 0x160   : > { %1494 = vst.msk [vmem:[%s2246_s16 + $0x40] sm:$0xf] %vm1477_vm0, %v1804_v15  ;;  %1532 = vst.msk [vmem:[%s2246_s16 + $0xd8] sm:$0xf] %vm1477_vm0, %v1842_v16  ;;  %v1805_v19 = vpack.c.bf16 %v1118_v17, %v1118_v17  ;;  %v1843_v20 = vpack.c.bf16 %v1156_v18, %v1156_v18 }
 0x161   : > { %v871_v21 = vpop.f32.mrb[36].mxu0  ;;  %v1023_v22 = vpop.f32.mrb[36].mxu1 }
 0x162   : > { %1495 = vst.msk [vmem:[%s2246_s16 + $0x44] sm:$0xf] %vm1477_vm0, %v1805_v19  ;;  %1533 = vst.msk [vmem:[%s2246_s16 + $0xdc] sm:$0xf] %vm1477_vm0, %v1843_v20  ;;  %v872_v23 = vadd.f32 %v2236_v30, %v871_v21  ;;  %v1024_v24 = vadd.f32 %v2236_v30, %v1023_v22  ;;  %v873_v25 = vpop.f32.mrb[37].mxu0  ;;  %v1025_v26 = vpop.f32.mrb[37].mxu1 }
 0x163   : > { %v874_v27 = vpop.f32.mrb[38].mxu0  ;;  %v1026_v28 = vpop.f32.mrb[38].mxu1 }
 0x164   : > { %v1119_v29 = vmax.f32 %v872_v23, 0.0  ;;  %v1157_v31 = vmax.f32 %v1024_v24, 0.0  ;;  %v875_v32 = vadd.f32 %v2236_v30, %v874_v27  ;;  %v1027_v33 = vadd.f32 %v2236_v30, %v1026_v28  ;;  %v876_v34 = vpop.f32.mrb[39].mxu0  ;;  %v1028_v35 = vpop.f32.mrb[39].mxu1 }
 0x166   : > { %v1806_v36 = vpack.c.bf16 %v1119_v29, %v1119_v29  ;;  %v1844_v37 = vpack.c.bf16 %v1157_v31, %v1157_v31  ;;  %v1120_v38 = vmax.f32 %v875_v32, 0.0  ;;  %v1158_v39 = vmax.f32 %v1027_v33, 0.0 }
 0x168   : > { %1496 = vst.msk [vmem:[%s2246_s16 + $0x48] sm:$0xf] %vm1477_vm0, %v1806_v36  ;;  %1534 = vst.msk [vmem:[%s2246_s16 + $0xe0] sm:$0xf] %vm1477_vm0, %v1844_v37  ;;  %v1807_v40 = vpack.c.bf16 %v1120_v38, %v1120_v38  ;;  %v1845_v41 = vpack.c.bf16 %v1158_v39, %v1158_v39 }
 0x169   : > { %v879_v42 = vpop.f32.mrb[40].mxu0  ;;  %v1031_v43 = vpop.f32.mrb[40].mxu1 }
 0x16a   : > { %1497 = vst.msk [vmem:[%s2246_s16 + $0x4c] sm:$0xf] %vm1477_vm0, %v1807_v40  ;;  %1535 = vst.msk [vmem:[%s2246_s16 + $0xe4] sm:$0xf] %vm1477_vm0, %v1845_v41  ;;  %v880_v44 = vadd.f32 %v2236_v30, %v879_v42  ;;  %v1032_v45 = vadd.f32 %v2236_v30, %v1031_v43  ;;  %v881_v46 = vpop.f32.mrb[41].mxu0  ;;  %v1033_v47 = vpop.f32.mrb[41].mxu1 }
 0x16b   : > { %v882_v48 = vpop.f32.mrb[42].mxu0  ;;  %v1034_v49 = vpop.f32.mrb[42].mxu1 }
 0x16c   : > { %v1121_v50 = vmax.f32 %v880_v44, 0.0  ;;  %v1159_v51 = vmax.f32 %v1032_v45, 0.0  ;;  %v883_v52 = vadd.f32 %v2236_v30, %v882_v48  ;;  %v1035_v53 = vadd.f32 %v2236_v30, %v1034_v49  ;;  %v884_v54 = vpop.f32.mrb[43].mxu0  ;;  %v1036_v55 = vpop.f32.mrb[43].mxu1 }
 0x16e   : > { %v1808_v56 = vpack.c.bf16 %v1121_v50, %v1121_v50  ;;  %v1846_v57 = vpack.c.bf16 %v1159_v51, %v1159_v51  ;;  %v1122_v58 = vmax.f32 %v883_v52, 0.0  ;;  %v1160_v59 = vmax.f32 %v1035_v53, 0.0 }
 0x170   : > { %1498 = vst.msk [vmem:[%s2246_s16 + $0x50] sm:$0xf] %vm1477_vm0, %v1808_v56  ;;  %1536 = vst.msk [vmem:[%s2246_s16 + $0xe8] sm:$0xf] %vm1477_vm0, %v1846_v57  ;;  %v1809_v60 = vpack.c.bf16 %v1122_v58, %v1122_v58  ;;  %v1847_v61 = vpack.c.bf16 %v1160_v59, %v1160_v59 }
 0x171   : > { %v887_v62 = vpop.f32.mrb[44].mxu0  ;;  %v1039_v63 = vpop.f32.mrb[44].mxu1 }
 0x172   : > { %1499 = vst.msk [vmem:[%s2246_s16 + $0x54] sm:$0xf] %vm1477_vm0, %v1809_v60  ;;  %1537 = vst.msk [vmem:[%s2246_s16 + $0xec] sm:$0xf] %vm1477_vm0, %v1847_v61  ;;  %v888_v0 = vadd.f32 %v2236_v30, %v887_v62  ;;  %v1040_v1 = vadd.f32 %v2236_v30, %v1039_v63  ;;  %v889_v2 = vpop.f32.mrb[45].mxu0  ;;  %v1041_v3 = vpop.f32.mrb[45].mxu1 }
 0x173   : > { %v890_v4 = vpop.f32.mrb[46].mxu0  ;;  %v1042_v5 = vpop.f32.mrb[46].mxu1 }
 0x174   : > { %v1123_v6 = vmax.f32 %v888_v0, 0.0  ;;  %v1161_v7 = vmax.f32 %v1040_v1, 0.0  ;;  %v891_v8 = vadd.f32 %v2236_v30, %v890_v4  ;;  %v1043_v9 = vadd.f32 %v2236_v30, %v1042_v5  ;;  %v892_v10 = vpop.f32.mrb[47].mxu0  ;;  %v1044_v11 = vpop.f32.mrb[47].mxu1 }
 0x176   : > { %v1810_v12 = vpack.c.bf16 %v1123_v6, %v1123_v6  ;;  %v1848_v13 = vpack.c.bf16 %v1161_v7, %v1161_v7  ;;  %v1124_v14 = vmax.f32 %v891_v8, 0.0  ;;  %v1162_v15 = vmax.f32 %v1043_v9, 0.0 }
 0x178   : > { %1500 = vst.msk [vmem:[%s2246_s16 + $0x58] sm:$0xf] %vm1477_vm0, %v1810_v12  ;;  %1538 = vst.msk [vmem:[%s2246_s16 + $0xf0] sm:$0xf] %vm1477_vm0, %v1848_v13  ;;  %v1811_v16 = vpack.c.bf16 %v1124_v14, %v1124_v14  ;;  %v1849_v17 = vpack.c.bf16 %v1162_v15, %v1162_v15 }
 0x179   : > { %v895_v18 = vpop.f32.mrb[48].mxu0  ;;  %v1047_v19 = vpop.f32.mrb[48].mxu1 }
 0x17a   : > { %1501 = vst.msk [vmem:[%s2246_s16 + $0x5c] sm:$0xf] %vm1477_vm0, %v1811_v16  ;;  %1539 = vst.msk [vmem:[%s2246_s16 + $0xf4] sm:$0xf] %vm1477_vm0, %v1849_v17  ;;  %v896_v20 = vadd.f32 %v2236_v30, %v895_v18  ;;  %v1048_v21 = vadd.f32 %v2236_v30, %v1047_v19  ;;  %v897_v22 = vpop.f32.mrb[49].mxu0  ;;  %v1049_v23 = vpop.f32.mrb[49].mxu1 }
 0x17b   : > { %v898_v24 = vpop.f32.mrb[50].mxu0  ;;  %v1050_v25 = vpop.f32.mrb[50].mxu1 }
 0x17c   : > { %v1125_v26 = vmax.f32 %v896_v20, 0.0  ;;  %v1163_v27 = vmax.f32 %v1048_v21, 0.0  ;;  %v899_v28 = vadd.f32 %v2236_v30, %v898_v24  ;;  %v1051_v29 = vadd.f32 %v2236_v30, %v1050_v25  ;;  %v900_v31 = vpop.f32.mrb[51].mxu0  ;;  %v1052_v32 = vpop.f32.mrb[51].mxu1 }
 0x17e   : > { %v1812_v33 = vpack.c.bf16 %v1125_v26, %v1125_v26  ;;  %v1850_v34 = vpack.c.bf16 %v1163_v27, %v1163_v27  ;;  %v1126_v35 = vmax.f32 %v899_v28, 0.0  ;;  %v1164_v36 = vmax.f32 %v1051_v29, 0.0 }
 0x180   : > { %1502 = vst.msk [vmem:[%s2246_s16 + $0x60] sm:$0xf] %vm1477_vm0, %v1812_v33  ;;  %1540 = vst.msk [vmem:[%s2246_s16 + $0xf8] sm:$0xf] %vm1477_vm0, %v1850_v34  ;;  %v1813_v37 = vpack.c.bf16 %v1126_v35, %v1126_v35  ;;  %v1851_v38 = vpack.c.bf16 %v1164_v36, %v1164_v36 }
 0x181   : > { %v903_v39 = vpop.f32.mrb[52].mxu0  ;;  %v1055_v40 = vpop.f32.mrb[52].mxu1 }
 0x182   : > { %1503 = vst.msk [vmem:[%s2246_s16 + $0x64] sm:$0xf] %vm1477_vm0, %v1813_v37  ;;  %1541 = vst.msk [vmem:[%s2246_s16 + $0xfc] sm:$0xf] %vm1477_vm0, %v1851_v38  ;;  %v904_v41 = vadd.f32 %v2236_v30, %v903_v39  ;;  %v1056_v42 = vadd.f32 %v2236_v30, %v1055_v40  ;;  %v905_v43 = vpop.f32.mrb[53].mxu0  ;;  %v1057_v44 = vpop.f32.mrb[53].mxu1 }
 0x183   : > { %v906_v45 = vpop.f32.mrb[54].mxu0  ;;  %v1058_v46 = vpop.f32.mrb[54].mxu1 }
 0x184   : > { %v1127_v47 = vmax.f32 %v904_v41, 0.0  ;;  %v1165_v48 = vmax.f32 %v1056_v42, 0.0  ;;  %v907_v49 = vadd.f32 %v2236_v30, %v906_v45  ;;  %v1059_v50 = vadd.f32 %v2236_v30, %v1058_v46  ;;  %v908_v51 = vpop.f32.mrb[55].mxu0  ;;  %v1060_v52 = vpop.f32.mrb[55].mxu1 }
 0x186   : > { %v1814_v53 = vpack.c.bf16 %v1127_v47, %v1127_v47  ;;  %v1852_v54 = vpack.c.bf16 %v1165_v48, %v1165_v48  ;;  %v1128_v55 = vmax.f32 %v907_v49, 0.0  ;;  %v1166_v56 = vmax.f32 %v1059_v50, 0.0 }
 0x188   : > { %1504 = vst.msk [vmem:[%s2246_s16 + $0x68] sm:$0xf] %vm1477_vm0, %v1814_v53  ;;  %1542 = vst.msk [vmem:[%s2246_s16 + $0x100] sm:$0xf] %vm1477_vm0, %v1852_v54  ;;  %v1815_v57 = vpack.c.bf16 %v1128_v55, %v1128_v55  ;;  %v1853_v58 = vpack.c.bf16 %v1166_v56, %v1166_v56 }
 0x189   : > { %v911_v59 = vpop.f32.mrb[56].mxu0  ;;  %v1063_v60 = vpop.f32.mrb[56].mxu1 }
 0x18a   : > { %1505 = vst.msk [vmem:[%s2246_s16 + $0x6c] sm:$0xf] %vm1477_vm0, %v1815_v57  ;;  %1543 = vst.msk [vmem:[%s2246_s16 + $0x104] sm:$0xf] %vm1477_vm0, %v1853_v58  ;;  %v912_v61 = vadd.f32 %v2236_v30, %v911_v59  ;;  %v1064_v62 = vadd.f32 %v2236_v30, %v1063_v60  ;;  %v913_v63 = vpop.f32.mrb[57].mxu0  ;;  %v1065_v0 = vpop.f32.mrb[57].mxu1 }
 0x18b   : > { %v914_v1 = vpop.f32.mrb[58].mxu0  ;;  %v1066_v2 = vpop.f32.mrb[58].mxu1 }
 0x18c   : > { %v1129_v3 = vmax.f32 %v912_v61, 0.0  ;;  %v1167_v4 = vmax.f32 %v1064_v62, 0.0  ;;  %v915_v5 = vadd.f32 %v2236_v30, %v914_v1  ;;  %v1067_v6 = vadd.f32 %v2236_v30, %v1066_v2  ;;  %v916_v7 = vpop.f32.mrb[59].mxu0  ;;  %v1068_v8 = vpop.f32.mrb[59].mxu1 }
 0x18e   : > { %v1816_v9 = vpack.c.bf16 %v1129_v3, %v1129_v3  ;;  %v1854_v10 = vpack.c.bf16 %v1167_v4, %v1167_v4  ;;  %v1130_v11 = vmax.f32 %v915_v5, 0.0  ;;  %v1168_v12 = vmax.f32 %v1067_v6, 0.0 }
 0x190   : > { %1506 = vst.msk [vmem:[%s2246_s16 + $0x70] sm:$0xf] %vm1477_vm0, %v1816_v9  ;;  %1544 = vst.msk [vmem:[%s2246_s16 + $0x108] sm:$0xf] %vm1477_vm0, %v1854_v10  ;;  %v1817_v13 = vpack.c.bf16 %v1130_v11, %v1130_v11  ;;  %v1855_v14 = vpack.c.bf16 %v1168_v12, %v1168_v12 }
 0x191   : > { %v919_v15 = vpop.f32.mrb[60].mxu0  ;;  %v1071_v16 = vpop.f32.mrb[60].mxu1 }
 0x192   : > { %1507 = vst.msk [vmem:[%s2246_s16 + $0x74] sm:$0xf] %vm1477_vm0, %v1817_v13  ;;  %1545 = vst.msk [vmem:[%s2246_s16 + $0x10c] sm:$0xf] %vm1477_vm0, %v1855_v14  ;;  %v920_v17 = vadd.f32 %v2236_v30, %v919_v15  ;;  %v1072_v18 = vadd.f32 %v2236_v30, %v1071_v16  ;;  %v921_v19 = vpop.f32.mrb[61].mxu0  ;;  %v1073_v20 = vpop.f32.mrb[61].mxu1 }
 0x193   : > { %v922_v21 = vpop.f32.mrb[62].mxu0  ;;  %v1074_v22 = vpop.f32.mrb[62].mxu1 }
 0x194   : > { %v1131_v23 = vmax.f32 %v920_v17, 0.0  ;;  %v1169_v24 = vmax.f32 %v1072_v18, 0.0  ;;  %v923_v25 = vadd.f32 %v2236_v30, %v922_v21  ;;  %v1075_v26 = vadd.f32 %v2236_v30, %v1074_v22  ;;  %v924_v27 = vpop.f32.mrb[63].mxu0  ;;  %v1076_v28 = vpop.f32.mrb[63].mxu1 }
 0x196   : > { %v1818_v29 = vpack.c.bf16 %v1131_v23, %v1131_v23  ;;  %v1856_v31 = vpack.c.bf16 %v1169_v24, %v1169_v24  ;;  %v1132_v32 = vmax.f32 %v923_v25, 0.0  ;;  %v1170_v33 = vmax.f32 %v1075_v26, 0.0 }
 0x198   : > { %1508 = vst.msk [vmem:[%s2246_s16 + $0x78] sm:$0xf] %vm1477_vm0, %v1818_v29  ;;  %1546 = vst.msk [vmem:[%s2246_s16 + $0x110] sm:$0xf] %vm1477_vm0, %v1856_v31  ;;  %v1819_v34 = vpack.c.bf16 %v1132_v32, %v1132_v32  ;;  %v1857_v35 = vpack.c.bf16 %v1170_v33, %v1170_v33 }
 0x199   : > { %v927_v36 = vpop.f32.mrb[64].mxu0  ;;  %v1079_v37 = vpop.f32.mrb[64].mxu1 }
 0x19a   : > { %1509 = vst.msk [vmem:[%s2246_s16 + $0x7c] sm:$0xf] %vm1477_vm0, %v1819_v34  ;;  %1547 = vst.msk [vmem:[%s2246_s16 + $0x114] sm:$0xf] %vm1477_vm0, %v1857_v35  ;;  %v928_v38 = vadd.f32 %v2236_v30, %v927_v36  ;;  %v1080_v39 = vadd.f32 %v2236_v30, %v1079_v37  ;;  %v929_v40 = vpop.f32.mrb[65].mxu0  ;;  %v1081_v41 = vpop.f32.mrb[65].mxu1 }
 0x19b   : > { %v930_v42 = vpop.f32.mrb[66].mxu0  ;;  %v1082_v43 = vpop.f32.mrb[66].mxu1 }
 0x19c   : > { %v1133_v44 = vmax.f32 %v928_v38, 0.0  ;;  %v1171_v45 = vmax.f32 %v1080_v39, 0.0  ;;  %v931_v46 = vadd.f32 %v2236_v30, %v930_v42  ;;  %v1083_v47 = vadd.f32 %v2236_v30, %v1082_v43  ;;  %v932_v48 = vpop.f32.mrb[67].mxu0  ;;  %v1084_v49 = vpop.f32.mrb[67].mxu1 }
 0x19e   : > { %v1820_v50 = vpack.c.bf16 %v1133_v44, %v1133_v44  ;;  %v1858_v51 = vpack.c.bf16 %v1171_v45, %v1171_v45  ;;  %v1134_v52 = vmax.f32 %v931_v46, 0.0  ;;  %v1172_v53 = vmax.f32 %v1083_v47, 0.0 }
 0x1a0   : > { %1510 = vst.msk [vmem:[%s2246_s16 + $0x80] sm:$0xf] %vm1477_vm0, %v1820_v50  ;;  %1548 = vst.msk [vmem:[%s2246_s16 + $0x118] sm:$0xf] %vm1477_vm0, %v1858_v51  ;;  %v1821_v54 = vpack.c.bf16 %v1134_v52, %v1134_v52  ;;  %v1859_v55 = vpack.c.bf16 %v1172_v53, %v1172_v53 }
 0x1a1   : > { %v935_v56 = vpop.f32.mrb[68].mxu0  ;;  %v1087_v57 = vpop.f32.mrb[68].mxu1 }
 0x1a2   : > { %1511 = vst.msk [vmem:[%s2246_s16 + $0x84] sm:$0xf] %vm1477_vm0, %v1821_v54  ;;  %1549 = vst.msk [vmem:[%s2246_s16 + $0x11c] sm:$0xf] %vm1477_vm0, %v1859_v55  ;;  %v936_v58 = vadd.f32 %v2236_v30, %v935_v56  ;;  %v1088_v59 = vadd.f32 %v2236_v30, %v1087_v57  ;;  %v937_v60 = vpop.f32.mrb[69].mxu0  ;;  %v1089_v61 = vpop.f32.mrb[69].mxu1 }
 0x1a3   : > { %v938_v62 = vpop.f32.mrb[70].mxu0  ;;  %v1090_v63 = vpop.f32.mrb[70].mxu1 }
 0x1a4   : > { %v1135_v0 = vmax.f32 %v936_v58, 0.0  ;;  %v1173_v1 = vmax.f32 %v1088_v59, 0.0  ;;  %v939_v2 = vadd.f32 %v2236_v30, %v938_v62  ;;  %v1091_v3 = vadd.f32 %v2236_v30, %v1090_v63  ;;  %v940_v4 = vpop.f32.mrb[71].mxu0  ;;  %v1092_v5 = vpop.f32.mrb[71].mxu1 }
 0x1a6   : > { %v1822_v6 = vpack.c.bf16 %v1135_v0, %v1135_v0  ;;  %v1860_v7 = vpack.c.bf16 %v1173_v1, %v1173_v1  ;;  %v1136_v8 = vmax.f32 %v939_v2, 0.0  ;;  %v1174_v9 = vmax.f32 %v1091_v3, 0.0 }
 0x1a8   : > { %1512 = vst.msk [vmem:[%s2246_s16 + $0x88] sm:$0xf] %vm1477_vm0, %v1822_v6  ;;  %1550 = vst.msk [vmem:[%s2246_s16 + $0x120] sm:$0xf] %vm1477_vm0, %v1860_v7  ;;  %v1823_v10 = vpack.c.bf16 %v1136_v8, %v1136_v8  ;;  %v1861_v11 = vpack.c.bf16 %v1174_v9, %v1174_v9 }
 0x1a9   : > { %v943_v12 = vpop.f32.mrb[72].mxu0  ;;  %v1095_v13 = vpop.f32.mrb[72].mxu1 }
 0x1aa   : > { %1513 = vst.msk [vmem:[%s2246_s16 + $0x8c] sm:$0xf] %vm1477_vm0, %v1823_v10  ;;  %1551 = vst.msk [vmem:[%s2246_s16 + $0x124] sm:$0xf] %vm1477_vm0, %v1861_v11  ;;  %v944_v14 = vadd.f32 %v2236_v30, %v943_v12  ;;  %v1096_v15 = vadd.f32 %v2236_v30, %v1095_v13  ;;  %v945_v16 = vpop.f32.mrb[73].mxu0  ;;  %v1097_v17 = vpop.f32.mrb[73].mxu1 }
 0x1ab   : > { %v946_v18 = vpop.f32.mrb[74].mxu0  ;;  %v1098_v19 = vpop.f32.mrb[74].mxu1 }
 0x1ac   : > { %v1137_v20 = vmax.f32 %v944_v14, 0.0  ;;  %v1175_v21 = vmax.f32 %v1096_v15, 0.0  ;;  %v947_v22 = vadd.f32 %v2236_v30, %v946_v18  ;;  %v948_v23 = vpop.f32.mrb[75].mxu0  ;;  %v1099_v24 = vpop.f32.mrb[75].mxu1 }
 0x1ae   : > { %v1824_v25 = vpack.c.bf16 %v1137_v20, %v1137_v20  ;;  %v1862_v26 = vpack.c.bf16 %v1175_v21, %v1175_v21  ;;  %v1138_v27 = vmax.f32 %v947_v22, 0.0 }
 0x1b0   : > { %1514 = vst.msk [vmem:[%s2246_s16 + $0x90] sm:$0xf] %vm1477_vm0, %v1824_v25  ;;  %1552 = vst.msk [vmem:[%s2246_s16 + $0x128] sm:$0xf] %vm1477_vm0, %v1862_v26  ;;  %v1825_v28 = vpack.c.bf16 %v1138_v27, %v1138_v27 }
 0x1b2   : > { %1515 = vst.msk [vmem:[%s2246_s16 + $0x94] sm:$0xf] %vm1477_vm0, %v1825_v28 }
 0x1b3 PF: > { %s13_s12 = sadd.s32 1, %s2039_s12  }
 0x1b4   : > { %p10_p4 = scmp.ge.s32.totalorder %s13_s12, 5  }
 0x1b6   :  { %12 = sbr.rel (!%p10_p4) target bundleno = 1 (0x1), region = 62 }

// kernel: value_network_forward.5
= control target key start
LH: loop header
LB: loop body
LE: loop exit
PB: predicated region body
PF: predicated region fallthrough
CT: control target
= control target key end

     0   :  { %v2144_v0 = vmov 0   ;;  %vm1580_vm0 = vcmask 519168   ;;  %s2837_s1 = inlined_call_operand.vmem [shape: bf16[512,64], index: 1, kind: input, shape index: {}]   ;;  %s2838_s0 = inlined_call_operand.vmem [shape: bf16[392,512], index: 0, kind: input, shape index: {}]   ;;  %s2839_s2 = inlined_call_operand.vmem [shape: f32[1,64], index: 2, kind: input, shape index: {}]   ;;  %s2840_s3 = inlined_call_operand.vmem [shape: bf16[392,64], index: 3, kind: output, shape index: {}]  }
   0x1   :  { %870 = vmatprep.subr.bf16.mxu1 %v2144_v0  ;;  %1102 = vmatprep.subr.bf16.mxu0 %v2144_v0  ;;  %v1964_v1 = vld [vmem:[%s2837_s1] sm:$0xff]   ;;  %v1966_v3 = vld [vmem:[%s2837_s1 + $0x8] sm:$0xff]   ;;  %v1968_v5 = vld [vmem:[%s2837_s1 + $0x10] sm:$0xff]  }
   0x2   :  { %v1965_v2 = vld [vmem:[%s2837_s1 + $0x80] sm:$0xff]   ;;  %871 = vmatpush1.bf16.msra.mxu1 %v1964_v1  ;;  %v1967_v4 = vld [vmem:[%s2837_s1 + $0x88] sm:$0xff]   ;;  %v1969_v6 = vld [vmem:[%s2837_s1 + $0x90] sm:$0xff]  }
   0x3   :  { %1103 = vmatpush1.bf16.msra.mxu0 %v1965_v2  ;;  %872 = vmatprep.subr.bf16.mxu1 %v2144_v0  ;;  %v1970_v7 = vld [vmem:[%s2837_s1 + $0x18] sm:$0xff]   ;;  %v1972_v9 = vld [vmem:[%s2837_s1 + $0x20] sm:$0xff]   ;;  %v1974_v11 = vld [vmem:[%s2837_s1 + $0x28] sm:$0xff]  }
   0x4   :  { %1104 = vmatprep.subr.bf16.mxu0 %v2144_v0  ;;  %v1971_v8 = vld [vmem:[%s2837_s1 + $0x98] sm:$0xff]   ;;  %v1973_v10 = vld [vmem:[%s2837_s1 + $0xa0] sm:$0xff]   ;;  %v1975_v12 = vld [vmem:[%s2837_s1 + $0xa8] sm:$0xff]  }
   0x5   :  { %v1976_v13 = vld [vmem:[%s2837_s1 + $0x30] sm:$0xff]   ;;  %v1978_v15 = vld [vmem:[%s2837_s1 + $0x38] sm:$0xff]   ;;  %v1980_v17 = vld [vmem:[%s2837_s1 + $0x40] sm:$0xff]  }
   0x6   :  { %873 = vmatpush1.bf16.msra.mxu1 %v1966_v3  ;;  %v1977_v14 = vld [vmem:[%s2837_s1 + $0xb0] sm:$0xff]   ;;  %v1979_v16 = vld [vmem:[%s2837_s1 + $0xb8] sm:$0xff]   ;;  %v1981_v18 = vld [vmem:[%s2837_s1 + $0xc0] sm:$0xff]  }
   0x7   :  { %1105 = vmatpush1.bf16.msra.mxu0 %v1967_v4  ;;  %874 = vmatprep.subr.bf16.mxu1 %v2144_v0  ;;  %v1998_v19 = vld [vmem:[%s2838_s0 + $0x4] ss:$16 sps:$4 sm:$0xff]   ;;  %v1982_v20 = vld [vmem:[%s2837_s1 + $0x48] sm:$0xff]   ;;  %v1986_v25 = vld [vmem:[%s2837_s1 + $0x58] sm:$0xff]  }
   0x8   :  { %1106 = vmatprep.subr.bf16.mxu0 %v2144_v0  ;;  %v2001_v21 = vld [vmem:[%s2838_s0 + $0xc] ss:$16 sps:$4 sm:$0xff]   ;;  %902 = vmatprep.mubr.bf16.mxu1 %v1998_v19  ;;  %v1984_v23 = vld [vmem:[%s2837_s1 + $0x50] sm:$0xff]   ;;  %v1988_v27 = vld [vmem:[%s2837_s1 + $0x60] sm:$0xff]  }
   0x9   :  { %v1983_v22 = vld [vmem:[%s2837_s1 + $0xc8] sm:$0xff]   ;;  %1134 = vmatprep.mubr.bf16.mxu0 %v2001_v21  ;;  %v1985_v24 = vld [vmem:[%s2837_s1 + $0xd0] sm:$0xff]   ;;  %v1987_v26 = vld [vmem:[%s2837_s1 + $0xd8] sm:$0xff]  }
   0xa   :  { %875 = vmatpush1.bf16.msra.mxu1 %v1968_v5  ;;  %v1989_v28 = vld [vmem:[%s2837_s1 + $0xe0] sm:$0xff]   ;;  %v1990_v29 = vld [vmem:[%s2837_s1 + $0x68] sm:$0xff]   ;;  %v1992_v31 = vld [vmem:[%s2837_s1 + $0x70] sm:$0xff]  }
   0xb   :  { %1107 = vmatpush1.bf16.msra.mxu0 %v1969_v6  ;;  %876 = vmatprep.subr.bf16.mxu1 %v2144_v0  ;;  %v1991_v30 = vld [vmem:[%s2837_s1 + $0xe8] sm:$0xff]   ;;  %v1993_v32 = vld [vmem:[%s2837_s1 + $0xf0] sm:$0xff]   ;;  %v1994_v33 = vld [vmem:[%s2837_s1 + $0x78] sm:$0xff]  }
   0xc   :  { %1108 = vmatprep.subr.bf16.mxu0 %v2144_v0  ;;  %v1995_v34 = vld [vmem:[%s2837_s1 + $0xf8] sm:$0xff]   ;;  %v1996_v35 = vld [vmem:[%s2838_s0] ss:$16 sps:$4 sm:$0xff]   ;;  %v2002_v37 = vld [vmem:[%s2838_s0 + $0x24] ss:$16 sps:$4 sm:$0xff]  }
   0xd   :  { %v1999_v36 = vld [vmem:[%s2838_s0 + $0x8] ss:$16 sps:$4 sm:$0xff]   ;;  %v2004_v38 = vld [vmem:[%s2838_s0 + $0x2c] ss:$16 sps:$4 sm:$0xff]   ;;  %v2006_v39 = vld [vmem:[%s2838_s0 + $0x20] ss:$16 sps:$4 sm:$0xff]  }
   0xe   :  { %877 = vmatpush1.bf16.msra.mxu1 %v1970_v7  ;;  %v2007_v40 = vld [vmem:[%s2838_s0 + $0x28] ss:$16 sps:$4 sm:$0xff]   ;;  %v2008_v41 = vld [vmem:[%s2838_s0 + $0x44] ss:$16 sps:$4 sm:$0xff]   ;;  %v2010_v42 = vld [vmem:[%s2838_s0 + $0x4c] ss:$16 sps:$4 sm:$0xff]  }
   0xf   :  { %1109 = vmatpush1.bf16.msra.mxu0 %v1971_v8  ;;  %878 = vmatprep.subr.bf16.mxu1 %v2144_v0  ;;  %v2012_v43 = vld [vmem:[%s2838_s0 + $0x40] ss:$16 sps:$4 sm:$0xff]   ;;  %v2013_v44 = vld [vmem:[%s2838_s0 + $0x48] ss:$16 sps:$4 sm:$0xff]   ;;  %v2014_v45 = vld [vmem:[%s2838_s0 + $0x64] ss:$16 sps:$4 sm:$0xff]  }
  0x10   :  { %1110 = vmatprep.subr.bf16.mxu0 %v2144_v0  ;;  %v2016_v46 = vld [vmem:[%s2838_s0 + $0x6c] ss:$16 sps:$4 sm:$0xff]   ;;  %v2018_v47 = vld [vmem:[%s2838_s0 + $0x60] ss:$16 sps:$4 sm:$0xff]   ;;  %v2019_v48 = vld [vmem:[%s2838_s0 + $0x68] ss:$16 sps:$4 sm:$0xff]  }
  0x11   :  { %v2020_v49 = vld [vmem:[%s2838_s0 + $0x84] ss:$16 sps:$4 sm:$0xff]   ;;  %v2022_v50 = vld [vmem:[%s2838_s0 + $0x8c] ss:$16 sps:$4 sm:$0xff]   ;;  %v2024_v51 = vld [vmem:[%s2838_s0 + $0x80] ss:$16 sps:$4 sm:$0xff]  }
  0x12   :  { %879 = vmatpush1.bf16.msra.mxu1 %v1972_v9  ;;  %v2025_v52 = vld [vmem:[%s2838_s0 + $0x88] ss:$16 sps:$4 sm:$0xff]   ;;  %v2026_v53 = vld [vmem:[%s2838_s0 + $0xa4] ss:$16 sps:$4 sm:$0xff]   ;;  %v2028_v54 = vld [vmem:[%s2838_s0 + $0xac] ss:$16 sps:$4 sm:$0xff]  }
  0x13   :  { %1111 = vmatpush1.bf16.msra.mxu0 %v1973_v10  ;;  %880 = vmatprep.subr.bf16.mxu1 %v2144_v0  ;;  %v2030_v55 = vld [vmem:[%s2838_s0 + $0xa0] ss:$16 sps:$4 sm:$0xff]   ;;  %v2031_v56 = vld [vmem:[%s2838_s0 + $0xa8] ss:$16 sps:$4 sm:$0xff]   ;;  %v2032_v57 = vld [vmem:[%s2838_s0 + $0xc4] ss:$16 sps:$4 sm:$0xff]  }
  0x14   :  { %1112 = vmatprep.subr.bf16.mxu0 %v2144_v0  ;;  %v2034_v58 = vld [vmem:[%s2838_s0 + $0xcc] ss:$16 sps:$4 sm:$0xff]   ;;  %v2036_v59 = vld [vmem:[%s2838_s0 + $0xc0] ss:$16 sps:$4 sm:$0xff]   ;;  %v2037_v60 = vld [vmem:[%s2838_s0 + $0xc8] ss:$16 sps:$4 sm:$0xff]  }
  0x15   :  { %v2038_v61 = vld [vmem:[%s2838_s0 + $0xe4] ss:$16 sps:$4 sm:$0xff]   ;;  %v2040_v62 = vld [vmem:[%s2838_s0 + $0xec] ss:$16 sps:$4 sm:$0xff]   ;;  %v2042_v63 = vld [vmem:[%s2838_s0 + $0xe0] ss:$16 sps:$4 sm:$0xff]  }
  0x16   :  { %881 = vmatpush1.bf16.msra.mxu1 %v1974_v11  ;;  %v2044_v1 = vld [vmem:[%s2838_s0 + $0x104] ss:$16 sps:$4 sm:$0xff]   ;;  %v2046_v2 = vld [vmem:[%s2838_s0 + $0x10c] ss:$16 sps:$4 sm:$0xff]   ;;  %v2048_v3 = vld [vmem:[%s2838_s0 + $0x100] ss:$16 sps:$4 sm:$0xff]  }
  0x17   :  { %1113 = vmatpush1.bf16.msra.mxu0 %v1975_v12  ;;  %882 = vmatprep.subr.bf16.mxu1 %v2144_v0  ;;  %v2049_v4 = vld [vmem:[%s2838_s0 + $0x108] ss:$16 sps:$4 sm:$0xff]   ;;  %v2050_v5 = vld [vmem:[%s2838_s0 + $0x124] ss:$16 sps:$4 sm:$0xff]   ;;  %v2052_v6 = vld [vmem:[%s2838_s0 + $0x12c] ss:$16 sps:$4 sm:$0xff]  }
  0x18   :  { %1114 = vmatprep.subr.bf16.mxu0 %v2144_v0  ;;  %v2054_v7 = vld [vmem:[%s2838_s0 + $0x120] ss:$16 sps:$4 sm:$0xff]   ;;  %v2055_v8 = vld [vmem:[%s2838_s0 + $0x128] ss:$16 sps:$4 sm:$0xff]   ;;  %v2056_v9 = vld [vmem:[%s2838_s0 + $0x144] ss:$16 sps:$4 sm:$0xff]  }
  0x19   :  { %v2058_v10 = vld [vmem:[%s2838_s0 + $0x14c] ss:$16 sps:$4 sm:$0xff]   ;;  %v2060_v11 = vld [vmem:[%s2838_s0 + $0x140] ss:$16 sps:$4 sm:$0xff]   ;;  %v2061_v12 = vld [vmem:[%s2838_s0 + $0x148] ss:$16 sps:$4 sm:$0xff]  }
  0x1a   :  { %883 = vmatpush1.bf16.msra.mxu1 %v1976_v13  ;;  %v2062_v13 = vld [vmem:[%s2838_s0 + $0x164] ss:$16 sps:$4 sm:$0xff]   ;;  %v2072_v19 = vld [vmem:[%s2838_s0 + $0x180] ss:$16 sps:$4 sm:$0xff]  }
  0x1b   :  { %1115 = vmatpush1.bf16.msra.mxu0 %v1977_v14  ;;  %884 = vmatprep.subr.bf16.mxu1 %v2144_v0  ;;  %v2064_v14 = vld [vmem:[%s2838_s0 + $0x16c] ss:$16 sps:$4 sm:$0xff]   ;;  %v2074_v21 = vld [vmem:[%s2838_s0 + $0x1a4] ss:$16 sps:$4 sm:$0xff]  }
  0x1c   :  { %1116 = vmatprep.subr.bf16.mxu0 %v2144_v0 }
  0x1e   :  { %885 = vmatpush1.bf16.msra.mxu1 %v1978_v15  ;;  %v2066_v15 = vld [vmem:[%s2838_s0 + $0x160] ss:$16 sps:$4 sm:$0xff]  }
  0x1f   :  { %1117 = vmatpush1.bf16.msra.mxu0 %v1979_v16  ;;  %886 = vmatprep.subr.bf16.mxu1 %v2144_v0  ;;  %v2067_v16 = vld [vmem:[%s2838_s0 + $0x168] ss:$16 sps:$4 sm:$0xff]  }
  0x20   :  { %1118 = vmatprep.subr.bf16.mxu0 %v2144_v0 }
  0x22   :  { %887 = vmatpush1.bf16.msra.mxu1 %v1980_v17  ;;  %v2068_v17 = vld [vmem:[%s2838_s0 + $0x184] ss:$16 sps:$4 sm:$0xff]  }
  0x23   :  { %1119 = vmatpush1.bf16.msra.mxu0 %v1981_v18  ;;  %888 = vmatprep.subr.bf16.mxu1 %v2144_v0  ;;  %v2070_v18 = vld [vmem:[%s2838_s0 + $0x18c] ss:$16 sps:$4 sm:$0xff]  }
  0x24   :  { %1120 = vmatprep.subr.bf16.mxu0 %v2144_v0 }
  0x26   :  { %889 = vmatpush1.bf16.msra.mxu1 %v1982_v20  ;;  %v2073_v20 = vld [vmem:[%s2838_s0 + $0x188] ss:$16 sps:$4 sm:$0xff]  }
  0x27   :  { %1121 = vmatpush1.bf16.msra.mxu0 %v1983_v22  ;;  %890 = vmatprep.subr.bf16.mxu1 %v2144_v0  ;;  %v2076_v22 = vld [vmem:[%s2838_s0 + $0x1ac] ss:$16 sps:$4 sm:$0xff]  }
  0x28   :  { %1122 = vmatprep.subr.bf16.mxu0 %v2144_v0 }
  0x2a   :  { %891 = vmatpush1.bf16.msra.mxu1 %v1984_v23  ;;  %v2078_v23 = vld [vmem:[%s2838_s0 + $0x1a0] ss:$16 sps:$4 sm:$0xff]  }
  0x2b   :  { %1123 = vmatpush1.bf16.msra.mxu0 %v1985_v24  ;;  %892 = vmatprep.subr.bf16.mxu1 %v2144_v0  ;;  %v2079_v24 = vld [vmem:[%s2838_s0 + $0x1a8] ss:$16 sps:$4 sm:$0xff]  }
  0x2c   :  { %1124 = vmatprep.subr.bf16.mxu0 %v2144_v0 }
  0x2e   :  { %893 = vmatpush1.bf16.msra.mxu1 %v1986_v25  ;;  %v2080_v25 = vld [vmem:[%s2838_s0 + $0x1c4] ss:$16 sps:$4 sm:$0xff]  }
  0x2f   :  { %1125 = vmatpush1.bf16.msra.mxu0 %v1987_v26  ;;  %894 = vmatprep.subr.bf16.mxu1 %v2144_v0  ;;  %v2082_v26 = vld [vmem:[%s2838_s0 + $0x1cc] ss:$16 sps:$4 sm:$0xff]  }
  0x30   :  { %1126 = vmatprep.subr.bf16.mxu0 %v2144_v0 }
  0x32   :  { %895 = vmatpush1.bf16.msra.mxu1 %v1988_v27  ;;  %v2084_v27 = vld [vmem:[%s2838_s0 + $0x1c0] ss:$16 sps:$4 sm:$0xff]  }
  0x33   :  { %1127 = vmatpush1.bf16.msra.mxu0 %v1989_v28  ;;  %896 = vmatprep.subr.bf16.mxu1 %v2144_v0  ;;  %v2085_v28 = vld [vmem:[%s2838_s0 + $0x1c8] ss:$16 sps:$4 sm:$0xff]  }
  0x34   :  { %1128 = vmatprep.subr.bf16.mxu0 %v2144_v0 }
  0x36   :  { %897 = vmatpush1.bf16.msra.mxu1 %v1990_v29  ;;  %v2086_v29 = vld [vmem:[%s2838_s0 + $0x1e4] ss:$16 sps:$4 sm:$0xff]  }
  0x37   :  { %1129 = vmatpush1.bf16.msra.mxu0 %v1991_v30  ;;  %898 = vmatprep.subr.bf16.mxu1 %v2144_v0  ;;  %v2088_v30 = vld [vmem:[%s2838_s0 + $0x1ec] ss:$16 sps:$4 sm:$0xff]  }
  0x38   :  { %1130 = vmatprep.subr.bf16.mxu0 %v2144_v0 }
  0x3a   :  { %899 = vmatpush1.bf16.msra.mxu1 %v1992_v31  ;;  %v2090_v31 = vld [vmem:[%s2838_s0 + $0x1e0] ss:$16 sps:$4 sm:$0xff]  }
  0x3b   :  { %1131 = vmatpush1.bf16.msra.mxu0 %v1993_v32  ;;  %900 = vmatprep.subr.bf16.mxu1 %v2144_v0  ;;  %v2091_v32 = vld [vmem:[%s2838_s0 + $0x1e8] ss:$16 sps:$4 sm:$0xff]  }
  0x3c   :  { %1132 = vmatprep.subr.bf16.mxu0 %v2144_v0  ;;  %v2043_v0 = vld [vmem:[%s2838_s0 + $0xe8] ss:$16 sps:$4 sm:$0xff]  }
  0x3e   :  { %901 = vmatpush1.bf16.msra.mxu1 %v1994_v33  ;;  %v2092_v33 = vld [vmem:[%s2838_s0 + $0x204] ss:$16 sps:$4 sm:$0xff]  }
  0x3f   :  { %1133 = vmatpush1.bf16.msra.mxu0 %v1995_v34  ;;  %v2094_v34 = vld [vmem:[%s2838_s0 + $0x20c] ss:$16 sps:$4 sm:$0xff]  }
  0x41   :  { %903 = vmatmul.mubr.bf16.vlgmr.msra.gmra.mrb[0].mxu1 %v1996_v35  ;;  %v2096_v35 = vld [vmem:[%s2838_s0 + $0x200] ss:$16 sps:$4 sm:$0xff]  }
  0x42   :  { %1135 = vmatmul.mubr.bf16.vlgmr.msra.gmra.mrb[0].mxu0 %v1999_v36  ;;  %910 = vmatprep.mubr.bf16.mxu1 %v2002_v37  ;;  %v2097_v36 = vld [vmem:[%s2838_s0 + $0x208] ss:$16 sps:$4 sm:$0xff]   ;;  %v2098_v37 = vld [vmem:[%s2838_s0 + $0x224] ss:$16 sps:$4 sm:$0xff]  }
  0x43   :  { %1142 = vmatprep.mubr.bf16.mxu0 %v2004_v38  ;;  %v2100_v38 = vld [vmem:[%s2838_s0 + $0x22c] ss:$16 sps:$4 sm:$0xff]  }
  0x49   :  { %911 = vmatmul.mubr.bf16.gmra.mrb[4].mxu1 %v2006_v39  ;;  %v2102_v39 = vld [vmem:[%s2838_s0 + $0x220] ss:$16 sps:$4 sm:$0xff]  }
  0x4a   :  { %1143 = vmatmul.mubr.bf16.gmra.mrb[4].mxu0 %v2007_v40  ;;  %918 = vmatprep.mubr.bf16.mxu1 %v2008_v41  ;;  %v2103_v40 = vld [vmem:[%s2838_s0 + $0x228] ss:$16 sps:$4 sm:$0xff]   ;;  %v2104_v41 = vld [vmem:[%s2838_s0 + $0x244] ss:$16 sps:$4 sm:$0xff]  }
  0x4b   :  { %1150 = vmatprep.mubr.bf16.mxu0 %v2010_v42  ;;  %v2106_v42 = vld [vmem:[%s2838_s0 + $0x24c] ss:$16 sps:$4 sm:$0xff]  }
  0x51   :  { %919 = vmatmul.mubr.bf16.gmra.mrb[8].mxu1 %v2012_v43  ;;  %v2108_v43 = vld [vmem:[%s2838_s0 + $0x240] ss:$16 sps:$4 sm:$0xff]  }
  0x52   :  { %1151 = vmatmul.mubr.bf16.gmra.mrb[8].mxu0 %v2013_v44  ;;  %926 = vmatprep.mubr.bf16.mxu1 %v2014_v45  ;;  %v2109_v44 = vld [vmem:[%s2838_s0 + $0x248] ss:$16 sps:$4 sm:$0xff]   ;;  %v2110_v45 = vld [vmem:[%s2838_s0 + $0x264] ss:$16 sps:$4 sm:$0xff]  }
  0x53   :  { %1158 = vmatprep.mubr.bf16.mxu0 %v2016_v46  ;;  %v2112_v46 = vld [vmem:[%s2838_s0 + $0x26c] ss:$16 sps:$4 sm:$0xff]  }
  0x59   :  { %927 = vmatmul.mubr.bf16.gmra.mrb[12].mxu1 %v2018_v47  ;;  %v2114_v47 = vld [vmem:[%s2838_s0 + $0x260] ss:$16 sps:$4 sm:$0xff]  }
  0x5a   :  { %1159 = vmatmul.mubr.bf16.gmra.mrb[12].mxu0 %v2019_v48  ;;  %934 = vmatprep.mubr.bf16.mxu1 %v2020_v49  ;;  %v2115_v48 = vld [vmem:[%s2838_s0 + $0x268] ss:$16 sps:$4 sm:$0xff]   ;;  %v2116_v49 = vld [vmem:[%s2838_s0 + $0x284] ss:$16 sps:$4 sm:$0xff]  }
  0x5b   :  { %1166 = vmatprep.mubr.bf16.mxu0 %v2022_v50  ;;  %v2118_v50 = vld [vmem:[%s2838_s0 + $0x28c] ss:$16 sps:$4 sm:$0xff]  }
  0x61   :  { %935 = vmatmul.mubr.bf16.gmra.mrb[16].mxu1 %v2024_v51  ;;  %v2120_v51 = vld [vmem:[%s2838_s0 + $0x280] ss:$16 sps:$4 sm:$0xff]  }
  0x62   :  { %1167 = vmatmul.mubr.bf16.gmra.mrb[16].mxu0 %v2025_v52  ;;  %942 = vmatprep.mubr.bf16.mxu1 %v2026_v53  ;;  %v2121_v52 = vld [vmem:[%s2838_s0 + $0x288] ss:$16 sps:$4 sm:$0xff]   ;;  %v2122_v53 = vld [vmem:[%s2838_s0 + $0x2a4] ss:$16 sps:$4 sm:$0xff]  }
  0x63   :  { %1174 = vmatprep.mubr.bf16.mxu0 %v2028_v54  ;;  %v2124_v54 = vld [vmem:[%s2838_s0 + $0x2ac] ss:$16 sps:$4 sm:$0xff]  }
  0x69   :  { %943 = vmatmul.mubr.bf16.gmra.mrb[20].mxu1 %v2030_v55  ;;  %v2126_v55 = vld [vmem:[%s2838_s0 + $0x2a0] ss:$16 sps:$4 sm:$0xff]  }
  0x6a   :  { %1175 = vmatmul.mubr.bf16.gmra.mrb[20].mxu0 %v2031_v56  ;;  %950 = vmatprep.mubr.bf16.mxu1 %v2032_v57  ;;  %v2127_v56 = vld [vmem:[%s2838_s0 + $0x2a8] ss:$16 sps:$4 sm:$0xff]   ;;  %v2128_v57 = vld [vmem:[%s2838_s0 + $0x2c4] ss:$16 sps:$4 sm:$0xff]  }
  0x6b   :  { %1182 = vmatprep.mubr.bf16.mxu0 %v2034_v58  ;;  %v2130_v58 = vld [vmem:[%s2838_s0 + $0x2cc] ss:$16 sps:$4 sm:$0xff]  }
  0x71   :  { %951 = vmatmul.mubr.bf16.gmra.mrb[24].mxu1 %v2036_v59  ;;  %v2132_v59 = vld [vmem:[%s2838_s0 + $0x2c0] ss:$16 sps:$4 sm:$0xff]  }
  0x72   :  { %1183 = vmatmul.mubr.bf16.gmra.mrb[24].mxu0 %v2037_v60  ;;  %958 = vmatprep.mubr.bf16.mxu1 %v2038_v61  ;;  %v2133_v60 = vld [vmem:[%s2838_s0 + $0x2c8] ss:$16 sps:$4 sm:$0xff]   ;;  %v2134_v61 = vld [vmem:[%s2838_s0 + $0x2e4] ss:$16 sps:$4 sm:$0xff]  }
  0x73   :  { %1190 = vmatprep.mubr.bf16.mxu0 %v2040_v62  ;;  %v2136_v62 = vld [vmem:[%s2838_s0 + $0x2ec] ss:$16 sps:$4 sm:$0xff]  }
  0x79   :  { %959 = vmatmul.mubr.bf16.gmra.mrb[28].mxu1 %v2042_v63  ;;  %v111_v63 = vld [vmem:[%s2838_s0 + $0x300] sm:$0xff] }
  0x7a   :  { %1191 = vmatmul.mubr.bf16.gmra.mrb[28].mxu0 %v2043_v0  ;;  %966 = vmatprep.mubr.bf16.mxu1 %v2044_v1  ;;  %v112_v0 = vld [vmem:[%s2838_s0 + $0x308] sm:$0xff]  ;;  %v2138_v1 = vld [vmem:[%s2838_s0 + $0x2e0] ss:$16 sps:$4 sm:$0xff]  }
  0x7b   :  { %1198 = vmatprep.mubr.bf16.mxu0 %v2046_v2  ;;  %v2139_v2 = vld [vmem:[%s2838_s0 + $0x2e8] ss:$16 sps:$4 sm:$0xff]  }
  0x81   :  { %967 = vmatmul.mubr.bf16.gmra.mrb[32].mxu1 %v2048_v3  ;;  %v1732_v3 = vcombine.high %v111_v63, %v111_v63 }
  0x82   :  { %1199 = vmatmul.mubr.bf16.gmra.mrb[32].mxu0 %v2049_v4  ;;  %974 = vmatprep.mubr.bf16.mxu1 %v2050_v5  ;;  %v1734_v4 = vcombine.high %v112_v0, %v112_v0  ;;  %v1731_v5 = vcombine.low %v111_v63, %v111_v63 }
  0x83   :  { %1206 = vmatprep.mubr.bf16.mxu0 %v2052_v6  ;;  %v1733_v6 = vcombine.low %v112_v0, %v112_v0 }
  0x89   :  { %975 = vmatmul.mubr.bf16.gmra.mrb[36].mxu1 %v2054_v7  ;;  %v2590_v7 = vld [vmem:[%s2839_s2] ss:$0 sm:$0xff] }
  0x8a   :  { %1207 = vmatmul.mubr.bf16.gmra.mrb[36].mxu0 %v2055_v8  ;;  %982 = vmatprep.mubr.bf16.mxu1 %v2056_v9 }
  0x8b   :  { %1214 = vmatprep.mubr.bf16.mxu0 %v2058_v10 }
  0x91   :  { %983 = vmatmul.mubr.bf16.gmra.mrb[40].mxu1 %v2060_v11 }
  0x92   :  { %1215 = vmatmul.mubr.bf16.gmra.mrb[40].mxu0 %v2061_v12  ;;  %990 = vmatprep.mubr.bf16.mxu1 %v2062_v13 }
  0x93   :  { %1222 = vmatprep.mubr.bf16.mxu0 %v2064_v14 }
  0x99   :  { %991 = vmatmul.mubr.bf16.gmra.mrb[44].mxu1 %v2066_v15 }
  0x9a   :  { %1223 = vmatmul.mubr.bf16.gmra.mrb[44].mxu0 %v2067_v16  ;;  %998 = vmatprep.mubr.bf16.mxu1 %v2068_v17 }
  0x9b   :  { %1230 = vmatprep.mubr.bf16.mxu0 %v2070_v18 }
  0xa1   :  { %999 = vmatmul.mubr.bf16.gmra.mrb[48].mxu1 %v2072_v19 }
  0xa2   :  { %1231 = vmatmul.mubr.bf16.gmra.mrb[48].mxu0 %v2073_v20  ;;  %1006 = vmatprep.mubr.bf16.mxu1 %v2074_v21 }
  0xa3   :  { %1238 = vmatprep.mubr.bf16.mxu0 %v2076_v22 }
  0xa9   :  { %1007 = vmatmul.mubr.bf16.gmra.mrb[52].mxu1 %v2078_v23 }
  0xaa   :  { %1239 = vmatmul.mubr.bf16.gmra.mrb[52].mxu0 %v2079_v24  ;;  %1014 = vmatprep.mubr.bf16.mxu1 %v2080_v25 }
  0xab   :  { %1246 = vmatprep.mubr.bf16.mxu0 %v2082_v26 }
  0xb1   :  { %1015 = vmatmul.mubr.bf16.gmra.mrb[56].mxu1 %v2084_v27 }
  0xb2   :  { %1247 = vmatmul.mubr.bf16.gmra.mrb[56].mxu0 %v2085_v28  ;;  %1022 = vmatprep.mubr.bf16.mxu1 %v2086_v29 }
  0xb3   :  { %1254 = vmatprep.mubr.bf16.mxu0 %v2088_v30 }
  0xb9   :  { %1023 = vmatmul.mubr.bf16.gmra.mrb[60].mxu1 %v2090_v31 }
  0xba   :  { %1255 = vmatmul.mubr.bf16.gmra.mrb[60].mxu0 %v2091_v32  ;;  %1030 = vmatprep.mubr.bf16.mxu1 %v2092_v33 }
  0xbb   :  { %1262 = vmatprep.mubr.bf16.mxu0 %v2094_v34 }
  0xc1   :  { %1031 = vmatmul.mubr.bf16.gmra.mrb[64].mxu1 %v2096_v35 }
  0xc2   :  { %1263 = vmatmul.mubr.bf16.gmra.mrb[64].mxu0 %v2097_v36  ;;  %1038 = vmatprep.mubr.bf16.mxu1 %v2098_v37 }
  0xc3   :  { %1270 = vmatprep.mubr.bf16.mxu0 %v2100_v38 }
  0xc9   :  { %1039 = vmatmul.mubr.bf16.gmra.mrb[68].mxu1 %v2102_v39 }
  0xca   :  { %1271 = vmatmul.mubr.bf16.gmra.mrb[68].mxu0 %v2103_v40  ;;  %1046 = vmatprep.mubr.bf16.mxu1 %v2104_v41 }
  0xcb   :  { %1278 = vmatprep.mubr.bf16.mxu0 %v2106_v42 }
  0xd1   :  { %1047 = vmatmul.mubr.bf16.gmra.mrb[72].mxu1 %v2108_v43 }
  0xd2   :  { %1279 = vmatmul.mubr.bf16.gmra.mrb[72].mxu0 %v2109_v44  ;;  %1054 = vmatprep.mubr.bf16.mxu1 %v2110_v45 }
  0xd3   :  { %1286 = vmatprep.mubr.bf16.mxu0 %v2112_v46 }
  0xd9   :  { %1055 = vmatmul.mubr.bf16.gmra.mrb[76].mxu1 %v2114_v47 }
  0xda   :  { %1287 = vmatmul.mubr.bf16.gmra.mrb[76].mxu0 %v2115_v48  ;;  %1062 = vmatprep.mubr.bf16.mxu1 %v2116_v49 }
  0xdb   :  { %1294 = vmatprep.mubr.bf16.mxu0 %v2118_v50 }
  0xe1   :  { %1063 = vmatmul.mubr.bf16.gmra.mrb[80].mxu1 %v2120_v51 }
  0xe2   :  { %1295 = vmatmul.mubr.bf16.gmra.mrb[80].mxu0 %v2121_v52  ;;  %1070 = vmatprep.mubr.bf16.mxu1 %v2122_v53 }
  0xe3   :  { %1302 = vmatprep.mubr.bf16.mxu0 %v2124_v54 }
  0xe9   :  { %1071 = vmatmul.mubr.bf16.gmra.mrb[84].mxu1 %v2126_v55 }
  0xea   :  { %1303 = vmatmul.mubr.bf16.gmra.mrb[84].mxu0 %v2127_v56  ;;  %1078 = vmatprep.mubr.bf16.mxu1 %v2128_v57 }
  0xeb   :  { %1310 = vmatprep.mubr.bf16.mxu0 %v2130_v58 }
  0xf1   :  { %1079 = vmatmul.mubr.bf16.gmra.mrb[88].mxu1 %v2132_v59 }
  0xf2   :  { %1311 = vmatmul.mubr.bf16.gmra.mrb[88].mxu0 %v2133_v60  ;;  %1086 = vmatprep.mubr.bf16.mxu1 %v2134_v61 }
  0xf3   :  { %1318 = vmatprep.mubr.bf16.mxu0 %v2136_v62 }
  0xf9   :  { %1087 = vmatmul.mubr.bf16.gmra.mrb[92].mxu1 %v2138_v1 }
  0xfa   :  { %1319 = vmatmul.mubr.bf16.gmra.mrb[92].mxu0 %v2139_v2  ;;  %1094 = vmatprep.mubr.bf16.mxu1 %v1732_v3 }
  0xfb   :  { %1326 = vmatprep.mubr.bf16.mxu0 %v1734_v4 }
 0x101   :  { %1095 = vmatmul.mubr.bf16.gmra.mrb[96].mxu1 %v1731_v5 }
 0x102   :  { %1327 = vmatmul.mubr.bf16.gmra.mrb[96].mxu0 %v1733_v6 }
 0x114   :  { %v904_v8 = vpop.f32.mrb[0].mxu1 }
 0x115   :  { %v905_v9 = vadd.f32 %v2590_v7, %v904_v8  ;;  %v1136_v10 = vpop.f32.mrb[0].mxu0  ;;  %v906_v11 = vpop.f32.mrb[1].mxu1 }
 0x116   :  { %v1138_v12 = vpop.f32.mrb[1].mxu0  ;;  %v907_v13 = vpop.f32.mrb[2].mxu1 }
 0x117   :  { %v1137_v14 = vadd.f32 %v1136_v10, %v905_v9  ;;  %v908_v15 = vadd.f32 %v2590_v7, %v907_v13  ;;  %v1139_v16 = vpop.f32.mrb[2].mxu0  ;;  %v909_v17 = vpop.f32.mrb[3].mxu1 }
 0x118   :  { %v1141_v18 = vpop.f32.mrb[3].mxu0 }
 0x119   :  { %v1334_v19 = vmax.f32 %v1137_v14, 0.0  ;;  %v1140_v20 = vadd.f32 %v1139_v16, %v908_v15 }
 0x11b   :  { %v1816_v21 = vpack.c.bf16 %v1334_v19, %v1334_v19  ;;  %v1335_v22 = vmax.f32 %v1140_v20, 0.0 }
 0x11c   :  { %v912_v23 = vpop.f32.mrb[4].mxu1 }
 0x11d   :  { %1581 = vst.msk [vmem:[%s2840_s3] sm:$0xf] %vm1580_vm0, %v1816_v21  ;;  %v1817_v24 = vpack.c.bf16 %v1335_v22, %v1335_v22  ;;  %v913_v25 = vadd.f32 %v2590_v7, %v912_v23  ;;  %v1144_v26 = vpop.f32.mrb[4].mxu0  ;;  %v914_v27 = vpop.f32.mrb[5].mxu1 }
 0x11e   :  { %v1146_v28 = vpop.f32.mrb[5].mxu0  ;;  %v915_v29 = vpop.f32.mrb[6].mxu1 }
 0x11f   :  { %1582 = vst.msk [vmem:[%s2840_s3 + $0x4] sm:$0xf] %vm1580_vm0, %v1817_v24  ;;  %v1145_v30 = vadd.f32 %v1144_v26, %v913_v25  ;;  %v916_v31 = vadd.f32 %v2590_v7, %v915_v29  ;;  %v1147_v32 = vpop.f32.mrb[6].mxu0  ;;  %v917_v33 = vpop.f32.mrb[7].mxu1 }
 0x120   :  { %v1149_v34 = vpop.f32.mrb[7].mxu0 }
 0x121   :  { %v1336_v35 = vmax.f32 %v1145_v30, 0.0  ;;  %v1148_v36 = vadd.f32 %v1147_v32, %v916_v31 }
 0x123   :  { %v1818_v37 = vpack.c.bf16 %v1336_v35, %v1336_v35  ;;  %v1337_v38 = vmax.f32 %v1148_v36, 0.0 }
 0x124   :  { %v920_v39 = vpop.f32.mrb[8].mxu1 }
 0x125   :  { %1583 = vst.msk [vmem:[%s2840_s3 + $0x8] sm:$0xf] %vm1580_vm0, %v1818_v37  ;;  %v1819_v40 = vpack.c.bf16 %v1337_v38, %v1337_v38  ;;  %v921_v41 = vadd.f32 %v2590_v7, %v920_v39  ;;  %v1152_v42 = vpop.f32.mrb[8].mxu0  ;;  %v922_v43 = vpop.f32.mrb[9].mxu1 }
 0x126   :  { %v1154_v44 = vpop.f32.mrb[9].mxu0  ;;  %v923_v45 = vpop.f32.mrb[10].mxu1 }
 0x127   :  { %1584 = vst.msk [vmem:[%s2840_s3 + $0xc] sm:$0xf] %vm1580_vm0, %v1819_v40  ;;  %v1153_v46 = vadd.f32 %v1152_v42, %v921_v41  ;;  %v924_v47 = vadd.f32 %v2590_v7, %v923_v45  ;;  %v1155_v48 = vpop.f32.mrb[10].mxu0  ;;  %v925_v49 = vpop.f32.mrb[11].mxu1 }
 0x128   :  { %v1157_v50 = vpop.f32.mrb[11].mxu0 }
 0x129   :  { %v1338_v51 = vmax.f32 %v1153_v46, 0.0  ;;  %v1156_v52 = vadd.f32 %v1155_v48, %v924_v47 }
 0x12b   :  { %v1820_v53 = vpack.c.bf16 %v1338_v51, %v1338_v51  ;;  %v1339_v54 = vmax.f32 %v1156_v52, 0.0 }
 0x12c   :  { %v928_v55 = vpop.f32.mrb[12].mxu1 }
 0x12d   :  { %1585 = vst.msk [vmem:[%s2840_s3 + $0x10] sm:$0xf] %vm1580_vm0, %v1820_v53  ;;  %v1821_v56 = vpack.c.bf16 %v1339_v54, %v1339_v54  ;;  %v929_v57 = vadd.f32 %v2590_v7, %v928_v55  ;;  %v1160_v58 = vpop.f32.mrb[12].mxu0  ;;  %v930_v59 = vpop.f32.mrb[13].mxu1 }
 0x12e   :  { %v1162_v60 = vpop.f32.mrb[13].mxu0  ;;  %v931_v61 = vpop.f32.mrb[14].mxu1 }
 0x12f   :  { %1586 = vst.msk [vmem:[%s2840_s3 + $0x14] sm:$0xf] %vm1580_vm0, %v1821_v56  ;;  %v1161_v62 = vadd.f32 %v1160_v58, %v929_v57  ;;  %v932_v63 = vadd.f32 %v2590_v7, %v931_v61  ;;  %v1163_v0 = vpop.f32.mrb[14].mxu0  ;;  %v933_v1 = vpop.f32.mrb[15].mxu1 }
 0x130   :  { %v1165_v2 = vpop.f32.mrb[15].mxu0 }
 0x131   :  { %v1340_v3 = vmax.f32 %v1161_v62, 0.0  ;;  %v1164_v4 = vadd.f32 %v1163_v0, %v932_v63 }
 0x133   :  { %v1822_v5 = vpack.c.bf16 %v1340_v3, %v1340_v3  ;;  %v1341_v6 = vmax.f32 %v1164_v4, 0.0 }
 0x134   :  { %v936_v8 = vpop.f32.mrb[16].mxu1 }
 0x135   :  { %1587 = vst.msk [vmem:[%s2840_s3 + $0x18] sm:$0xf] %vm1580_vm0, %v1822_v5  ;;  %v1823_v9 = vpack.c.bf16 %v1341_v6, %v1341_v6  ;;  %v937_v10 = vadd.f32 %v2590_v7, %v936_v8  ;;  %v1168_v11 = vpop.f32.mrb[16].mxu0  ;;  %v938_v12 = vpop.f32.mrb[17].mxu1 }
 0x136   :  { %v1170_v13 = vpop.f32.mrb[17].mxu0  ;;  %v939_v14 = vpop.f32.mrb[18].mxu1 }
 0x137   :  { %1588 = vst.msk [vmem:[%s2840_s3 + $0x1c] sm:$0xf] %vm1580_vm0, %v1823_v9  ;;  %v1169_v15 = vadd.f32 %v1168_v11, %v937_v10  ;;  %v940_v16 = vadd.f32 %v2590_v7, %v939_v14  ;;  %v1171_v17 = vpop.f32.mrb[18].mxu0  ;;  %v941_v18 = vpop.f32.mrb[19].mxu1 }
 0x138   :  { %v1173_v19 = vpop.f32.mrb[19].mxu0 }
 0x139   :  { %v1342_v20 = vmax.f32 %v1169_v15, 0.0  ;;  %v1172_v21 = vadd.f32 %v1171_v17, %v940_v16 }
 0x13b   :  { %v1824_v22 = vpack.c.bf16 %v1342_v20, %v1342_v20  ;;  %v1343_v23 = vmax.f32 %v1172_v21, 0.0 }
 0x13c   :  { %v944_v24 = vpop.f32.mrb[20].mxu1 }
 0x13d   :  { %1589 = vst.msk [vmem:[%s2840_s3 + $0x20] sm:$0xf] %vm1580_vm0, %v1824_v22  ;;  %v1825_v25 = vpack.c.bf16 %v1343_v23, %v1343_v23  ;;  %v945_v26 = vadd.f32 %v2590_v7, %v944_v24  ;;  %v1176_v27 = vpop.f32.mrb[20].mxu0  ;;  %v946_v28 = vpop.f32.mrb[21].mxu1 }
 0x13e   :  { %v1178_v29 = vpop.f32.mrb[21].mxu0  ;;  %v947_v30 = vpop.f32.mrb[22].mxu1 }
 0x13f   :  { %1590 = vst.msk [vmem:[%s2840_s3 + $0x24] sm:$0xf] %vm1580_vm0, %v1825_v25  ;;  %v1177_v31 = vadd.f32 %v1176_v27, %v945_v26  ;;  %v948_v32 = vadd.f32 %v2590_v7, %v947_v30  ;;  %v1179_v33 = vpop.f32.mrb[22].mxu0  ;;  %v949_v34 = vpop.f32.mrb[23].mxu1 }
 0x140   :  { %v1181_v35 = vpop.f32.mrb[23].mxu0 }
 0x141   :  { %v1344_v36 = vmax.f32 %v1177_v31, 0.0  ;;  %v1180_v37 = vadd.f32 %v1179_v33, %v948_v32 }
 0x143   :  { %v1826_v38 = vpack.c.bf16 %v1344_v36, %v1344_v36  ;;  %v1345_v39 = vmax.f32 %v1180_v37, 0.0 }
 0x144   :  { %v952_v40 = vpop.f32.mrb[24].mxu1 }
 0x145   :  { %1591 = vst.msk [vmem:[%s2840_s3 + $0x28] sm:$0xf] %vm1580_vm0, %v1826_v38  ;;  %v1827_v41 = vpack.c.bf16 %v1345_v39, %v1345_v39  ;;  %v953_v42 = vadd.f32 %v2590_v7, %v952_v40  ;;  %v1184_v43 = vpop.f32.mrb[24].mxu0  ;;  %v954_v44 = vpop.f32.mrb[25].mxu1 }
 0x146   :  { %v1186_v45 = vpop.f32.mrb[25].mxu0  ;;  %v955_v46 = vpop.f32.mrb[26].mxu1 }
 0x147   :  { %1592 = vst.msk [vmem:[%s2840_s3 + $0x2c] sm:$0xf] %vm1580_vm0, %v1827_v41  ;;  %v1185_v47 = vadd.f32 %v1184_v43, %v953_v42  ;;  %v956_v48 = vadd.f32 %v2590_v7, %v955_v46  ;;  %v1187_v49 = vpop.f32.mrb[26].mxu0  ;;  %v957_v50 = vpop.f32.mrb[27].mxu1 }
 0x148   :  { %v1189_v51 = vpop.f32.mrb[27].mxu0 }
 0x149   :  { %v1346_v52 = vmax.f32 %v1185_v47, 0.0  ;;  %v1188_v53 = vadd.f32 %v1187_v49, %v956_v48 }
 0x14b   :  { %v1828_v54 = vpack.c.bf16 %v1346_v52, %v1346_v52  ;;  %v1347_v55 = vmax.f32 %v1188_v53, 0.0 }
 0x14c   :  { %v960_v56 = vpop.f32.mrb[28].mxu1 }
 0x14d   :  { %1593 = vst.msk [vmem:[%s2840_s3 + $0x30] sm:$0xf] %vm1580_vm0, %v1828_v54  ;;  %v1829_v57 = vpack.c.bf16 %v1347_v55, %v1347_v55  ;;  %v961_v58 = vadd.f32 %v2590_v7, %v960_v56  ;;  %v1192_v59 = vpop.f32.mrb[28].mxu0  ;;  %v962_v60 = vpop.f32.mrb[29].mxu1 }
 0x14e   :  { %v1194_v61 = vpop.f32.mrb[29].mxu0  ;;  %v963_v62 = vpop.f32.mrb[30].mxu1 }
 0x14f   :  { %1594 = vst.msk [vmem:[%s2840_s3 + $0x34] sm:$0xf] %vm1580_vm0, %v1829_v57  ;;  %v1193_v63 = vadd.f32 %v1192_v59, %v961_v58  ;;  %v964_v0 = vadd.f32 %v2590_v7, %v963_v62  ;;  %v1195_v1 = vpop.f32.mrb[30].mxu0  ;;  %v965_v2 = vpop.f32.mrb[31].mxu1 }
 0x150   :  { %v1197_v3 = vpop.f32.mrb[31].mxu0 }
 0x151   :  { %v1348_v4 = vmax.f32 %v1193_v63, 0.0  ;;  %v1196_v5 = vadd.f32 %v1195_v1, %v964_v0 }
 0x153   :  { %v1830_v6 = vpack.c.bf16 %v1348_v4, %v1348_v4  ;;  %v1349_v8 = vmax.f32 %v1196_v5, 0.0 }
 0x154   :  { %v968_v9 = vpop.f32.mrb[32].mxu1 }
 0x155   :  { %1595 = vst.msk [vmem:[%s2840_s3 + $0x38] sm:$0xf] %vm1580_vm0, %v1830_v6  ;;  %v1831_v10 = vpack.c.bf16 %v1349_v8, %v1349_v8  ;;  %v969_v11 = vadd.f32 %v2590_v7, %v968_v9  ;;  %v1200_v12 = vpop.f32.mrb[32].mxu0  ;;  %v970_v13 = vpop.f32.mrb[33].mxu1 }
 0x156   :  { %v1202_v14 = vpop.f32.mrb[33].mxu0  ;;  %v971_v15 = vpop.f32.mrb[34].mxu1 }
 0x157   :  { %1596 = vst.msk [vmem:[%s2840_s3 + $0x3c] sm:$0xf] %vm1580_vm0, %v1831_v10  ;;  %v1201_v16 = vadd.f32 %v1200_v12, %v969_v11  ;;  %v972_v17 = vadd.f32 %v2590_v7, %v971_v15  ;;  %v1203_v18 = vpop.f32.mrb[34].mxu0  ;;  %v973_v19 = vpop.f32.mrb[35].mxu1 }
 0x158   :  { %v1205_v20 = vpop.f32.mrb[35].mxu0 }
 0x159   :  { %v1350_v21 = vmax.f32 %v1201_v16, 0.0  ;;  %v1204_v22 = vadd.f32 %v1203_v18, %v972_v17 }
 0x15b   :  { %v1832_v23 = vpack.c.bf16 %v1350_v21, %v1350_v21  ;;  %v1351_v24 = vmax.f32 %v1204_v22, 0.0 }
 0x15c   :  { %v976_v25 = vpop.f32.mrb[36].mxu1 }
 0x15d   :  { %1597 = vst.msk [vmem:[%s2840_s3 + $0x40] sm:$0xf] %vm1580_vm0, %v1832_v23  ;;  %v1833_v26 = vpack.c.bf16 %v1351_v24, %v1351_v24  ;;  %v977_v27 = vadd.f32 %v2590_v7, %v976_v25  ;;  %v1208_v28 = vpop.f32.mrb[36].mxu0  ;;  %v978_v29 = vpop.f32.mrb[37].mxu1 }
 0x15e   :  { %v1210_v30 = vpop.f32.mrb[37].mxu0  ;;  %v979_v31 = vpop.f32.mrb[38].mxu1 }
 0x15f   :  { %1598 = vst.msk [vmem:[%s2840_s3 + $0x44] sm:$0xf] %vm1580_vm0, %v1833_v26  ;;  %v1209_v32 = vadd.f32 %v1208_v28, %v977_v27  ;;  %v980_v33 = vadd.f32 %v2590_v7, %v979_v31  ;;  %v1211_v34 = vpop.f32.mrb[38].mxu0  ;;  %v981_v35 = vpop.f32.mrb[39].mxu1 }
 0x160   :  { %v1213_v36 = vpop.f32.mrb[39].mxu0 }
 0x161   :  { %v1352_v37 = vmax.f32 %v1209_v32, 0.0  ;;  %v1212_v38 = vadd.f32 %v1211_v34, %v980_v33 }
 0x163   :  { %v1834_v39 = vpack.c.bf16 %v1352_v37, %v1352_v37  ;;  %v1353_v40 = vmax.f32 %v1212_v38, 0.0 }
 0x164   :  { %v984_v41 = vpop.f32.mrb[40].mxu1 }
 0x165   :  { %1599 = vst.msk [vmem:[%s2840_s3 + $0x48] sm:$0xf] %vm1580_vm0, %v1834_v39  ;;  %v1835_v42 = vpack.c.bf16 %v1353_v40, %v1353_v40  ;;  %v985_v43 = vadd.f32 %v2590_v7, %v984_v41  ;;  %v1216_v44 = vpop.f32.mrb[40].mxu0  ;;  %v986_v45 = vpop.f32.mrb[41].mxu1 }
 0x166   :  { %v1218_v46 = vpop.f32.mrb[41].mxu0  ;;  %v987_v47 = vpop.f32.mrb[42].mxu1 }
 0x167   :  { %1600 = vst.msk [vmem:[%s2840_s3 + $0x4c] sm:$0xf] %vm1580_vm0, %v1835_v42  ;;  %v1217_v48 = vadd.f32 %v1216_v44, %v985_v43  ;;  %v988_v49 = vadd.f32 %v2590_v7, %v987_v47  ;;  %v1219_v50 = vpop.f32.mrb[42].mxu0  ;;  %v989_v51 = vpop.f32.mrb[43].mxu1 }
 0x168   :  { %v1221_v52 = vpop.f32.mrb[43].mxu0 }
 0x169   :  { %v1354_v53 = vmax.f32 %v1217_v48, 0.0  ;;  %v1220_v54 = vadd.f32 %v1219_v50, %v988_v49 }
 0x16b   :  { %v1836_v55 = vpack.c.bf16 %v1354_v53, %v1354_v53  ;;  %v1355_v56 = vmax.f32 %v1220_v54, 0.0 }
 0x16c   :  { %v992_v57 = vpop.f32.mrb[44].mxu1 }
 0x16d   :  { %1601 = vst.msk [vmem:[%s2840_s3 + $0x50] sm:$0xf] %vm1580_vm0, %v1836_v55  ;;  %v1837_v58 = vpack.c.bf16 %v1355_v56, %v1355_v56  ;;  %v993_v59 = vadd.f32 %v2590_v7, %v992_v57  ;;  %v1224_v60 = vpop.f32.mrb[44].mxu0  ;;  %v994_v61 = vpop.f32.mrb[45].mxu1 }
 0x16e   :  { %v1226_v62 = vpop.f32.mrb[45].mxu0  ;;  %v995_v63 = vpop.f32.mrb[46].mxu1 }
 0x16f   :  { %1602 = vst.msk [vmem:[%s2840_s3 + $0x54] sm:$0xf] %vm1580_vm0, %v1837_v58  ;;  %v1225_v0 = vadd.f32 %v1224_v60, %v993_v59  ;;  %v996_v1 = vadd.f32 %v2590_v7, %v995_v63  ;;  %v1227_v2 = vpop.f32.mrb[46].mxu0  ;;  %v997_v3 = vpop.f32.mrb[47].mxu1 }
 0x170   :  { %v1229_v4 = vpop.f32.mrb[47].mxu0 }
 0x171   :  { %v1356_v5 = vmax.f32 %v1225_v0, 0.0  ;;  %v1228_v6 = vadd.f32 %v1227_v2, %v996_v1 }
 0x173   :  { %v1838_v8 = vpack.c.bf16 %v1356_v5, %v1356_v5  ;;  %v1357_v9 = vmax.f32 %v1228_v6, 0.0 }
 0x174   :  { %v1000_v10 = vpop.f32.mrb[48].mxu1 }
 0x175   :  { %1603 = vst.msk [vmem:[%s2840_s3 + $0x58] sm:$0xf] %vm1580_vm0, %v1838_v8  ;;  %v1839_v11 = vpack.c.bf16 %v1357_v9, %v1357_v9  ;;  %v1001_v12 = vadd.f32 %v2590_v7, %v1000_v10  ;;  %v1232_v13 = vpop.f32.mrb[48].mxu0  ;;  %v1002_v14 = vpop.f32.mrb[49].mxu1 }
 0x176   :  { %v1234_v15 = vpop.f32.mrb[49].mxu0  ;;  %v1003_v16 = vpop.f32.mrb[50].mxu1 }
 0x177   :  { %1604 = vst.msk [vmem:[%s2840_s3 + $0x5c] sm:$0xf] %vm1580_vm0, %v1839_v11  ;;  %v1233_v17 = vadd.f32 %v1232_v13, %v1001_v12  ;;  %v1004_v18 = vadd.f32 %v2590_v7, %v1003_v16  ;;  %v1235_v19 = vpop.f32.mrb[50].mxu0  ;;  %v1005_v20 = vpop.f32.mrb[51].mxu1 }
 0x178   :  { %v1237_v21 = vpop.f32.mrb[51].mxu0 }
 0x179   :  { %v1358_v22 = vmax.f32 %v1233_v17, 0.0  ;;  %v1236_v23 = vadd.f32 %v1235_v19, %v1004_v18 }
 0x17b   :  { %v1840_v24 = vpack.c.bf16 %v1358_v22, %v1358_v22  ;;  %v1359_v25 = vmax.f32 %v1236_v23, 0.0 }
 0x17c   :  { %v1008_v26 = vpop.f32.mrb[52].mxu1 }
 0x17d   :  { %1605 = vst.msk [vmem:[%s2840_s3 + $0x60] sm:$0xf] %vm1580_vm0, %v1840_v24  ;;  %v1841_v27 = vpack.c.bf16 %v1359_v25, %v1359_v25  ;;  %v1009_v28 = vadd.f32 %v2590_v7, %v1008_v26  ;;  %v1240_v29 = vpop.f32.mrb[52].mxu0  ;;  %v1010_v30 = vpop.f32.mrb[53].mxu1 }
 0x17e   :  { %v1242_v31 = vpop.f32.mrb[53].mxu0  ;;  %v1011_v32 = vpop.f32.mrb[54].mxu1 }
 0x17f   :  { %1606 = vst.msk [vmem:[%s2840_s3 + $0x64] sm:$0xf] %vm1580_vm0, %v1841_v27  ;;  %v1241_v33 = vadd.f32 %v1240_v29, %v1009_v28  ;;  %v1012_v34 = vadd.f32 %v2590_v7, %v1011_v32  ;;  %v1243_v35 = vpop.f32.mrb[54].mxu0  ;;  %v1013_v36 = vpop.f32.mrb[55].mxu1 }
 0x180   :  { %v1245_v37 = vpop.f32.mrb[55].mxu0 }
 0x181   :  { %v1360_v38 = vmax.f32 %v1241_v33, 0.0  ;;  %v1244_v39 = vadd.f32 %v1243_v35, %v1012_v34 }
 0x183   :  { %v1842_v40 = vpack.c.bf16 %v1360_v38, %v1360_v38  ;;  %v1361_v41 = vmax.f32 %v1244_v39, 0.0 }
 0x184   :  { %v1016_v42 = vpop.f32.mrb[56].mxu1 }
 0x185   :  { %1607 = vst.msk [vmem:[%s2840_s3 + $0x68] sm:$0xf] %vm1580_vm0, %v1842_v40  ;;  %v1843_v43 = vpack.c.bf16 %v1361_v41, %v1361_v41  ;;  %v1017_v44 = vadd.f32 %v2590_v7, %v1016_v42  ;;  %v1248_v45 = vpop.f32.mrb[56].mxu0  ;;  %v1018_v46 = vpop.f32.mrb[57].mxu1 }
 0x186   :  { %v1250_v47 = vpop.f32.mrb[57].mxu0  ;;  %v1019_v48 = vpop.f32.mrb[58].mxu1 }
 0x187   :  { %1608 = vst.msk [vmem:[%s2840_s3 + $0x6c] sm:$0xf] %vm1580_vm0, %v1843_v43  ;;  %v1249_v49 = vadd.f32 %v1248_v45, %v1017_v44  ;;  %v1020_v50 = vadd.f32 %v2590_v7, %v1019_v48  ;;  %v1251_v51 = vpop.f32.mrb[58].mxu0  ;;  %v1021_v52 = vpop.f32.mrb[59].mxu1 }
 0x188   :  { %v1253_v53 = vpop.f32.mrb[59].mxu0 }
 0x189   :  { %v1362_v54 = vmax.f32 %v1249_v49, 0.0  ;;  %v1252_v55 = vadd.f32 %v1251_v51, %v1020_v50 }
 0x18b   :  { %v1844_v56 = vpack.c.bf16 %v1362_v54, %v1362_v54  ;;  %v1363_v57 = vmax.f32 %v1252_v55, 0.0 }
 0x18c   :  { %v1024_v58 = vpop.f32.mrb[60].mxu1 }
 0x18d   :  { %1609 = vst.msk [vmem:[%s2840_s3 + $0x70] sm:$0xf] %vm1580_vm0, %v1844_v56  ;;  %v1845_v59 = vpack.c.bf16 %v1363_v57, %v1363_v57  ;;  %v1025_v60 = vadd.f32 %v2590_v7, %v1024_v58  ;;  %v1256_v61 = vpop.f32.mrb[60].mxu0  ;;  %v1026_v62 = vpop.f32.mrb[61].mxu1 }
 0x18e   :  { %v1258_v63 = vpop.f32.mrb[61].mxu0  ;;  %v1027_v0 = vpop.f32.mrb[62].mxu1 }
 0x18f   :  { %1610 = vst.msk [vmem:[%s2840_s3 + $0x74] sm:$0xf] %vm1580_vm0, %v1845_v59  ;;  %v1257_v1 = vadd.f32 %v1256_v61, %v1025_v60  ;;  %v1028_v2 = vadd.f32 %v2590_v7, %v1027_v0  ;;  %v1259_v3 = vpop.f32.mrb[62].mxu0  ;;  %v1029_v4 = vpop.f32.mrb[63].mxu1 }
 0x190   :  { %v1261_v5 = vpop.f32.mrb[63].mxu0 }
 0x191   :  { %v1364_v6 = vmax.f32 %v1257_v1, 0.0  ;;  %v1260_v8 = vadd.f32 %v1259_v3, %v1028_v2 }
 0x193   :  { %v1846_v9 = vpack.c.bf16 %v1364_v6, %v1364_v6  ;;  %v1365_v10 = vmax.f32 %v1260_v8, 0.0 }
 0x194   :  { %v1032_v11 = vpop.f32.mrb[64].mxu1 }
 0x195   :  { %1611 = vst.msk [vmem:[%s2840_s3 + $0x78] sm:$0xf] %vm1580_vm0, %v1846_v9  ;;  %v1847_v12 = vpack.c.bf16 %v1365_v10, %v1365_v10  ;;  %v1033_v13 = vadd.f32 %v2590_v7, %v1032_v11  ;;  %v1264_v14 = vpop.f32.mrb[64].mxu0  ;;  %v1034_v15 = vpop.f32.mrb[65].mxu1 }
 0x196   :  { %v1266_v16 = vpop.f32.mrb[65].mxu0  ;;  %v1035_v17 = vpop.f32.mrb[66].mxu1 }
 0x197   :  { %1612 = vst.msk [vmem:[%s2840_s3 + $0x7c] sm:$0xf] %vm1580_vm0, %v1847_v12  ;;  %v1265_v18 = vadd.f32 %v1264_v14, %v1033_v13  ;;  %v1036_v19 = vadd.f32 %v2590_v7, %v1035_v17  ;;  %v1267_v20 = vpop.f32.mrb[66].mxu0  ;;  %v1037_v21 = vpop.f32.mrb[67].mxu1 }
 0x198   :  { %v1269_v22 = vpop.f32.mrb[67].mxu0 }
 0x199   :  { %v1366_v23 = vmax.f32 %v1265_v18, 0.0  ;;  %v1268_v24 = vadd.f32 %v1267_v20, %v1036_v19 }
 0x19b   :  { %v1848_v25 = vpack.c.bf16 %v1366_v23, %v1366_v23  ;;  %v1367_v26 = vmax.f32 %v1268_v24, 0.0 }
 0x19c   :  { %v1040_v27 = vpop.f32.mrb[68].mxu1 }
 0x19d   :  { %1613 = vst.msk [vmem:[%s2840_s3 + $0x80] sm:$0xf] %vm1580_vm0, %v1848_v25  ;;  %v1849_v28 = vpack.c.bf16 %v1367_v26, %v1367_v26  ;;  %v1041_v29 = vadd.f32 %v2590_v7, %v1040_v27  ;;  %v1272_v30 = vpop.f32.mrb[68].mxu0  ;;  %v1042_v31 = vpop.f32.mrb[69].mxu1 }
 0x19e   :  { %v1274_v32 = vpop.f32.mrb[69].mxu0  ;;  %v1043_v33 = vpop.f32.mrb[70].mxu1 }
 0x19f   :  { %1614 = vst.msk [vmem:[%s2840_s3 + $0x84] sm:$0xf] %vm1580_vm0, %v1849_v28  ;;  %v1273_v34 = vadd.f32 %v1272_v30, %v1041_v29  ;;  %v1044_v35 = vadd.f32 %v2590_v7, %v1043_v33  ;;  %v1275_v36 = vpop.f32.mrb[70].mxu0  ;;  %v1045_v37 = vpop.f32.mrb[71].mxu1 }
 0x1a0   :  { %v1277_v38 = vpop.f32.mrb[71].mxu0 }
 0x1a1   :  { %v1368_v39 = vmax.f32 %v1273_v34, 0.0  ;;  %v1276_v40 = vadd.f32 %v1275_v36, %v1044_v35 }
 0x1a3   :  { %v1850_v41 = vpack.c.bf16 %v1368_v39, %v1368_v39  ;;  %v1369_v42 = vmax.f32 %v1276_v40, 0.0 }
 0x1a4   :  { %v1048_v43 = vpop.f32.mrb[72].mxu1 }
 0x1a5   :  { %1615 = vst.msk [vmem:[%s2840_s3 + $0x88] sm:$0xf] %vm1580_vm0, %v1850_v41  ;;  %v1851_v44 = vpack.c.bf16 %v1369_v42, %v1369_v42  ;;  %v1049_v45 = vadd.f32 %v2590_v7, %v1048_v43  ;;  %v1280_v46 = vpop.f32.mrb[72].mxu0  ;;  %v1050_v47 = vpop.f32.mrb[73].mxu1 }
 0x1a6   :  { %v1282_v48 = vpop.f32.mrb[73].mxu0  ;;  %v1051_v49 = vpop.f32.mrb[74].mxu1 }
 0x1a7   :  { %1616 = vst.msk [vmem:[%s2840_s3 + $0x8c] sm:$0xf] %vm1580_vm0, %v1851_v44  ;;  %v1281_v50 = vadd.f32 %v1280_v46, %v1049_v45  ;;  %v1052_v51 = vadd.f32 %v2590_v7, %v1051_v49  ;;  %v1283_v52 = vpop.f32.mrb[74].mxu0  ;;  %v1053_v53 = vpop.f32.mrb[75].mxu1 }
 0x1a8   :  { %v1285_v54 = vpop.f32.mrb[75].mxu0 }
 0x1a9   :  { %v1370_v55 = vmax.f32 %v1281_v50, 0.0  ;;  %v1284_v56 = vadd.f32 %v1283_v52, %v1052_v51 }
 0x1ab   :  { %v1852_v57 = vpack.c.bf16 %v1370_v55, %v1370_v55  ;;  %v1371_v58 = vmax.f32 %v1284_v56, 0.0 }
 0x1ac   :  { %v1056_v59 = vpop.f32.mrb[76].mxu1 }
 0x1ad   :  { %1617 = vst.msk [vmem:[%s2840_s3 + $0x90] sm:$0xf] %vm1580_vm0, %v1852_v57  ;;  %v1853_v60 = vpack.c.bf16 %v1371_v58, %v1371_v58  ;;  %v1057_v61 = vadd.f32 %v2590_v7, %v1056_v59  ;;  %v1288_v62 = vpop.f32.mrb[76].mxu0  ;;  %v1058_v63 = vpop.f32.mrb[77].mxu1 }
 0x1ae   :  { %v1290_v0 = vpop.f32.mrb[77].mxu0  ;;  %v1059_v1 = vpop.f32.mrb[78].mxu1 }
 0x1af   :  { %1618 = vst.msk [vmem:[%s2840_s3 + $0x94] sm:$0xf] %vm1580_vm0, %v1853_v60  ;;  %v1289_v2 = vadd.f32 %v1288_v62, %v1057_v61  ;;  %v1060_v3 = vadd.f32 %v2590_v7, %v1059_v1  ;;  %v1291_v4 = vpop.f32.mrb[78].mxu0  ;;  %v1061_v5 = vpop.f32.mrb[79].mxu1 }
 0x1b0   :  { %v1293_v6 = vpop.f32.mrb[79].mxu0 }
 0x1b1   :  { %v1372_v8 = vmax.f32 %v1289_v2, 0.0  ;;  %v1292_v9 = vadd.f32 %v1291_v4, %v1060_v3 }
 0x1b3   :  { %v1854_v10 = vpack.c.bf16 %v1372_v8, %v1372_v8  ;;  %v1373_v11 = vmax.f32 %v1292_v9, 0.0 }
 0x1b4   :  { %v1064_v12 = vpop.f32.mrb[80].mxu1 }
 0x1b5   :  { %1619 = vst.msk [vmem:[%s2840_s3 + $0x98] sm:$0xf] %vm1580_vm0, %v1854_v10  ;;  %v1855_v13 = vpack.c.bf16 %v1373_v11, %v1373_v11  ;;  %v1065_v14 = vadd.f32 %v2590_v7, %v1064_v12  ;;  %v1296_v15 = vpop.f32.mrb[80].mxu0  ;;  %v1066_v16 = vpop.f32.mrb[81].mxu1 }
 0x1b6   :  { %v1298_v17 = vpop.f32.mrb[81].mxu0  ;;  %v1067_v18 = vpop.f32.mrb[82].mxu1 }
 0x1b7   :  { %1620 = vst.msk [vmem:[%s2840_s3 + $0x9c] sm:$0xf] %vm1580_vm0, %v1855_v13  ;;  %v1297_v19 = vadd.f32 %v1296_v15, %v1065_v14  ;;  %v1068_v20 = vadd.f32 %v2590_v7, %v1067_v18  ;;  %v1299_v21 = vpop.f32.mrb[82].mxu0  ;;  %v1069_v22 = vpop.f32.mrb[83].mxu1 }
 0x1b8   :  { %v1301_v23 = vpop.f32.mrb[83].mxu0 }
 0x1b9   :  { %v1374_v24 = vmax.f32 %v1297_v19, 0.0  ;;  %v1300_v25 = vadd.f32 %v1299_v21, %v1068_v20 }
 0x1bb   :  { %v1856_v26 = vpack.c.bf16 %v1374_v24, %v1374_v24  ;;  %v1375_v27 = vmax.f32 %v1300_v25, 0.0 }
 0x1bc   :  { %v1072_v28 = vpop.f32.mrb[84].mxu1 }
 0x1bd   :  { %1621 = vst.msk [vmem:[%s2840_s3 + $0xa0] sm:$0xf] %vm1580_vm0, %v1856_v26  ;;  %v1857_v29 = vpack.c.bf16 %v1375_v27, %v1375_v27  ;;  %v1073_v30 = vadd.f32 %v2590_v7, %v1072_v28  ;;  %v1304_v31 = vpop.f32.mrb[84].mxu0  ;;  %v1074_v32 = vpop.f32.mrb[85].mxu1 }
 0x1be   :  { %v1306_v33 = vpop.f32.mrb[85].mxu0  ;;  %v1075_v34 = vpop.f32.mrb[86].mxu1 }
 0x1bf   :  { %1622 = vst.msk [vmem:[%s2840_s3 + $0xa4] sm:$0xf] %vm1580_vm0, %v1857_v29  ;;  %v1305_v35 = vadd.f32 %v1304_v31, %v1073_v30  ;;  %v1076_v36 = vadd.f32 %v2590_v7, %v1075_v34  ;;  %v1307_v37 = vpop.f32.mrb[86].mxu0  ;;  %v1077_v38 = vpop.f32.mrb[87].mxu1 }
 0x1c0   :  { %v1309_v39 = vpop.f32.mrb[87].mxu0 }
 0x1c1   :  { %v1376_v40 = vmax.f32 %v1305_v35, 0.0  ;;  %v1308_v41 = vadd.f32 %v1307_v37, %v1076_v36 }
 0x1c3   :  { %v1858_v42 = vpack.c.bf16 %v1376_v40, %v1376_v40  ;;  %v1377_v43 = vmax.f32 %v1308_v41, 0.0 }
 0x1c4   :  { %v1080_v44 = vpop.f32.mrb[88].mxu1 }
 0x1c5   :  { %1623 = vst.msk [vmem:[%s2840_s3 + $0xa8] sm:$0xf] %vm1580_vm0, %v1858_v42  ;;  %v1859_v45 = vpack.c.bf16 %v1377_v43, %v1377_v43  ;;  %v1081_v46 = vadd.f32 %v2590_v7, %v1080_v44  ;;  %v1312_v47 = vpop.f32.mrb[88].mxu0  ;;  %v1082_v48 = vpop.f32.mrb[89].mxu1 }
 0x1c6   :  { %v1314_v49 = vpop.f32.mrb[89].mxu0  ;;  %v1083_v50 = vpop.f32.mrb[90].mxu1 }
 0x1c7   :  { %1624 = vst.msk [vmem:[%s2840_s3 + $0xac] sm:$0xf] %vm1580_vm0, %v1859_v45  ;;  %v1313_v51 = vadd.f32 %v1312_v47, %v1081_v46  ;;  %v1084_v52 = vadd.f32 %v2590_v7, %v1083_v50  ;;  %v1315_v53 = vpop.f32.mrb[90].mxu0  ;;  %v1085_v54 = vpop.f32.mrb[91].mxu1 }
 0x1c8   :  { %v1317_v55 = vpop.f32.mrb[91].mxu0 }
 0x1c9   :  { %v1378_v56 = vmax.f32 %v1313_v51, 0.0  ;;  %v1316_v57 = vadd.f32 %v1315_v53, %v1084_v52 }
 0x1cb   :  { %v1860_v58 = vpack.c.bf16 %v1378_v56, %v1378_v56  ;;  %v1379_v59 = vmax.f32 %v1316_v57, 0.0 }
 0x1cc   :  { %v1088_v60 = vpop.f32.mrb[92].mxu1 }
 0x1cd   :  { %1625 = vst.msk [vmem:[%s2840_s3 + $0xb0] sm:$0xf] %vm1580_vm0, %v1860_v58  ;;  %v1861_v61 = vpack.c.bf16 %v1379_v59, %v1379_v59  ;;  %v1089_v62 = vadd.f32 %v2590_v7, %v1088_v60  ;;  %v1320_v63 = vpop.f32.mrb[92].mxu0  ;;  %v1090_v0 = vpop.f32.mrb[93].mxu1 }
 0x1ce   :  { %v1322_v1 = vpop.f32.mrb[93].mxu0  ;;  %v1091_v2 = vpop.f32.mrb[94].mxu1 }
 0x1cf   :  { %1626 = vst.msk [vmem:[%s2840_s3 + $0xb4] sm:$0xf] %vm1580_vm0, %v1861_v61  ;;  %v1321_v3 = vadd.f32 %v1320_v63, %v1089_v62  ;;  %v1092_v4 = vadd.f32 %v2590_v7, %v1091_v2  ;;  %v1323_v5 = vpop.f32.mrb[94].mxu0  ;;  %v1093_v6 = vpop.f32.mrb[95].mxu1 }
 0x1d0   :  { %v1325_v8 = vpop.f32.mrb[95].mxu0 }
 0x1d1   :  { %v1380_v9 = vmax.f32 %v1321_v3, 0.0  ;;  %v1324_v10 = vadd.f32 %v1323_v5, %v1092_v4 }
 0x1d3   :  { %v1862_v11 = vpack.c.bf16 %v1380_v9, %v1380_v9  ;;  %v1381_v12 = vmax.f32 %v1324_v10, 0.0 }
 0x1d4   :  { %v1096_v13 = vpop.f32.mrb[96].mxu1 }
 0x1d5   :  { %1627 = vst.msk [vmem:[%s2840_s3 + $0xb8] sm:$0xf] %vm1580_vm0, %v1862_v11  ;;  %v1863_v14 = vpack.c.bf16 %v1381_v12, %v1381_v12  ;;  %v1097_v15 = vadd.f32 %v2590_v7, %v1096_v13  ;;  %v1328_v16 = vpop.f32.mrb[96].mxu0  ;;  %v1098_v17 = vpop.f32.mrb[97].mxu1 }
 0x1d6   :  { %v1330_v18 = vpop.f32.mrb[97].mxu0  ;;  %v1099_v19 = vpop.f32.mrb[98].mxu1 }
 0x1d7   :  { %1628 = vst.msk [vmem:[%s2840_s3 + $0xbc] sm:$0xf] %vm1580_vm0, %v1863_v14  ;;  %v1329_v20 = vadd.f32 %v1328_v16, %v1097_v15  ;;  %v1331_v21 = vpop.f32.mrb[98].mxu0  ;;  %v1100_v22 = vpop.f32.mrb[99].mxu1 }
 0x1d8   :  { %v1332_v23 = vpop.f32.mrb[99].mxu0 }
 0x1d9   :  { %v1382_v24 = vmax.f32 %v1329_v20, 0.0 }
 0x1db   :  { %v1864_v25 = vpack.c.bf16 %v1382_v24, %v1382_v24 }
 0x1dd   :  { %1629 = vst.msk [vmem:[%s2840_s3 + $0xc0] sm:$0xf] %vm1580_vm0, %v1864_v25 }

// kernel: value_network_forward.6
= control target key start
LH: loop header
LB: loop body
LE: loop exit
PB: predicated region body
PF: predicated region fallthrough
CT: control target
= control target key end

     0   :  { %v2235_v0 = vmov 0   ;;  %vm868_vm0 = vcmask 523264   ;;  %vm1634_vm1 = vcmask 519168   ;;  %s3108_s1 = inlined_call_operand.vmem [shape: bf16[576,64], index: 1, kind: input, shape index: {}]   ;;  %s3109_s0 = inlined_call_operand.vmem [shape: bf16[288,576], index: 0, kind: input, shape index: {}]   ;;  %s3110_s2 = inlined_call_operand.vmem [shape: f32[1,64], index: 2, kind: input, shape index: {}]   ;;  %s3111_s3 = inlined_call_operand.vmem [shape: bf16[288,64], index: 3, kind: output, shape index: {}]  }
   0x1   :  { %923 = vmatprep.subr.bf16.mxu0 %v2235_v0  ;;  %1958 = vmatprep.subr.bf16.mxu1 %v2235_v0  ;;  %v2073_v1 = vld [vmem:[%s3108_s1] sm:$0xff]   ;;  %v2075_v3 = vld [vmem:[%s3108_s1 + $0x8] sm:$0xff]   ;;  %v2077_v5 = vld [vmem:[%s3108_s1 + $0x10] sm:$0xff]  }
   0x2   :  { %v2264_v2 = vld [vmem:[%s3108_s1 + $0x80] sm:$0xff]   ;;  %924 = vmatpush1.bf16.msra.mxu0 %v2073_v1  ;;  %v2274_v4 = vld [vmem:[%s3108_s1 + $0x88] sm:$0xff]   ;;  %v2285_v6 = vld [vmem:[%s3108_s1 + $0x90] sm:$0xff]  }
   0x3   :  { %1974 = vmatpush1.bf16.msra.mxu1 %v2264_v2  ;;  %925 = vmatprep.subr.bf16.mxu0 %v2235_v0  ;;  %v2079_v7 = vld [vmem:[%s3108_s1 + $0x18] sm:$0xff]   ;;  %v2081_v9 = vld [vmem:[%s3108_s1 + $0x20] sm:$0xff]   ;;  %v2083_v11 = vld [vmem:[%s3108_s1 + $0x28] sm:$0xff]  }
   0x4   :  { %1959 = vmatprep.subr.bf16.mxu1 %v2235_v0  ;;  %v2296_v8 = vld [vmem:[%s3108_s1 + $0x98] sm:$0xff]   ;;  %v2307_v10 = vld [vmem:[%s3108_s1 + $0xa0] sm:$0xff]   ;;  %v2318_v12 = vld [vmem:[%s3108_s1 + $0xa8] sm:$0xff]  }
   0x5   :  { %v2085_v13 = vld [vmem:[%s3108_s1 + $0x30] sm:$0xff]   ;;  %v2087_v15 = vld [vmem:[%s3108_s1 + $0x38] sm:$0xff]   ;;  %v2089_v17 = vld [vmem:[%s3108_s1 + $0x40] sm:$0xff]  }
   0x6   :  { %926 = vmatpush1.bf16.msra.mxu0 %v2075_v3  ;;  %v2329_v14 = vld [vmem:[%s3108_s1 + $0xb0] sm:$0xff]   ;;  %v2340_v16 = vld [vmem:[%s3108_s1 + $0xb8] sm:$0xff]   ;;  %v2351_v18 = vld [vmem:[%s3108_s1 + $0xc0] sm:$0xff]  }
   0x7   :  { %1975 = vmatpush1.bf16.msra.mxu1 %v2274_v4  ;;  %927 = vmatprep.subr.bf16.mxu0 %v2235_v0  ;;  %v2107_v19 = vld [vmem:[%s3109_s0 + $0x4] ss:$20 sps:$4 sm:$0xff]   ;;  %v2091_v20 = vld [vmem:[%s3108_s1 + $0x48] sm:$0xff]   ;;  %v2093_v23 = vld [vmem:[%s3108_s1 + $0x50] sm:$0xff]  }
   0x8   :  { %1960 = vmatprep.subr.bf16.mxu1 %v2235_v0  ;;  %v2110_v21 = vld [vmem:[%s3109_s0 + $0xd4] ss:$20 sps:$4 sm:$0xff]   ;;  %955 = vmatprep.mubr.bf16.mxu0 %v2107_v19  ;;  %v2095_v25 = vld [vmem:[%s3108_s1 + $0x58] sm:$0xff]   ;;  %v2097_v27 = vld [vmem:[%s3108_s1 + $0x60] sm:$0xff]  }
   0x9   :  { %v2368_v22 = vld [vmem:[%s3108_s1 + $0xc8] sm:$0xff]   ;;  %1172 = vmatprep.mubr.bf16.mxu1 %v2110_v21  ;;  %v2379_v24 = vld [vmem:[%s3108_s1 + $0xd0] sm:$0xff]   ;;  %v2390_v26 = vld [vmem:[%s3108_s1 + $0xd8] sm:$0xff]  }
   0xa   :  { %928 = vmatpush1.bf16.msra.mxu0 %v2077_v5  ;;  %v2401_v28 = vld [vmem:[%s3108_s1 + $0xe0] sm:$0xff]   ;;  %v2099_v29 = vld [vmem:[%s3108_s1 + $0x68] sm:$0xff]   ;;  %v2101_v31 = vld [vmem:[%s3108_s1 + $0x70] sm:$0xff]  }
   0xb   :  { %1976 = vmatpush1.bf16.msra.mxu1 %v2285_v6  ;;  %929 = vmatprep.subr.bf16.mxu0 %v2235_v0  ;;  %v2412_v30 = vld [vmem:[%s3108_s1 + $0xe8] sm:$0xff]   ;;  %v2423_v32 = vld [vmem:[%s3108_s1 + $0xf0] sm:$0xff]   ;;  %v2103_v33 = vld [vmem:[%s3108_s1 + $0x78] sm:$0xff]  }
   0xc   :  { %1961 = vmatprep.subr.bf16.mxu1 %v2235_v0  ;;  %v2434_v34 = vld [vmem:[%s3108_s1 + $0xf8] sm:$0xff]   ;;  %v2117_v35 = vld [vmem:[%s3108_s1 + $0x100] sm:$0xff]   ;;  %v2136_v40 = vld [vmem:[%s3108_s1 + $0x108] sm:$0xff]  }
   0xd   :  { %v2105_v36 = vld [vmem:[%s3109_s0] ss:$20 sps:$4 sm:$0xff]   ;;  %v2108_v37 = vld [vmem:[%s3109_s0 + $0xd0] ss:$20 sps:$4 sm:$0xff]   ;;  %v2115_v41 = vld [vmem:[%s3109_s0 + $0x28] ss:$20 sps:$4 sm:$0xff]  }
   0xe   :  { %930 = vmatpush1.bf16.msra.mxu0 %v2079_v7  ;;  %v2111_v38 = vld [vmem:[%s3109_s0 + $0x2c] ss:$20 sps:$4 sm:$0xff]   ;;  %v2113_v39 = vld [vmem:[%s3109_s0 + $0xfc] ss:$20 sps:$4 sm:$0xff]   ;;  %v2118_v44 = vld [vmem:[%s3109_s0 + $0x54] ss:$20 sps:$4 sm:$0xff]  }
   0xf   :  { %1977 = vmatpush1.bf16.msra.mxu1 %v2296_v8  ;;  %931 = vmatprep.subr.bf16.mxu0 %v2235_v0  ;;  %v2155_v42 = vld [vmem:[%s3108_s1 + $0x110] sm:$0xff]   ;;  %v2116_v43 = vld [vmem:[%s3109_s0 + $0xf8] ss:$20 sps:$4 sm:$0xff]   ;;  %v2129_v52 = vld [vmem:[%s3109_s0 + $0x148] ss:$20 sps:$4 sm:$0xff]  }
  0x10   :  { %1962 = vmatprep.subr.bf16.mxu1 %v2235_v0  ;;  %v2120_v45 = vld [vmem:[%s3109_s0 + $0x124] ss:$20 sps:$4 sm:$0xff]   ;;  %v2123_v48 = vld [vmem:[%s3109_s0 + $0x120] ss:$20 sps:$4 sm:$0xff]   ;;  %v2124_v49 = vld [vmem:[%s3109_s0 + $0x7c] ss:$20 sps:$4 sm:$0xff]  }
  0x11   :  { %v2178_v46 = vld [vmem:[%s3108_s1 + $0x118] sm:$0xff]   ;;  %v2122_v47 = vld [vmem:[%s3109_s0 + $0x50] ss:$20 sps:$4 sm:$0xff]   ;;  %v2126_v50 = vld [vmem:[%s3109_s0 + $0x14c] ss:$20 sps:$4 sm:$0xff]  }
  0x12   :  { %932 = vmatpush1.bf16.msra.mxu0 %v2081_v9  ;;  %v2128_v51 = vld [vmem:[%s3109_s0 + $0x78] ss:$20 sps:$4 sm:$0xff]   ;;  %v2132_v54 = vld [vmem:[%s3109_s0 + $0x174] ss:$20 sps:$4 sm:$0xff]   ;;  %v2135_v56 = vld [vmem:[%s3109_s0 + $0x170] ss:$20 sps:$4 sm:$0xff]  }
  0x13   :  { %1978 = vmatpush1.bf16.msra.mxu1 %v2307_v10  ;;  %933 = vmatprep.subr.bf16.mxu0 %v2235_v0  ;;  %v2130_v53 = vld [vmem:[%s3109_s0 + $0xa4] ss:$20 sps:$4 sm:$0xff]   ;;  %v2134_v55 = vld [vmem:[%s3109_s0 + $0xa0] ss:$20 sps:$4 sm:$0xff]   ;;  %v2139_v58 = vld [vmem:[%s3109_s0 + $0x19c] ss:$20 sps:$4 sm:$0xff]  }
  0x14   :  { %1963 = vmatprep.subr.bf16.mxu1 %v2235_v0  ;;  %v2137_v57 = vld [vmem:[%s3109_s0 + $0xcc] ss:$20 sps:$4 sm:$0xff]   ;;  %v2141_v59 = vld [vmem:[%s3109_s0 + $0xc8] ss:$20 sps:$4 sm:$0xff]   ;;  %v2145_v62 = vld [vmem:[%s3109_s0 + $0x1c4] ss:$20 sps:$4 sm:$0xff]  }
  0x15   :  { %v2142_v60 = vld [vmem:[%s3109_s0 + $0x198] ss:$20 sps:$4 sm:$0xff]   ;;  %v2143_v61 = vld [vmem:[%s3109_s0 + $0xf4] ss:$20 sps:$4 sm:$0xff]   ;;  %v2147_v63 = vld [vmem:[%s3109_s0 + $0xf0] ss:$20 sps:$4 sm:$0xff]  }
  0x16   :  { %934 = vmatpush1.bf16.msra.mxu0 %v2083_v11  ;;  %v2148_v1 = vld [vmem:[%s3109_s0 + $0x1c0] ss:$20 sps:$4 sm:$0xff]   ;;  %v2154_v5 = vld [vmem:[%s3109_s0 + $0x1e8] ss:$20 sps:$4 sm:$0xff]   ;;  %v2161_v9 = vld [vmem:[%s3109_s0 + $0x210] ss:$20 sps:$4 sm:$0xff]  }
  0x17   :  { %1979 = vmatpush1.bf16.msra.mxu1 %v2318_v12  ;;  %935 = vmatprep.subr.bf16.mxu0 %v2235_v0  ;;  %v2151_v3 = vld [vmem:[%s3109_s0 + $0x1ec] ss:$20 sps:$4 sm:$0xff]   ;;  %v2158_v7 = vld [vmem:[%s3109_s0 + $0x214] ss:$20 sps:$4 sm:$0xff]   ;;  %v2164_v11 = vld [vmem:[%s3109_s0 + $0x23c] ss:$20 sps:$4 sm:$0xff]  }
  0x18   :  { %1964 = vmatprep.subr.bf16.mxu1 %v2235_v0  ;;  %v2179_v19 = vld [vmem:[%s3109_s0 + $0x1b8] ss:$20 sps:$4 sm:$0xff]  }
  0x19   :  { %v2181_v21 = vld [vmem:[%s3109_s0 + $0x1e4] ss:$20 sps:$4 sm:$0xff]  }
  0x1a   :  { %936 = vmatpush1.bf16.msra.mxu0 %v2085_v13  ;;  %v2168_v13 = vld [vmem:[%s3109_s0 + $0x194] ss:$20 sps:$4 sm:$0xff]  }
  0x1b   :  { %1980 = vmatpush1.bf16.msra.mxu1 %v2329_v14  ;;  %937 = vmatprep.subr.bf16.mxu0 %v2235_v0 }
  0x1c   :  { %1965 = vmatprep.subr.bf16.mxu1 %v2235_v0 }
  0x1e   :  { %938 = vmatpush1.bf16.msra.mxu0 %v2087_v15  ;;  %v2172_v15 = vld [vmem:[%s3109_s0 + $0x190] ss:$20 sps:$4 sm:$0xff]  }
  0x1f   :  { %1981 = vmatpush1.bf16.msra.mxu1 %v2340_v16  ;;  %939 = vmatprep.subr.bf16.mxu0 %v2235_v0 }
  0x20   :  { %1966 = vmatprep.subr.bf16.mxu1 %v2235_v0 }
  0x22   :  { %940 = vmatpush1.bf16.msra.mxu0 %v2089_v17  ;;  %v2174_v17 = vld [vmem:[%s3109_s0 + $0x1bc] ss:$20 sps:$4 sm:$0xff]  }
  0x23   :  { %1982 = vmatpush1.bf16.msra.mxu1 %v2351_v18  ;;  %941 = vmatprep.subr.bf16.mxu0 %v2235_v0 }
  0x24   :  { %1967 = vmatprep.subr.bf16.mxu1 %v2235_v0 }
  0x26   :  { %942 = vmatpush1.bf16.msra.mxu0 %v2091_v20  ;;  %v2180_v20 = vld [vmem:[%s3109_s0 + $0x288] ss:$20 sps:$4 sm:$0xff]  }
  0x27   :  { %1983 = vmatpush1.bf16.msra.mxu1 %v2368_v22  ;;  %943 = vmatprep.subr.bf16.mxu0 %v2235_v0 }
  0x28   :  { %1968 = vmatprep.subr.bf16.mxu1 %v2235_v0 }
  0x2a   :  { %944 = vmatpush1.bf16.msra.mxu0 %v2093_v23  ;;  %v2185_v23 = vld [vmem:[%s3109_s0 + $0x1e0] ss:$20 sps:$4 sm:$0xff]  }
  0x2b   :  { %1984 = vmatpush1.bf16.msra.mxu1 %v2379_v24  ;;  %945 = vmatprep.subr.bf16.mxu0 %v2235_v0 }
  0x2c   :  { %1969 = vmatprep.subr.bf16.mxu1 %v2235_v0 }
  0x2e   :  { %946 = vmatpush1.bf16.msra.mxu0 %v2095_v25  ;;  %v2187_v25 = vld [vmem:[%s3109_s0 + $0x20c] ss:$20 sps:$4 sm:$0xff]  }
  0x2f   :  { %1985 = vmatpush1.bf16.msra.mxu1 %v2390_v26  ;;  %947 = vmatprep.subr.bf16.mxu0 %v2235_v0 }
  0x30   :  { %1970 = vmatprep.subr.bf16.mxu1 %v2235_v0 }
  0x32   :  { %948 = vmatpush1.bf16.msra.mxu0 %v2097_v27  ;;  %v2190_v27 = vld [vmem:[%s3109_s0 + $0x208] ss:$20 sps:$4 sm:$0xff]  }
  0x33   :  { %1986 = vmatpush1.bf16.msra.mxu1 %v2401_v28  ;;  %949 = vmatprep.subr.bf16.mxu0 %v2235_v0 }
  0x34   :  { %1971 = vmatprep.subr.bf16.mxu1 %v2235_v0 }
  0x36   :  { %950 = vmatpush1.bf16.msra.mxu0 %v2099_v29  ;;  %v2192_v29 = vld [vmem:[%s3109_s0 + $0x234] ss:$20 sps:$4 sm:$0xff]  }
  0x37   :  { %1987 = vmatpush1.bf16.msra.mxu1 %v2412_v30  ;;  %951 = vmatprep.subr.bf16.mxu0 %v2235_v0 }
  0x38   :  { %1972 = vmatprep.subr.bf16.mxu1 %v2235_v0 }
  0x3a   :  { %952 = vmatpush1.bf16.msra.mxu0 %v2101_v31  ;;  %v2195_v31 = vld [vmem:[%s3109_s0 + $0x230] ss:$20 sps:$4 sm:$0xff]  }
  0x3b   :  { %1988 = vmatpush1.bf16.msra.mxu1 %v2423_v32  ;;  %953 = vmatprep.subr.bf16.mxu0 %v2235_v0 }
  0x3c   :  { %1973 = vmatprep.subr.bf16.mxu1 %v2235_v0 }
  0x3e   :  { %954 = vmatpush1.bf16.msra.mxu0 %v2103_v33  ;;  %v2197_v33 = vld [vmem:[%s3109_s0 + $0x25c] ss:$20 sps:$4 sm:$0xff]  }
  0x3f   :  { %1989 = vmatpush1.bf16.msra.mxu1 %v2434_v34  ;;  %1100 = vmatprep.subr.bf16.mxu0 %v2235_v0 }
  0x40   :  { %1914 = vmatprep.subr.bf16.mxu1 %v2117_v35 }
  0x41   :  { %956 = vmatmul.mubr.bf16.vlgmr.msra.gmra.mrb[0].mxu0 %v2105_v36  ;;  %v2201_v36 = vld [vmem:[%s3109_s0 + $0xd8] ss:$20 sps:$4 sm:$0xff]  }
  0x42   :  { %1173 = vmatmul.mubr.bf16.vlgmr.msra.gmra.mrb[0].mxu1 %v2108_v37  ;;  %1101 = vmatpush1.bf16.msra.mxu0 %v2264_v2  ;;  %v2149_v2 = vld [vmem:[%s3109_s0 + $0x11c] ss:$20 sps:$4 sm:$0xff]   ;;  %v2202_v37 = vld [vmem:[%s3109_s0 + $0x284] ss:$20 sps:$4 sm:$0xff]  }
  0x43   :  { %963 = vmatprep.mubr.bf16.mxu0 %v2111_v38  ;;  %1180 = vmatprep.mubr.bf16.mxu1 %v2113_v39  ;;  %v2204_v38 = vld [vmem:[%s3109_s0 + $0x100] ss:$20 sps:$4 sm:$0xff]  }
  0x44   :  { %1102 = vmatprep.subr.bf16.mxu0 %v2235_v0  ;;  %1915 = vmatpush3.bf16.msra.mxu1 %v2117_v35  ;;  %v2200_v35 = vld [vmem:[%s3109_s0 + $0x258] ss:$20 sps:$4 sm:$0xff]   ;;  %v2205_v39 = vld [vmem:[%s3109_s0 + $0x280] ss:$20 sps:$4 sm:$0xff]  }
  0x45   :  { %1916 = vmatprep.subr.bf16.mxu1 %v2136_v40 }
  0x46   :  { %1103 = vmatpush1.bf16.msra.mxu0 %v2274_v4  ;;  %v2153_v4 = vld [vmem:[%s3109_s0 + $0x118] ss:$20 sps:$4 sm:$0xff]  }
  0x47   :  { %1104 = vmatprep.subr.bf16.mxu0 %v2235_v0 }
  0x48   :  { %1917 = vmatpush3.bf16.msra.mxu1 %v2136_v40  ;;  %v2206_v40 = vld [vmem:[%s3109_s0 + $0x128] ss:$20 sps:$4 sm:$0xff]  }
  0x49   :  { %964 = vmatmul.mubr.bf16.gmra.mrb[4].mxu0 %v2115_v41  ;;  %1918 = vmatprep.subr.bf16.mxu1 %v2155_v42  ;;  %v2207_v41 = vld [vmem:[%s3109_s0 + $0x2ac] ss:$20 sps:$4 sm:$0xff]  }
  0x4a   :  { %1181 = vmatmul.mubr.bf16.gmra.mrb[4].mxu1 %v2116_v43  ;;  %971 = vmatprep.mubr.bf16.mxu0 %v2118_v44  ;;  %v2210_v43 = vld [vmem:[%s3109_s0 + $0x2a8] ss:$20 sps:$4 sm:$0xff]   ;;  %v2211_v44 = vld [vmem:[%s3109_s0 + $0x178] ss:$20 sps:$4 sm:$0xff]  }
  0x4b   :  { %1188 = vmatprep.mubr.bf16.mxu1 %v2120_v45  ;;  %1105 = vmatpush1.bf16.msra.mxu0 %v2285_v6  ;;  %v2156_v6 = vld [vmem:[%s3109_s0 + $0x144] ss:$20 sps:$4 sm:$0xff]   ;;  %v2214_v45 = vld [vmem:[%s3109_s0 + $0xc] ss:$20 sps:$4 sm:$0xff]  }
  0x4c   :  { %1106 = vmatprep.subr.bf16.mxu0 %v2235_v0  ;;  %1919 = vmatpush3.bf16.msra.mxu1 %v2155_v42  ;;  %v2209_v42 = vld [vmem:[%s3109_s0 + $0x150] ss:$20 sps:$4 sm:$0xff]  }
  0x4d   :  { %1920 = vmatprep.subr.bf16.mxu1 %v2178_v46 }
  0x4f   :  { %1107 = vmatpush1.bf16.msra.mxu0 %v2296_v8  ;;  %v2160_v8 = vld [vmem:[%s3109_s0 + $0x140] ss:$20 sps:$4 sm:$0xff]  }
  0x50   :  { %1108 = vmatprep.subr.bf16.mxu0 %v2235_v0  ;;  %1921 = vmatpush3.bf16.msra.mxu1 %v2178_v46  ;;  %v2215_v46 = vld [vmem:[%s3109_s0 + $0x1a0] ss:$20 sps:$4 sm:$0xff]  }
  0x51   :  { %972 = vmatmul.mubr.bf16.gmra.mrb[8].mxu0 %v2122_v47  ;;  %v2212_v47 = vld [vmem:[%s3109_s0 + $0x8] ss:$20 sps:$4 sm:$0xff]  }
  0x52   :  { %1189 = vmatmul.mubr.bf16.gmra.mrb[8].mxu1 %v2123_v48  ;;  %979 = vmatprep.mubr.bf16.mxu0 %v2124_v49  ;;  %v2216_v48 = vld [vmem:[%s3109_s0 + $0x1c8] ss:$20 sps:$4 sm:$0xff]  }
  0x53   :  { %1196 = vmatprep.mubr.bf16.mxu1 %v2126_v50  ;;  %1109 = vmatpush1.bf16.msra.mxu0 %v2307_v10  ;;  %v2162_v10 = vld [vmem:[%s3109_s0 + $0x16c] ss:$20 sps:$4 sm:$0xff]   ;;  %v2217_v49 = vld [vmem:[%s3109_s0 + $0x34] ss:$20 sps:$4 sm:$0xff]   ;;  %v2219_v50 = vld [vmem:[%s3109_s0 + $0x1f0] ss:$20 sps:$4 sm:$0xff]  }
  0x54   :  { %1110 = vmatprep.subr.bf16.mxu0 %v2235_v0 }
  0x57   :  { %1111 = vmatpush1.bf16.msra.mxu0 %v2318_v12  ;;  %v2167_v12 = vld [vmem:[%s3109_s0 + $0x238] ss:$20 sps:$4 sm:$0xff]  }
  0x58   :  { %1112 = vmatprep.subr.bf16.mxu0 %v2235_v0 }
  0x59   :  { %980 = vmatmul.mubr.bf16.gmra.mrb[12].mxu0 %v2128_v51  ;;  %v2220_v51 = vld [vmem:[%s3109_s0 + $0x30] ss:$20 sps:$4 sm:$0xff]  }
  0x5a   :  { %1197 = vmatmul.mubr.bf16.gmra.mrb[12].mxu1 %v2129_v52  ;;  %987 = vmatprep.mubr.bf16.mxu0 %v2130_v53  ;;  %v2221_v52 = vld [vmem:[%s3109_s0 + $0x218] ss:$20 sps:$4 sm:$0xff]   ;;  %v2222_v53 = vld [vmem:[%s3109_s0 + $0x5c] ss:$20 sps:$4 sm:$0xff]  }
  0x5b   :  { %1204 = vmatprep.mubr.bf16.mxu1 %v2132_v54  ;;  %1113 = vmatpush1.bf16.msra.mxu0 %v2329_v14  ;;  %v2170_v14 = vld [vmem:[%s3109_s0 + $0x264] ss:$20 sps:$4 sm:$0xff]   ;;  %v2224_v54 = vld [vmem:[%s3109_s0 + $0x240] ss:$20 sps:$4 sm:$0xff]  }
  0x5c   :  { %1114 = vmatprep.subr.bf16.mxu0 %v2235_v0 }
  0x5f   :  { %1115 = vmatpush1.bf16.msra.mxu0 %v2340_v16  ;;  %v2173_v16 = vld [vmem:[%s3109_s0 + $0x260] ss:$20 sps:$4 sm:$0xff]  }
  0x60   :  { %1116 = vmatprep.subr.bf16.mxu0 %v2235_v0 }
  0x61   :  { %988 = vmatmul.mubr.bf16.gmra.mrb[16].mxu0 %v2134_v55  ;;  %v2225_v55 = vld [vmem:[%s3109_s0 + $0x58] ss:$20 sps:$4 sm:$0xff]  }
  0x62   :  { %1205 = vmatmul.mubr.bf16.gmra.mrb[16].mxu1 %v2135_v56  ;;  %995 = vmatprep.mubr.bf16.mxu0 %v2137_v57  ;;  %v2226_v56 = vld [vmem:[%s3109_s0 + $0x268] ss:$20 sps:$4 sm:$0xff]   ;;  %v2227_v57 = vld [vmem:[%s3109_s0 + $0x84] ss:$20 sps:$4 sm:$0xff]  }
  0x63   :  { %1212 = vmatprep.mubr.bf16.mxu1 %v2139_v58  ;;  %1117 = vmatpush1.bf16.msra.mxu0 %v2351_v18  ;;  %v2176_v18 = vld [vmem:[%s3109_s0 + $0x28c] ss:$20 sps:$4 sm:$0xff]   ;;  %v2229_v58 = vld [vmem:[%s3109_s0 + $0x290] ss:$20 sps:$4 sm:$0xff]  }
  0x64   :  { %1118 = vmatprep.subr.bf16.mxu0 %v2235_v0 }
  0x67   :  { %1119 = vmatpush1.bf16.msra.mxu0 %v2368_v22  ;;  %v2183_v22 = vld [vmem:[%s3109_s0 + $0x2b4] ss:$20 sps:$4 sm:$0xff]  }
  0x68   :  { %1120 = vmatprep.subr.bf16.mxu0 %v2235_v0 }
  0x69   :  { %996 = vmatmul.mubr.bf16.gmra.mrb[20].mxu0 %v2141_v59  ;;  %v2230_v59 = vld [vmem:[%s3109_s0 + $0x80] ss:$20 sps:$4 sm:$0xff]  }
  0x6a   :  { %1213 = vmatmul.mubr.bf16.gmra.mrb[20].mxu1 %v2142_v60  ;;  %1003 = vmatprep.mubr.bf16.mxu0 %v2143_v61  ;;  %v2231_v60 = vld [vmem:[%s3109_s0 + $0x2b8] ss:$20 sps:$4 sm:$0xff]  }
  0x6b   :  { %1220 = vmatprep.mubr.bf16.mxu1 %v2145_v62  ;;  %1121 = vmatpush1.bf16.msra.mxu0 %v2379_v24  ;;  %v2186_v24 = vld [vmem:[%s3109_s0 + $0x2b0] ss:$20 sps:$4 sm:$0xff]   ;;  %v2232_v61 = vld [vmem:[%s3109_s0 + $0xac] ss:$20 sps:$4 sm:$0xff]   ;;  %v2234_v62 = vld [vmem:[%s3109_s0 + $0xa8] ss:$20 sps:$4 sm:$0xff]  }
  0x6c   :  { %1122 = vmatprep.subr.bf16.mxu0 %v2235_v0 }
  0x6f   :  { %1123 = vmatpush1.bf16.msra.mxu0 %v2390_v26  ;;  %v2189_v26 = vld [vmem:[%s3109_s0 + $0x10] ss:$20 sps:$4 sm:$0xff]  }
  0x70   :  { %1124 = vmatprep.subr.bf16.mxu0 %v2235_v0 }
  0x71   :  { %1004 = vmatmul.mubr.bf16.gmra.mrb[24].mxu0 %v2147_v63 }
  0x72   :  { %1221 = vmatmul.mubr.bf16.gmra.mrb[24].mxu1 %v2148_v1  ;;  %1011 = vmatprep.mubr.bf16.mxu0 %v2149_v2 }
  0x73   :  { %1228 = vmatprep.mubr.bf16.mxu1 %v2151_v3  ;;  %1125 = vmatpush1.bf16.msra.mxu0 %v2401_v28  ;;  %v2191_v28 = vld [vmem:[%s3109_s0 + $0x38] ss:$20 sps:$4 sm:$0xff]  }
  0x74   :  { %1126 = vmatprep.subr.bf16.mxu0 %v2235_v0 }
  0x77   :  { %1127 = vmatpush1.bf16.msra.mxu0 %v2412_v30  ;;  %v2194_v30 = vld [vmem:[%s3109_s0 + $0x60] ss:$20 sps:$4 sm:$0xff]  }
  0x78   :  { %1128 = vmatprep.subr.bf16.mxu0 %v2235_v0 }
  0x79   :  { %1012 = vmatmul.mubr.bf16.gmra.mrb[28].mxu0 %v2153_v4 }
  0x7a   :  { %1229 = vmatmul.mubr.bf16.gmra.mrb[28].mxu1 %v2154_v5  ;;  %1019 = vmatprep.mubr.bf16.mxu0 %v2156_v6 }
  0x7b   :  { %1236 = vmatprep.mubr.bf16.mxu1 %v2158_v7  ;;  %1129 = vmatpush1.bf16.msra.mxu0 %v2423_v32  ;;  %v2196_v32 = vld [vmem:[%s3109_s0 + $0x88] ss:$20 sps:$4 sm:$0xff]  }
  0x7c   :  { %1130 = vmatprep.subr.bf16.mxu0 %v2235_v0  ;;  %v2166_v0 = vld [vmem:[%s3109_s0 + $0x168] ss:$20 sps:$4 sm:$0xff]  }
  0x7f   :  { %1131 = vmatpush1.bf16.msra.mxu0 %v2434_v34  ;;  %v2199_v34 = vld [vmem:[%s3109_s0 + $0xb0] ss:$20 sps:$4 sm:$0xff]  }
  0x81   :  { %1020 = vmatmul.mubr.bf16.gmra.mrb[32].mxu0 %v2160_v8 }
  0x82   :  { %1237 = vmatmul.mubr.bf16.gmra.mrb[32].mxu1 %v2161_v9  ;;  %1027 = vmatprep.mubr.bf16.mxu0 %v2162_v10 }
  0x83   :  { %1244 = vmatprep.mubr.bf16.mxu1 %v2164_v11 }
  0x89   :  { %1028 = vmatmul.mubr.bf16.gmra.mrb[36].mxu0 %v2166_v0 }
  0x8a   :  { %1245 = vmatmul.mubr.bf16.gmra.mrb[36].mxu1 %v2167_v12  ;;  %1035 = vmatprep.mubr.bf16.mxu0 %v2168_v13 }
  0x8b   :  { %1252 = vmatprep.mubr.bf16.mxu1 %v2170_v14 }
  0x91   :  { %1036 = vmatmul.mubr.bf16.gmra.mrb[40].mxu0 %v2172_v15 }
  0x92   :  { %1253 = vmatmul.mubr.bf16.gmra.mrb[40].mxu1 %v2173_v16  ;;  %1043 = vmatprep.mubr.bf16.mxu0 %v2174_v17 }
  0x93   :  { %1260 = vmatprep.mubr.bf16.mxu1 %v2176_v18 }
  0x99   :  { %1044 = vmatmul.mubr.bf16.gmra.mrb[44].mxu0 %v2179_v19  ;;  %v2769_v19 = vld [vmem:[%s3110_s2] ss:$0 sm:$0xff] }
  0x9a   :  { %1261 = vmatmul.mubr.bf16.gmra.mrb[44].mxu1 %v2180_v20  ;;  %1051 = vmatprep.mubr.bf16.mxu0 %v2181_v21 }
  0x9b   :  { %1268 = vmatprep.mubr.bf16.mxu1 %v2183_v22 }
  0xa1   :  { %1052 = vmatmul.mubr.bf16.gmra.mrb[48].mxu0 %v2185_v23 }
  0xa2   :  { %1269 = vmatmul.mubr.bf16.gmra.mrb[48].mxu1 %v2186_v24  ;;  %1059 = vmatprep.mubr.bf16.mxu0 %v2187_v25 }
  0xa3   :  { %1922 = vmatprep.mubr.msk.bf16.mxu1 %vm868_vm0, %v2189_v26 }
  0xa9   :  { %1060 = vmatmul.mubr.bf16.gmra.mrb[52].mxu0 %v2190_v27 }
  0xaa   :  { %1923 = vmatmul.mubr.msk.bf16.vlgmr.msra.gmra.mrb[52].mxu1 %vm868_vm0, %v2191_v28  ;;  %1067 = vmatprep.mubr.bf16.mxu0 %v2192_v29 }
  0xab   :  { %1926 = vmatprep.mubr.msk.bf16.mxu1 %vm868_vm0, %v2194_v30 }
  0xb1   :  { %1068 = vmatmul.mubr.bf16.gmra.mrb[56].mxu0 %v2195_v31 }
  0xb2   :  { %1927 = vmatmul.mubr.msk.bf16.gmra.mrb[56].mxu1 %vm868_vm0, %v2196_v32  ;;  %1075 = vmatprep.mubr.bf16.mxu0 %v2197_v33 }
  0xb3   :  { %1930 = vmatprep.mubr.msk.bf16.mxu1 %vm868_vm0, %v2199_v34 }
  0xb9   :  { %1076 = vmatmul.mubr.bf16.gmra.mrb[60].mxu0 %v2200_v35 }
  0xba   :  { %1931 = vmatmul.mubr.msk.bf16.gmra.mrb[60].mxu1 %vm868_vm0, %v2201_v36  ;;  %1083 = vmatprep.mubr.bf16.mxu0 %v2202_v37 }
  0xbb   :  { %1934 = vmatprep.mubr.msk.bf16.mxu1 %vm868_vm0, %v2204_v38 }
  0xc1   :  { %1084 = vmatmul.mubr.bf16.gmra.mrb[64].mxu0 %v2205_v39 }
  0xc2   :  { %1935 = vmatmul.mubr.msk.bf16.gmra.mrb[64].mxu1 %vm868_vm0, %v2206_v40  ;;  %1091 = vmatprep.mubr.bf16.mxu0 %v2207_v41 }
  0xc3   :  { %1938 = vmatprep.mubr.msk.bf16.mxu1 %vm868_vm0, %v2209_v42 }
  0xc9   :  { %1092 = vmatmul.mubr.bf16.gmra.mrb[68].mxu0 %v2210_v43 }
  0xca   :  { %1939 = vmatmul.mubr.msk.bf16.gmra.mrb[68].mxu1 %vm868_vm0, %v2211_v44  ;;  %1132 = vmatprep.mubr.bf16.mxu0 %v2214_v45 }
  0xcb   :  { %1942 = vmatprep.mubr.msk.bf16.mxu1 %vm868_vm0, %v2215_v46 }
  0xd1   :  { %1133 = vmatmul.mubr.bf16.vlgmr.msra.gmra.mrb[0].mxu0 %v2212_v47 }
  0xd2   :  { %1943 = vmatmul.mubr.msk.bf16.gmra.mrb[72].mxu1 %vm868_vm0, %v2216_v48  ;;  %1140 = vmatprep.mubr.bf16.mxu0 %v2217_v49 }
  0xd3   :  { %1946 = vmatprep.mubr.msk.bf16.mxu1 %vm868_vm0, %v2219_v50 }
  0xd9   :  { %1141 = vmatmul.mubr.bf16.gmra.mrb[4].mxu0 %v2220_v51 }
  0xda   :  { %1947 = vmatmul.mubr.msk.bf16.gmra.mrb[76].mxu1 %vm868_vm0, %v2221_v52  ;;  %1148 = vmatprep.mubr.bf16.mxu0 %v2222_v53 }
  0xdb   :  { %1950 = vmatprep.mubr.msk.bf16.mxu1 %vm868_vm0, %v2224_v54 }
  0xe1   :  { %1149 = vmatmul.mubr.bf16.gmra.mrb[8].mxu0 %v2225_v55 }
  0xe2   :  { %1951 = vmatmul.mubr.msk.bf16.gmra.mrb[80].mxu1 %vm868_vm0, %v2226_v56  ;;  %1156 = vmatprep.mubr.bf16.mxu0 %v2227_v57 }
  0xe3   :  { %1954 = vmatprep.mubr.msk.bf16.mxu1 %vm868_vm0, %v2229_v58 }
  0xe9   :  { %1157 = vmatmul.mubr.bf16.gmra.mrb[12].mxu0 %v2230_v59 }
  0xea   :  { %1955 = vmatmul.mubr.msk.bf16.gmra.mrb[84].mxu1 %vm868_vm0, %v2231_v60  ;;  %1164 = vmatprep.mubr.bf16.mxu0 %v2232_v61 }
  0xf1   :  { %1165 = vmatmul.mubr.bf16.gmra.mrb[16].mxu0 %v2234_v62 }
 0x115   :  { %v1174_v63 = vpop.f32.mrb[0].mxu1 }
 0x116   :  { %v1176_v1 = vpop.f32.mrb[1].mxu1 }
 0x117   :  { %v1177_v2 = vpop.f32.mrb[2].mxu1 }
 0x118   :  { %v1179_v3 = vpop.f32.mrb[3].mxu1 }
 0x11d   :  { %v1182_v4 = vpop.f32.mrb[4].mxu1 }
 0x11e   :  { %v1184_v5 = vpop.f32.mrb[5].mxu1 }
 0x11f   :  { %v1185_v6 = vpop.f32.mrb[6].mxu1 }
 0x120   :  { %v1187_v7 = vpop.f32.mrb[7].mxu1 }
 0x125   :  { %v1190_v8 = vpop.f32.mrb[8].mxu1 }
 0x126   :  { %v1192_v9 = vpop.f32.mrb[9].mxu1 }
 0x127   :  { %v1193_v10 = vpop.f32.mrb[10].mxu1 }
 0x128   :  { %v1195_v11 = vpop.f32.mrb[11].mxu1 }
 0x12d   :  { %v1198_v0 = vpop.f32.mrb[12].mxu1 }
 0x12e   :  { %v1200_v12 = vpop.f32.mrb[13].mxu1 }
 0x12f   :  { %v1201_v13 = vpop.f32.mrb[14].mxu1 }
 0x130   :  { %v1203_v14 = vpop.f32.mrb[15].mxu1 }
 0x135   :  { %v2764_v15 = vpop.f32.mrb[16].mxu1 }
 0x136   :  { %v1208_v16 = vpop.f32.mrb[17].mxu1 }
 0x137   :  { %v1209_v17 = vpop.f32.mrb[18].mxu1 }
 0x138   :  { %v1211_v18 = vpop.f32.mrb[19].mxu1 }
 0x13c   :  { %v997_v20 = vpop.f32.mrb[20].mxu0 }
 0x13d   :  { %v998_v21 = vadd.f32 %v2769_v19, %v997_v20  ;;  %v999_v22 = vpop.f32.mrb[21].mxu0  ;;  %v2772_v23 = vpop.f32.mrb[20].mxu1 }
 0x13e   :  { %v1000_v24 = vpop.f32.mrb[22].mxu0  ;;  %v1216_v25 = vpop.f32.mrb[21].mxu1 }
 0x13f   :  { %v1001_v26 = vadd.f32 %v2769_v19, %v1000_v24  ;;  %v1002_v27 = vpop.f32.mrb[23].mxu0  ;;  %v2775_v28 = vpop.f32.mrb[22].mxu1  ;;  %v2777_v29 = vadd.f32 %v1174_v63, %v998_v21 }
 0x140   :  { %v1219_v30 = vpop.f32.mrb[23].mxu1 }
 0x141   :  { %v2779_v31 = vadd.f32 %v1177_v2, %v1001_v26 }
 0x144   :  { %v1005_v32 = vpop.f32.mrb[24].mxu0 }
 0x145   :  { %v1006_v33 = vadd.f32 %v2769_v19, %v1005_v32  ;;  %v1007_v34 = vpop.f32.mrb[25].mxu0  ;;  %v2782_v35 = vpop.f32.mrb[24].mxu1 }
 0x146   :  { %v1008_v36 = vpop.f32.mrb[26].mxu0  ;;  %v1224_v37 = vpop.f32.mrb[25].mxu1 }
 0x147   :  { %v1009_v38 = vadd.f32 %v2769_v19, %v1008_v36  ;;  %v1010_v39 = vpop.f32.mrb[27].mxu0  ;;  %v2785_v40 = vpop.f32.mrb[26].mxu1  ;;  %v2787_v41 = vadd.f32 %v1182_v4, %v1006_v33 }
 0x148   :  { %v1227_v42 = vpop.f32.mrb[27].mxu1 }
 0x149   :  { %v2789_v43 = vadd.f32 %v1185_v6, %v1009_v38 }
 0x14c   :  { %v1013_v44 = vpop.f32.mrb[28].mxu0 }
 0x14d   :  { %v1014_v45 = vadd.f32 %v2769_v19, %v1013_v44  ;;  %v1015_v46 = vpop.f32.mrb[29].mxu0  ;;  %v2792_v47 = vpop.f32.mrb[28].mxu1 }
 0x14e   :  { %v1016_v48 = vpop.f32.mrb[30].mxu0  ;;  %v1232_v49 = vpop.f32.mrb[29].mxu1 }
 0x14f   :  { %v1017_v50 = vadd.f32 %v2769_v19, %v1016_v48  ;;  %v1018_v51 = vpop.f32.mrb[31].mxu0  ;;  %v2795_v52 = vpop.f32.mrb[30].mxu1  ;;  %v2797_v53 = vadd.f32 %v1190_v8, %v1014_v45 }
 0x150   :  { %v1235_v54 = vpop.f32.mrb[31].mxu1 }
 0x151   :  { %v2799_v55 = vadd.f32 %v1193_v10, %v1017_v50 }
 0x154   :  { %v1021_v56 = vpop.f32.mrb[32].mxu0 }
 0x155   :  { %v1022_v57 = vadd.f32 %v2769_v19, %v1021_v56  ;;  %v1023_v58 = vpop.f32.mrb[33].mxu0  ;;  %v2802_v59 = vpop.f32.mrb[32].mxu1 }
 0x156   :  { %v1024_v60 = vpop.f32.mrb[34].mxu0  ;;  %v1240_v61 = vpop.f32.mrb[33].mxu1 }
 0x157   :  { %v1025_v62 = vadd.f32 %v2769_v19, %v1024_v60  ;;  %v1026_v63 = vpop.f32.mrb[35].mxu0  ;;  %v2805_v1 = vpop.f32.mrb[34].mxu1  ;;  %v2807_v2 = vadd.f32 %v1198_v0, %v1022_v57 }
 0x158   :  { %v1243_v3 = vpop.f32.mrb[35].mxu1 }
 0x159   :  { %v2809_v4 = vadd.f32 %v1201_v13, %v1025_v62 }
 0x15c   :  { %v1029_v5 = vpop.f32.mrb[36].mxu0 }
 0x15d   :  { %v1030_v6 = vadd.f32 %v2769_v19, %v1029_v5  ;;  %v1031_v7 = vpop.f32.mrb[37].mxu0  ;;  %v2812_v8 = vpop.f32.mrb[36].mxu1 }
 0x15e   :  { %v1032_v9 = vpop.f32.mrb[38].mxu0  ;;  %v1248_v10 = vpop.f32.mrb[37].mxu1 }
 0x15f   :  { %v1033_v11 = vadd.f32 %v2769_v19, %v1032_v9  ;;  %v1034_v12 = vpop.f32.mrb[39].mxu0  ;;  %v2815_v14 = vpop.f32.mrb[38].mxu1  ;;  %v2818_v16 = vadd.f32 %v2764_v15, %v1030_v6 }
 0x160   :  { %v1251_v0 = vpop.f32.mrb[39].mxu1 }
 0x161   :  { %v2820_v18 = vadd.f32 %v1209_v17, %v1033_v11 }
 0x164   :  { %v1037_v13 = vpop.f32.mrb[40].mxu0 }
 0x165   :  { %v1038_v20 = vadd.f32 %v2769_v19, %v1037_v13  ;;  %v1039_v21 = vpop.f32.mrb[41].mxu0  ;;  %v2823_v22 = vpop.f32.mrb[40].mxu1 }
 0x166   :  { %v1040_v24 = vpop.f32.mrb[42].mxu0  ;;  %v1256_v25 = vpop.f32.mrb[41].mxu1 }
 0x167   :  { %v1041_v26 = vadd.f32 %v2769_v19, %v1040_v24  ;;  %v1042_v27 = vpop.f32.mrb[43].mxu0  ;;  %v2826_v30 = vpop.f32.mrb[42].mxu1  ;;  %v2829_v32 = vadd.f32 %v2772_v23, %v1038_v20 }
 0x168   :  { %v1259_v15 = vpop.f32.mrb[43].mxu1 }
 0x169   :  { %v2832_v17 = vadd.f32 %v2775_v28, %v1041_v26 }
 0x16c   :  { %v1045_v33 = vpop.f32.mrb[44].mxu0 }
 0x16d   :  { %v1046_v34 = vadd.f32 %v2769_v19, %v1045_v33  ;;  %v1047_v36 = vpop.f32.mrb[45].mxu0  ;;  %v2835_v37 = vpop.f32.mrb[44].mxu1 }
 0x16e   :  { %v1048_v38 = vpop.f32.mrb[46].mxu0  ;;  %v1264_v39 = vpop.f32.mrb[45].mxu1 }
 0x16f   :  { %v1049_v42 = vadd.f32 %v2769_v19, %v1048_v38  ;;  %v1050_v44 = vpop.f32.mrb[47].mxu0  ;;  %v2838_v45 = vpop.f32.mrb[46].mxu1  ;;  %v2841_v23 = vadd.f32 %v2782_v35, %v1046_v34 }
 0x170   :  { %v1267_v46 = vpop.f32.mrb[47].mxu1 }
 0x171   :  { %v2844_v28 = vadd.f32 %v2785_v40, %v1049_v42 }
 0x174   :  { %v1053_v48 = vpop.f32.mrb[48].mxu0 }
 0x175   :  { %v1054_v49 = vadd.f32 %v2769_v19, %v1053_v48  ;;  %v1055_v50 = vpop.f32.mrb[49].mxu0  ;;  %v2847_v51 = vpop.f32.mrb[48].mxu1 }
 0x176   :  { %v1056_v54 = vpop.f32.mrb[50].mxu0  ;;  %v1272_v56 = vpop.f32.mrb[49].mxu1 }
 0x177   :  { %v1057_v57 = vadd.f32 %v2769_v19, %v1056_v54  ;;  %v1058_v58 = vpop.f32.mrb[51].mxu0  ;;  %v2850_v60 = vpop.f32.mrb[50].mxu1  ;;  %v2853_v35 = vadd.f32 %v2792_v47, %v1054_v49 }
 0x178   :  { %v1275_v61 = vpop.f32.mrb[51].mxu1 }
 0x179   :  { %v2856_v40 = vadd.f32 %v2795_v52, %v1057_v57 }
 0x17c   :  { %v1061_v62 = vpop.f32.mrb[52].mxu0 }
 0x17d   :  { %v1062_v63 = vadd.f32 %v2769_v19, %v1061_v62  ;;  %v1063_v3 = vpop.f32.mrb[53].mxu0  ;;  %v2859_v5 = vpop.f32.mrb[52].mxu1 }
 0x17e   :  { %v1064_v6 = vpop.f32.mrb[54].mxu0  ;;  %v2861_v7 = vpop.f32.mrb[53].mxu1 }
 0x17f   :  { %v1065_v9 = vadd.f32 %v2769_v19, %v1064_v6  ;;  %v1066_v10 = vpop.f32.mrb[55].mxu0  ;;  %v2864_v11 = vpop.f32.mrb[54].mxu1  ;;  %v2867_v47 = vadd.f32 %v2802_v59, %v1062_v63 }
 0x180   :  { %v2869_v12 = vpop.f32.mrb[55].mxu1 }
 0x181   :  { %v2872_v52 = vadd.f32 %v2805_v1, %v1065_v9 }
 0x184   :  { %v1069_v0 = vpop.f32.mrb[56].mxu0 }
 0x185   :  { %v1070_v13 = vadd.f32 %v2769_v19, %v1069_v0  ;;  %v1071_v20 = vpop.f32.mrb[57].mxu0  ;;  %v2875_v21 = vpop.f32.mrb[56].mxu1 }
 0x186   :  { %v1072_v24 = vpop.f32.mrb[58].mxu0  ;;  %v2877_v25 = vpop.f32.mrb[57].mxu1 }
 0x187   :  { %v1073_v26 = vadd.f32 %v2769_v19, %v1072_v24  ;;  %v1074_v27 = vpop.f32.mrb[59].mxu0  ;;  %v2880_v15 = vpop.f32.mrb[58].mxu1  ;;  %v2883_v59 = vadd.f32 %v2812_v8, %v1070_v13 }
 0x188   :  { %v2885_v33 = vpop.f32.mrb[59].mxu1 }
 0x189   :  { %v2888_v1 = vadd.f32 %v2815_v14, %v1073_v26 }
 0x18c   :  { %v1077_v34 = vpop.f32.mrb[60].mxu0 }
 0x18d   :  { %v1078_v36 = vadd.f32 %v2769_v19, %v1077_v34  ;;  %v1932_v38 = vpop.f32.mrb[60].mxu1  ;;  %v1079_v39 = vpop.f32.mrb[61].mxu0 }
 0x18e   :  { %v1352_v42 = vadd.f32 %v1932_v38, %v2777_v29  ;;  %v2892_v44 = vpop.f32.mrb[61].mxu1  ;;  %v1080_v46 = vpop.f32.mrb[62].mxu0 }
 0x18f   :  { %v1081_v48 = vadd.f32 %v2769_v19, %v1080_v46  ;;  %v1933_v49 = vpop.f32.mrb[62].mxu1  ;;  %v1082_v8 = vpop.f32.mrb[63].mxu0  ;;  %v2896_v50 = vadd.f32 %v2823_v22, %v1078_v36 }
 0x190   :  { %v1464_v54 = vmax.f32 %v1352_v42, 0.0  ;;  %v1355_v14 = vadd.f32 %v1933_v49, %v2779_v31  ;;  %v2899_v56 = vpop.f32.mrb[63].mxu1 }
 0x191   :  { %v2902_v57 = vadd.f32 %v2826_v30, %v1081_v48 }
 0x192   :  { %v1866_v29 = vpack.c.bf16 %v1464_v54, %v1464_v54  ;;  %v1465_v58 = vmax.f32 %v1355_v14, 0.0 }
 0x194   :  { %1645 = vst.msk [vmem:[%s3111_s3 + $0x28] sm:$0xf] %vm1634_vm1, %v1866_v29  ;;  %v1867_v61 = vpack.c.bf16 %v1465_v58, %v1465_v58  ;;  %v1085_v62 = vpop.f32.mrb[64].mxu0 }
 0x195   :  { %v1086_v22 = vadd.f32 %v2769_v19, %v1085_v62  ;;  %v1936_v63 = vpop.f32.mrb[64].mxu1  ;;  %v1087_v3 = vpop.f32.mrb[65].mxu0 }
 0x196   :  { %1646 = vst.msk [vmem:[%s3111_s3 + $0x2c] sm:$0xf] %vm1634_vm1, %v1867_v61  ;;  %v1368_v31 = vadd.f32 %v1936_v63, %v2797_v53  ;;  %v1359_v30 = vpop.f32.mrb[65].mxu1  ;;  %v1088_v6 = vpop.f32.mrb[66].mxu0 }
 0x197   :  { %v1360_v9 = vadd.f32 %v1359_v30, %v2787_v41  ;;  %v1089_v10 = vadd.f32 %v2769_v19, %v1088_v6  ;;  %v1937_v0 = vpop.f32.mrb[66].mxu1  ;;  %v1090_v13 = vpop.f32.mrb[67].mxu0  ;;  %v2917_v20 = vadd.f32 %v2835_v37, %v1086_v22 }
 0x198   :  { %v1468_v24 = vmax.f32 %v1368_v31, 0.0  ;;  %v1371_v26 = vadd.f32 %v1937_v0, %v2799_v55  ;;  %v1362_v27 = vpop.f32.mrb[67].mxu1 }
 0x199   :  { %v1466_v34 = vmax.f32 %v1360_v9, 0.0  ;;  %v1363_v36 = vadd.f32 %v1362_v27, %v2789_v43  ;;  %v2922_v53 = vadd.f32 %v2838_v45, %v1089_v10 }
 0x19a   :  { %v1870_v38 = vpack.c.bf16 %v1468_v24, %v1468_v24  ;;  %v1469_v39 = vmax.f32 %v1371_v26, 0.0 }
 0x19b   :  { %v1868_v41 = vpack.c.bf16 %v1466_v34, %v1466_v34  ;;  %v1467_v42 = vmax.f32 %v1363_v36, 0.0 }
 0x19c   :  { %1649 = vst.msk [vmem:[%s3111_s3 + $0x38] sm:$0xf] %vm1634_vm1, %v1870_v38  ;;  %v1871_v37 = vpack.c.bf16 %v1469_v39, %v1469_v39  ;;  %v1093_v46 = vpop.f32.mrb[68].mxu0 }
 0x19d   :  { %1647 = vst.msk [vmem:[%s3111_s3 + $0x30] sm:$0xf] %vm1634_vm1, %v1868_v41  ;;  %v1869_v43 = vpack.c.bf16 %v1467_v42, %v1467_v42  ;;  %v1094_v55 = vadd.f32 %v2769_v19, %v1093_v46  ;;  %v1940_v45 = vpop.f32.mrb[68].mxu1  ;;  %v1095_v48 = vpop.f32.mrb[69].mxu0 }
 0x19e   :  { %1650 = vst.msk [vmem:[%s3111_s3 + $0x3c] sm:$0xf] %vm1634_vm1, %v1871_v37  ;;  %v1384_v49 = vadd.f32 %v1940_v45, %v2818_v16  ;;  %v1375_v8 = vpop.f32.mrb[69].mxu1  ;;  %v1096_v54 = vpop.f32.mrb[70].mxu0 }
 0x19f   :  { %1648 = vst.msk [vmem:[%s3111_s3 + $0x34] sm:$0xf] %vm1634_vm1, %v1869_v43  ;;  %v1376_v14 = vadd.f32 %v1375_v8, %v2807_v2  ;;  %v1097_v29 = vadd.f32 %v2769_v19, %v1096_v54  ;;  %v1941_v58 = vpop.f32.mrb[70].mxu1  ;;  %v1098_v61 = vpop.f32.mrb[71].mxu0  ;;  %v2945_v62 = vadd.f32 %v2847_v51, %v1094_v55 }
 0x1a0   :  { %v1472_v22 = vmax.f32 %v1384_v49, 0.0  ;;  %v1387_v63 = vadd.f32 %v1941_v58, %v2820_v18  ;;  %v1378_v16 = vpop.f32.mrb[71].mxu1 }
 0x1a1   :  { %v1470_v3 = vmax.f32 %v1376_v14, 0.0  ;;  %v1379_v31 = vadd.f32 %v1378_v16, %v2809_v4  ;;  %v2950_v30 = vadd.f32 %v2850_v60, %v1097_v29 }
 0x1a2   :  { %v1874_v6 = vpack.c.bf16 %v1472_v22, %v1472_v22  ;;  %v1473_v9 = vmax.f32 %v1387_v63, 0.0 }
 0x1a3   :  { %v1872_v2 = vpack.c.bf16 %v1470_v3, %v1470_v3  ;;  %v1471_v10 = vmax.f32 %v1379_v31, 0.0 }
 0x1a4   :  { %1653 = vst.msk [vmem:[%s3111_s3 + $0x48] sm:$0xf] %vm1634_vm1, %v1874_v6  ;;  %v1875_v51 = vpack.c.bf16 %v1473_v9, %v1473_v9  ;;  %v1134_v0 = vpop.f32.mrb[0].mxu0 }
 0x1a5   :  { %1651 = vst.msk [vmem:[%s3111_s3 + $0x40] sm:$0xf] %vm1634_vm1, %v1872_v2  ;;  %v1873_v4 = vpack.c.bf16 %v1471_v10, %v1471_v10  ;;  %v1990_v18 = vadd.f32 %v2769_v19, %v1134_v0  ;;  %v1944_v60 = vpop.f32.mrb[72].mxu1  ;;  %v1136_v13 = vpop.f32.mrb[1].mxu0 }
 0x1a6   :  { %1654 = vst.msk [vmem:[%s3111_s3 + $0x4c] sm:$0xf] %vm1634_vm1, %v1875_v51  ;;  %v1400_v24 = vadd.f32 %v1944_v60, %v2841_v23  ;;  %v1391_v26 = vpop.f32.mrb[73].mxu1  ;;  %v1137_v27 = vpop.f32.mrb[2].mxu0 }
 0x1a7   :  { %1652 = vst.msk [vmem:[%s3111_s3 + $0x44] sm:$0xf] %vm1634_vm1, %v1873_v4  ;;  %v1312_v34 = vadd.f32 %v1990_v18, %v2861_v7  ;;  %v1392_v36 = vadd.f32 %v1391_v26, %v2829_v32  ;;  %v1991_v38 = vadd.f32 %v2769_v19, %v1137_v27  ;;  %v1945_v39 = vpop.f32.mrb[74].mxu1  ;;  %v1139_v41 = vpop.f32.mrb[3].mxu0 }
 0x1a8   :  { %v1476_v42 = vmax.f32 %v1400_v24, 0.0  ;;  %v1403_v37 = vadd.f32 %v1945_v39, %v2844_v28  ;;  %v1394_v46 = vpop.f32.mrb[75].mxu1 }
 0x1a9   :  { %v1454_v23 = vmax.f32 %v1312_v34, 0.0  ;;  %v1474_v43 = vmax.f32 %v1392_v36, 0.0  ;;  %v1315_v55 = vadd.f32 %v1991_v38, %v2869_v12  ;;  %v1395_v45 = vadd.f32 %v1394_v46, %v2832_v17 }
 0x1aa   :  { %v1878_v48 = vpack.c.bf16 %v1476_v42, %v1476_v42  ;;  %v1477_v49 = vmax.f32 %v1403_v37, 0.0 }
 0x1ab   :  { %v1856_v8 = vpack.c.bf16 %v1454_v23, %v1454_v23  ;;  %v1876_v7 = vpack.c.bf16 %v1474_v43, %v1474_v43  ;;  %v1455_v54 = vmax.f32 %v1315_v55, 0.0  ;;  %v1475_v32 = vmax.f32 %v1395_v45, 0.0 }
 0x1ac   :  { %1657 = vst.msk [vmem:[%s3111_s3 + $0x58] sm:$0xf] %vm1634_vm1, %v1878_v48  ;;  %v1879_v14 = vpack.c.bf16 %v1477_v49, %v1477_v49  ;;  %v1142_v28 = vpop.f32.mrb[4].mxu0 }
 0x1ad   :  { %1635 = vst.msk [vmem:[%s3111_s3] sm:$0xf] %vm1634_vm1, %v1856_v8  ;;  %1655 = vst.msk [vmem:[%s3111_s3 + $0x50] sm:$0xf] %vm1634_vm1, %v1876_v7  ;;  %v1857_v17 = vpack.c.bf16 %v1455_v54, %v1455_v54  ;;  %v1877_v12 = vpack.c.bf16 %v1475_v32, %v1475_v32  ;;  %v1992_v29 = vadd.f32 %v2769_v19, %v1142_v28  ;;  %v1948_v58 = vpop.f32.mrb[76].mxu1  ;;  %v1144_v61 = vpop.f32.mrb[5].mxu0 }
 0x1ae   :  { %1658 = vst.msk [vmem:[%s3111_s3 + $0x5c] sm:$0xf] %vm1634_vm1, %v1879_v14  ;;  %v1416_v22 = vadd.f32 %v1948_v58, %v2867_v47  ;;  %v1407_v63 = vpop.f32.mrb[77].mxu1  ;;  %v1145_v16 = vpop.f32.mrb[6].mxu0 }
 0x1af   :  { %1636 = vst.msk [vmem:[%s3111_s3 + $0x4] sm:$0xf] %vm1634_vm1, %v1857_v17  ;;  %1656 = vst.msk [vmem:[%s3111_s3 + $0x54] sm:$0xf] %vm1634_vm1, %v1877_v12  ;;  %v1320_v3 = vadd.f32 %v1992_v29, %v2859_v5  ;;  %v1408_v31 = vadd.f32 %v1407_v63, %v2853_v35  ;;  %v1993_v6 = vadd.f32 %v2769_v19, %v1145_v16  ;;  %v1949_v9 = vpop.f32.mrb[78].mxu1  ;;  %v1147_v47 = vpop.f32.mrb[7].mxu0 }
 0x1b0   :  { %v1480_v2 = vmax.f32 %v1416_v22, 0.0  ;;  %v1419_v10 = vadd.f32 %v1949_v9, %v2872_v52  ;;  %v1410_v51 = vpop.f32.mrb[79].mxu1 }
 0x1b1   :  { %v1456_v0 = vmax.f32 %v1320_v3, 0.0  ;;  %v1478_v4 = vmax.f32 %v1408_v31, 0.0  ;;  %v1323_v18 = vadd.f32 %v1993_v6, %v2864_v11  ;;  %v1411_v60 = vadd.f32 %v1410_v51, %v2856_v40 }
 0x1b2   :  { %v1882_v13 = vpack.c.bf16 %v1480_v2, %v1480_v2  ;;  %v1481_v24 = vmax.f32 %v1419_v10, 0.0 }
 0x1b3   :  { %v1858_v26 = vpack.c.bf16 %v1456_v0, %v1456_v0  ;;  %v1880_v5 = vpack.c.bf16 %v1478_v4, %v1478_v4  ;;  %v1457_v27 = vmax.f32 %v1323_v18, 0.0  ;;  %v1479_v35 = vmax.f32 %v1411_v60, 0.0 }
 0x1b4   :  { %1661 = vst.msk [vmem:[%s3111_s3 + $0x68] sm:$0xf] %vm1634_vm1, %v1882_v13  ;;  %v1883_v34 = vpack.c.bf16 %v1481_v24, %v1481_v24  ;;  %v1150_v52 = vpop.f32.mrb[8].mxu0 }
 0x1b5   :  { %1637 = vst.msk [vmem:[%s3111_s3 + $0x8] sm:$0xf] %vm1634_vm1, %v1858_v26  ;;  %1659 = vst.msk [vmem:[%s3111_s3 + $0x60] sm:$0xf] %vm1634_vm1, %v1880_v5  ;;  %v1859_v40 = vpack.c.bf16 %v1457_v27, %v1457_v27  ;;  %v1881_v11 = vpack.c.bf16 %v1479_v35, %v1479_v35  ;;  %v1994_v36 = vadd.f32 %v2769_v19, %v1150_v52  ;;  %v1952_v38 = vpop.f32.mrb[80].mxu1  ;;  %v1152_v39 = vpop.f32.mrb[9].mxu0 }
 0x1b6   :  { %1662 = vst.msk [vmem:[%s3111_s3 + $0x6c] sm:$0xf] %vm1634_vm1, %v1883_v34  ;;  %v1432_v41 = vadd.f32 %v1952_v38, %v2896_v50  ;;  %v1423_v42 = vpop.f32.mrb[81].mxu1  ;;  %v1153_v37 = vpop.f32.mrb[10].mxu0 }
 0x1b7   :  { %1638 = vst.msk [vmem:[%s3111_s3 + $0xc] sm:$0xf] %vm1634_vm1, %v1859_v40  ;;  %1660 = vst.msk [vmem:[%s3111_s3 + $0x64] sm:$0xf] %vm1634_vm1, %v1881_v11  ;;  %v1328_v46 = vadd.f32 %v1994_v36, %v2877_v25  ;;  %v1424_v23 = vadd.f32 %v1423_v42, %v2883_v59  ;;  %v1995_v43 = vadd.f32 %v2769_v19, %v1153_v37  ;;  %v1953_v55 = vpop.f32.mrb[82].mxu1  ;;  %v1155_v50 = vpop.f32.mrb[11].mxu0 }
 0x1b8   :  { %v1484_v45 = vmax.f32 %v1432_v41, 0.0  ;;  %v1435_v48 = vadd.f32 %v1953_v55, %v2902_v57  ;;  %v1426_v49 = vpop.f32.mrb[83].mxu1 }
 0x1b9   :  { %v1458_v8 = vmax.f32 %v1328_v46, 0.0  ;;  %v1482_v7 = vmax.f32 %v1424_v23, 0.0  ;;  %v1331_v54 = vadd.f32 %v1995_v43, %v2885_v33  ;;  %v1427_v32 = vadd.f32 %v1426_v49, %v2888_v1 }
 0x1ba   :  { %v1886_v14 = vpack.c.bf16 %v1484_v45, %v1484_v45  ;;  %v1485_v28 = vmax.f32 %v1435_v48, 0.0 }
 0x1bb   :  { %v1860_v17 = vpack.c.bf16 %v1458_v8, %v1458_v8  ;;  %v1884_v25 = vpack.c.bf16 %v1482_v7, %v1482_v7  ;;  %v1459_v12 = vmax.f32 %v1331_v54, 0.0  ;;  %v1483_v59 = vmax.f32 %v1427_v32, 0.0 }
 0x1bc   :  { %1665 = vst.msk [vmem:[%s3111_s3 + $0x78] sm:$0xf] %vm1634_vm1, %v1886_v14  ;;  %v1887_v29 = vpack.c.bf16 %v1485_v28, %v1485_v28  ;;  %v1158_v57 = vpop.f32.mrb[12].mxu0 }
 0x1bd   :  { %1639 = vst.msk [vmem:[%s3111_s3 + $0x10] sm:$0xf] %vm1634_vm1, %v1860_v17  ;;  %1663 = vst.msk [vmem:[%s3111_s3 + $0x70] sm:$0xf] %vm1634_vm1, %v1884_v25  ;;  %v1861_v33 = vpack.c.bf16 %v1459_v12, %v1459_v12  ;;  %v1885_v1 = vpack.c.bf16 %v1483_v59, %v1483_v59  ;;  %v1996_v58 = vadd.f32 %v2769_v19, %v1158_v57  ;;  %v1956_v61 = vpop.f32.mrb[84].mxu1  ;;  %v1160_v22 = vpop.f32.mrb[13].mxu0 }
 0x1be   :  { %1666 = vst.msk [vmem:[%s3111_s3 + $0x7c] sm:$0xf] %vm1634_vm1, %v1887_v29  ;;  %v1448_v63 = vadd.f32 %v1956_v61, %v2945_v62  ;;  %v1439_v16 = vpop.f32.mrb[85].mxu1  ;;  %v1161_v3 = vpop.f32.mrb[14].mxu0 }
 0x1bf   :  { %1640 = vst.msk [vmem:[%s3111_s3 + $0x14] sm:$0xf] %vm1634_vm1, %v1861_v33  ;;  %1664 = vst.msk [vmem:[%s3111_s3 + $0x74] sm:$0xf] %vm1634_vm1, %v1885_v1  ;;  %v1336_v31 = vadd.f32 %v1996_v58, %v2875_v21  ;;  %v1440_v6 = vadd.f32 %v1439_v16, %v2917_v20  ;;  %v1997_v9 = vadd.f32 %v2769_v19, %v1161_v3  ;;  %v1957_v47 = vpop.f32.mrb[86].mxu1  ;;  %v1163_v62 = vpop.f32.mrb[15].mxu0 }
 0x1c0   :  { %v1488_v2 = vmax.f32 %v1448_v63, 0.0  ;;  %v1451_v10 = vadd.f32 %v1957_v47, %v2950_v30  ;;  %v1442_v51 = vpop.f32.mrb[87].mxu1 }
 0x1c1   :  { %v1460_v0 = vmax.f32 %v1336_v31, 0.0  ;;  %v1486_v4 = vmax.f32 %v1440_v6, 0.0  ;;  %v1339_v18 = vadd.f32 %v1997_v9, %v2880_v15  ;;  %v1443_v60 = vadd.f32 %v1442_v51, %v2922_v53 }
 0x1c2   :  { %v1890_v13 = vpack.c.bf16 %v1488_v2, %v1488_v2  ;;  %v1489_v24 = vmax.f32 %v1451_v10, 0.0 }
 0x1c3   :  { %v1862_v26 = vpack.c.bf16 %v1460_v0, %v1460_v0  ;;  %v1888_v21 = vpack.c.bf16 %v1486_v4, %v1486_v4  ;;  %v1461_v5 = vmax.f32 %v1339_v18, 0.0  ;;  %v1487_v20 = vmax.f32 %v1443_v60, 0.0 }
 0x1c4   :  { %1669 = vst.msk [vmem:[%s3111_s3 + $0x88] sm:$0xf] %vm1634_vm1, %v1890_v13  ;;  %v1891_v27 = vpack.c.bf16 %v1489_v24, %v1489_v24  ;;  %v1166_v30 = vpop.f32.mrb[16].mxu0 }
 0x1c5   :  { %1641 = vst.msk [vmem:[%s3111_s3 + $0x18] sm:$0xf] %vm1634_vm1, %v1862_v26  ;;  %1667 = vst.msk [vmem:[%s3111_s3 + $0x80] sm:$0xf] %vm1634_vm1, %v1888_v21  ;;  %v1863_v15 = vpack.c.bf16 %v1461_v5, %v1461_v5  ;;  %v1889_v53 = vpack.c.bf16 %v1487_v20, %v1487_v20  ;;  %v1998_v35 = vadd.f32 %v2769_v19, %v1166_v30  ;;  %v1168_v34 = vpop.f32.mrb[17].mxu0 }
 0x1c6   :  { %1670 = vst.msk [vmem:[%s3111_s3 + $0x8c] sm:$0xf] %vm1634_vm1, %v1891_v27  ;;  %v1169_v52 = vpop.f32.mrb[18].mxu0 }
 0x1c7   :  { %1642 = vst.msk [vmem:[%s3111_s3 + $0x1c] sm:$0xf] %vm1634_vm1, %v1863_v15  ;;  %1668 = vst.msk [vmem:[%s3111_s3 + $0x84] sm:$0xf] %vm1634_vm1, %v1889_v53  ;;  %v1344_v40 = vadd.f32 %v1998_v35, %v2892_v44  ;;  %v1999_v11 = vadd.f32 %v2769_v19, %v1169_v52  ;;  %v1171_v36 = vpop.f32.mrb[19].mxu0 }
 0x1c9   :  { %v1462_v38 = vmax.f32 %v1344_v40, 0.0  ;;  %v1347_v39 = vadd.f32 %v1999_v11, %v2899_v56 }
 0x1cb   :  { %v1864_v41 = vpack.c.bf16 %v1462_v38, %v1462_v38  ;;  %v1463_v42 = vmax.f32 %v1347_v39, 0.0 }
 0x1cd   :  { %1643 = vst.msk [vmem:[%s3111_s3 + $0x20] sm:$0xf] %vm1634_vm1, %v1864_v41  ;;  %v1865_v37 = vpack.c.bf16 %v1463_v42, %v1463_v42 }
 0x1cf   :  { %1644 = vst.msk [vmem:[%s3111_s3 + $0x24] sm:$0xf] %vm1634_vm1, %v1865_v37 }

// kernel: value_network_forward.7
= control target key start
LH: loop header
LB: loop body
LE: loop exit
PB: predicated region body
PF: predicated region fallthrough
CT: control target
= control target key end

     0   :  { %s6938_s26 = smov 0   ;;  %s7934_s0 = inlined_call_operand.vmem [shape: bf16[2,9216], index: 0, kind: input, shape index: {}]   ;;  %s7935_s1 = inlined_call_operand.vmem [shape: bf16[9216,256], index: 1, kind: input, shape index: {}]   ;;  %s7936_s2 = inlined_call_operand.vmem [shape: f32[1,256], index: 2, kind: input, shape index: {}]   ;;  %s7937_s3 = inlined_call_operand.vmem [shape: bf16[256,256], index: 3, kind: input, shape index: {}]   ;;  %s7938_s4 = inlined_call_operand.vmem [shape: f32[1,256], index: 4, kind: input, shape index: {}]   ;;  %s7939_s5 = inlined_call_operand.vmem [shape: f32[256,1], index: 5, kind: input, shape index: {}]   ;;  %s7940_s6 = inlined_call_operand.<no memory space> [shape: f32[1,1], index: 6, kind: input, shape index: {}]   ;;  %s7941_s7 = inlined_call_operand.vmem [shape: f32[2,1], index: 7, kind: output, shape index: {}]  }
   0x1   :  { %v12_v0 = vstv %s7940_s6 }
   0x2   :  { %13 = vst [vmem:[#allocation3] sm:$0x1] %v12_v0 }
   0x3 LB: > { %s6944_s27 = sadd.s32 4294967295, %s6890_s26   ;;  %p5206_p0 = scmp.ge.s32.totalorder %s6890_s26, 1  ;;  %s6890_s26 = sphi %s6938_s26, %s19_s26  }
   0x4   : > { %p246_p1 = scmp.lt.s32.totalorder %s6890_s26, 3 }
   0x6   : > { %p247_p2 = pnand %p5206_p0, %p246_p1 }
   0x7   : > { %s278_s6 = smul.u32 (!%p247_p2), 36, %s6944_s27  ;;  %p5209_p5 = scmp.ne.s32.totalorder (!%p247_p2), %s6944_s27, 0 }
   0x8   : > { %250 = sbr.rel (%p247_p2) target bundleno = 1283 (0x503), region = 48 }
   0x9   : > { %s283_s28 = smul.u32 (!%p247_p2), 576, %s6944_s27  ;;  %p279_p3 = scmp.lt.s32.totalorder (!%p247_p2), %s278_s6, 71 }
   0xb   : > { %p284_p4 = scmp.lt.s32.totalorder (!%p247_p2), %s283_s28, 1151 }
   0xf   : > { %s7943_s6 = smov (!%p279_p3, %s278_s6), 71  ;;  %s7945_s28 = smov (!%p284_p4, %s283_s28), 1151 }
  0x10   : > { %s6953_s8 = scalar_lea.vmem %s7934_s0, %s7943_s6  ;;  %s5823_s9 = sshll.u32 %s7945_s28, 3  ;;  %v6892_v1 = vmov (!%p5209_p5), 0.0  }
  0x11   : > { %s6958_s12 = scalar_lea.vmem %s7935_s1, %s5823_s9  ;;  %293 = sbr.rel (%p5209_p5) target bundleno = 24 (0x18), region = 52  ;;  %294 = vst [vmem:[#allocation2] sm:$0xf] (!%p5209_p5), %v6892_v1 }
  0x18 PF: > { %v5968_v2 = vld [vmem:[%s6958_s12 + $0x4] ss:$8 sps:$4 sm:$0xff]   ;;  %v5972_v4 = vld [vmem:[%s6958_s12] ss:$8 sps:$4 sm:$0xff]   ;;  %v5974_v6 = vld [vmem:[%s6958_s12 + $0x14] ss:$8 sps:$4 sm:$0xff]   ;;  %v886_v42 = vlaneseq }
  0x19   : > { %v5970_v3 = vld [vmem:[%s6958_s12 + $0x904] ss:$8 sps:$4 sm:$0xff]   ;;  %4018 = vmatprep.subr.bf16.mxu1 %v5968_v2  ;;  %v5973_v5 = vld [vmem:[%s6958_s12 + $0x900] ss:$8 sps:$4 sm:$0xff]   ;;  %v5976_v7 = vld [vmem:[%s6958_s12 + $0x914] ss:$8 sps:$4 sm:$0xff]  }
  0x1a   : > { %4387 = vmatprep.subr.bf16.mxu0 %v5970_v3  ;;  %4019 = vmatpush1.bf16.msra.mxu1 %v5972_v4  ;;  %v5978_v8 = vld [vmem:[%s6958_s12 + $0x10] ss:$8 sps:$4 sm:$0xff]   ;;  %v5980_v10 = vld [vmem:[%s6958_s12 + $0x24] ss:$8 sps:$4 sm:$0xff]   ;;  %v5984_v12 = vld [vmem:[%s6958_s12 + $0x20] ss:$8 sps:$4 sm:$0xff]  }
  0x1b   : > { %4388 = vmatpush1.bf16.msra.mxu0 %v5973_v5  ;;  %4020 = vmatprep.subr.bf16.mxu1 %v5974_v6  ;;  %v5979_v9 = vld [vmem:[%s6958_s12 + $0x910] ss:$8 sps:$4 sm:$0xff]   ;;  %v5982_v11 = vld [vmem:[%s6958_s12 + $0x924] ss:$8 sps:$4 sm:$0xff]   ;;  %v5985_v13 = vld [vmem:[%s6958_s12 + $0x920] ss:$8 sps:$4 sm:$0xff]  }
  0x1c   : > { %4389 = vmatprep.subr.bf16.mxu0 %v5976_v7  ;;  %v5986_v14 = vld [vmem:[%s6958_s12 + $0x34] ss:$8 sps:$4 sm:$0xff]   ;;  %v5990_v16 = vld [vmem:[%s6958_s12 + $0x30] ss:$8 sps:$4 sm:$0xff]   ;;  %v5992_v18 = vld [vmem:[%s6958_s12 + $0x44] ss:$8 sps:$4 sm:$0xff]  }
  0x1d   : > { %v5988_v15 = vld [vmem:[%s6958_s12 + $0x934] ss:$8 sps:$4 sm:$0xff]   ;;  %v5991_v17 = vld [vmem:[%s6958_s12 + $0x930] ss:$8 sps:$4 sm:$0xff]   ;;  %v5994_v19 = vld [vmem:[%s6958_s12 + $0x944] ss:$8 sps:$4 sm:$0xff]  }
  0x1e   : > { %4021 = vmatpush1.bf16.msra.mxu1 %v5978_v8  ;;  %v5996_v20 = vld [vmem:[%s6958_s12 + $0x40] ss:$8 sps:$4 sm:$0xff]   ;;  %v5998_v22 = vld [vmem:[%s6958_s12 + $0x54] ss:$8 sps:$4 sm:$0xff]   ;;  %v6002_v24 = vld [vmem:[%s6958_s12 + $0x50] ss:$8 sps:$4 sm:$0xff]  }
  0x1f   : > { %4390 = vmatpush1.bf16.msra.mxu0 %v5979_v9  ;;  %4022 = vmatprep.subr.bf16.mxu1 %v5980_v10  ;;  %v5997_v21 = vld [vmem:[%s6958_s12 + $0x940] ss:$8 sps:$4 sm:$0xff]   ;;  %v6000_v23 = vld [vmem:[%s6958_s12 + $0x954] ss:$8 sps:$4 sm:$0xff]   ;;  %v6003_v25 = vld [vmem:[%s6958_s12 + $0x950] ss:$8 sps:$4 sm:$0xff]  }
  0x20   : > { %4391 = vmatprep.subr.bf16.mxu0 %v5982_v11  ;;  %v6004_v26 = vld [vmem:[%s6958_s12 + $0x64] ss:$8 sps:$4 sm:$0xff]   ;;  %v6008_v28 = vld [vmem:[%s6958_s12 + $0x60] ss:$8 sps:$4 sm:$0xff]   ;;  %v6010_v30 = vld [vmem:[%s6958_s12 + $0x74] ss:$8 sps:$4 sm:$0xff]  }
  0x21   : > { %v6006_v27 = vld [vmem:[%s6958_s12 + $0x964] ss:$8 sps:$4 sm:$0xff]   ;;  %v6009_v29 = vld [vmem:[%s6958_s12 + $0x960] ss:$8 sps:$4 sm:$0xff]   ;;  %v6012_v31 = vld [vmem:[%s6958_s12 + $0x974] ss:$8 sps:$4 sm:$0xff]  }
  0x22   : > { %4023 = vmatpush1.bf16.msra.mxu1 %v5984_v12  ;;  %v6014_v32 = vld [vmem:[%s6958_s12 + $0x70] ss:$8 sps:$4 sm:$0xff]   ;;  %v6016_v34 = vld [vmem:[%s6958_s12 + $0x84] ss:$8 sps:$4 sm:$0xff]   ;;  %v6020_v36 = vld [vmem:[%s6958_s12 + $0x80] ss:$8 sps:$4 sm:$0xff]  }
  0x23   : > { %4392 = vmatpush1.bf16.msra.mxu0 %v5985_v13  ;;  %4024 = vmatprep.subr.bf16.mxu1 %v5986_v14  ;;  %v6015_v33 = vld [vmem:[%s6958_s12 + $0x970] ss:$8 sps:$4 sm:$0xff]   ;;  %v6018_v35 = vld [vmem:[%s6958_s12 + $0x984] ss:$8 sps:$4 sm:$0xff]   ;;  %v6021_v37 = vld [vmem:[%s6958_s12 + $0x980] ss:$8 sps:$4 sm:$0xff]  }
  0x24   : > { %4393 = vmatprep.subr.bf16.mxu0 %v5988_v15  ;;  %v6022_v38 = vld [vmem:[%s6958_s12 + $0x94] ss:$8 sps:$4 sm:$0xff]   ;;  %v6893_v40 = vmov 1966171168   ;;  %v6026_v43 = vld [vmem:[%s6958_s12 + $0x90] ss:$8 sps:$4 sm:$0xff]  }
  0x25   : > { %v6024_v39 = vld [vmem:[%s6958_s12 + $0x994] ss:$8 sps:$4 sm:$0xff]   ;;  %v884_v41 = vunpack.c.l.s4 %v6893_v40  ;;  %v6027_v44 = vld [vmem:[%s6958_s12 + $0x990] ss:$8 sps:$4 sm:$0xff]   ;;  %v6028_v45 = vld [vmem:[%s6958_s12 + $0xa4] ss:$8 sps:$4 sm:$0xff]  }
  0x26   : > { %4025 = vmatpush1.bf16.msra.mxu1 %v5990_v16  ;;  %v6030_v46 = vld [vmem:[%s6958_s12 + $0x9a4] ss:$8 sps:$4 sm:$0xff]   ;;  %v7003_v48 = vshrl.u32 %v886_v42, 7  ;;  %v6032_v49 = vld [vmem:[%s6958_s12 + $0xa0] ss:$8 sps:$4 sm:$0xff]   ;;  %v298_v58 = vld [vmem:[%s6953_s8 + $0x10] sm:$0xff] }
  0x27   : > { %4394 = vmatpush1.bf16.msra.mxu0 %v5991_v17  ;;  %4026 = vmatprep.subr.bf16.mxu1 %v5992_v18  ;;  %v885_v47 = vunpack.c.0.s8 %v884_v41  ;;  %v6033_v50 = vld [vmem:[%s6958_s12 + $0x9a0] ss:$8 sps:$4 sm:$0xff]   ;;  %v6034_v51 = vld [vmem:[%s6958_s12 + $0xb4] ss:$8 sps:$4 sm:$0xff]   ;;  %v6038_v55 = vld [vmem:[%s6958_s12 + $0xb0] ss:$8 sps:$4 sm:$0xff]   ;;  %v980_v11 = vcombine.high %v298_v58, %v298_v58 }
  0x28   : > { %4395 = vmatprep.subr.bf16.mxu0 %v5994_v19  ;;  %v6036_v52 = vld [vmem:[%s6958_s12 + $0x9b4] ss:$8 sps:$4 sm:$0xff]   ;;  %v7013_v54 = vld [vmem:[%s6953_s8] sm:$0xff]  ;;  %v6039_v57 = vld [vmem:[%s6958_s12 + $0x9b0] ss:$8 sps:$4 sm:$0xff]   ;;  %p5787_p6 = scmp.ne.s32.totalorder %s6944_s27, 1 }
  0x29   : > { %v7010_v53 = vsub.s32 %v885_v47, %v7003_v48  ;;  %v6040_v59 = vld [vmem:[%s6958_s12 + $0xc4] ss:$8 sps:$4 sm:$0xff]   ;;  %v6044_v1 = vld [vmem:[%s6958_s12 + $0xc0] ss:$8 sps:$4 sm:$0xff]   ;;  %v6046_v3 = vld [vmem:[%s6958_s12 + $0xd4] ss:$8 sps:$4 sm:$0xff]  }
  0x2a   : > { %4027 = vmatpush1.bf16.msra.mxu1 %v5996_v20  ;;  %v6042_v60 = vld [vmem:[%s6958_s12 + $0x9c4] ss:$8 sps:$4 sm:$0xff]   ;;  %v6045_v2 = vld [vmem:[%s6958_s12 + $0x9c0] ss:$8 sps:$4 sm:$0xff]   ;;  %v6048_v4 = vld [vmem:[%s6958_s12 + $0x9d4] ss:$8 sps:$4 sm:$0xff]  }
  0x2b   : > { %4396 = vmatpush1.bf16.msra.mxu0 %v5997_v21  ;;  %4028 = vmatprep.subr.bf16.mxu1 %v5998_v22  ;;  %v889_v56 = vrot.slane %v7013_v54, %v7010_v53  ;;  %v987_v62 = vrot.slane %v298_v58, %v7010_v53  ;;  %v6050_v7 = vld [vmem:[%s6958_s12 + $0xd0] ss:$8 sps:$4 sm:$0xff]   ;;  %v6052_v9 = vld [vmem:[%s6958_s12 + $0xe4] ss:$8 sps:$4 sm:$0xff]   ;;  %v6056_v12 = vld [vmem:[%s6958_s12 + $0xe0] ss:$8 sps:$4 sm:$0xff]   ;;  %v7045_v16 = vrot.slane %v980_v11, %v7010_v53 }
  0x2c   : > { %4397 = vmatprep.subr.bf16.mxu0 %v6000_v23  ;;  %v6051_v8 = vld [vmem:[%s6958_s12 + $0x9d0] ss:$8 sps:$4 sm:$0xff]   ;;  %v6054_v10 = vld [vmem:[%s6958_s12 + $0x9e4] ss:$8 sps:$4 sm:$0xff]   ;;  %v6057_v13 = vld [vmem:[%s6958_s12 + $0x9e0] ss:$8 sps:$4 sm:$0xff]  }
  0x2d   : > { %v897_v61 = vcombine.high %v889_v56, %v889_v56  ;;  %v995_v0 = vcombine.high %v987_v62, %v987_v62  ;;  %v6058_v14 = vld [vmem:[%s6958_s12 + $0xf4] ss:$8 sps:$4 sm:$0xff]   ;;  %v7048_v17 = vrot.slane %v987_v62, %v7010_v53  ;;  %v6062_v18 = vld [vmem:[%s6958_s12 + $0xf0] ss:$8 sps:$4 sm:$0xff]   ;;  %v6067_v20 = vld [vmem:[%s6958_s12 + $0x104] ss:$8 sps:$4 sm:$0xff]   ;;  %v996_v22 = vcombine.high %v7045_v16, %v7045_v16 }
  0x2e   : > { %4029 = vmatpush1.bf16.msra.mxu1 %v6002_v24  ;;  %v6060_v15 = vld [vmem:[%s6958_s12 + $0x9f4] ss:$8 sps:$4 sm:$0xff]   ;;  %v6063_v19 = vld [vmem:[%s6958_s12 + $0x9f0] ss:$8 sps:$4 sm:$0xff]   ;;  %v6071_v21 = vld [vmem:[%s6958_s12 + $0xa04] ss:$8 sps:$4 sm:$0xff]   ;;  %v7057_v23 = vrot.slane %v889_v56, %v7010_v53 }
  0x2f   : > { %4398 = vmatpush1.bf16.msra.mxu0 %v6003_v25  ;;  %4030 = vmatprep.subr.bf16.mxu1 %v6004_v26  ;;  %v7024_v63 = vrot.slane %v897_v61, %v7010_v53  ;;  %v7031_v5 = vrot.slane %v995_v0, %v7010_v53  ;;  %v1025_v24 = vcombine.high %v7048_v17, %v7048_v17  ;;  %v6065_v25 = vld [vmem:[%s6958_s12 + $0x100] ss:$8 sps:$4 sm:$0xff]   ;;  %v6087_v40 = vld [vmem:[%s6958_s12 + $0xa30] ss:$8 sps:$4 sm:$0xff]   ;;  %v6092_v41 = vld [vmem:[%s6958_s12 + $0x144] ss:$8 sps:$4 sm:$0xff]  }
  0x30   : > { %4399 = vmatprep.subr.bf16.mxu0 %v6006_v27  ;;  %v6069_v26 = vld [vmem:[%s6958_s12 + $0xa00] ss:$8 sps:$4 sm:$0xff]   ;;  %v6074_v27 = vld [vmem:[%s6958_s12 + $0x114] ss:$8 sps:$4 sm:$0xff]   ;;  %v6095_v42 = vld [vmem:[%s6958_s12 + $0xa44] ss:$8 sps:$4 sm:$0xff]  }
  0x31   : > { %4050 = vmatprep.mubr.bf16.mxu1 %v7024_v63  ;;  %v1027_v6 = vcombine.high %v7031_v5, %v7031_v5  ;;  %v6096_v47 = vld [vmem:[%s6958_s12 + $0x150] ss:$8 sps:$4 sm:$0xff]   ;;  %v6110_v56 = vld [vmem:[%s6958_s12 + $0x174] ss:$8 sps:$4 sm:$0xff]   ;;  %v6119_v61 = vld [vmem:[%s6958_s12 + $0xa84] ss:$8 sps:$4 sm:$0xff]  }
  0x32   : > { %4031 = vmatpush1.bf16.msra.mxu1 %v6008_v28  ;;  %v6077_v28 = vld [vmem:[%s6958_s12 + $0xa14] ss:$8 sps:$4 sm:$0xff]   ;;  %v6108_v58 = vld [vmem:[%s6958_s12 + $0x170] ss:$8 sps:$4 sm:$0xff]   ;;  %v6114_v62 = vld [vmem:[%s6958_s12 + $0x180] ss:$8 sps:$4 sm:$0xff]  }
  0x33   : > { %4400 = vmatpush1.bf16.msra.mxu0 %v6009_v29  ;;  %4032 = vmatprep.subr.bf16.mxu1 %v6010_v30  ;;  %v929_v29 = vcombine.high %v7024_v63, %v7024_v63  ;;  %v7068_v30 = vrot.slane %v996_v22, %v7010_v53  ;;  %v6117_v63 = vld [vmem:[%s6958_s12 + $0xa80] ss:$8 sps:$4 sm:$0xff]   ;;  %v6122_v0 = vld [vmem:[%s6958_s12 + $0x194] ss:$8 sps:$4 sm:$0xff]   ;;  %v6132_v11 = vld [vmem:[%s6958_s12 + $0x1b0] ss:$8 sps:$4 sm:$0xff]  }
  0x34   : > { %4401 = vmatprep.subr.bf16.mxu0 %v6012_v31  ;;  %4419 = vmatprep.mubr.bf16.mxu0 %v1027_v6  ;;  %v6072_v31 = vld [vmem:[%s6958_s12 + $0x110] ss:$8 sps:$4 sm:$0xff]   ;;  %v6131_v6 = vld [vmem:[%s6958_s12 + $0xaa4] ss:$8 sps:$4 sm:$0xff]   ;;  %vm5164_vm0 = vcmask (!%p5787_p6), 1024  }
  0x35   : > { %v6147_v22 = vld [vmem:[%s6958_s12 + $0xad0] ss:$8 sps:$4 sm:$0xff]  }
  0x36   : > { %4033 = vmatpush1.bf16.msra.mxu1 %v6014_v32  ;;  %v6075_v32 = vld [vmem:[%s6958_s12 + $0xa10] ss:$8 sps:$4 sm:$0xff]  }
  0x37   : > { %4402 = vmatpush1.bf16.msra.mxu0 %v6015_v33  ;;  %4034 = vmatprep.subr.bf16.mxu1 %v6016_v34  ;;  %v6080_v33 = vld [vmem:[%s6958_s12 + $0x124] ss:$8 sps:$4 sm:$0xff]  }
  0x38   : > { %4403 = vmatprep.subr.bf16.mxu0 %v6018_v35  ;;  %v6083_v34 = vld [vmem:[%s6958_s12 + $0xa24] ss:$8 sps:$4 sm:$0xff]   ;;  %v6078_v35 = vld [vmem:[%s6958_s12 + $0x120] ss:$8 sps:$4 sm:$0xff]  }
  0x3a   : > { %4035 = vmatpush1.bf16.msra.mxu1 %v6020_v36  ;;  %v6081_v36 = vld [vmem:[%s6958_s12 + $0xa20] ss:$8 sps:$4 sm:$0xff]  }
  0x3b   : > { %4404 = vmatpush1.bf16.msra.mxu0 %v6021_v37  ;;  %4036 = vmatprep.subr.bf16.mxu1 %v6022_v38  ;;  %v6086_v37 = vld [vmem:[%s6958_s12 + $0x134] ss:$8 sps:$4 sm:$0xff]  }
  0x3c   : > { %4405 = vmatprep.subr.bf16.mxu0 %v6024_v39  ;;  %v6089_v38 = vld [vmem:[%s6958_s12 + $0xa34] ss:$8 sps:$4 sm:$0xff]   ;;  %v6084_v39 = vld [vmem:[%s6958_s12 + $0x130] ss:$8 sps:$4 sm:$0xff]  }
  0x3e   : > { %4037 = vmatpush1.bf16.msra.mxu1 %v6026_v43  ;;  %v6090_v43 = vld [vmem:[%s6958_s12 + $0x140] ss:$8 sps:$4 sm:$0xff]  }
  0x3f   : > { %4406 = vmatpush1.bf16.msra.mxu0 %v6027_v44  ;;  %4038 = vmatprep.subr.bf16.mxu1 %v6028_v45  ;;  %v6093_v44 = vld [vmem:[%s6958_s12 + $0xa40] ss:$8 sps:$4 sm:$0xff]   ;;  %v6098_v45 = vld [vmem:[%s6958_s12 + $0x154] ss:$8 sps:$4 sm:$0xff]  }
  0x40   : > { %4407 = vmatprep.subr.bf16.mxu0 %v6030_v46  ;;  %v6101_v46 = vld [vmem:[%s6958_s12 + $0xa54] ss:$8 sps:$4 sm:$0xff]  }
  0x42   : > { %4039 = vmatpush1.bf16.msra.mxu1 %v6032_v49  ;;  %v6099_v49 = vld [vmem:[%s6958_s12 + $0xa50] ss:$8 sps:$4 sm:$0xff]  }
  0x43   : > { %4408 = vmatpush1.bf16.msra.mxu0 %v6033_v50  ;;  %4040 = vmatprep.subr.bf16.mxu1 %v6034_v51  ;;  %v6104_v50 = vld [vmem:[%s6958_s12 + $0x164] ss:$8 sps:$4 sm:$0xff]  }
  0x44   : > { %4409 = vmatprep.subr.bf16.mxu0 %v6036_v52  ;;  %v6107_v51 = vld [vmem:[%s6958_s12 + $0xa64] ss:$8 sps:$4 sm:$0xff]   ;;  %v6102_v52 = vld [vmem:[%s6958_s12 + $0x160] ss:$8 sps:$4 sm:$0xff]  }
  0x46   : > { %4041 = vmatpush1.bf16.msra.mxu1 %v6038_v55  ;;  %v6105_v55 = vld [vmem:[%s6958_s12 + $0xa60] ss:$8 sps:$4 sm:$0xff]  }
  0x47   : > { %4410 = vmatpush1.bf16.msra.mxu0 %v6039_v57  ;;  %4042 = vmatprep.subr.bf16.mxu1 %v6040_v59  ;;  %v6113_v57 = vld [vmem:[%s6958_s12 + $0xa74] ss:$8 sps:$4 sm:$0xff]   ;;  %v6111_v59 = vld [vmem:[%s6958_s12 + $0xa70] ss:$8 sps:$4 sm:$0xff]  }
  0x48   : > { %4411 = vmatprep.subr.bf16.mxu0 %v6042_v60  ;;  %v6116_v60 = vld [vmem:[%s6958_s12 + $0x184] ss:$8 sps:$4 sm:$0xff]  }
  0x4a   : > { %4043 = vmatpush1.bf16.msra.mxu1 %v6044_v1  ;;  %v6125_v1 = vld [vmem:[%s6958_s12 + $0xa94] ss:$8 sps:$4 sm:$0xff]  }
  0x4b   : > { %4412 = vmatpush1.bf16.msra.mxu0 %v6045_v2  ;;  %4044 = vmatprep.subr.bf16.mxu1 %v6046_v3  ;;  %v6120_v2 = vld [vmem:[%s6958_s12 + $0x190] ss:$8 sps:$4 sm:$0xff]  }
  0x4c   : > { %4413 = vmatprep.subr.bf16.mxu0 %v6048_v4  ;;  %v6123_v3 = vld [vmem:[%s6958_s12 + $0xa90] ss:$8 sps:$4 sm:$0xff]   ;;  %v6128_v4 = vld [vmem:[%s6958_s12 + $0x1a4] ss:$8 sps:$4 sm:$0xff]  }
  0x4e   : > { %4045 = vmatpush1.bf16.msra.mxu1 %v6050_v7  ;;  %v6126_v7 = vld [vmem:[%s6958_s12 + $0x1a0] ss:$8 sps:$4 sm:$0xff]  }
  0x4f   : > { %4414 = vmatpush1.bf16.msra.mxu0 %v6051_v8  ;;  %4046 = vmatprep.subr.bf16.mxu1 %v6052_v9  ;;  %v6129_v8 = vld [vmem:[%s6958_s12 + $0xaa0] ss:$8 sps:$4 sm:$0xff]   ;;  %v6134_v9 = vld [vmem:[%s6958_s12 + $0x1b4] ss:$8 sps:$4 sm:$0xff]  }
  0x50   : > { %4415 = vmatprep.subr.bf16.mxu0 %v6054_v10  ;;  %v6137_v10 = vld [vmem:[%s6958_s12 + $0xab4] ss:$8 sps:$4 sm:$0xff]  }
  0x52   : > { %4047 = vmatpush1.bf16.msra.mxu1 %v6056_v12  ;;  %v6135_v12 = vld [vmem:[%s6958_s12 + $0xab0] ss:$8 sps:$4 sm:$0xff]  }
  0x53   : > { %4416 = vmatpush1.bf16.msra.mxu0 %v6057_v13  ;;  %4048 = vmatprep.subr.bf16.mxu1 %v6058_v14  ;;  %v6140_v13 = vld [vmem:[%s6958_s12 + $0x1c4] ss:$8 sps:$4 sm:$0xff]  }
  0x54   : > { %4417 = vmatprep.subr.bf16.mxu0 %v6060_v15  ;;  %v6143_v14 = vld [vmem:[%s6958_s12 + $0xac4] ss:$8 sps:$4 sm:$0xff]   ;;  %v6138_v15 = vld [vmem:[%s6958_s12 + $0x1c0] ss:$8 sps:$4 sm:$0xff]  }
  0x56   : > { %4049 = vmatpush1.bf16.msra.mxu1 %v6062_v18  ;;  %v6141_v18 = vld [vmem:[%s6958_s12 + $0xac0] ss:$8 sps:$4 sm:$0xff]  }
  0x57   : > { %4418 = vmatpush1.bf16.msra.mxu0 %v6063_v19  ;;  %4059 = vmatprep.subr.bf16.mxu1 %v6067_v20  ;;  %v6146_v19 = vld [vmem:[%s6958_s12 + $0x1d4] ss:$8 sps:$4 sm:$0xff]  }
  0x58   : > { %4428 = vmatprep.subr.bf16.mxu0 %v6071_v21  ;;  %v6149_v20 = vld [vmem:[%s6958_s12 + $0xad4] ss:$8 sps:$4 sm:$0xff]   ;;  %v6144_v21 = vld [vmem:[%s6958_s12 + $0x1d0] ss:$8 sps:$4 sm:$0xff]  }
  0x59   : > { %4051 = vmatmul.mubr.bf16.vlgmr.msra.gmra.mrb[0].mxu1 %v7057_v23 }
  0x5a   : > { %4420 = vmatmul.mubr.bf16.vlgmr.msra.gmra.mrb[0].mxu0 %v1025_v24  ;;  %4060 = vmatpush1.bf16.msra.mxu1 %v6065_v25  ;;  %v6152_v24 = vld [vmem:[%s6958_s12 + $0x1e4] ss:$8 sps:$4 sm:$0xff]  }
  0x5b   : > { %4429 = vmatpush1.bf16.msra.mxu0 %v6069_v26  ;;  %4061 = vmatprep.subr.bf16.mxu1 %v6074_v27  ;;  %v6155_v25 = vld [vmem:[%s6958_s12 + $0xae4] ss:$8 sps:$4 sm:$0xff]   ;;  %v882_v26 = vcombine.high %v7013_v54, %v7013_v54  ;;  %v6150_v27 = vld [vmem:[%s6958_s12 + $0x1e0] ss:$8 sps:$4 sm:$0xff]   ;;  %v6159_v54 = vld [vmem:[%s6958_s12 + $0xaf0] ss:$8 sps:$4 sm:$0xff]  }
  0x5c   : > { %4430 = vmatprep.subr.bf16.mxu0 %v6077_v28  ;;  %4091 = vmatprep.mubr.bf16.mxu1 %v929_v29  ;;  %v6153_v28 = vld [vmem:[%s6958_s12 + $0xae0] ss:$8 sps:$4 sm:$0xff]   ;;  %v6158_v29 = vld [vmem:[%s6958_s12 + $0x1f4] ss:$8 sps:$4 sm:$0xff]  }
  0x5d   : > { %4460 = vmatprep.mubr.bf16.mxu0 %v7068_v30 }
  0x5e   : > { %4062 = vmatpush1.bf16.msra.mxu1 %v6072_v31  ;;  %v6161_v31 = vld [vmem:[%s6958_s12 + $0xaf4] ss:$8 sps:$4 sm:$0xff]  }
  0x5f   : > { %4431 = vmatpush1.bf16.msra.mxu0 %v6075_v32  ;;  %4063 = vmatprep.subr.bf16.mxu1 %v6080_v33  ;;  %v7131_v32 = vrot.slane %v882_v26, %v7010_v53  ;;  %v6156_v33 = vld [vmem:[%s6958_s12 + $0x1f0] ss:$8 sps:$4 sm:$0xff]  }
  0x60   : > { %4432 = vmatprep.subr.bf16.mxu0 %v6083_v34  ;;  %v6164_v34 = vld [vmem:[%s6958_s12 + $0x204] ss:$8 sps:$4 sm:$0xff]   ;;  %v6231_v26 = vld [vmem:[%s6958_s12 + $0xbb0] ss:$8 sps:$4 sm:$0xff]  }
  0x62   : > { %4064 = vmatpush1.bf16.msra.mxu1 %v6078_v35  ;;  %v6167_v35 = vld [vmem:[%s6958_s12 + $0xb04] ss:$8 sps:$4 sm:$0xff]  }
  0x63   : > { %4433 = vmatpush1.bf16.msra.mxu0 %v6081_v36  ;;  %4065 = vmatprep.subr.bf16.mxu1 %v6086_v37  ;;  %v898_v36 = vcombine.high %v7131_v32, %v7131_v32  ;;  %v927_v37 = vcombine.high %v7057_v23, %v7057_v23  ;;  %v1028_v23 = vcombine.high %v7068_v30, %v7068_v30  ;;  %v6174_v30 = vld [vmem:[%s6958_s12 + $0x220] ss:$8 sps:$4 sm:$0xff]  }
  0x64   : > { %4434 = vmatprep.subr.bf16.mxu0 %v6089_v38  ;;  %v7143_v38 = vrot.slane %v7045_v16, %v7010_v53  ;;  %v6168_v16 = vld [vmem:[%s6958_s12 + $0x210] ss:$8 sps:$4 sm:$0xff]  }
  0x66   : > { %4066 = vmatpush1.bf16.msra.mxu1 %v6084_v39  ;;  %v6162_v39 = vld [vmem:[%s6958_s12 + $0x200] ss:$8 sps:$4 sm:$0xff]  }
  0x67   : > { %4435 = vmatpush1.bf16.msra.mxu0 %v6087_v40  ;;  %4067 = vmatprep.subr.bf16.mxu1 %v6092_v41  ;;  %v6165_v40 = vld [vmem:[%s6958_s12 + $0xb00] ss:$8 sps:$4 sm:$0xff]   ;;  %v6170_v41 = vld [vmem:[%s6958_s12 + $0x214] ss:$8 sps:$4 sm:$0xff]  }
  0x68   : > { %4436 = vmatprep.subr.bf16.mxu0 %v6095_v42  ;;  %v6173_v42 = vld [vmem:[%s6958_s12 + $0xb14] ss:$8 sps:$4 sm:$0xff]  }
  0x6a   : > { %4068 = vmatpush1.bf16.msra.mxu1 %v6090_v43  ;;  %v7150_v43 = vrot.slane %v898_v36, %v7010_v53  ;;  %v6248_v36 = vld [vmem:[%s6958_s12 + $0x2e4] ss:$8 sps:$4 sm:$0xff]  }
  0x6b   : > { %4437 = vmatpush1.bf16.msra.mxu0 %v6093_v44  ;;  %4069 = vmatprep.subr.bf16.mxu1 %v6098_v45  ;;  %v6171_v44 = vld [vmem:[%s6958_s12 + $0xb10] ss:$8 sps:$4 sm:$0xff]   ;;  %v6176_v45 = vld [vmem:[%s6958_s12 + $0x224] ss:$8 sps:$4 sm:$0xff]  }
  0x6c   : > { %4438 = vmatprep.subr.bf16.mxu0 %v6101_v46  ;;  %v6179_v46 = vld [vmem:[%s6958_s12 + $0xb24] ss:$8 sps:$4 sm:$0xff]  }
  0x6e   : > { %4070 = vmatpush1.bf16.msra.mxu1 %v6096_v47  ;;  %v6177_v47 = vld [vmem:[%s6958_s12 + $0xb20] ss:$8 sps:$4 sm:$0xff]  }
  0x6f   : > { %4439 = vmatpush1.bf16.msra.mxu0 %v6099_v49  ;;  %4071 = vmatprep.subr.bf16.mxu1 %v6104_v50  ;;  %v6182_v49 = vld [vmem:[%s6958_s12 + $0x234] ss:$8 sps:$4 sm:$0xff]  }
  0x70   : > { %4440 = vmatprep.subr.bf16.mxu0 %v6107_v51  ;;  %v6185_v50 = vld [vmem:[%s6958_s12 + $0xb34] ss:$8 sps:$4 sm:$0xff]   ;;  %v6180_v51 = vld [vmem:[%s6958_s12 + $0x230] ss:$8 sps:$4 sm:$0xff]  }
  0x72   : > { %4072 = vmatpush1.bf16.msra.mxu1 %v6102_v52  ;;  %v6183_v52 = vld [vmem:[%s6958_s12 + $0xb30] ss:$8 sps:$4 sm:$0xff]  }
  0x73   : > { %4441 = vmatpush1.bf16.msra.mxu0 %v6105_v55  ;;  %4073 = vmatprep.subr.bf16.mxu1 %v6110_v56  ;;  %v6188_v55 = vld [vmem:[%s6958_s12 + $0x244] ss:$8 sps:$4 sm:$0xff]  }
  0x74   : > { %4442 = vmatprep.subr.bf16.mxu0 %v6113_v57  ;;  %v6191_v56 = vld [vmem:[%s6958_s12 + $0xb44] ss:$8 sps:$4 sm:$0xff]   ;;  %v6186_v57 = vld [vmem:[%s6958_s12 + $0x240] ss:$8 sps:$4 sm:$0xff]  }
  0x76   : > { %4074 = vmatpush1.bf16.msra.mxu1 %v6108_v58  ;;  %v6189_v58 = vld [vmem:[%s6958_s12 + $0xb40] ss:$8 sps:$4 sm:$0xff]  }
  0x77   : > { %4443 = vmatpush1.bf16.msra.mxu0 %v6111_v59  ;;  %4075 = vmatprep.subr.bf16.mxu1 %v6116_v60  ;;  %v6194_v59 = vld [vmem:[%s6958_s12 + $0x254] ss:$8 sps:$4 sm:$0xff]  }
  0x78   : > { %4444 = vmatprep.subr.bf16.mxu0 %v6119_v61  ;;  %v6197_v60 = vld [vmem:[%s6958_s12 + $0xb54] ss:$8 sps:$4 sm:$0xff]   ;;  %v6192_v61 = vld [vmem:[%s6958_s12 + $0x250] ss:$8 sps:$4 sm:$0xff]  }
  0x7a   : > { %4076 = vmatpush1.bf16.msra.mxu1 %v6114_v62  ;;  %v6195_v62 = vld [vmem:[%s6958_s12 + $0xb50] ss:$8 sps:$4 sm:$0xff]  }
  0x7b   : > { %4445 = vmatpush1.bf16.msra.mxu0 %v6117_v63  ;;  %4077 = vmatprep.subr.bf16.mxu1 %v6122_v0  ;;  %v6200_v63 = vld [vmem:[%s6958_s12 + $0x264] ss:$8 sps:$4 sm:$0xff]  }
  0x7c   : > { %4446 = vmatprep.subr.bf16.mxu0 %v6125_v1  ;;  %v6203_v0 = vld [vmem:[%s6958_s12 + $0xb64] ss:$8 sps:$4 sm:$0xff]   ;;  %v6198_v1 = vld [vmem:[%s6958_s12 + $0x260] ss:$8 sps:$4 sm:$0xff]  }
  0x7e   : > { %4078 = vmatpush1.bf16.msra.mxu1 %v6120_v2  ;;  %v6201_v2 = vld [vmem:[%s6958_s12 + $0xb60] ss:$8 sps:$4 sm:$0xff]  }
  0x7f   : > { %4447 = vmatpush1.bf16.msra.mxu0 %v6123_v3  ;;  %4079 = vmatprep.subr.bf16.mxu1 %v6128_v4  ;;  %v6206_v3 = vld [vmem:[%s6958_s12 + $0x274] ss:$8 sps:$4 sm:$0xff]  }
  0x80   : > { %4448 = vmatprep.subr.bf16.mxu0 %v6131_v6  ;;  %v6209_v4 = vld [vmem:[%s6958_s12 + $0xb74] ss:$8 sps:$4 sm:$0xff]   ;;  %v6204_v6 = vld [vmem:[%s6958_s12 + $0x270] ss:$8 sps:$4 sm:$0xff]  }
  0x82   : > { %4080 = vmatpush1.bf16.msra.mxu1 %v6126_v7  ;;  %v6207_v7 = vld [vmem:[%s6958_s12 + $0xb70] ss:$8 sps:$4 sm:$0xff]  }
  0x83   : > { %4449 = vmatpush1.bf16.msra.mxu0 %v6129_v8  ;;  %4081 = vmatprep.subr.bf16.mxu1 %v6134_v9  ;;  %v6212_v8 = vld [vmem:[%s6958_s12 + $0x284] ss:$8 sps:$4 sm:$0xff]  }
  0x84   : > { %4450 = vmatprep.subr.bf16.mxu0 %v6137_v10  ;;  %v6215_v9 = vld [vmem:[%s6958_s12 + $0xb84] ss:$8 sps:$4 sm:$0xff]   ;;  %v6210_v10 = vld [vmem:[%s6958_s12 + $0x280] ss:$8 sps:$4 sm:$0xff]  }
  0x86   : > { %4082 = vmatpush1.bf16.msra.mxu1 %v6132_v11  ;;  %v6213_v11 = vld [vmem:[%s6958_s12 + $0xb80] ss:$8 sps:$4 sm:$0xff]  }
  0x87   : > { %4451 = vmatpush1.bf16.msra.mxu0 %v6135_v12  ;;  %4083 = vmatprep.subr.bf16.mxu1 %v6140_v13  ;;  %v6218_v12 = vld [vmem:[%s6958_s12 + $0x294] ss:$8 sps:$4 sm:$0xff]  }
  0x88   : > { %4452 = vmatprep.subr.bf16.mxu0 %v6143_v14  ;;  %v6221_v13 = vld [vmem:[%s6958_s12 + $0xb94] ss:$8 sps:$4 sm:$0xff]   ;;  %v6216_v14 = vld [vmem:[%s6958_s12 + $0x290] ss:$8 sps:$4 sm:$0xff]  }
  0x8a   : > { %4084 = vmatpush1.bf16.msra.mxu1 %v6138_v15  ;;  %v6219_v15 = vld [vmem:[%s6958_s12 + $0xb90] ss:$8 sps:$4 sm:$0xff]  }
  0x8b   : > { %4453 = vmatpush1.bf16.msra.mxu0 %v6141_v18  ;;  %4085 = vmatprep.subr.bf16.mxu1 %v6146_v19  ;;  %v6224_v18 = vld [vmem:[%s6958_s12 + $0x2a4] ss:$8 sps:$4 sm:$0xff]  }
  0x8c   : > { %4454 = vmatprep.subr.bf16.mxu0 %v6149_v20  ;;  %v6227_v19 = vld [vmem:[%s6958_s12 + $0xba4] ss:$8 sps:$4 sm:$0xff]   ;;  %v6222_v20 = vld [vmem:[%s6958_s12 + $0x2a0] ss:$8 sps:$4 sm:$0xff]  }
  0x8e   : > { %4086 = vmatpush1.bf16.msra.mxu1 %v6144_v21  ;;  %v6225_v21 = vld [vmem:[%s6958_s12 + $0xba0] ss:$8 sps:$4 sm:$0xff]  }
  0x8f   : > { %4455 = vmatpush1.bf16.msra.mxu0 %v6147_v22  ;;  %4087 = vmatprep.subr.bf16.mxu1 %v6152_v24  ;;  %v6230_v22 = vld [vmem:[%s6958_s12 + $0x2b4] ss:$8 sps:$4 sm:$0xff]  }
  0x90   : > { %4456 = vmatprep.subr.bf16.mxu0 %v6155_v25  ;;  %v6233_v24 = vld [vmem:[%s6958_s12 + $0xbb4] ss:$8 sps:$4 sm:$0xff]   ;;  %v6228_v25 = vld [vmem:[%s6958_s12 + $0x2b0] ss:$8 sps:$4 sm:$0xff]  }
  0x92   : > { %4088 = vmatpush1.bf16.msra.mxu1 %v6150_v27  ;;  %v6236_v27 = vld [vmem:[%s6958_s12 + $0x2c4] ss:$8 sps:$4 sm:$0xff]  }
  0x93   : > { %4457 = vmatpush1.bf16.msra.mxu0 %v6153_v28  ;;  %4089 = vmatprep.subr.bf16.mxu1 %v6158_v29  ;;  %v6239_v28 = vld [vmem:[%s6958_s12 + $0xbc4] ss:$8 sps:$4 sm:$0xff]   ;;  %v6234_v29 = vld [vmem:[%s6958_s12 + $0x2c0] ss:$8 sps:$4 sm:$0xff]  }
  0x94   : > { %4458 = vmatprep.subr.bf16.mxu0 %v6161_v31  ;;  %v6237_v31 = vld [vmem:[%s6958_s12 + $0xbc0] ss:$8 sps:$4 sm:$0xff]  }
  0x96   : > { %4090 = vmatpush1.bf16.msra.mxu1 %v6156_v33  ;;  %v6242_v33 = vld [vmem:[%s6958_s12 + $0x2d4] ss:$8 sps:$4 sm:$0xff]  }
  0x97   : > { %4459 = vmatpush1.bf16.msra.mxu0 %v6159_v54  ;;  %4100 = vmatprep.subr.bf16.mxu1 %v6164_v34  ;;  %v6245_v54 = vld [vmem:[%s6958_s12 + $0xbd4] ss:$8 sps:$4 sm:$0xff]   ;;  %v6240_v34 = vld [vmem:[%s6958_s12 + $0x2d0] ss:$8 sps:$4 sm:$0xff]  }
  0x98   : > { %4469 = vmatprep.subr.bf16.mxu0 %v6167_v35  ;;  %v6243_v35 = vld [vmem:[%s6958_s12 + $0xbd0] ss:$8 sps:$4 sm:$0xff]  }
  0x99   : > { %4092 = vmatmul.mubr.bf16.vlgmr.msra.gmra.mrb[0].mxu1 %v927_v37  ;;  %v6251_v37 = vld [vmem:[%s6958_s12 + $0xbe4] ss:$8 sps:$4 sm:$0xff]  }
  0x9a   : > { %4461 = vmatmul.mubr.bf16.vlgmr.msra.gmra.mrb[0].mxu0 %v7143_v38  ;;  %4101 = vmatpush1.bf16.msra.mxu1 %v6162_v39  ;;  %v6246_v39 = vld [vmem:[%s6958_s12 + $0x2e0] ss:$8 sps:$4 sm:$0xff]  }
  0x9b   : > { %4470 = vmatpush1.bf16.msra.mxu0 %v6165_v40  ;;  %4102 = vmatprep.subr.bf16.mxu1 %v6170_v41  ;;  %v7210_v40 = vld [vmem:[%s6953_s8 + $0x18] sm:$0xff]  ;;  %v6249_v41 = vld [vmem:[%s6958_s12 + $0xbe0] ss:$8 sps:$4 sm:$0xff]  }
  0x9c   : > { %4471 = vmatprep.subr.bf16.mxu0 %v6173_v42  ;;  %4132 = vmatprep.mubr.bf16.mxu1 %v7150_v43  ;;  %v6254_v42 = vld [vmem:[%s6958_s12 + $0x2f4] ss:$8 sps:$4 sm:$0xff]  }
  0x9d   : > { %4501 = vmatprep.mubr.bf16.mxu0 %v1028_v23  ;;  %v6257_v23 = vld [vmem:[%s6958_s12 + $0xbf4] ss:$8 sps:$4 sm:$0xff]  }
  0x9e   : > { %4103 = vmatpush1.bf16.msra.mxu1 %v6168_v16  ;;  %v7217_v16 = vrot.slane %v7210_v40, %v7010_v53 }
  0x9f   : > { %4472 = vmatpush1.bf16.msra.mxu0 %v6171_v44  ;;  %4104 = vmatprep.subr.bf16.mxu1 %v6176_v45  ;;  %v6252_v44 = vld [vmem:[%s6958_s12 + $0x2f0] ss:$8 sps:$4 sm:$0xff]  }
  0xa0   : > { %4473 = vmatprep.subr.bf16.mxu0 %v6179_v46  ;;  %v6255_v45 = vld [vmem:[%s6958_s12 + $0xbf0] ss:$8 sps:$4 sm:$0xff]   ;;  %v6260_v46 = vld [vmem:[%s6958_s12 + $0x304] ss:$8 sps:$4 sm:$0xff]  }
  0xa2   : > { %4105 = vmatpush1.bf16.msra.mxu1 %v6174_v30  ;;  %v6263_v30 = vld [vmem:[%s6958_s12 + $0xc04] ss:$8 sps:$4 sm:$0xff]  }
  0xa3   : > { %4474 = vmatpush1.bf16.msra.mxu0 %v6177_v47  ;;  %4106 = vmatprep.subr.bf16.mxu1 %v6182_v49  ;;  %v1044_v47 = vcombine.high %v7217_v16, %v7217_v16  ;;  %v6258_v49 = vld [vmem:[%s6958_s12 + $0x300] ss:$8 sps:$4 sm:$0xff]  }
  0xa4   : > { %4475 = vmatprep.subr.bf16.mxu0 %v6185_v50  ;;  %v7228_v50 = vrot.slane %v7131_v32, %v7010_v53 }
  0xa5   : > { %v7238_v32 = vrot.slane %v1044_v47, %v7010_v53  ;;  %v6339_v47 = vld [vmem:[%s6958_s12 + $0xcd0] ss:$8 sps:$4 sm:$0xff]  }
  0xa6   : > { %4107 = vmatpush1.bf16.msra.mxu1 %v6180_v51  ;;  %v1026_v51 = vcombine.high %v7143_v38, %v7143_v38  ;;  %v6264_v38 = vld [vmem:[%s6958_s12 + $0x310] ss:$8 sps:$4 sm:$0xff]  }
  0xa7   : > { %4476 = vmatpush1.bf16.msra.mxu0 %v6183_v52  ;;  %4108 = vmatprep.subr.bf16.mxu1 %v6188_v55  ;;  %v6261_v52 = vld [vmem:[%s6958_s12 + $0xc00] ss:$8 sps:$4 sm:$0xff]   ;;  %v6266_v55 = vld [vmem:[%s6958_s12 + $0x314] ss:$8 sps:$4 sm:$0xff]  }
  0xa8   : > { %4477 = vmatprep.subr.bf16.mxu0 %v6191_v56  ;;  %v6269_v56 = vld [vmem:[%s6958_s12 + $0xc14] ss:$8 sps:$4 sm:$0xff]  }
  0xaa   : > { %4109 = vmatpush1.bf16.msra.mxu1 %v6186_v57  ;;  %v930_v57 = vcombine.high %v7150_v43, %v7150_v43  ;;  %v6275_v43 = vld [vmem:[%s6958_s12 + $0xc24] ss:$8 sps:$4 sm:$0xff]  }
  0xab   : > { %4478 = vmatpush1.bf16.msra.mxu0 %v6189_v58  ;;  %4110 = vmatprep.subr.bf16.mxu1 %v6194_v59  ;;  %v6267_v58 = vld [vmem:[%s6958_s12 + $0xc10] ss:$8 sps:$4 sm:$0xff]   ;;  %v6272_v59 = vld [vmem:[%s6958_s12 + $0x324] ss:$8 sps:$4 sm:$0xff]  }
  0xac   : > { %4479 = vmatprep.subr.bf16.mxu0 %v6197_v60  ;;  %v6270_v60 = vld [vmem:[%s6958_s12 + $0x320] ss:$8 sps:$4 sm:$0xff]  }
  0xae   : > { %4111 = vmatpush1.bf16.msra.mxu1 %v6192_v61  ;;  %v6273_v61 = vld [vmem:[%s6958_s12 + $0xc20] ss:$8 sps:$4 sm:$0xff]  }
  0xaf   : > { %4480 = vmatpush1.bf16.msra.mxu0 %v6195_v62  ;;  %4112 = vmatprep.subr.bf16.mxu1 %v6200_v63  ;;  %v6278_v62 = vld [vmem:[%s6958_s12 + $0x334] ss:$8 sps:$4 sm:$0xff]  }
  0xb0   : > { %4481 = vmatprep.subr.bf16.mxu0 %v6203_v0  ;;  %v6281_v63 = vld [vmem:[%s6958_s12 + $0xc34] ss:$8 sps:$4 sm:$0xff]   ;;  %v6276_v0 = vld [vmem:[%s6958_s12 + $0x330] ss:$8 sps:$4 sm:$0xff]  }
  0xb2   : > { %4113 = vmatpush1.bf16.msra.mxu1 %v6198_v1  ;;  %v6279_v1 = vld [vmem:[%s6958_s12 + $0xc30] ss:$8 sps:$4 sm:$0xff]  }
  0xb3   : > { %4482 = vmatpush1.bf16.msra.mxu0 %v6201_v2  ;;  %4114 = vmatprep.subr.bf16.mxu1 %v6206_v3  ;;  %v6284_v2 = vld [vmem:[%s6958_s12 + $0x344] ss:$8 sps:$4 sm:$0xff]  }
  0xb4   : > { %4483 = vmatprep.subr.bf16.mxu0 %v6209_v4  ;;  %v6287_v3 = vld [vmem:[%s6958_s12 + $0xc44] ss:$8 sps:$4 sm:$0xff]   ;;  %v6282_v4 = vld [vmem:[%s6958_s12 + $0x340] ss:$8 sps:$4 sm:$0xff]  }
  0xb6   : > { %4115 = vmatpush1.bf16.msra.mxu1 %v6204_v6  ;;  %v6285_v6 = vld [vmem:[%s6958_s12 + $0xc40] ss:$8 sps:$4 sm:$0xff]  }
  0xb7   : > { %4484 = vmatpush1.bf16.msra.mxu0 %v6207_v7  ;;  %4116 = vmatprep.subr.bf16.mxu1 %v6212_v8  ;;  %v6290_v7 = vld [vmem:[%s6958_s12 + $0x354] ss:$8 sps:$4 sm:$0xff]  }
  0xb8   : > { %4485 = vmatprep.subr.bf16.mxu0 %v6215_v9  ;;  %v6293_v8 = vld [vmem:[%s6958_s12 + $0xc54] ss:$8 sps:$4 sm:$0xff]   ;;  %v6288_v9 = vld [vmem:[%s6958_s12 + $0x350] ss:$8 sps:$4 sm:$0xff]  }
  0xba   : > { %4117 = vmatpush1.bf16.msra.mxu1 %v6210_v10  ;;  %v6291_v10 = vld [vmem:[%s6958_s12 + $0xc50] ss:$8 sps:$4 sm:$0xff]  }
  0xbb   : > { %4486 = vmatpush1.bf16.msra.mxu0 %v6213_v11  ;;  %4118 = vmatprep.subr.bf16.mxu1 %v6218_v12  ;;  %v6296_v11 = vld [vmem:[%s6958_s12 + $0x364] ss:$8 sps:$4 sm:$0xff]  }
  0xbc   : > { %4487 = vmatprep.subr.bf16.mxu0 %v6221_v13  ;;  %v6299_v12 = vld [vmem:[%s6958_s12 + $0xc64] ss:$8 sps:$4 sm:$0xff]   ;;  %v6294_v13 = vld [vmem:[%s6958_s12 + $0x360] ss:$8 sps:$4 sm:$0xff]  }
  0xbe   : > { %4119 = vmatpush1.bf16.msra.mxu1 %v6216_v14  ;;  %v6297_v14 = vld [vmem:[%s6958_s12 + $0xc60] ss:$8 sps:$4 sm:$0xff]  }
  0xbf   : > { %4488 = vmatpush1.bf16.msra.mxu0 %v6219_v15  ;;  %4120 = vmatprep.subr.bf16.mxu1 %v6224_v18  ;;  %v6302_v15 = vld [vmem:[%s6958_s12 + $0x374] ss:$8 sps:$4 sm:$0xff]  }
  0xc0   : > { %4489 = vmatprep.subr.bf16.mxu0 %v6227_v19  ;;  %v6305_v18 = vld [vmem:[%s6958_s12 + $0xc74] ss:$8 sps:$4 sm:$0xff]   ;;  %v6300_v19 = vld [vmem:[%s6958_s12 + $0x370] ss:$8 sps:$4 sm:$0xff]  }
  0xc2   : > { %4121 = vmatpush1.bf16.msra.mxu1 %v6222_v20  ;;  %v6303_v20 = vld [vmem:[%s6958_s12 + $0xc70] ss:$8 sps:$4 sm:$0xff]  }
  0xc3   : > { %4490 = vmatpush1.bf16.msra.mxu0 %v6225_v21  ;;  %4122 = vmatprep.subr.bf16.mxu1 %v6230_v22  ;;  %v6308_v21 = vld [vmem:[%s6958_s12 + $0x384] ss:$8 sps:$4 sm:$0xff]  }
  0xc4   : > { %4491 = vmatprep.subr.bf16.mxu0 %v6233_v24  ;;  %v6311_v22 = vld [vmem:[%s6958_s12 + $0xc84] ss:$8 sps:$4 sm:$0xff]   ;;  %v6306_v24 = vld [vmem:[%s6958_s12 + $0x380] ss:$8 sps:$4 sm:$0xff]  }
  0xc6   : > { %4123 = vmatpush1.bf16.msra.mxu1 %v6228_v25  ;;  %v6309_v25 = vld [vmem:[%s6958_s12 + $0xc80] ss:$8 sps:$4 sm:$0xff]  }
  0xc7   : > { %4492 = vmatpush1.bf16.msra.mxu0 %v6231_v26  ;;  %4124 = vmatprep.subr.bf16.mxu1 %v6236_v27  ;;  %v6314_v26 = vld [vmem:[%s6958_s12 + $0x394] ss:$8 sps:$4 sm:$0xff]  }
  0xc8   : > { %4493 = vmatprep.subr.bf16.mxu0 %v6239_v28  ;;  %v6317_v27 = vld [vmem:[%s6958_s12 + $0xc94] ss:$8 sps:$4 sm:$0xff]   ;;  %v6312_v28 = vld [vmem:[%s6958_s12 + $0x390] ss:$8 sps:$4 sm:$0xff]  }
  0xca   : > { %4125 = vmatpush1.bf16.msra.mxu1 %v6234_v29  ;;  %v6315_v29 = vld [vmem:[%s6958_s12 + $0xc90] ss:$8 sps:$4 sm:$0xff]  }
  0xcb   : > { %4494 = vmatpush1.bf16.msra.mxu0 %v6237_v31  ;;  %4126 = vmatprep.subr.bf16.mxu1 %v6242_v33  ;;  %v6320_v31 = vld [vmem:[%s6958_s12 + $0x3a4] ss:$8 sps:$4 sm:$0xff]  }
  0xcc   : > { %4495 = vmatprep.subr.bf16.mxu0 %v6245_v54  ;;  %v6323_v33 = vld [vmem:[%s6958_s12 + $0xca4] ss:$8 sps:$4 sm:$0xff]   ;;  %v6318_v54 = vld [vmem:[%s6958_s12 + $0x3a0] ss:$8 sps:$4 sm:$0xff]  }
  0xce   : > { %4127 = vmatpush1.bf16.msra.mxu1 %v6240_v34  ;;  %v6321_v34 = vld [vmem:[%s6958_s12 + $0xca0] ss:$8 sps:$4 sm:$0xff]  }
  0xcf   : > { %4496 = vmatpush1.bf16.msra.mxu0 %v6243_v35  ;;  %4128 = vmatprep.subr.bf16.mxu1 %v6248_v36  ;;  %v6326_v35 = vld [vmem:[%s6958_s12 + $0x3b4] ss:$8 sps:$4 sm:$0xff]  }
  0xd0   : > { %4497 = vmatprep.subr.bf16.mxu0 %v6251_v37  ;;  %v6329_v36 = vld [vmem:[%s6958_s12 + $0xcb4] ss:$8 sps:$4 sm:$0xff]   ;;  %v6324_v37 = vld [vmem:[%s6958_s12 + $0x3b0] ss:$8 sps:$4 sm:$0xff]  }
  0xd2   : > { %4129 = vmatpush1.bf16.msra.mxu1 %v6246_v39  ;;  %v6327_v39 = vld [vmem:[%s6958_s12 + $0xcb0] ss:$8 sps:$4 sm:$0xff]  }
  0xd3   : > { %4498 = vmatpush1.bf16.msra.mxu0 %v6249_v41  ;;  %4130 = vmatprep.subr.bf16.mxu1 %v6254_v42  ;;  %v6332_v41 = vld [vmem:[%s6958_s12 + $0x3c4] ss:$8 sps:$4 sm:$0xff]  }
  0xd4   : > { %4499 = vmatprep.subr.bf16.mxu0 %v6257_v23  ;;  %v6335_v42 = vld [vmem:[%s6958_s12 + $0xcc4] ss:$8 sps:$4 sm:$0xff]   ;;  %v6330_v23 = vld [vmem:[%s6958_s12 + $0x3c0] ss:$8 sps:$4 sm:$0xff]  }
  0xd6   : > { %4131 = vmatpush1.bf16.msra.mxu1 %v6252_v44  ;;  %v6333_v44 = vld [vmem:[%s6958_s12 + $0xcc0] ss:$8 sps:$4 sm:$0xff]  }
  0xd7   : > { %4500 = vmatpush1.bf16.msra.mxu0 %v6255_v45  ;;  %4141 = vmatprep.subr.bf16.mxu1 %v6260_v46  ;;  %v6338_v45 = vld [vmem:[%s6958_s12 + $0x3d4] ss:$8 sps:$4 sm:$0xff]  }
  0xd8   : > { %4510 = vmatprep.subr.bf16.mxu0 %v6263_v30  ;;  %v6341_v46 = vld [vmem:[%s6958_s12 + $0xcd4] ss:$8 sps:$4 sm:$0xff]   ;;  %v6336_v30 = vld [vmem:[%s6958_s12 + $0x3d0] ss:$8 sps:$4 sm:$0xff]  }
  0xd9   : > { %4133 = vmatmul.mubr.bf16.vlgmr.msra.gmra.mrb[0].mxu1 %v7228_v50 }
  0xda   : > { %4502 = vmatmul.mubr.bf16.vlgmr.msra.gmra.mrb[0].mxu0 %v1026_v51  ;;  %4142 = vmatpush1.bf16.msra.mxu1 %v6258_v49  ;;  %v6344_v49 = vld [vmem:[%s6958_s12 + $0x3e4] ss:$8 sps:$4 sm:$0xff]  }
  0xdb   : > { %4511 = vmatpush1.bf16.msra.mxu0 %v6261_v52  ;;  %4143 = vmatprep.subr.bf16.mxu1 %v6266_v55  ;;  %v6347_v51 = vld [vmem:[%s6958_s12 + $0xce4] ss:$8 sps:$4 sm:$0xff]   ;;  %v6342_v52 = vld [vmem:[%s6958_s12 + $0x3e0] ss:$8 sps:$4 sm:$0xff]  }
  0xdc   : > { %4512 = vmatprep.subr.bf16.mxu0 %v6269_v56  ;;  %4173 = vmatprep.mubr.bf16.mxu1 %v930_v57  ;;  %v6345_v55 = vld [vmem:[%s6958_s12 + $0xce0] ss:$8 sps:$4 sm:$0xff]   ;;  %v6350_v57 = vld [vmem:[%s6958_s12 + $0x3f4] ss:$8 sps:$4 sm:$0xff]  }
  0xdd   : > { %4542 = vmatprep.mubr.bf16.mxu0 %v7238_v32  ;;  %v7297_v56 = vld [vmem:[%s6953_s8 + $0x8] sm:$0xff] }
  0xde   : > { %4144 = vmatpush1.bf16.msra.mxu1 %v6264_v38  ;;  %v6353_v38 = vld [vmem:[%s6958_s12 + $0xcf4] ss:$8 sps:$4 sm:$0xff]  }
  0xdf   : > { %4513 = vmatpush1.bf16.msra.mxu0 %v6267_v58  ;;  %4145 = vmatprep.subr.bf16.mxu1 %v6272_v59  ;;  %v7303_v58 = vrot.slane %v7297_v56, %v7010_v53  ;;  %v6348_v59 = vld [vmem:[%s6958_s12 + $0x3f0] ss:$8 sps:$4 sm:$0xff]  }
  0xe0   : > { %4514 = vmatprep.subr.bf16.mxu0 %v6275_v43  ;;  %v6351_v43 = vld [vmem:[%s6958_s12 + $0xcf0] ss:$8 sps:$4 sm:$0xff]  }
  0xe2   : > { %4146 = vmatpush1.bf16.msra.mxu1 %v6270_v60  ;;  %v6356_v60 = vld [vmem:[%s6958_s12 + $0x404] ss:$8 sps:$4 sm:$0xff]  }
  0xe3   : > { %4515 = vmatpush1.bf16.msra.mxu0 %v6273_v61  ;;  %4147 = vmatprep.subr.bf16.mxu1 %v6278_v62  ;;  %v6359_v61 = vld [vmem:[%s6958_s12 + $0xd04] ss:$8 sps:$4 sm:$0xff]   ;;  %v946_v62 = vcombine.high %v7303_v58, %v7303_v58 }
  0xe4   : > { %4516 = vmatprep.subr.bf16.mxu0 %v6281_v63  ;;  %v6354_v63 = vld [vmem:[%s6958_s12 + $0x400] ss:$8 sps:$4 sm:$0xff]  }
  0xe6   : > { %4148 = vmatpush1.bf16.msra.mxu1 %v6276_v0  ;;  %v6357_v0 = vld [vmem:[%s6958_s12 + $0xd00] ss:$8 sps:$4 sm:$0xff]  }
  0xe7   : > { %4517 = vmatpush1.bf16.msra.mxu0 %v6279_v1  ;;  %4149 = vmatprep.subr.bf16.mxu1 %v6284_v2  ;;  %v928_v1 = vcombine.high %v7228_v50, %v7228_v50  ;;  %v7317_v2 = vrot.slane %v7217_v16, %v7010_v53  ;;  %v6360_v16 = vld [vmem:[%s6958_s12 + $0x410] ss:$8 sps:$4 sm:$0xff]  }
  0xe8   : > { %4518 = vmatprep.subr.bf16.mxu0 %v6287_v3  ;;  %v6362_v3 = vld [vmem:[%s6958_s12 + $0x414] ss:$8 sps:$4 sm:$0xff]   ;;  %v6363_v50 = vld [vmem:[%s6958_s12 + $0xd10] ss:$8 sps:$4 sm:$0xff]  }
  0xea   : > { %4150 = vmatpush1.bf16.msra.mxu1 %v6282_v4  ;;  %v6365_v4 = vld [vmem:[%s6958_s12 + $0xd14] ss:$8 sps:$4 sm:$0xff]  }
  0xeb   : > { %4519 = vmatpush1.bf16.msra.mxu0 %v6285_v6  ;;  %4151 = vmatprep.subr.bf16.mxu1 %v6290_v7  ;;  %v7322_v6 = vrot.slane %v946_v62, %v7010_v53  ;;  %v1076_v7 = vcombine.high %v7238_v32, %v7238_v32  ;;  %v6366_v32 = vld [vmem:[%s6958_s12 + $0x420] ss:$8 sps:$4 sm:$0xff]   ;;  %v6432_v62 = vld [vmem:[%s6958_s12 + $0x4d0] ss:$8 sps:$4 sm:$0xff]  }
  0xec   : > { %4520 = vmatprep.subr.bf16.mxu0 %v6293_v8  ;;  %v6368_v8 = vld [vmem:[%s6958_s12 + $0x424] ss:$8 sps:$4 sm:$0xff]  }
  0xee   : > { %4152 = vmatpush1.bf16.msra.mxu1 %v6288_v9  ;;  %v6371_v9 = vld [vmem:[%s6958_s12 + $0xd24] ss:$8 sps:$4 sm:$0xff]  }
  0xef   : > { %4521 = vmatpush1.bf16.msra.mxu0 %v6291_v10  ;;  %4153 = vmatprep.subr.bf16.mxu1 %v6296_v11  ;;  %v6369_v10 = vld [vmem:[%s6958_s12 + $0xd20] ss:$8 sps:$4 sm:$0xff]   ;;  %v6374_v11 = vld [vmem:[%s6958_s12 + $0x434] ss:$8 sps:$4 sm:$0xff]  }
  0xf0   : > { %4522 = vmatprep.subr.bf16.mxu0 %v6299_v12  ;;  %v6377_v12 = vld [vmem:[%s6958_s12 + $0xd34] ss:$8 sps:$4 sm:$0xff]  }
  0xf2   : > { %4154 = vmatpush1.bf16.msra.mxu1 %v6294_v13  ;;  %v6372_v13 = vld [vmem:[%s6958_s12 + $0x430] ss:$8 sps:$4 sm:$0xff]  }
  0xf3   : > { %4523 = vmatpush1.bf16.msra.mxu0 %v6297_v14  ;;  %4155 = vmatprep.subr.bf16.mxu1 %v6302_v15  ;;  %v6375_v14 = vld [vmem:[%s6958_s12 + $0xd30] ss:$8 sps:$4 sm:$0xff]   ;;  %v6380_v15 = vld [vmem:[%s6958_s12 + $0x444] ss:$8 sps:$4 sm:$0xff]  }
  0xf4   : > { %4524 = vmatprep.subr.bf16.mxu0 %v6305_v18  ;;  %v6383_v18 = vld [vmem:[%s6958_s12 + $0xd44] ss:$8 sps:$4 sm:$0xff]  }
  0xf6   : > { %4156 = vmatpush1.bf16.msra.mxu1 %v6300_v19  ;;  %v6378_v19 = vld [vmem:[%s6958_s12 + $0x440] ss:$8 sps:$4 sm:$0xff]  }
  0xf7   : > { %4525 = vmatpush1.bf16.msra.mxu0 %v6303_v20  ;;  %4157 = vmatprep.subr.bf16.mxu1 %v6308_v21  ;;  %v6381_v20 = vld [vmem:[%s6958_s12 + $0xd40] ss:$8 sps:$4 sm:$0xff]   ;;  %v6386_v21 = vld [vmem:[%s6958_s12 + $0x454] ss:$8 sps:$4 sm:$0xff]  }
  0xf8   : > { %4526 = vmatprep.subr.bf16.mxu0 %v6311_v22  ;;  %v6389_v22 = vld [vmem:[%s6958_s12 + $0xd54] ss:$8 sps:$4 sm:$0xff]  }
  0xfa   : > { %4158 = vmatpush1.bf16.msra.mxu1 %v6306_v24  ;;  %v6384_v24 = vld [vmem:[%s6958_s12 + $0x450] ss:$8 sps:$4 sm:$0xff]  }
  0xfb   : > { %4527 = vmatpush1.bf16.msra.mxu0 %v6309_v25  ;;  %4159 = vmatprep.subr.bf16.mxu1 %v6314_v26  ;;  %v6387_v25 = vld [vmem:[%s6958_s12 + $0xd50] ss:$8 sps:$4 sm:$0xff]   ;;  %v6392_v26 = vld [vmem:[%s6958_s12 + $0x464] ss:$8 sps:$4 sm:$0xff]  }
  0xfc   : > { %4528 = vmatprep.subr.bf16.mxu0 %v6317_v27  ;;  %v6395_v27 = vld [vmem:[%s6958_s12 + $0xd64] ss:$8 sps:$4 sm:$0xff]  }
  0xfe   : > { %4160 = vmatpush1.bf16.msra.mxu1 %v6312_v28  ;;  %v6390_v28 = vld [vmem:[%s6958_s12 + $0x460] ss:$8 sps:$4 sm:$0xff]  }
  0xff   : > { %4529 = vmatpush1.bf16.msra.mxu0 %v6315_v29  ;;  %4161 = vmatprep.subr.bf16.mxu1 %v6320_v31  ;;  %v6393_v29 = vld [vmem:[%s6958_s12 + $0xd60] ss:$8 sps:$4 sm:$0xff]   ;;  %v6398_v31 = vld [vmem:[%s6958_s12 + $0x474] ss:$8 sps:$4 sm:$0xff]  }
 0x100   : > { %4530 = vmatprep.subr.bf16.mxu0 %v6323_v33  ;;  %v6401_v33 = vld [vmem:[%s6958_s12 + $0xd74] ss:$8 sps:$4 sm:$0xff]  }
 0x102   : > { %4162 = vmatpush1.bf16.msra.mxu1 %v6318_v54  ;;  %v6396_v54 = vld [vmem:[%s6958_s12 + $0x470] ss:$8 sps:$4 sm:$0xff]  }
 0x103   : > { %4531 = vmatpush1.bf16.msra.mxu0 %v6321_v34  ;;  %4163 = vmatprep.subr.bf16.mxu1 %v6326_v35  ;;  %v6399_v34 = vld [vmem:[%s6958_s12 + $0xd70] ss:$8 sps:$4 sm:$0xff]   ;;  %v6404_v35 = vld [vmem:[%s6958_s12 + $0x484] ss:$8 sps:$4 sm:$0xff]  }
 0x104   : > { %4532 = vmatprep.subr.bf16.mxu0 %v6329_v36  ;;  %v6407_v36 = vld [vmem:[%s6958_s12 + $0xd84] ss:$8 sps:$4 sm:$0xff]  }
 0x106   : > { %4164 = vmatpush1.bf16.msra.mxu1 %v6324_v37  ;;  %v6402_v37 = vld [vmem:[%s6958_s12 + $0x480] ss:$8 sps:$4 sm:$0xff]  }
 0x107   : > { %4533 = vmatpush1.bf16.msra.mxu0 %v6327_v39  ;;  %4165 = vmatprep.subr.bf16.mxu1 %v6332_v41  ;;  %v6405_v39 = vld [vmem:[%s6958_s12 + $0xd80] ss:$8 sps:$4 sm:$0xff]   ;;  %v6410_v41 = vld [vmem:[%s6958_s12 + $0x494] ss:$8 sps:$4 sm:$0xff]  }
 0x108   : > { %4534 = vmatprep.subr.bf16.mxu0 %v6335_v42  ;;  %v6413_v42 = vld [vmem:[%s6958_s12 + $0xd94] ss:$8 sps:$4 sm:$0xff]  }
 0x10a   : > { %4166 = vmatpush1.bf16.msra.mxu1 %v6330_v23  ;;  %v6408_v23 = vld [vmem:[%s6958_s12 + $0x490] ss:$8 sps:$4 sm:$0xff]  }
 0x10b   : > { %4535 = vmatpush1.bf16.msra.mxu0 %v6333_v44  ;;  %4167 = vmatprep.subr.bf16.mxu1 %v6338_v45  ;;  %v6411_v44 = vld [vmem:[%s6958_s12 + $0xd90] ss:$8 sps:$4 sm:$0xff]   ;;  %v6416_v45 = vld [vmem:[%s6958_s12 + $0x4a4] ss:$8 sps:$4 sm:$0xff]  }
 0x10c   : > { %4536 = vmatprep.subr.bf16.mxu0 %v6341_v46  ;;  %v6419_v46 = vld [vmem:[%s6958_s12 + $0xda4] ss:$8 sps:$4 sm:$0xff]  }
 0x10e   : > { %4168 = vmatpush1.bf16.msra.mxu1 %v6336_v30  ;;  %v6414_v30 = vld [vmem:[%s6958_s12 + $0x4a0] ss:$8 sps:$4 sm:$0xff]  }
 0x10f   : > { %4537 = vmatpush1.bf16.msra.mxu0 %v6339_v47  ;;  %4169 = vmatprep.subr.bf16.mxu1 %v6344_v49  ;;  %v6417_v47 = vld [vmem:[%s6958_s12 + $0xda0] ss:$8 sps:$4 sm:$0xff]   ;;  %v6422_v49 = vld [vmem:[%s6958_s12 + $0x4b4] ss:$8 sps:$4 sm:$0xff]  }
 0x110   : > { %4538 = vmatprep.subr.bf16.mxu0 %v6347_v51  ;;  %v6425_v51 = vld [vmem:[%s6958_s12 + $0xdb4] ss:$8 sps:$4 sm:$0xff]  }
 0x112   : > { %4170 = vmatpush1.bf16.msra.mxu1 %v6342_v52  ;;  %v6420_v52 = vld [vmem:[%s6958_s12 + $0x4b0] ss:$8 sps:$4 sm:$0xff]  }
 0x113   : > { %4539 = vmatpush1.bf16.msra.mxu0 %v6345_v55  ;;  %4171 = vmatprep.subr.bf16.mxu1 %v6350_v57  ;;  %v6423_v55 = vld [vmem:[%s6958_s12 + $0xdb0] ss:$8 sps:$4 sm:$0xff]   ;;  %v6428_v57 = vld [vmem:[%s6958_s12 + $0x4c4] ss:$8 sps:$4 sm:$0xff]  }
 0x114   : > { %4540 = vmatprep.subr.bf16.mxu0 %v6353_v38  ;;  %v6431_v38 = vld [vmem:[%s6958_s12 + $0xdc4] ss:$8 sps:$4 sm:$0xff]  }
 0x116   : > { %4172 = vmatpush1.bf16.msra.mxu1 %v6348_v59  ;;  %v6426_v59 = vld [vmem:[%s6958_s12 + $0x4c0] ss:$8 sps:$4 sm:$0xff]  }
 0x117   : > { %4541 = vmatpush1.bf16.msra.mxu0 %v6351_v43  ;;  %4182 = vmatprep.subr.bf16.mxu1 %v6356_v60  ;;  %v6429_v43 = vld [vmem:[%s6958_s12 + $0xdc0] ss:$8 sps:$4 sm:$0xff]   ;;  %v6434_v60 = vld [vmem:[%s6958_s12 + $0x4d4] ss:$8 sps:$4 sm:$0xff]  }
 0x118   : > { %4551 = vmatprep.subr.bf16.mxu0 %v6359_v61  ;;  %v6437_v61 = vld [vmem:[%s6958_s12 + $0xdd4] ss:$8 sps:$4 sm:$0xff]  }
 0x119   : > { %4174 = vmatmul.mubr.bf16.vlgmr.msra.gmra.mrb[0].mxu1 %v928_v1  ;;  %v6443_v1 = vld [vmem:[%s6958_s12 + $0xde4] ss:$8 sps:$4 sm:$0xff]  }
 0x11a   : > { %4543 = vmatmul.mubr.bf16.vlgmr.msra.gmra.mrb[0].mxu0 %v7317_v2  ;;  %4183 = vmatpush1.bf16.msra.mxu1 %v6354_v63  ;;  %v6435_v63 = vld [vmem:[%s6958_s12 + $0xdd0] ss:$8 sps:$4 sm:$0xff]  }
 0x11b   : > { %4552 = vmatpush1.bf16.msra.mxu0 %v6357_v0  ;;  %4184 = vmatprep.subr.bf16.mxu1 %v6362_v3  ;;  %v6440_v0 = vld [vmem:[%s6958_s12 + $0x4e4] ss:$8 sps:$4 sm:$0xff]   ;;  %v1029_v3 = vcombine.high %v7210_v40, %v7210_v40  ;;  %v6447_v40 = vld [vmem:[%s6958_s12 + $0xdf0] ss:$8 sps:$4 sm:$0xff]  }
 0x11c   : > { %4553 = vmatprep.subr.bf16.mxu0 %v6365_v4  ;;  %4214 = vmatprep.mubr.bf16.mxu1 %v7322_v6  ;;  %v6438_v4 = vld [vmem:[%s6958_s12 + $0x4e0] ss:$8 sps:$4 sm:$0xff]  }
 0x11d   : > { %4583 = vmatprep.mubr.bf16.mxu0 %v1076_v7  ;;  %v6441_v7 = vld [vmem:[%s6958_s12 + $0xde0] ss:$8 sps:$4 sm:$0xff]  }
 0x11e   : > { %4185 = vmatpush1.bf16.msra.mxu1 %v6360_v16  ;;  %v6446_v16 = vld [vmem:[%s6958_s12 + $0x4f4] ss:$8 sps:$4 sm:$0xff]  }
 0x11f   : > { %4554 = vmatpush1.bf16.msra.mxu0 %v6363_v50  ;;  %4186 = vmatprep.subr.bf16.mxu1 %v6368_v8  ;;  %v6449_v50 = vld [vmem:[%s6958_s12 + $0xdf4] ss:$8 sps:$4 sm:$0xff]   ;;  %v7387_v8 = vrot.slane %v1029_v3, %v7010_v53  ;;  %v6516_v3 = vld [vmem:[%s6958_s12 + $0x5b0] ss:$8 sps:$4 sm:$0xff]  }
 0x120   : > { %4555 = vmatprep.subr.bf16.mxu0 %v6371_v9  ;;  %v6444_v9 = vld [vmem:[%s6958_s12 + $0x4f0] ss:$8 sps:$4 sm:$0xff]  }
 0x122   : > { %4187 = vmatpush1.bf16.msra.mxu1 %v6366_v32  ;;  %v6452_v32 = vld [vmem:[%s6958_s12 + $0x504] ss:$8 sps:$4 sm:$0xff]  }
 0x123   : > { %4556 = vmatpush1.bf16.msra.mxu0 %v6369_v10  ;;  %4188 = vmatprep.subr.bf16.mxu1 %v6374_v11  ;;  %v6455_v10 = vld [vmem:[%s6958_s12 + $0xe04] ss:$8 sps:$4 sm:$0xff]   ;;  %v1045_v11 = vcombine.high %v7387_v8, %v7387_v8 }
 0x124   : > { %4557 = vmatprep.subr.bf16.mxu0 %v6377_v12  ;;  %v7397_v12 = vrot.slane %v7303_v58, %v7010_v53 }
 0x125   : > { %v7408_v58 = vrot.slane %v1045_v11, %v7010_v53  ;;  %v6531_v11 = vld [vmem:[%s6958_s12 + $0xed0] ss:$8 sps:$4 sm:$0xff]  }
 0x126   : > { %4189 = vmatpush1.bf16.msra.mxu1 %v6372_v13  ;;  %v1074_v13 = vcombine.high %v7317_v2, %v7317_v2  ;;  %v6456_v2 = vld [vmem:[%s6958_s12 + $0x510] ss:$8 sps:$4 sm:$0xff]  }
 0x127   : > { %4558 = vmatpush1.bf16.msra.mxu0 %v6375_v14  ;;  %4190 = vmatprep.subr.bf16.mxu1 %v6380_v15  ;;  %v6450_v14 = vld [vmem:[%s6958_s12 + $0x500] ss:$8 sps:$4 sm:$0xff]  }
 0x128   : > { %4559 = vmatprep.subr.bf16.mxu0 %v6383_v18  ;;  %v6453_v15 = vld [vmem:[%s6958_s12 + $0xe00] ss:$8 sps:$4 sm:$0xff]   ;;  %v6458_v18 = vld [vmem:[%s6958_s12 + $0x514] ss:$8 sps:$4 sm:$0xff]  }
 0x12a   : > { %4191 = vmatpush1.bf16.msra.mxu1 %v6378_v19  ;;  %v6461_v19 = vld [vmem:[%s6958_s12 + $0xe14] ss:$8 sps:$4 sm:$0xff]  }
 0x12b   : > { %4560 = vmatpush1.bf16.msra.mxu0 %v6381_v20  ;;  %4192 = vmatprep.subr.bf16.mxu1 %v6386_v21  ;;  %v978_v20 = vcombine.high %v7322_v6, %v7322_v6  ;;  %v6459_v21 = vld [vmem:[%s6958_s12 + $0xe10] ss:$8 sps:$4 sm:$0xff]   ;;  %v6467_v6 = vld [vmem:[%s6958_s12 + $0xe24] ss:$8 sps:$4 sm:$0xff]  }
 0x12c   : > { %4561 = vmatprep.subr.bf16.mxu0 %v6389_v22  ;;  %v6464_v22 = vld [vmem:[%s6958_s12 + $0x524] ss:$8 sps:$4 sm:$0xff]  }
 0x12e   : > { %4193 = vmatpush1.bf16.msra.mxu1 %v6384_v24  ;;  %v6462_v24 = vld [vmem:[%s6958_s12 + $0x520] ss:$8 sps:$4 sm:$0xff]  }
 0x12f   : > { %4562 = vmatpush1.bf16.msra.mxu0 %v6387_v25  ;;  %4194 = vmatprep.subr.bf16.mxu1 %v6392_v26  ;;  %v6465_v25 = vld [vmem:[%s6958_s12 + $0xe20] ss:$8 sps:$4 sm:$0xff]   ;;  %v6470_v26 = vld [vmem:[%s6958_s12 + $0x534] ss:$8 sps:$4 sm:$0xff]  }
 0x130   : > { %4563 = vmatprep.subr.bf16.mxu0 %v6395_v27  ;;  %v6473_v27 = vld [vmem:[%s6958_s12 + $0xe34] ss:$8 sps:$4 sm:$0xff]  }
 0x132   : > { %4195 = vmatpush1.bf16.msra.mxu1 %v6390_v28  ;;  %v6468_v28 = vld [vmem:[%s6958_s12 + $0x530] ss:$8 sps:$4 sm:$0xff]  }
 0x133   : > { %4564 = vmatpush1.bf16.msra.mxu0 %v6393_v29  ;;  %4196 = vmatprep.subr.bf16.mxu1 %v6398_v31  ;;  %v6471_v29 = vld [vmem:[%s6958_s12 + $0xe30] ss:$8 sps:$4 sm:$0xff]   ;;  %v6476_v31 = vld [vmem:[%s6958_s12 + $0x544] ss:$8 sps:$4 sm:$0xff]  }
 0x134   : > { %4565 = vmatprep.subr.bf16.mxu0 %v6401_v33  ;;  %v6479_v33 = vld [vmem:[%s6958_s12 + $0xe44] ss:$8 sps:$4 sm:$0xff]  }
 0x136   : > { %4197 = vmatpush1.bf16.msra.mxu1 %v6396_v54  ;;  %v6474_v54 = vld [vmem:[%s6958_s12 + $0x540] ss:$8 sps:$4 sm:$0xff]  }
 0x137   : > { %4566 = vmatpush1.bf16.msra.mxu0 %v6399_v34  ;;  %4198 = vmatprep.subr.bf16.mxu1 %v6404_v35  ;;  %v6477_v34 = vld [vmem:[%s6958_s12 + $0xe40] ss:$8 sps:$4 sm:$0xff]   ;;  %v6482_v35 = vld [vmem:[%s6958_s12 + $0x554] ss:$8 sps:$4 sm:$0xff]  }
 0x138   : > { %4567 = vmatprep.subr.bf16.mxu0 %v6407_v36  ;;  %v6485_v36 = vld [vmem:[%s6958_s12 + $0xe54] ss:$8 sps:$4 sm:$0xff]  }
 0x13a   : > { %4199 = vmatpush1.bf16.msra.mxu1 %v6402_v37  ;;  %v6480_v37 = vld [vmem:[%s6958_s12 + $0x550] ss:$8 sps:$4 sm:$0xff]  }
 0x13b   : > { %4568 = vmatpush1.bf16.msra.mxu0 %v6405_v39  ;;  %4200 = vmatprep.subr.bf16.mxu1 %v6410_v41  ;;  %v6483_v39 = vld [vmem:[%s6958_s12 + $0xe50] ss:$8 sps:$4 sm:$0xff]   ;;  %v6488_v41 = vld [vmem:[%s6958_s12 + $0x564] ss:$8 sps:$4 sm:$0xff]  }
 0x13c   : > { %4569 = vmatprep.subr.bf16.mxu0 %v6413_v42  ;;  %v6491_v42 = vld [vmem:[%s6958_s12 + $0xe64] ss:$8 sps:$4 sm:$0xff]  }
 0x13e   : > { %4201 = vmatpush1.bf16.msra.mxu1 %v6408_v23  ;;  %v6486_v23 = vld [vmem:[%s6958_s12 + $0x560] ss:$8 sps:$4 sm:$0xff]  }
 0x13f   : > { %4570 = vmatpush1.bf16.msra.mxu0 %v6411_v44  ;;  %4202 = vmatprep.subr.bf16.mxu1 %v6416_v45  ;;  %v6489_v44 = vld [vmem:[%s6958_s12 + $0xe60] ss:$8 sps:$4 sm:$0xff]   ;;  %v6494_v45 = vld [vmem:[%s6958_s12 + $0x574] ss:$8 sps:$4 sm:$0xff]  }
 0x140   : > { %4571 = vmatprep.subr.bf16.mxu0 %v6419_v46  ;;  %v6497_v46 = vld [vmem:[%s6958_s12 + $0xe74] ss:$8 sps:$4 sm:$0xff]  }
 0x142   : > { %4203 = vmatpush1.bf16.msra.mxu1 %v6414_v30  ;;  %v6492_v30 = vld [vmem:[%s6958_s12 + $0x570] ss:$8 sps:$4 sm:$0xff]  }
 0x143   : > { %4572 = vmatpush1.bf16.msra.mxu0 %v6417_v47  ;;  %4204 = vmatprep.subr.bf16.mxu1 %v6422_v49  ;;  %v6495_v47 = vld [vmem:[%s6958_s12 + $0xe70] ss:$8 sps:$4 sm:$0xff]   ;;  %v6500_v49 = vld [vmem:[%s6958_s12 + $0x584] ss:$8 sps:$4 sm:$0xff]  }
 0x144   : > { %4573 = vmatprep.subr.bf16.mxu0 %v6425_v51  ;;  %v6503_v51 = vld [vmem:[%s6958_s12 + $0xe84] ss:$8 sps:$4 sm:$0xff]  }
 0x146   : > { %4205 = vmatpush1.bf16.msra.mxu1 %v6420_v52  ;;  %v6498_v52 = vld [vmem:[%s6958_s12 + $0x580] ss:$8 sps:$4 sm:$0xff]  }
 0x147   : > { %4574 = vmatpush1.bf16.msra.mxu0 %v6423_v55  ;;  %4206 = vmatprep.subr.bf16.mxu1 %v6428_v57  ;;  %v6501_v55 = vld [vmem:[%s6958_s12 + $0xe80] ss:$8 sps:$4 sm:$0xff]   ;;  %v6506_v57 = vld [vmem:[%s6958_s12 + $0x594] ss:$8 sps:$4 sm:$0xff]  }
 0x148   : > { %4575 = vmatprep.subr.bf16.mxu0 %v6431_v38  ;;  %v6509_v38 = vld [vmem:[%s6958_s12 + $0xe94] ss:$8 sps:$4 sm:$0xff]  }
 0x14a   : > { %4207 = vmatpush1.bf16.msra.mxu1 %v6426_v59  ;;  %v6504_v59 = vld [vmem:[%s6958_s12 + $0x590] ss:$8 sps:$4 sm:$0xff]  }
 0x14b   : > { %4576 = vmatpush1.bf16.msra.mxu0 %v6429_v43  ;;  %4208 = vmatprep.subr.bf16.mxu1 %v6434_v60  ;;  %v6507_v43 = vld [vmem:[%s6958_s12 + $0xe90] ss:$8 sps:$4 sm:$0xff]   ;;  %v6512_v60 = vld [vmem:[%s6958_s12 + $0x5a4] ss:$8 sps:$4 sm:$0xff]  }
 0x14c   : > { %4577 = vmatprep.subr.bf16.mxu0 %v6437_v61  ;;  %v6515_v61 = vld [vmem:[%s6958_s12 + $0xea4] ss:$8 sps:$4 sm:$0xff]  }
 0x14e   : > { %4209 = vmatpush1.bf16.msra.mxu1 %v6432_v62  ;;  %v6510_v62 = vld [vmem:[%s6958_s12 + $0x5a0] ss:$8 sps:$4 sm:$0xff]  }
 0x14f   : > { %4578 = vmatpush1.bf16.msra.mxu0 %v6435_v63  ;;  %4210 = vmatprep.subr.bf16.mxu1 %v6440_v0  ;;  %v6513_v63 = vld [vmem:[%s6958_s12 + $0xea0] ss:$8 sps:$4 sm:$0xff]   ;;  %v6518_v0 = vld [vmem:[%s6958_s12 + $0x5b4] ss:$8 sps:$4 sm:$0xff]  }
 0x150   : > { %4579 = vmatprep.subr.bf16.mxu0 %v6443_v1  ;;  %v6521_v1 = vld [vmem:[%s6958_s12 + $0xeb4] ss:$8 sps:$4 sm:$0xff]  }
 0x152   : > { %4211 = vmatpush1.bf16.msra.mxu1 %v6438_v4  ;;  %v6519_v4 = vld [vmem:[%s6958_s12 + $0xeb0] ss:$8 sps:$4 sm:$0xff]  }
 0x153   : > { %4580 = vmatpush1.bf16.msra.mxu0 %v6441_v7  ;;  %4212 = vmatprep.subr.bf16.mxu1 %v6446_v16  ;;  %v6524_v7 = vld [vmem:[%s6958_s12 + $0x5c4] ss:$8 sps:$4 sm:$0xff]  }
 0x154   : > { %4581 = vmatprep.subr.bf16.mxu0 %v6449_v50  ;;  %v6527_v16 = vld [vmem:[%s6958_s12 + $0xec4] ss:$8 sps:$4 sm:$0xff]   ;;  %v6522_v50 = vld [vmem:[%s6958_s12 + $0x5c0] ss:$8 sps:$4 sm:$0xff]  }
 0x156   : > { %4213 = vmatpush1.bf16.msra.mxu1 %v6444_v9  ;;  %v6525_v9 = vld [vmem:[%s6958_s12 + $0xec0] ss:$8 sps:$4 sm:$0xff]  }
 0x157   : > { %4582 = vmatpush1.bf16.msra.mxu0 %v6447_v40  ;;  %4223 = vmatprep.subr.bf16.mxu1 %v6452_v32  ;;  %v6530_v40 = vld [vmem:[%s6958_s12 + $0x5d4] ss:$8 sps:$4 sm:$0xff]  }
 0x158   : > { %4592 = vmatprep.subr.bf16.mxu0 %v6455_v10  ;;  %v6533_v32 = vld [vmem:[%s6958_s12 + $0xed4] ss:$8 sps:$4 sm:$0xff]   ;;  %v6528_v10 = vld [vmem:[%s6958_s12 + $0x5d0] ss:$8 sps:$4 sm:$0xff]  }
 0x159   : > { %4215 = vmatmul.mubr.bf16.vlgmr.msra.gmra.mrb[0].mxu1 %v7397_v12 }
 0x15a   : > { %4584 = vmatmul.mubr.bf16.vlgmr.msra.gmra.mrb[0].mxu0 %v1074_v13  ;;  %4224 = vmatpush1.bf16.msra.mxu1 %v6450_v14  ;;  %v6536_v13 = vld [vmem:[%s6958_s12 + $0x5e4] ss:$8 sps:$4 sm:$0xff]  }
 0x15b   : > { %4593 = vmatpush1.bf16.msra.mxu0 %v6453_v15  ;;  %4225 = vmatprep.subr.bf16.mxu1 %v6458_v18  ;;  %v6539_v14 = vld [vmem:[%s6958_s12 + $0xee4] ss:$8 sps:$4 sm:$0xff]   ;;  %v931_v15 = vcombine.high %v7297_v56, %v7297_v56  ;;  %v6534_v18 = vld [vmem:[%s6958_s12 + $0x5e0] ss:$8 sps:$4 sm:$0xff]   ;;  %v6543_v56 = vld [vmem:[%s6958_s12 + $0xef0] ss:$8 sps:$4 sm:$0xff]  }
 0x15c   : > { %4594 = vmatprep.subr.bf16.mxu0 %v6461_v19  ;;  %4255 = vmatprep.mubr.bf16.mxu1 %v978_v20  ;;  %v6537_v19 = vld [vmem:[%s6958_s12 + $0xee0] ss:$8 sps:$4 sm:$0xff]   ;;  %v6542_v20 = vld [vmem:[%s6958_s12 + $0x5f4] ss:$8 sps:$4 sm:$0xff]  }
 0x15d   : > { %4624 = vmatprep.mubr.bf16.mxu0 %v7408_v58 }
 0x15e   : > { %4226 = vmatpush1.bf16.msra.mxu1 %v6456_v2  ;;  %v6545_v2 = vld [vmem:[%s6958_s12 + $0xef4] ss:$8 sps:$4 sm:$0xff]  }
 0x15f   : > { %4595 = vmatpush1.bf16.msra.mxu0 %v6459_v21  ;;  %4227 = vmatprep.subr.bf16.mxu1 %v6464_v22  ;;  %v7471_v21 = vrot.slane %v931_v15, %v7010_v53  ;;  %v6540_v22 = vld [vmem:[%s6958_s12 + $0x5f0] ss:$8 sps:$4 sm:$0xff]  }
 0x160   : > { %4596 = vmatprep.subr.bf16.mxu0 %v6467_v6  ;;  %v6548_v6 = vld [vmem:[%s6958_s12 + $0x604] ss:$8 sps:$4 sm:$0xff]   ;;  %v6616_v15 = vld [vmem:[%s6958_s12 + $0xfb0] ss:$8 sps:$4 sm:$0xff]  }
 0x162   : > { %4228 = vmatpush1.bf16.msra.mxu1 %v6462_v24  ;;  %v6552_v24 = vld [vmem:[%s6958_s12 + $0xf04] ss:$8 sps:$4 sm:$0xff]  }
 0x163   : > { %4597 = vmatpush1.bf16.msra.mxu0 %v6465_v25  ;;  %4229 = vmatprep.subr.bf16.mxu1 %v6470_v26  ;;  %v947_v25 = vcombine.high %v7471_v21, %v7471_v21  ;;  %v976_v26 = vcombine.high %v7397_v12, %v7397_v12  ;;  %v1077_v12 = vcombine.high %v7408_v58, %v7408_v58  ;;  %v6559_v58 = vld [vmem:[%s6958_s12 + $0x620] ss:$8 sps:$4 sm:$0xff]  }
 0x164   : > { %4598 = vmatprep.subr.bf16.mxu0 %v6473_v27  ;;  %v7483_v27 = vrot.slane %v7387_v8, %v7010_v53  ;;  %v6553_v8 = vld [vmem:[%s6958_s12 + $0x610] ss:$8 sps:$4 sm:$0xff]  }
 0x166   : > { %4230 = vmatpush1.bf16.msra.mxu1 %v6468_v28  ;;  %v6546_v28 = vld [vmem:[%s6958_s12 + $0x600] ss:$8 sps:$4 sm:$0xff]  }
 0x167   : > { %4599 = vmatpush1.bf16.msra.mxu0 %v6471_v29  ;;  %4231 = vmatprep.subr.bf16.mxu1 %v6476_v31  ;;  %v6550_v29 = vld [vmem:[%s6958_s12 + $0xf00] ss:$8 sps:$4 sm:$0xff]   ;;  %v6555_v31 = vld [vmem:[%s6958_s12 + $0x614] ss:$8 sps:$4 sm:$0xff]  }
 0x168   : > { %4600 = vmatprep.subr.bf16.mxu0 %v6479_v33  ;;  %v6558_v33 = vld [vmem:[%s6958_s12 + $0xf14] ss:$8 sps:$4 sm:$0xff]  }
 0x16a   : > { %4232 = vmatpush1.bf16.msra.mxu1 %v6474_v54  ;;  %v7490_v54 = vrot.slane %v947_v25, %v7010_v53  ;;  %v6633_v25 = vld [vmem:[%s6958_s12 + $0x6e4] ss:$8 sps:$4 sm:$0xff]  }
 0x16b   : > { %4601 = vmatpush1.bf16.msra.mxu0 %v6477_v34  ;;  %4233 = vmatprep.subr.bf16.mxu1 %v6482_v35  ;;  %v6556_v34 = vld [vmem:[%s6958_s12 + $0xf10] ss:$8 sps:$4 sm:$0xff]   ;;  %v6561_v35 = vld [vmem:[%s6958_s12 + $0x624] ss:$8 sps:$4 sm:$0xff]  }
 0x16c   : > { %4602 = vmatprep.subr.bf16.mxu0 %v6485_v36  ;;  %v6564_v36 = vld [vmem:[%s6958_s12 + $0xf24] ss:$8 sps:$4 sm:$0xff]  }
 0x16e   : > { %4234 = vmatpush1.bf16.msra.mxu1 %v6480_v37  ;;  %v6562_v37 = vld [vmem:[%s6958_s12 + $0xf20] ss:$8 sps:$4 sm:$0xff]  }
 0x16f   : > { %4603 = vmatpush1.bf16.msra.mxu0 %v6483_v39  ;;  %4235 = vmatprep.subr.bf16.mxu1 %v6488_v41  ;;  %v6567_v39 = vld [vmem:[%s6958_s12 + $0x634] ss:$8 sps:$4 sm:$0xff]  }
 0x170   : > { %4604 = vmatprep.subr.bf16.mxu0 %v6491_v42  ;;  %v6570_v41 = vld [vmem:[%s6958_s12 + $0xf34] ss:$8 sps:$4 sm:$0xff]   ;;  %v6565_v42 = vld [vmem:[%s6958_s12 + $0x630] ss:$8 sps:$4 sm:$0xff]  }
 0x172   : > { %4236 = vmatpush1.bf16.msra.mxu1 %v6486_v23  ;;  %v6568_v23 = vld [vmem:[%s6958_s12 + $0xf30] ss:$8 sps:$4 sm:$0xff]  }
 0x173   : > { %4605 = vmatpush1.bf16.msra.mxu0 %v6489_v44  ;;  %4237 = vmatprep.subr.bf16.mxu1 %v6494_v45  ;;  %v6573_v44 = vld [vmem:[%s6958_s12 + $0x644] ss:$8 sps:$4 sm:$0xff]  }
 0x174   : > { %4606 = vmatprep.subr.bf16.mxu0 %v6497_v46  ;;  %v6576_v45 = vld [vmem:[%s6958_s12 + $0xf44] ss:$8 sps:$4 sm:$0xff]   ;;  %v6571_v46 = vld [vmem:[%s6958_s12 + $0x640] ss:$8 sps:$4 sm:$0xff]  }
 0x176   : > { %4238 = vmatpush1.bf16.msra.mxu1 %v6492_v30  ;;  %v6574_v30 = vld [vmem:[%s6958_s12 + $0xf40] ss:$8 sps:$4 sm:$0xff]  }
 0x177   : > { %4607 = vmatpush1.bf16.msra.mxu0 %v6495_v47  ;;  %4239 = vmatprep.subr.bf16.mxu1 %v6500_v49  ;;  %v6579_v47 = vld [vmem:[%s6958_s12 + $0x654] ss:$8 sps:$4 sm:$0xff]  }
 0x178   : > { %4608 = vmatprep.subr.bf16.mxu0 %v6503_v51  ;;  %v6582_v49 = vld [vmem:[%s6958_s12 + $0xf54] ss:$8 sps:$4 sm:$0xff]   ;;  %v6577_v51 = vld [vmem:[%s6958_s12 + $0x650] ss:$8 sps:$4 sm:$0xff]  }
 0x17a   : > { %4240 = vmatpush1.bf16.msra.mxu1 %v6498_v52  ;;  %v6580_v52 = vld [vmem:[%s6958_s12 + $0xf50] ss:$8 sps:$4 sm:$0xff]  }
 0x17b   : > { %4609 = vmatpush1.bf16.msra.mxu0 %v6501_v55  ;;  %4241 = vmatprep.subr.bf16.mxu1 %v6506_v57  ;;  %v6585_v55 = vld [vmem:[%s6958_s12 + $0x664] ss:$8 sps:$4 sm:$0xff]  }
 0x17c   : > { %4610 = vmatprep.subr.bf16.mxu0 %v6509_v38  ;;  %v6588_v57 = vld [vmem:[%s6958_s12 + $0xf64] ss:$8 sps:$4 sm:$0xff]   ;;  %v6583_v38 = vld [vmem:[%s6958_s12 + $0x660] ss:$8 sps:$4 sm:$0xff]  }
 0x17e   : > { %4242 = vmatpush1.bf16.msra.mxu1 %v6504_v59  ;;  %v6586_v59 = vld [vmem:[%s6958_s12 + $0xf60] ss:$8 sps:$4 sm:$0xff]  }
 0x17f   : > { %4611 = vmatpush1.bf16.msra.mxu0 %v6507_v43  ;;  %4243 = vmatprep.subr.bf16.mxu1 %v6512_v60  ;;  %v6591_v43 = vld [vmem:[%s6958_s12 + $0x674] ss:$8 sps:$4 sm:$0xff]  }
 0x180   : > { %4612 = vmatprep.subr.bf16.mxu0 %v6515_v61  ;;  %v6594_v60 = vld [vmem:[%s6958_s12 + $0xf74] ss:$8 sps:$4 sm:$0xff]   ;;  %v6589_v61 = vld [vmem:[%s6958_s12 + $0x670] ss:$8 sps:$4 sm:$0xff]  }
 0x182   : > { %4244 = vmatpush1.bf16.msra.mxu1 %v6510_v62  ;;  %v6592_v62 = vld [vmem:[%s6958_s12 + $0xf70] ss:$8 sps:$4 sm:$0xff]  }
 0x183   : > { %4613 = vmatpush1.bf16.msra.mxu0 %v6513_v63  ;;  %4245 = vmatprep.subr.bf16.mxu1 %v6518_v0  ;;  %v6597_v63 = vld [vmem:[%s6958_s12 + $0x684] ss:$8 sps:$4 sm:$0xff]  }
 0x184   : > { %4614 = vmatprep.subr.bf16.mxu0 %v6521_v1  ;;  %v6600_v0 = vld [vmem:[%s6958_s12 + $0xf84] ss:$8 sps:$4 sm:$0xff]   ;;  %v6595_v1 = vld [vmem:[%s6958_s12 + $0x680] ss:$8 sps:$4 sm:$0xff]  }
 0x186   : > { %4246 = vmatpush1.bf16.msra.mxu1 %v6516_v3  ;;  %v6598_v3 = vld [vmem:[%s6958_s12 + $0xf80] ss:$8 sps:$4 sm:$0xff]  }
 0x187   : > { %4615 = vmatpush1.bf16.msra.mxu0 %v6519_v4  ;;  %4247 = vmatprep.subr.bf16.mxu1 %v6524_v7  ;;  %v6603_v4 = vld [vmem:[%s6958_s12 + $0x694] ss:$8 sps:$4 sm:$0xff]  }
 0x188   : > { %4616 = vmatprep.subr.bf16.mxu0 %v6527_v16  ;;  %v6606_v7 = vld [vmem:[%s6958_s12 + $0xf94] ss:$8 sps:$4 sm:$0xff]   ;;  %v6601_v16 = vld [vmem:[%s6958_s12 + $0x690] ss:$8 sps:$4 sm:$0xff]  }
 0x18a   : > { %4248 = vmatpush1.bf16.msra.mxu1 %v6522_v50  ;;  %v6604_v50 = vld [vmem:[%s6958_s12 + $0xf90] ss:$8 sps:$4 sm:$0xff]  }
 0x18b   : > { %4617 = vmatpush1.bf16.msra.mxu0 %v6525_v9  ;;  %4249 = vmatprep.subr.bf16.mxu1 %v6530_v40  ;;  %v6609_v9 = vld [vmem:[%s6958_s12 + $0x6a4] ss:$8 sps:$4 sm:$0xff]  }
 0x18c   : > { %4618 = vmatprep.subr.bf16.mxu0 %v6533_v32  ;;  %v6612_v40 = vld [vmem:[%s6958_s12 + $0xfa4] ss:$8 sps:$4 sm:$0xff]   ;;  %v6607_v32 = vld [vmem:[%s6958_s12 + $0x6a0] ss:$8 sps:$4 sm:$0xff]  }
 0x18e   : > { %4250 = vmatpush1.bf16.msra.mxu1 %v6528_v10  ;;  %v6610_v10 = vld [vmem:[%s6958_s12 + $0xfa0] ss:$8 sps:$4 sm:$0xff]  }
 0x18f   : > { %4619 = vmatpush1.bf16.msra.mxu0 %v6531_v11  ;;  %4251 = vmatprep.subr.bf16.mxu1 %v6536_v13  ;;  %v6615_v11 = vld [vmem:[%s6958_s12 + $0x6b4] ss:$8 sps:$4 sm:$0xff]  }
 0x190   : > { %4620 = vmatprep.subr.bf16.mxu0 %v6539_v14  ;;  %v6618_v13 = vld [vmem:[%s6958_s12 + $0xfb4] ss:$8 sps:$4 sm:$0xff]   ;;  %v6613_v14 = vld [vmem:[%s6958_s12 + $0x6b0] ss:$8 sps:$4 sm:$0xff]  }
 0x192   : > { %4252 = vmatpush1.bf16.msra.mxu1 %v6534_v18  ;;  %v6621_v18 = vld [vmem:[%s6958_s12 + $0x6c4] ss:$8 sps:$4 sm:$0xff]  }
 0x193   : > { %4621 = vmatpush1.bf16.msra.mxu0 %v6537_v19  ;;  %4253 = vmatprep.subr.bf16.mxu1 %v6542_v20  ;;  %v6624_v19 = vld [vmem:[%s6958_s12 + $0xfc4] ss:$8 sps:$4 sm:$0xff]   ;;  %v6619_v20 = vld [vmem:[%s6958_s12 + $0x6c0] ss:$8 sps:$4 sm:$0xff]  }
 0x194   : > { %4622 = vmatprep.subr.bf16.mxu0 %v6545_v2  ;;  %v6622_v2 = vld [vmem:[%s6958_s12 + $0xfc0] ss:$8 sps:$4 sm:$0xff]  }
 0x196   : > { %4254 = vmatpush1.bf16.msra.mxu1 %v6540_v22  ;;  %v6627_v22 = vld [vmem:[%s6958_s12 + $0x6d4] ss:$8 sps:$4 sm:$0xff]  }
 0x197   : > { %4623 = vmatpush1.bf16.msra.mxu0 %v6543_v56  ;;  %4264 = vmatprep.subr.bf16.mxu1 %v6548_v6  ;;  %v6630_v56 = vld [vmem:[%s6958_s12 + $0xfd4] ss:$8 sps:$4 sm:$0xff]   ;;  %v6625_v6 = vld [vmem:[%s6958_s12 + $0x6d0] ss:$8 sps:$4 sm:$0xff]  }
 0x198   : > { %4633 = vmatprep.subr.bf16.mxu0 %v6552_v24  ;;  %v6628_v24 = vld [vmem:[%s6958_s12 + $0xfd0] ss:$8 sps:$4 sm:$0xff]  }
 0x199   : > { %4256 = vmatmul.mubr.bf16.vlgmr.msra.gmra.mrb[0].mxu1 %v976_v26  ;;  %v6636_v26 = vld [vmem:[%s6958_s12 + $0xfe4] ss:$8 sps:$4 sm:$0xff]  }
 0x19a   : > { %4625 = vmatmul.mubr.bf16.vlgmr.msra.gmra.mrb[0].mxu0 %v7483_v27  ;;  %4265 = vmatpush1.bf16.msra.mxu1 %v6546_v28  ;;  %v6631_v28 = vld [vmem:[%s6958_s12 + $0x6e0] ss:$8 sps:$4 sm:$0xff]  }
 0x19b   : > { %4634 = vmatpush1.bf16.msra.mxu0 %v6550_v29  ;;  %4266 = vmatprep.subr.bf16.mxu1 %v6555_v31  ;;  %v6634_v29 = vld [vmem:[%s6958_s12 + $0xfe0] ss:$8 sps:$4 sm:$0xff]   ;;  %v6639_v31 = vld [vmem:[%s6958_s12 + $0x6f4] ss:$8 sps:$4 sm:$0xff]  }
 0x19c   : > { %4635 = vmatprep.subr.bf16.mxu0 %v6558_v33  ;;  %4296 = vmatprep.mubr.bf16.mxu1 %v7490_v54  ;;  %v6642_v33 = vld [vmem:[%s6958_s12 + $0xff4] ss:$8 sps:$4 sm:$0xff]  }
 0x19d   : > { %4665 = vmatprep.mubr.bf16.mxu0 %v1077_v12  ;;  %v7553_v12 = vld.sshfl [vmem:[%s6953_s8 + $0x20] sm:$0x33 pattern:$0x75316420] }
 0x19e   : > { %4267 = vmatpush1.bf16.msra.mxu1 %v6553_v8  ;;  %v6637_v8 = vld [vmem:[%s6958_s12 + $0x6f0] ss:$8 sps:$4 sm:$0xff]  }
 0x19f   : > { %4636 = vmatpush1.bf16.msra.mxu0 %v6556_v34  ;;  %4268 = vmatprep.subr.bf16.mxu1 %v6561_v35  ;;  %v6640_v34 = vld [vmem:[%s6958_s12 + $0xff0] ss:$8 sps:$4 sm:$0xff]   ;;  %v6646_v35 = vld [vmem:[%s6958_s12 + $0x704] ss:$8 sps:$4 sm:$0xff]  }
 0x1a0   : > { %4637 = vmatprep.subr.bf16.mxu0 %v6564_v36  ;;  %v6649_v36 = vld [vmem:[%s6958_s12 + $0x1004] ss:$8 sps:$4 sm:$0xff]  }
 0x1a2   : > { %4269 = vmatpush1.bf16.msra.mxu1 %v6559_v58  ;;  %v1085_v58 = vcombine.high %v7553_v12, %v7553_v12 }
 0x1a3   : > { %4638 = vmatpush1.bf16.msra.mxu0 %v6562_v37  ;;  %4270 = vmatprep.subr.bf16.mxu1 %v6567_v39  ;;  %v7563_v37 = vrot.slane %v7471_v21, %v7010_v53  ;;  %v1075_v39 = vcombine.high %v7483_v27, %v7483_v27  ;;  %v6650_v27 = vld [vmem:[%s6958_s12 + $0x710] ss:$8 sps:$4 sm:$0xff]  }
 0x1a4   : > { %4639 = vmatprep.subr.bf16.mxu0 %v6570_v41  ;;  %v6644_v41 = vld [vmem:[%s6958_s12 + $0x700] ss:$8 sps:$4 sm:$0xff]   ;;  %v7574_v21 = vrot.slane %v1085_v58, %v7010_v53  ;;  %v6730_v58 = vld [vmem:[%s6958_s12 + $0x7e4] ss:$8 sps:$4 sm:$0xff]  }
 0x1a6   : > { %4271 = vmatpush1.bf16.msra.mxu1 %v6565_v42  ;;  %v6647_v42 = vld [vmem:[%s6958_s12 + $0x1000] ss:$8 sps:$4 sm:$0xff]  }
 0x1a7   : > { %4640 = vmatpush1.bf16.msra.mxu0 %v6568_v23  ;;  %4272 = vmatprep.subr.bf16.mxu1 %v6573_v44  ;;  %v6652_v23 = vld [vmem:[%s6958_s12 + $0x714] ss:$8 sps:$4 sm:$0xff]  }
 0x1a8   : > { %4641 = vmatprep.subr.bf16.mxu0 %v6576_v45  ;;  %v6655_v44 = vld [vmem:[%s6958_s12 + $0x1014] ss:$8 sps:$4 sm:$0xff]   ;;  %v979_v45 = vcombine.high %v7490_v54, %v7490_v54  ;;  %v6661_v54 = vld [vmem:[%s6958_s12 + $0x1024] ss:$8 sps:$4 sm:$0xff]  }
 0x1aa   : > { %4273 = vmatpush1.bf16.msra.mxu1 %v6571_v46  ;;  %v6653_v46 = vld [vmem:[%s6958_s12 + $0x1010] ss:$8 sps:$4 sm:$0xff]  }
 0x1ab   : > { %4642 = vmatpush1.bf16.msra.mxu0 %v6574_v30  ;;  %4274 = vmatprep.subr.bf16.mxu1 %v6579_v47  ;;  %v6658_v30 = vld [vmem:[%s6958_s12 + $0x724] ss:$8 sps:$4 sm:$0xff]   ;;  %v6656_v47 = vld [vmem:[%s6958_s12 + $0x720] ss:$8 sps:$4 sm:$0xff]  }
 0x1ac   : > { %4643 = vmatprep.subr.bf16.mxu0 %v6582_v49  ;;  %v6659_v49 = vld [vmem:[%s6958_s12 + $0x1020] ss:$8 sps:$4 sm:$0xff]  }
 0x1ae   : > { %4275 = vmatpush1.bf16.msra.mxu1 %v6577_v51  ;;  %v6664_v51 = vld [vmem:[%s6958_s12 + $0x734] ss:$8 sps:$4 sm:$0xff]  }
 0x1af   : > { %4644 = vmatpush1.bf16.msra.mxu0 %v6580_v52  ;;  %4276 = vmatprep.subr.bf16.mxu1 %v6585_v55  ;;  %v6667_v52 = vld [vmem:[%s6958_s12 + $0x1034] ss:$8 sps:$4 sm:$0xff]   ;;  %v6662_v55 = vld [vmem:[%s6958_s12 + $0x730] ss:$8 sps:$4 sm:$0xff]  }
 0x1b0   : > { %4645 = vmatprep.subr.bf16.mxu0 %v6588_v57  ;;  %v6665_v57 = vld [vmem:[%s6958_s12 + $0x1030] ss:$8 sps:$4 sm:$0xff]  }
 0x1b2   : > { %4277 = vmatpush1.bf16.msra.mxu1 %v6583_v38  ;;  %v6670_v38 = vld [vmem:[%s6958_s12 + $0x744] ss:$8 sps:$4 sm:$0xff]  }
 0x1b3   : > { %4646 = vmatpush1.bf16.msra.mxu0 %v6586_v59  ;;  %4278 = vmatprep.subr.bf16.mxu1 %v6591_v43  ;;  %v6673_v59 = vld [vmem:[%s6958_s12 + $0x1044] ss:$8 sps:$4 sm:$0xff]   ;;  %v6668_v43 = vld [vmem:[%s6958_s12 + $0x740] ss:$8 sps:$4 sm:$0xff]  }
 0x1b4   : > { %4647 = vmatprep.subr.bf16.mxu0 %v6594_v60  ;;  %v6671_v60 = vld [vmem:[%s6958_s12 + $0x1040] ss:$8 sps:$4 sm:$0xff]  }
 0x1b6   : > { %4279 = vmatpush1.bf16.msra.mxu1 %v6589_v61  ;;  %v6676_v61 = vld [vmem:[%s6958_s12 + $0x754] ss:$8 sps:$4 sm:$0xff]  }
 0x1b7   : > { %4648 = vmatpush1.bf16.msra.mxu0 %v6592_v62  ;;  %4280 = vmatprep.subr.bf16.mxu1 %v6597_v63  ;;  %v6679_v62 = vld [vmem:[%s6958_s12 + $0x1054] ss:$8 sps:$4 sm:$0xff]   ;;  %v6674_v63 = vld [vmem:[%s6958_s12 + $0x750] ss:$8 sps:$4 sm:$0xff]  }
 0x1b8   : > { %4649 = vmatprep.subr.bf16.mxu0 %v6600_v0  ;;  %v6677_v0 = vld [vmem:[%s6958_s12 + $0x1050] ss:$8 sps:$4 sm:$0xff]  }
 0x1ba   : > { %4281 = vmatpush1.bf16.msra.mxu1 %v6595_v1  ;;  %v6682_v1 = vld [vmem:[%s6958_s12 + $0x764] ss:$8 sps:$4 sm:$0xff]  }
 0x1bb   : > { %4650 = vmatpush1.bf16.msra.mxu0 %v6598_v3  ;;  %4282 = vmatprep.subr.bf16.mxu1 %v6603_v4  ;;  %v6685_v3 = vld [vmem:[%s6958_s12 + $0x1064] ss:$8 sps:$4 sm:$0xff]   ;;  %v6680_v4 = vld [vmem:[%s6958_s12 + $0x760] ss:$8 sps:$4 sm:$0xff]  }
 0x1bc   : > { %4651 = vmatprep.subr.bf16.mxu0 %v6606_v7  ;;  %v6683_v7 = vld [vmem:[%s6958_s12 + $0x1060] ss:$8 sps:$4 sm:$0xff]  }
 0x1be   : > { %4283 = vmatpush1.bf16.msra.mxu1 %v6601_v16  ;;  %v6688_v16 = vld [vmem:[%s6958_s12 + $0x774] ss:$8 sps:$4 sm:$0xff]  }
 0x1bf   : > { %4652 = vmatpush1.bf16.msra.mxu0 %v6604_v50  ;;  %4284 = vmatprep.subr.bf16.mxu1 %v6609_v9  ;;  %v6691_v50 = vld [vmem:[%s6958_s12 + $0x1074] ss:$8 sps:$4 sm:$0xff]   ;;  %v6686_v9 = vld [vmem:[%s6958_s12 + $0x770] ss:$8 sps:$4 sm:$0xff]  }
 0x1c0   : > { %4653 = vmatprep.subr.bf16.mxu0 %v6612_v40  ;;  %v6689_v40 = vld [vmem:[%s6958_s12 + $0x1070] ss:$8 sps:$4 sm:$0xff]  }
 0x1c2   : > { %4285 = vmatpush1.bf16.msra.mxu1 %v6607_v32  ;;  %v6694_v32 = vld [vmem:[%s6958_s12 + $0x784] ss:$8 sps:$4 sm:$0xff]  }
 0x1c3   : > { %4654 = vmatpush1.bf16.msra.mxu0 %v6610_v10  ;;  %4286 = vmatprep.subr.bf16.mxu1 %v6615_v11  ;;  %v6697_v10 = vld [vmem:[%s6958_s12 + $0x1084] ss:$8 sps:$4 sm:$0xff]   ;;  %v6692_v11 = vld [vmem:[%s6958_s12 + $0x780] ss:$8 sps:$4 sm:$0xff]  }
 0x1c4   : > { %4655 = vmatprep.subr.bf16.mxu0 %v6618_v13  ;;  %v6695_v13 = vld [vmem:[%s6958_s12 + $0x1080] ss:$8 sps:$4 sm:$0xff]  }
 0x1c6   : > { %4287 = vmatpush1.bf16.msra.mxu1 %v6613_v14  ;;  %v6700_v14 = vld [vmem:[%s6958_s12 + $0x794] ss:$8 sps:$4 sm:$0xff]  }
 0x1c7   : > { %4656 = vmatpush1.bf16.msra.mxu0 %v6616_v15  ;;  %4288 = vmatprep.subr.bf16.mxu1 %v6621_v18  ;;  %v6703_v15 = vld [vmem:[%s6958_s12 + $0x1094] ss:$8 sps:$4 sm:$0xff]   ;;  %v6698_v18 = vld [vmem:[%s6958_s12 + $0x790] ss:$8 sps:$4 sm:$0xff]  }
 0x1c8   : > { %4657 = vmatprep.subr.bf16.mxu0 %v6624_v19  ;;  %v6701_v19 = vld [vmem:[%s6958_s12 + $0x1090] ss:$8 sps:$4 sm:$0xff]  }
 0x1ca   : > { %4289 = vmatpush1.bf16.msra.mxu1 %v6619_v20  ;;  %v6706_v20 = vld [vmem:[%s6958_s12 + $0x7a4] ss:$8 sps:$4 sm:$0xff]  }
 0x1cb   : > { %4658 = vmatpush1.bf16.msra.mxu0 %v6622_v2  ;;  %4290 = vmatprep.subr.bf16.mxu1 %v6627_v22  ;;  %v6709_v2 = vld [vmem:[%s6958_s12 + $0x10a4] ss:$8 sps:$4 sm:$0xff]   ;;  %v6704_v22 = vld [vmem:[%s6958_s12 + $0x7a0] ss:$8 sps:$4 sm:$0xff]  }
 0x1cc   : > { %4659 = vmatprep.subr.bf16.mxu0 %v6630_v56  ;;  %v6707_v56 = vld [vmem:[%s6958_s12 + $0x10a0] ss:$8 sps:$4 sm:$0xff]  }
 0x1ce   : > { %4291 = vmatpush1.bf16.msra.mxu1 %v6625_v6  ;;  %v6712_v6 = vld [vmem:[%s6958_s12 + $0x7b4] ss:$8 sps:$4 sm:$0xff]  }
 0x1cf   : > { %4660 = vmatpush1.bf16.msra.mxu0 %v6628_v24  ;;  %4292 = vmatprep.subr.bf16.mxu1 %v6633_v25  ;;  %v6715_v24 = vld [vmem:[%s6958_s12 + $0x10b4] ss:$8 sps:$4 sm:$0xff]   ;;  %v6710_v25 = vld [vmem:[%s6958_s12 + $0x7b0] ss:$8 sps:$4 sm:$0xff]  }
 0x1d0   : > { %4661 = vmatprep.subr.bf16.mxu0 %v6636_v26  ;;  %v6713_v26 = vld [vmem:[%s6958_s12 + $0x10b0] ss:$8 sps:$4 sm:$0xff]  }
 0x1d2   : > { %4293 = vmatpush1.bf16.msra.mxu1 %v6631_v28  ;;  %v6718_v28 = vld [vmem:[%s6958_s12 + $0x7c4] ss:$8 sps:$4 sm:$0xff]  }
 0x1d3   : > { %4662 = vmatpush1.bf16.msra.mxu0 %v6634_v29  ;;  %4294 = vmatprep.subr.bf16.mxu1 %v6639_v31  ;;  %v6721_v29 = vld [vmem:[%s6958_s12 + $0x10c4] ss:$8 sps:$4 sm:$0xff]   ;;  %v6716_v31 = vld [vmem:[%s6958_s12 + $0x7c0] ss:$8 sps:$4 sm:$0xff]  }
 0x1d4   : > { %4663 = vmatprep.subr.bf16.mxu0 %v6642_v33  ;;  %v6719_v33 = vld [vmem:[%s6958_s12 + $0x10c0] ss:$8 sps:$4 sm:$0xff]  }
 0x1d6   : > { %4295 = vmatpush1.bf16.msra.mxu1 %v6637_v8  ;;  %v6724_v8 = vld [vmem:[%s6958_s12 + $0x7d4] ss:$8 sps:$4 sm:$0xff]  }
 0x1d7   : > { %4664 = vmatpush1.bf16.msra.mxu0 %v6640_v34  ;;  %4305 = vmatprep.subr.bf16.mxu1 %v6646_v35  ;;  %v6727_v34 = vld [vmem:[%s6958_s12 + $0x10d4] ss:$8 sps:$4 sm:$0xff]   ;;  %v6722_v35 = vld [vmem:[%s6958_s12 + $0x7d0] ss:$8 sps:$4 sm:$0xff]  }
 0x1d8   : > { %4674 = vmatprep.subr.bf16.mxu0 %v6649_v36  ;;  %v6725_v36 = vld [vmem:[%s6958_s12 + $0x10d0] ss:$8 sps:$4 sm:$0xff]  }
 0x1d9   : > { %4297 = vmatmul.mubr.bf16.vlgmr.msra.gmra.mrb[0].mxu1 %v7563_v37 }
 0x1da   : > { %4666 = vmatmul.mubr.bf16.vlgmr.msra.gmra.mrb[0].mxu0 %v1075_v39  ;;  %4306 = vmatpush1.bf16.msra.mxu1 %v6644_v41  ;;  %v6733_v39 = vld [vmem:[%s6958_s12 + $0x10e4] ss:$8 sps:$4 sm:$0xff]   ;;  %v6728_v41 = vld [vmem:[%s6958_s12 + $0x7e0] ss:$8 sps:$4 sm:$0xff]  }
 0x1db   : > { %4675 = vmatpush1.bf16.msra.mxu0 %v6647_v42  ;;  %4307 = vmatprep.subr.bf16.mxu1 %v6652_v23  ;;  %v6731_v42 = vld [vmem:[%s6958_s12 + $0x10e0] ss:$8 sps:$4 sm:$0xff]   ;;  %v6736_v23 = vld [vmem:[%s6958_s12 + $0x7f4] ss:$8 sps:$4 sm:$0xff]  }
 0x1dc   : > { %4676 = vmatprep.subr.bf16.mxu0 %v6655_v44  ;;  %4337 = vmatprep.mubr.bf16.mxu1 %v979_v45  ;;  %v6739_v44 = vld [vmem:[%s6958_s12 + $0x10f4] ss:$8 sps:$4 sm:$0xff]   ;;  %v6734_v45 = vld [vmem:[%s6958_s12 + $0x7f0] ss:$8 sps:$4 sm:$0xff]  }
 0x1dd   : > { %4706 = vmatprep.mubr.bf16.mxu0 %v7574_v21 }
 0x1de   : > { %4308 = vmatpush1.bf16.msra.mxu1 %v6650_v27  ;;  %v6737_v27 = vld [vmem:[%s6958_s12 + $0x10f0] ss:$8 sps:$4 sm:$0xff]  }
 0x1df   : > { %4677 = vmatpush1.bf16.msra.mxu0 %v6653_v46  ;;  %4309 = vmatprep.subr.bf16.mxu1 %v6658_v30  ;;  %v6742_v46 = vld [vmem:[%s6958_s12 + $0x804] ss:$8 sps:$4 sm:$0xff]  }
 0x1e0   : > { %4678 = vmatprep.subr.bf16.mxu0 %v6661_v54  ;;  %v6745_v30 = vld [vmem:[%s6958_s12 + $0x1104] ss:$8 sps:$4 sm:$0xff]   ;;  %v977_v54 = vcombine.high %v7563_v37, %v7563_v37 }
 0x1e1   : > { %v6754_v37 = vld [vmem:[%s6958_s12 + $0x824] ss:$8 sps:$4 sm:$0xff]  }
 0x1e2   : > { %4310 = vmatpush1.bf16.msra.mxu1 %v6656_v47  ;;  %v7642_v47 = vrot.slane %v7553_v12, %v7010_v53  ;;  %v6746_v53 = vld [vmem:[%s6958_s12 + $0x810] ss:$8 sps:$4 sm:$0xff]  }
 0x1e3   : > { %4679 = vmatpush1.bf16.msra.mxu0 %v6659_v49  ;;  %4311 = vmatprep.subr.bf16.mxu1 %v6664_v51  ;;  %v6740_v49 = vld [vmem:[%s6958_s12 + $0x800] ss:$8 sps:$4 sm:$0xff]   ;;  %v6749_v12 = vld [vmem:[%s6958_s12 + $0x1110] ss:$8 sps:$4 sm:$0xff]  }
 0x1e4   : > { %4680 = vmatprep.subr.bf16.mxu0 %v6667_v52  ;;  %v6743_v51 = vld [vmem:[%s6958_s12 + $0x1100] ss:$8 sps:$4 sm:$0xff]   ;;  %v6748_v52 = vld [vmem:[%s6958_s12 + $0x814] ss:$8 sps:$4 sm:$0xff]  }
 0x1e6   : > { %4312 = vmatpush1.bf16.msra.mxu1 %v6662_v55  ;;  %v6751_v55 = vld [vmem:[%s6958_s12 + $0x1114] ss:$8 sps:$4 sm:$0xff]  }
 0x1e7   : > { %4681 = vmatpush1.bf16.msra.mxu0 %v6665_v57  ;;  %4313 = vmatprep.subr.bf16.mxu1 %v6670_v38  ;;  %v1101_v57 = vcombine.high %v7574_v21, %v7574_v21  ;;  %v6757_v38 = vld [vmem:[%s6958_s12 + $0x1124] ss:$8 sps:$4 sm:$0xff]   ;;  %v6752_v21 = vld [vmem:[%s6958_s12 + $0x820] ss:$8 sps:$4 sm:$0xff]  }
 0x1e8   : > { %4682 = vmatprep.subr.bf16.mxu0 %v6673_v59  ;;  %v6755_v59 = vld [vmem:[%s6958_s12 + $0x1120] ss:$8 sps:$4 sm:$0xff]  }
 0x1ea   : > { %4314 = vmatpush1.bf16.msra.mxu1 %v6668_v43  ;;  %v6760_v43 = vld [vmem:[%s6958_s12 + $0x834] ss:$8 sps:$4 sm:$0xff]  }
 0x1eb   : > { %4683 = vmatpush1.bf16.msra.mxu0 %v6671_v60  ;;  %4315 = vmatprep.subr.bf16.mxu1 %v6676_v61  ;;  %v6763_v60 = vld [vmem:[%s6958_s12 + $0x1134] ss:$8 sps:$4 sm:$0xff]   ;;  %v6758_v61 = vld [vmem:[%s6958_s12 + $0x830] ss:$8 sps:$4 sm:$0xff]  }
 0x1ec   : > { %4684 = vmatprep.subr.bf16.mxu0 %v6679_v62  ;;  %v6766_v62 = vld [vmem:[%s6958_s12 + $0x844] ss:$8 sps:$4 sm:$0xff]  }
 0x1ee   : > { %4316 = vmatpush1.bf16.msra.mxu1 %v6674_v63  ;;  %v6769_v63 = vld [vmem:[%s6958_s12 + $0x1144] ss:$8 sps:$4 sm:$0xff]  }
 0x1ef   : > { %4685 = vmatpush1.bf16.msra.mxu0 %v6677_v0  ;;  %4317 = vmatprep.subr.bf16.mxu1 %v6682_v1  ;;  %v6764_v0 = vld [vmem:[%s6958_s12 + $0x840] ss:$8 sps:$4 sm:$0xff]  }
 0x1f0   : > { %4686 = vmatprep.subr.bf16.mxu0 %v6685_v3  ;;  %v6767_v1 = vld [vmem:[%s6958_s12 + $0x1140] ss:$8 sps:$4 sm:$0xff]   ;;  %v6772_v3 = vld [vmem:[%s6958_s12 + $0x854] ss:$8 sps:$4 sm:$0xff]  }
 0x1f2   : > { %4318 = vmatpush1.bf16.msra.mxu1 %v6680_v4  ;;  %v6775_v4 = vld [vmem:[%s6958_s12 + $0x1154] ss:$8 sps:$4 sm:$0xff]  }
 0x1f3   : > { %4687 = vmatpush1.bf16.msra.mxu0 %v6683_v7  ;;  %4319 = vmatprep.subr.bf16.mxu1 %v6688_v16  ;;  %v6770_v7 = vld [vmem:[%s6958_s12 + $0x850] ss:$8 sps:$4 sm:$0xff]  }
 0x1f4   : > { %4688 = vmatprep.subr.bf16.mxu0 %v6691_v50  ;;  %v6773_v16 = vld [vmem:[%s6958_s12 + $0x1150] ss:$8 sps:$4 sm:$0xff]   ;;  %v6778_v50 = vld [vmem:[%s6958_s12 + $0x864] ss:$8 sps:$4 sm:$0xff]  }
 0x1f6   : > { %4320 = vmatpush1.bf16.msra.mxu1 %v6686_v9  ;;  %v6781_v9 = vld [vmem:[%s6958_s12 + $0x1164] ss:$8 sps:$4 sm:$0xff]  }
 0x1f7   : > { %4689 = vmatpush1.bf16.msra.mxu0 %v6689_v40  ;;  %4321 = vmatprep.subr.bf16.mxu1 %v6694_v32  ;;  %v6776_v40 = vld [vmem:[%s6958_s12 + $0x860] ss:$8 sps:$4 sm:$0xff]  }
 0x1f8   : > { %4690 = vmatprep.subr.bf16.mxu0 %v6697_v10  ;;  %v6779_v32 = vld [vmem:[%s6958_s12 + $0x1160] ss:$8 sps:$4 sm:$0xff]   ;;  %v6784_v10 = vld [vmem:[%s6958_s12 + $0x874] ss:$8 sps:$4 sm:$0xff]  }
 0x1fa   : > { %4322 = vmatpush1.bf16.msra.mxu1 %v6692_v11  ;;  %v6787_v11 = vld [vmem:[%s6958_s12 + $0x1174] ss:$8 sps:$4 sm:$0xff]  }
 0x1fb   : > { %4691 = vmatpush1.bf16.msra.mxu0 %v6695_v13  ;;  %4323 = vmatprep.subr.bf16.mxu1 %v6700_v14  ;;  %v6782_v13 = vld [vmem:[%s6958_s12 + $0x870] ss:$8 sps:$4 sm:$0xff]  }
 0x1fc   : > { %4692 = vmatprep.subr.bf16.mxu0 %v6703_v15  ;;  %v6785_v14 = vld [vmem:[%s6958_s12 + $0x1170] ss:$8 sps:$4 sm:$0xff]   ;;  %v6790_v15 = vld [vmem:[%s6958_s12 + $0x884] ss:$8 sps:$4 sm:$0xff]  }
 0x1fe   : > { %4324 = vmatpush1.bf16.msra.mxu1 %v6698_v18  ;;  %v6793_v18 = vld [vmem:[%s6958_s12 + $0x1184] ss:$8 sps:$4 sm:$0xff]  }
 0x1ff   : > { %4693 = vmatpush1.bf16.msra.mxu0 %v6701_v19  ;;  %4325 = vmatprep.subr.bf16.mxu1 %v6706_v20  ;;  %v6788_v19 = vld [vmem:[%s6958_s12 + $0x880] ss:$8 sps:$4 sm:$0xff]  }
 0x200   : > { %4694 = vmatprep.subr.bf16.mxu0 %v6709_v2  ;;  %v6791_v20 = vld [vmem:[%s6958_s12 + $0x1180] ss:$8 sps:$4 sm:$0xff]   ;;  %v6796_v2 = vld [vmem:[%s6958_s12 + $0x894] ss:$8 sps:$4 sm:$0xff]  }
 0x202   : > { %4326 = vmatpush1.bf16.msra.mxu1 %v6704_v22  ;;  %v6799_v22 = vld [vmem:[%s6958_s12 + $0x1194] ss:$8 sps:$4 sm:$0xff]  }
 0x203   : > { %4695 = vmatpush1.bf16.msra.mxu0 %v6707_v56  ;;  %4327 = vmatprep.subr.bf16.mxu1 %v6712_v6  ;;  %v6794_v56 = vld [vmem:[%s6958_s12 + $0x890] ss:$8 sps:$4 sm:$0xff]  }
 0x204   : > { %4696 = vmatprep.subr.bf16.mxu0 %v6715_v24  ;;  %v6797_v6 = vld [vmem:[%s6958_s12 + $0x1190] ss:$8 sps:$4 sm:$0xff]   ;;  %v6802_v24 = vld [vmem:[%s6958_s12 + $0x8a4] ss:$8 sps:$4 sm:$0xff]  }
 0x206   : > { %4328 = vmatpush1.bf16.msra.mxu1 %v6710_v25  ;;  %v6805_v25 = vld [vmem:[%s6958_s12 + $0x11a4] ss:$8 sps:$4 sm:$0xff]  }
 0x207   : > { %4697 = vmatpush1.bf16.msra.mxu0 %v6713_v26  ;;  %4329 = vmatprep.subr.bf16.mxu1 %v6718_v28  ;;  %v6800_v26 = vld [vmem:[%s6958_s12 + $0x8a0] ss:$8 sps:$4 sm:$0xff]  }
 0x208   : > { %4698 = vmatprep.subr.bf16.mxu0 %v6721_v29  ;;  %v6803_v28 = vld [vmem:[%s6958_s12 + $0x11a0] ss:$8 sps:$4 sm:$0xff]   ;;  %v6808_v29 = vld [vmem:[%s6958_s12 + $0x8b4] ss:$8 sps:$4 sm:$0xff]  }
 0x20a   : > { %4330 = vmatpush1.bf16.msra.mxu1 %v6716_v31  ;;  %v6811_v31 = vld [vmem:[%s6958_s12 + $0x11b4] ss:$8 sps:$4 sm:$0xff]  }
 0x20b   : > { %4699 = vmatpush1.bf16.msra.mxu0 %v6719_v33  ;;  %4331 = vmatprep.subr.bf16.mxu1 %v6724_v8  ;;  %v6806_v33 = vld [vmem:[%s6958_s12 + $0x8b0] ss:$8 sps:$4 sm:$0xff]  }
 0x20c   : > { %4700 = vmatprep.subr.bf16.mxu0 %v6727_v34  ;;  %v6809_v8 = vld [vmem:[%s6958_s12 + $0x11b0] ss:$8 sps:$4 sm:$0xff]   ;;  %v6814_v34 = vld [vmem:[%s6958_s12 + $0x8c4] ss:$8 sps:$4 sm:$0xff]  }
 0x20e   : > { %4332 = vmatpush1.bf16.msra.mxu1 %v6722_v35  ;;  %v6817_v35 = vld [vmem:[%s6958_s12 + $0x11c4] ss:$8 sps:$4 sm:$0xff]  }
 0x20f   : > { %4701 = vmatpush1.bf16.msra.mxu0 %v6725_v36  ;;  %4333 = vmatprep.subr.bf16.mxu1 %v6730_v58  ;;  %v6812_v36 = vld [vmem:[%s6958_s12 + $0x8c0] ss:$8 sps:$4 sm:$0xff]  }
 0x210   : > { %4702 = vmatprep.subr.bf16.mxu0 %v6733_v39  ;;  %v6815_v58 = vld [vmem:[%s6958_s12 + $0x11c0] ss:$8 sps:$4 sm:$0xff]   ;;  %v6820_v39 = vld [vmem:[%s6958_s12 + $0x8d4] ss:$8 sps:$4 sm:$0xff]  }
 0x212   : > { %4334 = vmatpush1.bf16.msra.mxu1 %v6728_v41  ;;  %v6823_v41 = vld [vmem:[%s6958_s12 + $0x11d4] ss:$8 sps:$4 sm:$0xff]  }
 0x213   : > { %4703 = vmatpush1.bf16.msra.mxu0 %v6731_v42  ;;  %4335 = vmatprep.subr.bf16.mxu1 %v6736_v23  ;;  %v6818_v42 = vld [vmem:[%s6958_s12 + $0x8d0] ss:$8 sps:$4 sm:$0xff]  }
 0x214   : > { %4704 = vmatprep.subr.bf16.mxu0 %v6739_v44  ;;  %v6821_v23 = vld [vmem:[%s6958_s12 + $0x11d0] ss:$8 sps:$4 sm:$0xff]   ;;  %v6826_v44 = vld [vmem:[%s6958_s12 + $0x8e4] ss:$8 sps:$4 sm:$0xff]  }
 0x216   : > { %4336 = vmatpush1.bf16.msra.mxu1 %v6734_v45  ;;  %v6829_v45 = vld [vmem:[%s6958_s12 + $0x11e4] ss:$8 sps:$4 sm:$0xff]  }
 0x217   : > { %4705 = vmatpush1.bf16.msra.mxu0 %v6737_v27  ;;  %4346 = vmatprep.subr.bf16.mxu1 %v6742_v46  ;;  %v6824_v27 = vld [vmem:[%s6958_s12 + $0x8e0] ss:$8 sps:$4 sm:$0xff]  }
 0x218   : > { %4715 = vmatprep.subr.bf16.mxu0 %v6745_v30  ;;  %v6827_v46 = vld [vmem:[%s6958_s12 + $0x11e0] ss:$8 sps:$4 sm:$0xff]   ;;  %v6832_v30 = vld [vmem:[%s6958_s12 + $0x8f4] ss:$8 sps:$4 sm:$0xff]  }
 0x219   : > { %4338 = vmatmul.mubr.bf16.vlgmr.msra.gmra.mrb[0].mxu1 %v977_v54  ;;  %v6835_v54 = vld [vmem:[%s6958_s12 + $0x11f4] ss:$8 sps:$4 sm:$0xff]  }
 0x21a   : > { %4707 = vmatmul.mubr.bf16.vlgmr.msra.gmra.mrb[0].mxu0 %v7642_v47  ;;  %4347 = vmatpush1.bf16.msra.mxu1 %v6740_v49  ;;  %v6830_v49 = vld [vmem:[%s6958_s12 + $0x8f0] ss:$8 sps:$4 sm:$0xff]  }
 0x21b   : > { %4716 = vmatpush1.bf16.msra.mxu0 %v6743_v51  ;;  %4348 = vmatprep.subr.bf16.mxu1 %v6748_v52  ;;  %v6833_v51 = vld [vmem:[%s6958_s12 + $0x11f0] ss:$8 sps:$4 sm:$0xff]   ;;  %v1100_v52 = vcombine.high %v7642_v47, %v7642_v47 }
 0x21c   : > { %4717 = vmatprep.subr.bf16.mxu0 %v6751_v55  ;;  %4378 = vmatprep.mubr.bf16.mxu1 %v7031_v5  ;;  %v6761_v5 = vld [vmem:[%s6958_s12 + $0x1130] ss:$8 sps:$4 sm:$0xff]   ;;  %v6894_v55 = vmov 1983009808  }
 0x21d   : > { %4747 = vmatprep.mubr.bf16.mxu0 %v1101_v57  ;;  %v4760_v57 = vunpack.c.l.s4 %v6894_v55 }
 0x21e   : > { %4349 = vmatpush1.bf16.msra.mxu1 %v6746_v53 }
 0x21f   : > { %4718 = vmatpush1.bf16.msra.mxu0 %v6749_v12  ;;  %4350 = vmatprep.subr.bf16.mxu1 %v6754_v37  ;;  %v4761_v53 = vunpack.c.0.s8 %v4760_v57 }
 0x220   : > { %4719 = vmatprep.subr.bf16.mxu0 %v6757_v38 }
 0x222   : > { %4351 = vmatpush1.bf16.msra.mxu1 %v6752_v21 }
 0x223   : > { %4720 = vmatpush1.bf16.msra.mxu0 %v6755_v59  ;;  %4352 = vmatprep.subr.bf16.mxu1 %v6760_v43 }
 0x224   : > { %4721 = vmatprep.subr.bf16.mxu0 %v6763_v60  ;;  %v7714_v60 = vsub.s32 %v4761_v53, %v7003_v48  ;;  %v6862_v53 = vld [vmem:[%s7937_s3 + $0x80] ss:$8 sps:$4 sm:$0xff] (!%p5787_p6)  }
 0x226   : > { %4353 = vmatpush1.bf16.msra.mxu1 %v6758_v61 }
 0x227   : > { %4722 = vmatpush1.bf16.msra.mxu0 %v6761_v5  ;;  %4354 = vmatprep.subr.bf16.mxu1 %v6766_v62 }
 0x228   : > { %4723 = vmatprep.subr.bf16.mxu0 %v6769_v63 }
 0x22a   : > { %4355 = vmatpush1.bf16.msra.mxu1 %v6764_v0  ;;  %v295_v0 = vld [vmem:[#allocation2] sm:$0xf] }
 0x22b   : > { %4724 = vmatpush1.bf16.msra.mxu0 %v6767_v1  ;;  %4356 = vmatprep.subr.bf16.mxu1 %v6772_v3  ;;  %v6836_v3 = vld [vmem:[%s7937_s3 + $0x4] ss:$8 sps:$4 sm:$0xff] (!%p5787_p6)  }
 0x22c   : > { %4725 = vmatprep.subr.bf16.mxu0 %v6775_v4  ;;  %v6838_v4 = vld [vmem:[%s7937_s3] ss:$8 sps:$4 sm:$0xff] (!%p5787_p6)  }
 0x22e   : > { %4357 = vmatpush1.bf16.msra.mxu1 %v6770_v7  ;;  %v6839_v7 = vld [vmem:[%s7937_s3 + $0x14] ss:$8 sps:$4 sm:$0xff] (!%p5787_p6)  }
 0x22f   : > { %4726 = vmatpush1.bf16.msra.mxu0 %v6773_v16  ;;  %4358 = vmatprep.subr.bf16.mxu1 %v6778_v50  ;;  %v6841_v16 = vld [vmem:[%s7937_s3 + $0x10] ss:$8 sps:$4 sm:$0xff] (!%p5787_p6)   ;;  %v6842_v50 = vld [vmem:[%s7937_s3 + $0x24] ss:$8 sps:$4 sm:$0xff] (!%p5787_p6)  }
 0x230   : > { %4727 = vmatprep.subr.bf16.mxu0 %v6781_v9  ;;  %v6844_v9 = vld [vmem:[%s7937_s3 + $0x20] ss:$8 sps:$4 sm:$0xff] (!%p5787_p6)  }
 0x232   : > { %4359 = vmatpush1.bf16.msra.mxu1 %v6776_v40  ;;  %v6845_v40 = vld [vmem:[%s7937_s3 + $0x34] ss:$8 sps:$4 sm:$0xff] (!%p5787_p6)  }
 0x233   : > { %4728 = vmatpush1.bf16.msra.mxu0 %v6779_v32  ;;  %4360 = vmatprep.subr.bf16.mxu1 %v6784_v10  ;;  %v6847_v32 = vld [vmem:[%s7937_s3 + $0x30] ss:$8 sps:$4 sm:$0xff] (!%p5787_p6)   ;;  %v6848_v10 = vld [vmem:[%s7937_s3 + $0x44] ss:$8 sps:$4 sm:$0xff] (!%p5787_p6)  }
 0x234   : > { %4729 = vmatprep.subr.bf16.mxu0 %v6787_v11  ;;  %v6850_v11 = vld [vmem:[%s7937_s3 + $0x40] ss:$8 sps:$4 sm:$0xff] (!%p5787_p6)  }
 0x236   : > { %4361 = vmatpush1.bf16.msra.mxu1 %v6782_v13  ;;  %v6851_v13 = vld [vmem:[%s7937_s3 + $0x54] ss:$8 sps:$4 sm:$0xff] (!%p5787_p6)  }
 0x237   : > { %4730 = vmatpush1.bf16.msra.mxu0 %v6785_v14  ;;  %4362 = vmatprep.subr.bf16.mxu1 %v6790_v15  ;;  %v4778_v14 = vsub.s32 (!%p5787_p6), 0, %v7003_v48  ;;  %v4782_v15 = vsub.s32 (!%p5787_p6), 1, %v7003_v48 }
 0x238   : > { %4731 = vmatprep.subr.bf16.mxu0 %v6793_v18  ;;  %v6853_v18 = vld [vmem:[%s7937_s3 + $0x50] ss:$8 sps:$4 sm:$0xff] (!%p5787_p6)  }
 0x23a   : > { %4363 = vmatpush1.bf16.msra.mxu1 %v6788_v19  ;;  %v6854_v19 = vld [vmem:[%s7937_s3 + $0x64] ss:$8 sps:$4 sm:$0xff] (!%p5787_p6)  }
 0x23b   : > { %4732 = vmatpush1.bf16.msra.mxu0 %v6791_v20  ;;  %4364 = vmatprep.subr.bf16.mxu1 %v6796_v2  ;;  %v6856_v20 = vld [vmem:[%s7937_s3 + $0x60] ss:$8 sps:$4 sm:$0xff] (!%p5787_p6)  }
 0x23c   : > { %4733 = vmatprep.subr.bf16.mxu0 %v6799_v22  ;;  %v4774_v2 = vld [vmem:[%s7936_s2] sm:$0x3] (!%p5787_p6)  ;;  %v6857_v22 = vld [vmem:[%s7937_s3 + $0x74] ss:$8 sps:$4 sm:$0xff] (!%p5787_p6)  }
 0x23e   : > { %4365 = vmatpush1.bf16.msra.mxu1 %v6794_v56  ;;  %v4779_v56 = vrot.slane (!%p5787_p6), %v4774_v2, %v4778_v14 }
 0x23f   : > { %4734 = vmatpush1.bf16.msra.mxu0 %v6797_v6  ;;  %4366 = vmatprep.subr.bf16.mxu1 %v6802_v24  ;;  %v4783_v6 = vrot.slane (!%p5787_p6), %v4774_v2, %v4782_v15  ;;  %v5071_v24 = vld [vmem:[%s7939_s5 + $0x80] sm:$0xff] (!%p5787_p6) }
 0x240   : > { %4735 = vmatprep.subr.bf16.mxu0 %v6805_v25  ;;  %v5072_v25 = vld [vmem:[%s7939_s5 + $0x88] sm:$0xff] (!%p5787_p6) }
 0x241   : > { %v6874_v2 = vld [vmem:[%s7937_s3 + $0xc0] ss:$8 sps:$4 sm:$0xff] (!%p5787_p6)  }
 0x242   : > { %4367 = vmatpush1.bf16.msra.mxu1 %v6800_v26  ;;  %v5055_v26 = vld [vmem:[%s7939_s5] sm:$0xff] (!%p5787_p6) }
 0x243   : > { %4736 = vmatpush1.bf16.msra.mxu0 %v6803_v28  ;;  %4368 = vmatprep.subr.bf16.mxu1 %v6808_v29  ;;  %v5859_v28 = vpack.c.bf16 (!%p5787_p6), %v5072_v25, %v5071_v24  ;;  %v5056_v29 = vld [vmem:[%s7939_s5 + $0x8] sm:$0xff] (!%p5787_p6)  ;;  %v6881_v25 = vld [vmem:[%s7937_s3 + $0xf4] ss:$8 sps:$4 sm:$0xff] (!%p5787_p6)  }
 0x244   : > { %4737 = vmatprep.subr.bf16.mxu0 %v6811_v31  ;;  %v5073_v31 = vld [vmem:[%s7939_s5 + $0x90] sm:$0xff] (!%p5787_p6)  ;;  %v6880_v24 = vld [vmem:[%s7937_s3 + $0xe0] ss:$8 sps:$4 sm:$0xff] (!%p5787_p6)  }
 0x246   : > { %4369 = vmatpush1.bf16.msra.mxu1 %v6806_v33  ;;  %v5074_v33 = vld [vmem:[%s7939_s5 + $0x98] sm:$0xff] (!%p5787_p6) }
 0x247   : > { %4738 = vmatpush1.bf16.msra.mxu0 %v6809_v8  ;;  %4370 = vmatprep.subr.bf16.mxu1 %v6814_v34  ;;  %v4784_v8 = vcombine.low (!%p5787_p6), %v4779_v56, %v4783_v6  ;;  %v5861_v34 = vpack.c.bf16 (!%p5787_p6), %v5056_v29, %v5055_v26  ;;  %v6877_v56 = vld [vmem:[%s7937_s3 + $0xd0] ss:$8 sps:$4 sm:$0xff] (!%p5787_p6)   ;;  %v6878_v6 = vld [vmem:[%s7937_s3 + $0xe4] ss:$8 sps:$4 sm:$0xff] (!%p5787_p6)  }
 0x248   : > { %4739 = vmatprep.subr.bf16.mxu0 %v6817_v35  ;;  %v5863_v35 = vpack.c.bf16 (!%p5787_p6), %v5074_v33, %v5073_v31  ;;  %v6883_v26 = vld [vmem:[%s7937_s3 + $0xf0] ss:$8 sps:$4 sm:$0xff] (!%p5787_p6)   ;;  %v5067_v29 = vld [vmem:[%s7939_s5 + $0x60] sm:$0xff] (!%p5787_p6)  ;;  %v5068_v31 = vld [vmem:[%s7939_s5 + $0x68] sm:$0xff] (!%p5787_p6) }
 0x249   : > { %v5885_v33 = vpack.c.bf16 (!%p5787_p6), %v5068_v31, %v5067_v29 }
 0x24a   : > { %4371 = vmatpush1.bf16.msra.mxu1 %v6812_v36  ;;  %v5057_v36 = vld [vmem:[%s7939_s5 + $0x10] sm:$0xff] (!%p5787_p6) }
 0x24b   : > { %4740 = vmatpush1.bf16.msra.mxu0 %v6815_v58  ;;  %4372 = vmatprep.subr.bf16.mxu1 %v6820_v39  ;;  %v5058_v58 = vld [vmem:[%s7939_s5 + $0x18] sm:$0xff] (!%p5787_p6)  ;;  %v5075_v39 = vld [vmem:[%s7939_s5 + $0xa0] sm:$0xff] (!%p5787_p6) }
 0x24c   : > { %4741 = vmatprep.subr.bf16.mxu0 %v6823_v41 }
 0x24e   : > { %4373 = vmatpush1.bf16.msra.mxu1 %v6818_v42  ;;  %v5076_v42 = vld [vmem:[%s7939_s5 + $0xa8] sm:$0xff] (!%p5787_p6) }
 0x24f   : > { %4742 = vmatpush1.bf16.msra.mxu0 %v6821_v23  ;;  %4374 = vmatprep.subr.bf16.mxu1 %v6826_v44  ;;  %v4791_v23 = vrot.slane (!%p5787_p6), %v4784_v8, %v7714_v60  ;;  %v5865_v44 = vpack.c.bf16 (!%p5787_p6), %v5058_v58, %v5057_v36  ;;  %v5085_v8 = vld [vmem:[%s7939_s5 + $0xf0] sm:$0xff] (!%p5787_p6)  ;;  %v5070_v58 = vld [vmem:[%s7939_s5 + $0x78] sm:$0xff] (!%p5787_p6) }
 0x250   : > { %4743 = vmatprep.subr.bf16.mxu0 %v6829_v45  ;;  %v6859_v45 = vld [vmem:[%s7937_s3 + $0x70] ss:$8 sps:$4 sm:$0xff] (!%p5787_p6)  }
 0x251   : > { %v5069_v36 = vld [vmem:[%s7939_s5 + $0x70] sm:$0xff] (!%p5787_p6) }
 0x252   : > { %4375 = vmatpush1.bf16.msra.mxu1 %v6824_v27  ;;  %v5867_v27 = vpack.c.bf16 (!%p5787_p6), %v5076_v42, %v5075_v39  ;;  %v5889_v39 = vpack.c.bf16 (!%p5787_p6), %v5070_v58, %v5069_v36 }
 0x253   : > { %4744 = vmatpush1.bf16.msra.mxu0 %v6827_v46  ;;  %4376 = vmatprep.subr.bf16.mxu1 %v6832_v30  ;;  %v5059_v46 = vld [vmem:[%s7939_s5 + $0x20] sm:$0xff] (!%p5787_p6)  ;;  %v5060_v30 = vld [vmem:[%s7939_s5 + $0x28] sm:$0xff] (!%p5787_p6) }
 0x254   : > { %4745 = vmatprep.subr.bf16.mxu0 %v6835_v54  ;;  %v6860_v54 = vld [vmem:[%s7937_s3 + $0x84] ss:$8 sps:$4 sm:$0xff] (!%p5787_p6)   ;;  %v5869_v57 = vpack.c.bf16 (!%p5787_p6), %v5060_v30, %v5059_v46 }
 0x256   : > { %4377 = vmatpush1.bf16.msra.mxu1 %v6830_v49 }
 0x257   : > { %4746 = vmatpush1.bf16.msra.mxu0 %v6833_v51  ;;  %5860 = vmatprep.subr.bf16.mxu1 (!%p5787_p6), %v5859_v28  ;;  %v5077_v51 = vld [vmem:[%s7939_s5 + $0xb0] sm:$0xff] (!%p5787_p6) }
 0x258   : > { %5012 = vmatprep.subr.bf16.mxu0 (!%p5787_p6), %v6836_v3  ;;  %v5081_v3 = vld [vmem:[%s7939_s5 + $0xd0] sm:$0xff] (!%p5787_p6) }
 0x259   : > { %4379 = vmatmul.mubr.bf16.vlgmr.msra.gmra.mrb[0].mxu1 %v7048_v17 }
 0x25a   : > { %4748 = vmatmul.mubr.bf16.vlgmr.msra.gmra.mrb[0].mxu0 %v1100_v52  ;;  %5862 = vmatpush3.bf16.msra.mxu1 (!%p5787_p6), %v5861_v34  ;;  %v5078_v52 = vld [vmem:[%s7939_s5 + $0xb8] sm:$0xff] (!%p5787_p6) }
 0x25b   : > { %5013 = vmatpush1.bf16.msra.mxu0 (!%p5787_p6), %v6838_v4  ;;  %5864 = vmatprep.subr.bf16.mxu1 (!%p5787_p6), %v5863_v35  ;;  %v5082_v4 = vld [vmem:[%s7939_s5 + $0xd8] sm:$0xff] (!%p5787_p6) }
 0x25c   : > { %5014 = vmatprep.subr.bf16.mxu0 (!%p5787_p6), %v6839_v7  ;;  %v5086_v34 = vld [vmem:[%s7939_s5 + $0xf8] sm:$0xff] (!%p5787_p6) }
 0x25d   : > { %v5887_v35 = vpack.c.bf16 (!%p5787_p6), %v5086_v34, %v5085_v8 }
 0x25e   : > { %5866 = vmatpush3.bf16.msra.mxu1 (!%p5787_p6), %v5865_v44 }
 0x25f   : > { %5015 = vmatpush1.bf16.msra.mxu0 (!%p5787_p6), %v6841_v16  ;;  %5868 = vmatprep.subr.bf16.mxu1 (!%p5787_p6), %v5867_v27  ;;  %v6868_v16 = vld [vmem:[%s7937_s3 + $0xa0] ss:$8 sps:$4 sm:$0xff] (!%p5787_p6)  }
 0x260   : > { %5016 = vmatprep.subr.bf16.mxu0 (!%p5787_p6), %v6842_v50  ;;  %v5879_v50 = vpack.c.bf16 (!%p5787_p6), %v5082_v4, %v5081_v3 }
 0x262   : > { %5870 = vmatpush3.bf16.msra.mxu1 (!%p5787_p6), %v5869_v57 }
 0x263   : > { %5017 = vmatpush1.bf16.msra.mxu0 (!%p5787_p6), %v6844_v9  ;;  %v5065_v9 = vld [vmem:[%s7939_s5 + $0x50] sm:$0xff] (!%p5787_p6) }
 0x264   : > { %5018 = vmatprep.subr.bf16.mxu0 (!%p5787_p6), %v6845_v40  ;;  %v5066_v40 = vld [vmem:[%s7939_s5 + $0x58] sm:$0xff] (!%p5787_p6) }
 0x267   : > { %5019 = vmatpush1.bf16.msra.mxu0 (!%p5787_p6), %v6847_v32  ;;  %v6869_v32 = vld [vmem:[%s7937_s3 + $0xb4] ss:$8 sps:$4 sm:$0xff] (!%p5787_p6)  }
 0x268   : > { %5020 = vmatprep.subr.bf16.mxu0 (!%p5787_p6), %v6848_v10  ;;  %v5083_v10 = vld [vmem:[%s7939_s5 + $0xe0] sm:$0xff] (!%p5787_p6) }
 0x26b   : > { %5021 = vmatpush1.bf16.msra.mxu0 (!%p5787_p6), %v6850_v11  ;;  %v5084_v11 = vld [vmem:[%s7939_s5 + $0xe8] sm:$0xff] (!%p5787_p6) }
 0x26c   : > { %5022 = vmatprep.subr.bf16.mxu0 (!%p5787_p6), %v6851_v13  ;;  %v5881_v13 = vpack.c.bf16 (!%p5787_p6), %v5066_v40, %v5065_v9 }
 0x26f   : > { %5023 = vmatpush1.bf16.msra.mxu0 (!%p5787_p6), %v6853_v18  ;;  %v6871_v18 = vld [vmem:[%s7937_s3 + $0xb0] ss:$8 sps:$4 sm:$0xff] (!%p5787_p6)  }
 0x270   : > { %5024 = vmatprep.subr.bf16.mxu0 (!%p5787_p6), %v6854_v19  ;;  %v5883_v19 = vpack.c.bf16 (!%p5787_p6), %v5084_v11, %v5083_v10 }
 0x273   : > { %5025 = vmatpush1.bf16.msra.mxu0 (!%p5787_p6), %v6856_v20  ;;  %v6872_v20 = vld [vmem:[%s7937_s3 + $0xc4] ss:$8 sps:$4 sm:$0xff] (!%p5787_p6)  }
 0x274   : > { %5026 = vmatprep.subr.bf16.mxu0 (!%p5787_p6), %v6857_v22  ;;  %v6875_v22 = vld [vmem:[%s7937_s3 + $0xd4] ss:$8 sps:$4 sm:$0xff] (!%p5787_p6)  }
 0x277   : > { %5027 = vmatpush1.bf16.msra.mxu0 (!%p5787_p6), %v6859_v45 }
 0x278   : > { %5028 = vmatprep.subr.bf16.mxu0 (!%p5787_p6), %v6860_v54 }
 0x27b   : > { %5029 = vmatpush1.bf16.msra.mxu0 (!%p5787_p6), %v6862_v53 }
 0x32c   : > { %v4380_v12 = vpop.f32.mrb[0].mxu1 }
 0x32d   : > { %v4749_v37 = vpop.f32.mrb[0].mxu0  ;;  %v4382_v21 = vpop.f32.mrb[1].mxu1 }
 0x32e   : > { %v5891_v38 = vadd.f32 %v4749_v37, %v4380_v12  ;;  %v4751_v59 = vpop.f32.mrb[1].mxu0  ;;  %v4384_v61 = vpop.f32.mrb[2].mxu1  ;;  %v5871_v12 = vpack.c.bf16 (!%p5787_p6), %v5078_v52, %v5077_v51  ;;  %v5061_v37 = vld [vmem:[%s7939_s5 + $0x30] sm:$0xff] (!%p5787_p6) }
 0x32f   : > { %v5892_v43 = vadd.f32 %v4751_v59, %v4382_v21  ;;  %v4753_v5 = vpop.f32.mrb[2].mxu0  ;;  %v4385_v47 = vpop.f32.mrb[3].mxu1  ;;  %v6863_v21 = vld [vmem:[%s7937_s3 + $0x94] ss:$8 sps:$4 sm:$0xff] (!%p5787_p6)   ;;  %v5080_v61 = vld [vmem:[%s7939_s5 + $0xc8] sm:$0xff] (!%p5787_p6) }
 0x330   : > { %v4754_v62 = vpop.f32.mrb[3].mxu0  ;;  %5872 = vmatprep.subr.bf16.mxu1 (!%p5787_p6), %v5871_v12  ;;  %5030 = vmatprep.subr.bf16.mxu0 (!%p5787_p6), %v6863_v21 }
 0x331   : > { %v4758_v63 = vcombine.low %v5891_v38, %v5892_v43  ;;  %4772 = sbr.rel (%p5787_p6) target bundleno = 1283 (0x503), region = 56  ;;  %v5062_v38 = vld [vmem:[%s7939_s5 + $0x38] sm:$0xff] (!%p5787_p6)  ;;  %v5079_v43 = vld [vmem:[%s7939_s5 + $0xc0] sm:$0xff] (!%p5787_p6) }
 0x332   : > { %v5873_v47 = vpack.c.bf16 (!%p5787_p6), %v5062_v38, %v5061_v37  ;;  %v6865_v62 = vld [vmem:[%s7937_s3 + $0x90] ss:$8 sps:$4 sm:$0xff] (!%p5787_p6)  }
 0x333   : > { %v4765_v17 = vrot.slane %v4758_v63, %v7714_v60  ;;  %v5875_v63 = vpack.c.bf16 (!%p5787_p6), %v5080_v61, %v5079_v43  ;;  %5031 = vmatpush1.bf16.msra.mxu0 (!%p5787_p6), %v6865_v62 }
 0x334   : > { %5874 = vmatpush3.bf16.msra.mxu1 (!%p5787_p6), %v5873_v47 }
 0x335   : > { %v4767_v1 = vadd.f32 %v4765_v17, %v295_v0  ;;  %v5064_v0 = vld [vmem:[%s7939_s5 + $0x48] sm:$0xff] (!%p5787_p6)  ;;  %5876 = vmatprep.subr.bf16.mxu1 (!%p5787_p6), %v5875_v63 }
 0x336   : > { %v6866_v17 = vld [vmem:[%s7937_s3 + $0xa4] ss:$8 sps:$4 sm:$0xff] (!%p5787_p6)  }
 0x337   : > { %4768 = vst [vmem:[#allocation2] sm:$0xf] %v4767_v1  ;;  %5032 = vmatprep.subr.bf16.mxu0 (!%p5787_p6), %v6866_v17 }
 0x338   : > { %5033 = vmatpush1.bf16.msra.mxu0 %v6868_v16 }
 0x339   : > { %5034 = vmatprep.subr.bf16.mxu0 %v6869_v32 }
 0x33c   : > { %5035 = vmatpush1.bf16.msra.mxu0 %v6871_v18 }
 0x33d   : > { %5036 = vmatprep.subr.bf16.mxu0 %v6872_v20 }
 0x33e   : > { %v4773_v41 = vld [vmem:[#allocation2] sm:$0xf] }
 0x33f   : > { %v4793_v49 = vadd.f32 %v4791_v23, %v4773_v41  ;;  %v4840_v41 = vld [vmem:[%s7938_s4] sm:$0x3] }
 0x340   : > { %5037 = vmatpush1.bf16.msra.mxu0 %v6874_v2  ;;  %v4845_v42 = vrot.slane %v4840_v41, %v4778_v14  ;;  %v4849_v23 = vrot.slane %v4840_v41, %v4782_v15 }
 0x341   : > { %v4794_v55 = vmax.f32 %v4793_v49, 0.0  ;;  %5038 = vmatprep.subr.bf16.mxu0 %v6875_v22 }
 0x343   : > { %v4802_v59 = vrot.slane %v4794_v55, %v7714_v60  ;;  %v5063_v60 = vld [vmem:[%s7939_s5 + $0x40] sm:$0xff] }
 0x344   : > { %v5877_v7 = vpack.c.bf16 %v5064_v0, %v5063_v60  ;;  %5039 = vmatpush1.bf16.msra.mxu0 %v6877_v56  ;;  %v5820_v55 = vld [vmem:[#allocation3] ss:$0 sm:$0xff] }
 0x345   : > { %v4803_v5 = vcombine.high %v4802_v59, %v4802_v59  ;;  %5040 = vmatprep.subr.bf16.mxu0 %v6878_v6  ;;  %v4806_v28 = vpack.c.bf16 %v4802_v59, %v4802_v59 }
 0x346   : > { %5878 = vmatpush3.bf16.msra.mxu1 %v5877_v7 }
 0x347   : > { %v4807_v1 = vpack.c.bf16 %v4803_v5, %v4803_v5  ;;  %5880 = vmatprep.subr.bf16.mxu1 %v5879_v50 }
 0x348   : > { %5041 = vmatpush1.bf16.msra.mxu0 %v6880_v24 }
 0x349   : > { %5044 = vmatprep.mubr.bf16.mxu0 %v4807_v1  ;;  %5042 = vmatprep.subr.bf16.mxu0 %v6881_v25 }
 0x34a   : > { %5882 = vmatpush3.bf16.msra.mxu1 %v5881_v13 }
 0x34b   : > { %5884 = vmatprep.subr.bf16.mxu1 %v5883_v19 }
 0x34c   : > { %5043 = vmatpush1.bf16.msra.mxu0 %v6883_v26 }
 0x34e   : > { %5886 = vmatpush3.bf16.msra.mxu1 %v5885_v33 }
 0x34f   : > { %5045 = vmatmul.mubr.bf16.vlgmr.msra.gmra.mrb[0].mxu0 %v4806_v28  ;;  %5888 = vmatprep.subr.bf16.mxu1 %v5887_v35 }
 0x352   : > { %5890 = vmatpush3.bf16.msra.mxu1 %v5889_v39 }
 0x422   : > { %v5046_v44 = vpop.f32.mrb[0].mxu0 }
 0x423   : > { %v5047_v45 = vadd.f32 %v5046_v44, %v4845_v42  ;;  %v5048_v27 = vpop.f32.mrb[1].mxu0 }
 0x424   : > { %v5050_v46 = vpop.f32.mrb[2].mxu0  ;;  %v5049_v30 = vadd.f32 %v5048_v27, %v4849_v23 }
 0x425   : > { %v5051_v54 = vpop.f32.mrb[3].mxu0  ;;  %v5053_v51 = vmax.f32 %v5047_v45, 0.0 }
 0x426   : > { %v5054_v49 = vmax.f32 %v5049_v30, 0.0 }
 0x428   : > { %5158 = vmatprep.mubr.f32.mxu1 %v5054_v49 }
 0x429   : > { %5159 = vmatmul.mubr.f32.vlgmr.msra.gmra.mrb[0].mxu1 %v5053_v51 }
 0x4fc   : > { %v5856_v52 = vpop.f32.mrb[0].mxu1 }
 0x4fd   : > { %v5857_v57 = vpop.f32.mrb[1].mxu1 }
 0x4fe   : > { %v5858_v53 = vadd.f32 %v5857_v57, %v5856_v52 }
 0x500   : > { %v5161_v12 = vadd.f32 %v5858_v53, %v5820_v55 }
 0x502   : > { %5165 = vst.msk [vmem:[%s7941_s7] sm:$0x3] %vm5164_vm0, %v5161_v12 }
 0x503 PF: > { %s19_s26 = sadd.s32 1, %s6890_s26  }
 0x504   : > { %p16_p7 = scmp.ge.s32.totalorder %s19_s26, 4  }
 0x506   :  { %18 = sbr.rel (!%p16_p7) target bundleno = 3 (0x3), region = 85 }

</bundles_post_ra>
